<compile_context>
chip_gen: v7x
topology: tpu7x:2x2x1
jax: 0.10.0
libtpu: 0.0.40
codegen_flags: <defaults>
</compile_context>

<pallas_src>
import jax
import jax.numpy as jnp
from jax import lax
from jax.experimental import pallas as pl
from jax.experimental.pallas import tpu as pltpu


def _make_kernel(H, W, C1, C2, hidden, Bt):
    """Per-grid-step kernel processing Bt images laid out as (H, W, Bt, C)."""
    H2, W2 = H // 2, W // 2       # spatial after layer1 pool
    H4, W4 = H // 4, W // 4       # spatial after layer2 pool

    def kernel(x_ref, w1_ref, s1_ref, b1_ref, w2_ref, s2_ref, b2_ref,
               fc1w_ref, fc1b_ref, fc2w_ref, fc2b_ref, o_ref):
        s1 = s1_ref[...]            # (1, C2) folded BN scale
        bb1 = b1_ref[...]           # (1, C2) folded BN bias (incl. conv bias)
        s2 = s2_ref[...]
        bb2 = b2_ref[...]

        # ---- layer1: conv3x3(pad=1) as ONE fused long-K matmul ------------
        # Lane-concat the 9 shifted bf16 patches (each a full 128-lane group)
        # into a (H*W*Bt, 9*C1) LHS; accumulation stays inside the MXU.
        pieces = []
        for dh in range(3):
            for dw in range(3):
                patch = x_ref[dh:dh + H, dw:dw + W, :, :]        # (H,W,Bt,C1) bf16
                pieces.append(patch.reshape(H * W * Bt, C1))
        lhs1 = jnp.concatenate(pieces, axis=-1)                  # (H*W*Bt, 9*C1)
        acc1 = jnp.dot(lhs1, w1_ref[...],
                       preferred_element_type=jnp.float32)       # (H*W*Bt, C2) f32
        y1 = jnp.maximum(acc1 * s1 + bb1, 0.0).reshape(H, W, Bt, C2)

        # ---- 2x2 max pool (spatial dims are leading/untiled -> cheap) -----
        p1 = jnp.max(y1.reshape(H2, 2, W, Bt, C2), axis=1)       # (H2,W,Bt,C2)
        p1 = jnp.max(p1.reshape(H2, W2, 2, Bt, C2), axis=2)      # (H2,W2,Bt,C2)

        # ---- zero-pad spatial for layer2; cast to bf16 ONCE ----------------
        p1b = p1.astype(jnp.bfloat16)
        zr = jnp.zeros((1, W2, Bt, C2), jnp.bfloat16)
        zc = jnp.zeros((H2 + 2, 1, Bt, C2), jnp.bfloat16)
        x2 = jnp.concatenate([zr, p1b, zr], axis=0)              # (H2+2,W2,Bt,C2)
        x2 = jnp.concatenate([zc, x2, zc], axis=1)               # (H2+2,W2+2,Bt,C2)

        # ---- layer2: conv3x3(pad=1) as 9 per-tap matmuls (64-lane taps) ----
        acc2 = jnp.zeros((H2 * W2 * Bt, C2), jnp.float32)
        for dh in range(3):
            for dw in range(3):
                patch = x2[dh:dh + H2, dw:dw + W2, :, :]         # (H2,W2,Bt,C2)
                lhs = patch.reshape(H2 * W2 * Bt, C2)            # bf16
                acc2 = acc2 + jnp.dot(lhs, w2_ref[dh * 3 + dw],
                                      preferred_element_type=jnp.float32)
        y2 = jnp.maximum(acc2 * s2 + bb2, 0.0).reshape(H2, W2, Bt, C2)

        # ---- 2x2 max pool --------------------------------------------------
        p2 = jnp.max(y2.reshape(H4, 2, W2, Bt, C2), axis=1)      # (H4,W2,Bt,C2)
        p2 = jnp.max(p2.reshape(H4, W4, 2, Bt, C2), axis=2)      # (H4,W4,Bt,C2)

        # ---- fc1 + ReLU: sum of per-position dots (lane-aligned, no concat)
        h1 = fc1b_ref[...]                                       # (1, hidden)
        for ho in range(H4):
            for wo in range(W4):
                h1 = h1 + jnp.dot(p2[ho, wo], fc1w_ref[ho * W4 + wo],
                                  preferred_element_type=jnp.float32)
        h1 = jnp.maximum(h1, 0.0)                                # (Bt, hidden)

        # ---- fc2 + sigmoid; lane-dense store -------------------------------
        logit = (jnp.sum(h1 * fc2w_ref[...], axis=1, keepdims=True)
                 + fc2b_ref[...])                                # (Bt, 1)
        sig = 1.0 / (1.0 + jnp.exp(-logit))
        o_ref[...] = jnp.broadcast_to(sig, (Bt, 128)).astype(o_ref.dtype)

    return kernel


def relation_network_forward(x_nchw, params, *, batch_tile=16):
    """Pallas forward.  x_nchw: (B, 128, H, W) float32, PyTorch layout.

    batch_tile must be a multiple of 16 (bf16 sublane tile).  On dual-TC v7x
    pick batch_tile = padded_batch/2 so the parallel grid shards both cores;
    on single-TC v5e/v6e run the whole batch per step when VMEM allows.
    """
    eps = 1e-5
    B, C1, H, W = x_nchw.shape
    C2 = params["conv1_w"].shape[0]              # 64
    hidden = params["fc1_w"].shape[0]
    H4, W4 = H // 4, W // 4

    Bt = batch_tile
    assert Bt % 16 == 0, "batch_tile must be a multiple of 16 (bf16 tile)"
    Bp = ((B + Bt - 1) // Bt) * Bt

    # fold conv bias + inference-mode BN into per-channel scale/bias (f32)
    def fold(conv_b, g, bt, m, v):
        s = g / jnp.sqrt(v + eps)
        return (s.reshape(1, -1).astype(jnp.float32),
                ((conv_b - m) * s + bt).reshape(1, -1).astype(jnp.float32))

    s1, b1 = fold(params["conv1_b"], params["bn1_gamma"], params["bn1_beta"],
                  params["bn1_mean"], params["bn1_var"])
    s2, b2 = fold(params["conv2_b"], params["bn2_gamma"], params["bn2_beta"],
                  params["bn2_mean"], params["bn2_var"])

    # conv1: (Cout, Cin, 3, 3) -> (tap, Cin, Cout) -> fused-K (9*Cin, Cout) bf16
    w1r = (jnp.transpose(params["conv1_w"], (2, 3, 1, 0))
           .reshape(9 * C1, C2).astype(jnp.bfloat16))
    # conv2: keep per-tap (tap, Cin, Cout) bf16
    w2r = (jnp.transpose(params["conv2_w"], (2, 3, 1, 0))
           .reshape(9, C2, C2).astype(jnp.bfloat16))

    # fc1 weight (hidden, C*H4*W4) in PyTorch NCHW-flatten order
    # -> (pos=ho*W4+wo, C2, hidden) to match the kernel's per-position dots.
    fc1w_r = (params["fc1_w"].reshape(hidden, C2, H4, W4)
              .transpose(2, 3, 1, 0).reshape(H4 * W4, C2, hidden)
              .astype(jnp.float32))
    fc1b = params["fc1_b"].reshape(1, hidden).astype(jnp.float32)
    fc2w = params["fc2_w"].reshape(1, hidden).astype(jnp.float32)
    fc2b = params["fc2_b"].reshape(1, 1).astype(jnp.float32)

    # NCHW -> (H, W, B, C) in bf16; pad spatial by 1 (conv pad) and batch to Bp.
    x_hwbc = jnp.transpose(x_nchw, (2, 3, 0, 1)).astype(jnp.bfloat16)
    x_pad = jnp.pad(x_hwbc, ((1, 1), (1, 1), (0, Bp - B), (0, 0)))
    Hp, Wp = H + 2, W + 2

    kernel = _make_kernel(H, W, C1, C2, hidden, Bt)

    out = pl.pallas_call(
        kernel,
        out_shape=jax.ShapeDtypeStruct((Bp, 128), jnp.float32),
        grid_spec=pltpu.PrefetchScalarGridSpec(
            num_scalar_prefetch=0,
            grid=(Bp // Bt,),
            in_specs=[
                pl.BlockSpec((Hp, Wp, Bt, C1), lambda b: (0, 0, b, 0)),
                pl.BlockSpec((9 * C1, C2), lambda b: (0, 0)),
                pl.BlockSpec((1, C2), lambda b: (0, 0)),
                pl.BlockSpec((1, C2), lambda b: (0, 0)),
                pl.BlockSpec((9, C2, C2), lambda b: (0, 0, 0)),
                pl.BlockSpec((1, C2), lambda b: (0, 0)),
                pl.BlockSpec((1, C2), lambda b: (0, 0)),
                pl.BlockSpec((H4 * W4, C2, hidden), lambda b: (0, 0, 0)),
                pl.BlockSpec((1, hidden), lambda b: (0, 0)),
                pl.BlockSpec((1, hidden), lambda b: (0, 0)),
                pl.BlockSpec((1, 1), lambda b: (0, 0)),
            ],
            out_specs=pl.BlockSpec((Bt, 128), lambda b: (b, 0)),
        ),
        compiler_params=pltpu.CompilerParams(
            dimension_semantics=("parallel",),
            vmem_limit_bytes=32 * 1024 * 1024),
    )(x_pad, w1r, s1, b1, w2r, s2, b2, fc1w_r, fc1b, fc2w, fc2b)

    return out[:B, :1]


def ref_forward(x, params):
    """Pure-JAX reference mirroring the PyTorch forward (eval-mode BN)."""
    eps = 1e-5
    hp = lax.Precision.HIGHEST

    def block(z, w, cb, g, bt, m, v):
        z = lax.conv_general_dilated(
            z, w, (1, 1), ((1, 1), (1, 1)),
            dimension_numbers=("NCHW", "OIHW", "NCHW"), precision=hp)
        z = z + cb[None, :, None, None]
        z = ((z - m[None, :, None, None]) / jnp.sqrt(v[None, :, None, None] + eps)
             * g[None, :, None, None] + bt[None, :, None, None])
        z = jnp.maximum(z, 0.0)
        z = lax.reduce_window(z, -jnp.inf, lax.max,
                              (1, 1, 2, 2), (1, 1, 2, 2), "VALID")
        return z

    z = block(x, params["conv1_w"], params["conv1_b"], params["bn1_gamma"],
              params["bn1_beta"], params["bn1_mean"], params["bn1_var"])
    z = block(z, params["conv2_w"], params["conv2_b"], params["bn2_gamma"],
              params["bn2_beta"], params["bn2_mean"], params["bn2_var"])
    flat = z.reshape(z.shape[0], -1)
    h = jnp.maximum(jnp.dot(flat, params["fc1_w"].T, precision=hp)
                    + params["fc1_b"], 0.0)
    return jax.nn.sigmoid(jnp.dot(h, params["fc2_w"].T, precision=hp)
                          + params["fc2_b"])


if __name__ == "__main__":
    key = jax.random.PRNGKey(0)
    B, C_in, H, W = 32, 128, 8, 8           # conv1 requires 128 input channels
    C_mid = 64
    input_size = C_mid * (H // 4) * (W // 4)     # = 256 (module's `input_size`)
    hidden_size = 8                              # module's `hidden_size`

    ks = jax.random.split(key, 20)
    n = lambda k, shp, s=0.05: s * jax.random.normal(k, shp, dtype=jnp.float32)
    params = {
        "conv1_w": n(ks[0], (C_mid, C_in, 3, 3)),
        "conv1_b": n(ks[1], (C_mid,)),
        "bn1_gamma": 1.0 + n(ks[2], (C_mid,), 0.1),
        "bn1_beta": n(ks[3], (C_mid,), 0.1),
        "bn1_mean": n(ks[4], (C_mid,), 0.1),
        "bn1_var": jax.random.uniform(ks[5], (C_mid,), jnp.float32, 0.5, 1.5),
        "conv2_w": n(ks[6], (C_mid, C_mid, 3, 3)),
        "conv2_b": n(ks[7], (C_mid,)),
        "bn2_gamma": 1.0 + n(ks[8], (C_mid,), 0.1),
        "bn2_beta": n(ks[9], (C_mid,), 0.1),
        "bn2_mean": n(ks[10], (C_mid,), 0.1),
        "bn2_var": jax.random.uniform(ks[11], (C_mid,), jnp.float32, 0.5, 1.5),
        "fc1_w": n(ks[12], (hidden_size, input_size)),
        "fc1_b": n(ks[13], (hidden_size,)),
        "fc2_w": n(ks[14], (1, hidden_size)),
        "fc2_b": n(ks[15], (1,)),
    }
    x = jax.random.normal(ks[16], (B, C_in, H, W), dtype=jnp.float32)

    out = jax.jit(relation_network_forward)(x, params)
    out = jax.block_until_ready(out)
    assert out.shape == (B, 1)

    ref = ref_forward(x, params)
    if not jnp.allclose(out, ref, atol=1e-2, rtol=1e-2):
        raise AssertionError(
            f"mismatch: max|diff|={jnp.max(jnp.abs(out - ref))}")

    print("KERNEL_OK")
</pallas_src>

<mosaic_0001>
module attributes {stable_mosaic.version = 11 : i64} {
  func.func @kernel(%arg0: i32, %arg1: memref<10x10x16x128xbf16, #tpu.memory_space<vmem>>, %arg2: memref<1152x64xbf16, #tpu.memory_space<vmem>>, %arg3: memref<1x64xf32, #tpu.memory_space<vmem>>, %arg4: memref<1x64xf32, #tpu.memory_space<vmem>>, %arg5: memref<9x64x64xbf16, #tpu.memory_space<vmem>>, %arg6: memref<1x64xf32, #tpu.memory_space<vmem>>, %arg7: memref<1x64xf32, #tpu.memory_space<vmem>>, %arg8: memref<4x64x8xf32, #tpu.memory_space<vmem>>, %arg9: memref<1x8xf32, #tpu.memory_space<vmem>>, %arg10: memref<1x8xf32, #tpu.memory_space<vmem>>, %arg11: memref<1x1xf32, #tpu.memory_space<vmem>>, %arg12: memref<16x128xf32, #tpu.memory_space<vmem>>) attributes {dimension_semantics = [#tpu.dimension_semantics<parallel>], iteration_bounds = array<i64: 2>, scalar_prefetch = 0 : i64, scratch_operands = 0 : i64, tpu.core_type = #tpu.core_type<tc>, window_params = [{transform_indices = @transform_0, window_bounds = array<i64: 10, 10, 16, 128>}, {pipeline_mode = #tpu.pipeline_mode<synchronous>, transform_indices = @transform_1, window_bounds = array<i64: 1152, 64>}, {pipeline_mode = #tpu.pipeline_mode<synchronous>, transform_indices = @transform_2, window_bounds = array<i64: 1, 64>}, {pipeline_mode = #tpu.pipeline_mode<synchronous>, transform_indices = @transform_3, window_bounds = array<i64: 1, 64>}, {pipeline_mode = #tpu.pipeline_mode<synchronous>, transform_indices = @transform_4, window_bounds = array<i64: 9, 64, 64>}, {pipeline_mode = #tpu.pipeline_mode<synchronous>, transform_indices = @transform_5, window_bounds = array<i64: 1, 64>}, {pipeline_mode = #tpu.pipeline_mode<synchronous>, transform_indices = @transform_6, window_bounds = array<i64: 1, 64>}, {pipeline_mode = #tpu.pipeline_mode<synchronous>, transform_indices = @transform_7, window_bounds = array<i64: 4, 64, 8>}, {pipeline_mode = #tpu.pipeline_mode<synchronous>, transform_indices = @transform_8, window_bounds = array<i64: 1, 8>}, {pipeline_mode = #tpu.pipeline_mode<synchronous>, transform_indices = @transform_9, window_bounds = array<i64: 1, 8>}, {pipeline_mode = #tpu.pipeline_mode<synchronous>, transform_indices = @transform_10, window_bounds = array<i64: 1, 1>}, {transform_indices = @transform_11, window_bounds = array<i64: 16, 128>}]} {
    %c0 = arith.constant 0 : index
    %c0_0 = arith.constant 0 : index
    %0 = vector.load %arg3[%c0, %c0_0] : memref<1x64xf32, #tpu.memory_space<vmem>>, vector<1x64xf32>
    %c0_1 = arith.constant 0 : index
    %c0_2 = arith.constant 0 : index
    %1 = vector.load %arg4[%c0_1, %c0_2] : memref<1x64xf32, #tpu.memory_space<vmem>>, vector<1x64xf32>
    %c0_3 = arith.constant 0 : index
    %c0_4 = arith.constant 0 : index
    %2 = vector.load %arg6[%c0_3, %c0_4] : memref<1x64xf32, #tpu.memory_space<vmem>>, vector<1x64xf32>
    %c0_5 = arith.constant 0 : index
    %c0_6 = arith.constant 0 : index
    %3 = vector.load %arg7[%c0_5, %c0_6] : memref<1x64xf32, #tpu.memory_space<vmem>>, vector<1x64xf32>
    %c0_7 = arith.constant 0 : index
    %c0_8 = arith.constant 0 : index
    %c0_9 = arith.constant 0 : index
    %c0_10 = arith.constant 0 : index
    %4 = vector.load %arg1[%c0_7, %c0_8, %c0_9, %c0_10] : memref<10x10x16x128xbf16, #tpu.memory_space<vmem>>, vector<8x8x16x128xbf16>
    %5 = vector.shape_cast %4 : vector<8x8x16x128xbf16> to vector<1024x128xbf16>
    %c0_11 = arith.constant 0 : index
    %c1 = arith.constant 1 : index
    %c0_12 = arith.constant 0 : index
    %c0_13 = arith.constant 0 : index
    %6 = vector.load %arg1[%c0_11, %c1, %c0_12, %c0_13] : memref<10x10x16x128xbf16, #tpu.memory_space<vmem>>, vector<8x8x16x128xbf16>
    %7 = vector.shape_cast %6 : vector<8x8x16x128xbf16> to vector<1024x128xbf16>
    %c0_14 = arith.constant 0 : index
    %c2 = arith.constant 2 : index
    %c0_15 = arith.constant 0 : index
    %c0_16 = arith.constant 0 : index
    %8 = vector.load %arg1[%c0_14, %c2, %c0_15, %c0_16] : memref<10x10x16x128xbf16, #tpu.memory_space<vmem>>, vector<8x8x16x128xbf16>
    %9 = vector.shape_cast %8 : vector<8x8x16x128xbf16> to vector<1024x128xbf16>
    %c1_17 = arith.constant 1 : index
    %c0_18 = arith.constant 0 : index
    %c0_19 = arith.constant 0 : index
    %c0_20 = arith.constant 0 : index
    %10 = vector.load %arg1[%c1_17, %c0_18, %c0_19, %c0_20] : memref<10x10x16x128xbf16, #tpu.memory_space<vmem>>, vector<8x8x16x128xbf16>
    %11 = vector.shape_cast %10 : vector<8x8x16x128xbf16> to vector<1024x128xbf16>
    %c1_21 = arith.constant 1 : index
    %c1_22 = arith.constant 1 : index
    %c0_23 = arith.constant 0 : index
    %c0_24 = arith.constant 0 : index
    %12 = vector.load %arg1[%c1_21, %c1_22, %c0_23, %c0_24] : memref<10x10x16x128xbf16, #tpu.memory_space<vmem>>, vector<8x8x16x128xbf16>
    %13 = vector.shape_cast %12 : vector<8x8x16x128xbf16> to vector<1024x128xbf16>
    %c1_25 = arith.constant 1 : index
    %c2_26 = arith.constant 2 : index
    %c0_27 = arith.constant 0 : index
    %c0_28 = arith.constant 0 : index
    %14 = vector.load %arg1[%c1_25, %c2_26, %c0_27, %c0_28] : memref<10x10x16x128xbf16, #tpu.memory_space<vmem>>, vector<8x8x16x128xbf16>
    %15 = vector.shape_cast %14 : vector<8x8x16x128xbf16> to vector<1024x128xbf16>
    %c2_29 = arith.constant 2 : index
    %c0_30 = arith.constant 0 : index
    %c0_31 = arith.constant 0 : index
    %c0_32 = arith.constant 0 : index
    %16 = vector.load %arg1[%c2_29, %c0_30, %c0_31, %c0_32] : memref<10x10x16x128xbf16, #tpu.memory_space<vmem>>, vector<8x8x16x128xbf16>
    %17 = vector.shape_cast %16 : vector<8x8x16x128xbf16> to vector<1024x128xbf16>
    %c2_33 = arith.constant 2 : index
    %c1_34 = arith.constant 1 : index
    %c0_35 = arith.constant 0 : index
    %c0_36 = arith.constant 0 : index
    %18 = vector.load %arg1[%c2_33, %c1_34, %c0_35, %c0_36] : memref<10x10x16x128xbf16, #tpu.memory_space<vmem>>, vector<8x8x16x128xbf16>
    %19 = vector.shape_cast %18 : vector<8x8x16x128xbf16> to vector<1024x128xbf16>
    %c2_37 = arith.constant 2 : index
    %c2_38 = arith.constant 2 : index
    %c0_39 = arith.constant 0 : index
    %c0_40 = arith.constant 0 : index
    %20 = vector.load %arg1[%c2_37, %c2_38, %c0_39, %c0_40] : memref<10x10x16x128xbf16, #tpu.memory_space<vmem>>, vector<8x8x16x128xbf16>
    %21 = vector.shape_cast %20 : vector<8x8x16x128xbf16> to vector<1024x128xbf16>
    %22 = tpu.concatenate %5, %7, %9, %11, %13, %15, %17, %19, %21 in 1 : vector<1024x128xbf16>, vector<1024x128xbf16>, vector<1024x128xbf16>, vector<1024x128xbf16>, vector<1024x128xbf16>, vector<1024x128xbf16>, vector<1024x128xbf16>, vector<1024x128xbf16>, vector<1024x128xbf16> -> vector<1024x1152xbf16>
    %c0_41 = arith.constant 0 : index
    %c0_42 = arith.constant 0 : index
    %23 = vector.load %arg2[%c0_41, %c0_42] : memref<1152x64xbf16, #tpu.memory_space<vmem>>, vector<1152x64xbf16>
    %cst = arith.constant dense<0.000000e+00> : vector<1024x64xf32>
    %24 = tpu.matmul %22, %23, %cst {dimension_numbers = #tpu.dot_dimension_numbers<[1], [0], [0], [1], [0, 0, 1, 1], [], []>} : vector<1024x1152xbf16>, vector<1152x64xbf16>, vector<1024x64xf32> -> vector<1024x64xf32>
    %25 = vector.broadcast %0 : vector<1x64xf32> to vector<1024x64xf32>
    %26 = arith.mulf %24, %25 : vector<1024x64xf32>
    %27 = vector.broadcast %1 : vector<1x64xf32> to vector<1024x64xf32>
    %28 = arith.addf %26, %27 : vector<1024x64xf32>
    %cst_43 = arith.constant 0.000000e+00 : f32
    %29 = vector.broadcast %cst_43 : f32 to vector<1024x64xf32>
    %30 = arith.maximumf %28, %29 : vector<1024x64xf32>
    %31 = vector.shape_cast %30 : vector<1024x64xf32> to vector<8x8x16x64xf32>
    %32 = vector.shape_cast %31 : vector<8x8x16x64xf32> to vector<4x2x8x16x64xf32>
    %cst_44 = arith.constant dense<0xFF800000> : vector<4x8x16x64xf32>
    %33 = vector.multi_reduction <maximumf>, %32, %cst_44 [1] : vector<4x2x8x16x64xf32> to vector<4x8x16x64xf32>
    %34 = vector.shape_cast %33 : vector<4x8x16x64xf32> to vector<4x4x2x16x64xf32>
    %cst_45 = arith.constant dense<0xFF800000> : vector<4x4x16x64xf32>
    %35 = vector.multi_reduction <maximumf>, %34, %cst_45 [2] : vector<4x4x2x16x64xf32> to vector<4x4x16x64xf32>
    %36 = arith.truncf %35 : vector<4x4x16x64xf32> to vector<4x4x16x64xbf16>
    %cst_46 = arith.constant 0.000000e+00 : bf16
    %37 = vector.broadcast %cst_46 : bf16 to vector<1x4x16x64xbf16>
    %cst_47 = arith.constant 0.000000e+00 : bf16
    %38 = vector.broadcast %cst_47 : bf16 to vector<6x1x16x64xbf16>
    %39 = tpu.concatenate %37, %36, %37 in 0 : vector<1x4x16x64xbf16>, vector<4x4x16x64xbf16>, vector<1x4x16x64xbf16> -> vector<6x4x16x64xbf16>
    %40 = tpu.concatenate %38, %39, %38 in 1 : vector<6x1x16x64xbf16>, vector<6x4x16x64xbf16>, vector<6x1x16x64xbf16> -> vector<6x6x16x64xbf16>
    %cst_48 = arith.constant 0.000000e+00 : f32
    %41 = vector.broadcast %cst_48 : f32 to vector<256x64xf32>
    %42 = vector.extract_strided_slice %40 {offsets = [0, 0, 0, 0], sizes = [4, 4, 16, 64], strides = [1, 1, 1, 1]} : vector<6x6x16x64xbf16> to vector<4x4x16x64xbf16>
    %43 = vector.shape_cast %42 : vector<4x4x16x64xbf16> to vector<256x64xbf16>
    %c0_49 = arith.constant 0 : index
    %c0_50 = arith.constant 0 : index
    %c0_51 = arith.constant 0 : index
    %44 = vector.load %arg5[%c0_49, %c0_50, %c0_51] : memref<9x64x64xbf16, #tpu.memory_space<vmem>>, vector<1x64x64xbf16>
    %45 = vector.shape_cast %44 : vector<1x64x64xbf16> to vector<64x64xbf16>
    %cst_52 = arith.constant dense<0.000000e+00> : vector<256x64xf32>
    %46 = tpu.matmul %43, %45, %cst_52 {dimension_numbers = #tpu.dot_dimension_numbers<[1], [0], [0], [1], [0, 0, 1, 1], [], []>} : vector<256x64xbf16>, vector<64x64xbf16>, vector<256x64xf32> -> vector<256x64xf32>
    %47 = arith.addf %41, %46 : vector<256x64xf32>
    %48 = vector.extract_strided_slice %40 {offsets = [0, 1, 0, 0], sizes = [4, 4, 16, 64], strides = [1, 1, 1, 1]} : vector<6x6x16x64xbf16> to vector<4x4x16x64xbf16>
    %49 = vector.shape_cast %48 : vector<4x4x16x64xbf16> to vector<256x64xbf16>
    %c1_53 = arith.constant 1 : index
    %c0_54 = arith.constant 0 : index
    %c0_55 = arith.constant 0 : index
    %50 = vector.load %arg5[%c1_53, %c0_54, %c0_55] : memref<9x64x64xbf16, #tpu.memory_space<vmem>>, vector<1x64x64xbf16>
    %51 = vector.shape_cast %50 : vector<1x64x64xbf16> to vector<64x64xbf16>
    %cst_56 = arith.constant dense<0.000000e+00> : vector<256x64xf32>
    %52 = tpu.matmul %49, %51, %cst_56 {dimension_numbers = #tpu.dot_dimension_numbers<[1], [0], [0], [1], [0, 0, 1, 1], [], []>} : vector<256x64xbf16>, vector<64x64xbf16>, vector<256x64xf32> -> vector<256x64xf32>
    %53 = arith.addf %47, %52 : vector<256x64xf32>
    %54 = vector.extract_strided_slice %40 {offsets = [0, 2, 0, 0], sizes = [4, 4, 16, 64], strides = [1, 1, 1, 1]} : vector<6x6x16x64xbf16> to vector<4x4x16x64xbf16>
    %55 = vector.shape_cast %54 : vector<4x4x16x64xbf16> to vector<256x64xbf16>
    %c2_57 = arith.constant 2 : index
    %c0_58 = arith.constant 0 : index
    %c0_59 = arith.constant 0 : index
    %56 = vector.load %arg5[%c2_57, %c0_58, %c0_59] : memref<9x64x64xbf16, #tpu.memory_space<vmem>>, vector<1x64x64xbf16>
    %57 = vector.shape_cast %56 : vector<1x64x64xbf16> to vector<64x64xbf16>
    %cst_60 = arith.constant dense<0.000000e+00> : vector<256x64xf32>
    %58 = tpu.matmul %55, %57, %cst_60 {dimension_numbers = #tpu.dot_dimension_numbers<[1], [0], [0], [1], [0, 0, 1, 1], [], []>} : vector<256x64xbf16>, vector<64x64xbf16>, vector<256x64xf32> -> vector<256x64xf32>
    %59 = arith.addf %53, %58 : vector<256x64xf32>
    %60 = vector.extract_strided_slice %40 {offsets = [1, 0, 0, 0], sizes = [4, 4, 16, 64], strides = [1, 1, 1, 1]} : vector<6x6x16x64xbf16> to vector<4x4x16x64xbf16>
    %61 = vector.shape_cast %60 : vector<4x4x16x64xbf16> to vector<256x64xbf16>
    %c3 = arith.constant 3 : index
    %c0_61 = arith.constant 0 : index
    %c0_62 = arith.constant 0 : index
    %62 = vector.load %arg5[%c3, %c0_61, %c0_62] : memref<9x64x64xbf16, #tpu.memory_space<vmem>>, vector<1x64x64xbf16>
    %63 = vector.shape_cast %62 : vector<1x64x64xbf16> to vector<64x64xbf16>
    %cst_63 = arith.constant dense<0.000000e+00> : vector<256x64xf32>
    %64 = tpu.matmul %61, %63, %cst_63 {dimension_numbers = #tpu.dot_dimension_numbers<[1], [0], [0], [1], [0, 0, 1, 1], [], []>} : vector<256x64xbf16>, vector<64x64xbf16>, vector<256x64xf32> -> vector<256x64xf32>
    %65 = arith.addf %59, %64 : vector<256x64xf32>
    %66 = vector.extract_strided_slice %40 {offsets = [1, 1, 0, 0], sizes = [4, 4, 16, 64], strides = [1, 1, 1, 1]} : vector<6x6x16x64xbf16> to vector<4x4x16x64xbf16>
    %67 = vector.shape_cast %66 : vector<4x4x16x64xbf16> to vector<256x64xbf16>
    %c4 = arith.constant 4 : index
    %c0_64 = arith.constant 0 : index
    %c0_65 = arith.constant 0 : index
    %68 = vector.load %arg5[%c4, %c0_64, %c0_65] : memref<9x64x64xbf16, #tpu.memory_space<vmem>>, vector<1x64x64xbf16>
    %69 = vector.shape_cast %68 : vector<1x64x64xbf16> to vector<64x64xbf16>
    %cst_66 = arith.constant dense<0.000000e+00> : vector<256x64xf32>
    %70 = tpu.matmul %67, %69, %cst_66 {dimension_numbers = #tpu.dot_dimension_numbers<[1], [0], [0], [1], [0, 0, 1, 1], [], []>} : vector<256x64xbf16>, vector<64x64xbf16>, vector<256x64xf32> -> vector<256x64xf32>
    %71 = arith.addf %65, %70 : vector<256x64xf32>
    %72 = vector.extract_strided_slice %40 {offsets = [1, 2, 0, 0], sizes = [4, 4, 16, 64], strides = [1, 1, 1, 1]} : vector<6x6x16x64xbf16> to vector<4x4x16x64xbf16>
    %73 = vector.shape_cast %72 : vector<4x4x16x64xbf16> to vector<256x64xbf16>
    %c5 = arith.constant 5 : index
    %c0_67 = arith.constant 0 : index
    %c0_68 = arith.constant 0 : index
    %74 = vector.load %arg5[%c5, %c0_67, %c0_68] : memref<9x64x64xbf16, #tpu.memory_space<vmem>>, vector<1x64x64xbf16>
    %75 = vector.shape_cast %74 : vector<1x64x64xbf16> to vector<64x64xbf16>
    %cst_69 = arith.constant dense<0.000000e+00> : vector<256x64xf32>
    %76 = tpu.matmul %73, %75, %cst_69 {dimension_numbers = #tpu.dot_dimension_numbers<[1], [0], [0], [1], [0, 0, 1, 1], [], []>} : vector<256x64xbf16>, vector<64x64xbf16>, vector<256x64xf32> -> vector<256x64xf32>
    %77 = arith.addf %71, %76 : vector<256x64xf32>
    %78 = vector.extract_strided_slice %40 {offsets = [2, 0, 0, 0], sizes = [4, 4, 16, 64], strides = [1, 1, 1, 1]} : vector<6x6x16x64xbf16> to vector<4x4x16x64xbf16>
    %79 = vector.shape_cast %78 : vector<4x4x16x64xbf16> to vector<256x64xbf16>
    %c6 = arith.constant 6 : index
    %c0_70 = arith.constant 0 : index
    %c0_71 = arith.constant 0 : index
    %80 = vector.load %arg5[%c6, %c0_70, %c0_71] : memref<9x64x64xbf16, #tpu.memory_space<vmem>>, vector<1x64x64xbf16>
    %81 = vector.shape_cast %80 : vector<1x64x64xbf16> to vector<64x64xbf16>
    %cst_72 = arith.constant dense<0.000000e+00> : vector<256x64xf32>
    %82 = tpu.matmul %79, %81, %cst_72 {dimension_numbers = #tpu.dot_dimension_numbers<[1], [0], [0], [1], [0, 0, 1, 1], [], []>} : vector<256x64xbf16>, vector<64x64xbf16>, vector<256x64xf32> -> vector<256x64xf32>
    %83 = arith.addf %77, %82 : vector<256x64xf32>
    %84 = vector.extract_strided_slice %40 {offsets = [2, 1, 0, 0], sizes = [4, 4, 16, 64], strides = [1, 1, 1, 1]} : vector<6x6x16x64xbf16> to vector<4x4x16x64xbf16>
    %85 = vector.shape_cast %84 : vector<4x4x16x64xbf16> to vector<256x64xbf16>
    %c7 = arith.constant 7 : index
    %c0_73 = arith.constant 0 : index
    %c0_74 = arith.constant 0 : index
    %86 = vector.load %arg5[%c7, %c0_73, %c0_74] : memref<9x64x64xbf16, #tpu.memory_space<vmem>>, vector<1x64x64xbf16>
    %87 = vector.shape_cast %86 : vector<1x64x64xbf16> to vector<64x64xbf16>
    %cst_75 = arith.constant dense<0.000000e+00> : vector<256x64xf32>
    %88 = tpu.matmul %85, %87, %cst_75 {dimension_numbers = #tpu.dot_dimension_numbers<[1], [0], [0], [1], [0, 0, 1, 1], [], []>} : vector<256x64xbf16>, vector<64x64xbf16>, vector<256x64xf32> -> vector<256x64xf32>
    %89 = arith.addf %83, %88 : vector<256x64xf32>
    %90 = vector.extract_strided_slice %40 {offsets = [2, 2, 0, 0], sizes = [4, 4, 16, 64], strides = [1, 1, 1, 1]} : vector<6x6x16x64xbf16> to vector<4x4x16x64xbf16>
    %91 = vector.shape_cast %90 : vector<4x4x16x64xbf16> to vector<256x64xbf16>
    %c8 = arith.constant 8 : index
    %c0_76 = arith.constant 0 : index
    %c0_77 = arith.constant 0 : index
    %92 = vector.load %arg5[%c8, %c0_76, %c0_77] : memref<9x64x64xbf16, #tpu.memory_space<vmem>>, vector<1x64x64xbf16>
    %93 = vector.shape_cast %92 : vector<1x64x64xbf16> to vector<64x64xbf16>
    %cst_78 = arith.constant dense<0.000000e+00> : vector<256x64xf32>
    %94 = tpu.matmul %91, %93, %cst_78 {dimension_numbers = #tpu.dot_dimension_numbers<[1], [0], [0], [1], [0, 0, 1, 1], [], []>} : vector<256x64xbf16>, vector<64x64xbf16>, vector<256x64xf32> -> vector<256x64xf32>
    %95 = arith.addf %89, %94 : vector<256x64xf32>
    %96 = vector.broadcast %2 : vector<1x64xf32> to vector<256x64xf32>
    %97 = arith.mulf %95, %96 : vector<256x64xf32>
    %98 = vector.broadcast %3 : vector<1x64xf32> to vector<256x64xf32>
    %99 = arith.addf %97, %98 : vector<256x64xf32>
    %cst_79 = arith.constant 0.000000e+00 : f32
    %100 = vector.broadcast %cst_79 : f32 to vector<256x64xf32>
    %101 = arith.maximumf %99, %100 : vector<256x64xf32>
    %102 = vector.shape_cast %101 : vector<256x64xf32> to vector<4x4x16x64xf32>
    %103 = vector.shape_cast %102 : vector<4x4x16x64xf32> to vector<2x2x4x16x64xf32>
    %cst_80 = arith.constant dense<0xFF800000> : vector<2x4x16x64xf32>
    %104 = vector.multi_reduction <maximumf>, %103, %cst_80 [1] : vector<2x2x4x16x64xf32> to vector<2x4x16x64xf32>
    %105 = vector.shape_cast %104 : vector<2x4x16x64xf32> to vector<2x2x2x16x64xf32>
    %cst_81 = arith.constant dense<0xFF800000> : vector<2x2x16x64xf32>
    %106 = vector.multi_reduction <maximumf>, %105, %cst_81 [2] : vector<2x2x2x16x64xf32> to vector<2x2x16x64xf32>
    %c0_82 = arith.constant 0 : index
    %c0_83 = arith.constant 0 : index
    %107 = vector.load %arg9[%c0_82, %c0_83] : memref<1x8xf32, #tpu.memory_space<vmem>>, vector<1x8xf32>
    %108 = vector.extract_strided_slice %106 {offsets = [0, 0, 0, 0], sizes = [1, 1, 16, 64], strides = [1, 1, 1, 1]} : vector<2x2x16x64xf32> to vector<1x1x16x64xf32>
    %109 = vector.shape_cast %108 : vector<1x1x16x64xf32> to vector<16x64xf32>
    %c0_84 = arith.constant 0 : index
    %c0_85 = arith.constant 0 : index
    %c0_86 = arith.constant 0 : index
    %110 = vector.load %arg8[%c0_84, %c0_85, %c0_86] : memref<4x64x8xf32, #tpu.memory_space<vmem>>, vector<1x64x8xf32>
    %111 = vector.shape_cast %110 : vector<1x64x8xf32> to vector<64x8xf32>
    %cst_87 = arith.constant dense<0.000000e+00> : vector<16x8xf32>
    %112 = tpu.matmul %109, %111, %cst_87 {dimension_numbers = #tpu.dot_dimension_numbers<[1], [0], [0], [1], [0, 0, 1, 1], [], []>} : vector<16x64xf32>, vector<64x8xf32>, vector<16x8xf32> -> vector<16x8xf32>
    %113 = vector.broadcast %107 : vector<1x8xf32> to vector<16x8xf32>
    %114 = arith.addf %113, %112 : vector<16x8xf32>
    %115 = vector.extract_strided_slice %106 {offsets = [0, 1, 0, 0], sizes = [1, 1, 16, 64], strides = [1, 1, 1, 1]} : vector<2x2x16x64xf32> to vector<1x1x16x64xf32>
    %116 = vector.shape_cast %115 : vector<1x1x16x64xf32> to vector<16x64xf32>
    %c1_88 = arith.constant 1 : index
    %c0_89 = arith.constant 0 : index
    %c0_90 = arith.constant 0 : index
    %117 = vector.load %arg8[%c1_88, %c0_89, %c0_90] : memref<4x64x8xf32, #tpu.memory_space<vmem>>, vector<1x64x8xf32>
    %118 = vector.shape_cast %117 : vector<1x64x8xf32> to vector<64x8xf32>
    %cst_91 = arith.constant dense<0.000000e+00> : vector<16x8xf32>
    %119 = tpu.matmul %116, %118, %cst_91 {dimension_numbers = #tpu.dot_dimension_numbers<[1], [0], [0], [1], [0, 0, 1, 1], [], []>} : vector<16x64xf32>, vector<64x8xf32>, vector<16x8xf32> -> vector<16x8xf32>
    %120 = arith.addf %114, %119 : vector<16x8xf32>
    %121 = vector.extract_strided_slice %106 {offsets = [1, 0, 0, 0], sizes = [1, 1, 16, 64], strides = [1, 1, 1, 1]} : vector<2x2x16x64xf32> to vector<1x1x16x64xf32>
    %122 = vector.shape_cast %121 : vector<1x1x16x64xf32> to vector<16x64xf32>
    %c2_92 = arith.constant 2 : index
    %c0_93 = arith.constant 0 : index
    %c0_94 = arith.constant 0 : index
    %123 = vector.load %arg8[%c2_92, %c0_93, %c0_94] : memref<4x64x8xf32, #tpu.memory_space<vmem>>, vector<1x64x8xf32>
    %124 = vector.shape_cast %123 : vector<1x64x8xf32> to vector<64x8xf32>
    %cst_95 = arith.constant dense<0.000000e+00> : vector<16x8xf32>
    %125 = tpu.matmul %122, %124, %cst_95 {dimension_numbers = #tpu.dot_dimension_numbers<[1], [0], [0], [1], [0, 0, 1, 1], [], []>} : vector<16x64xf32>, vector<64x8xf32>, vector<16x8xf32> -> vector<16x8xf32>
    %126 = arith.addf %120, %125 : vector<16x8xf32>
    %127 = vector.extract_strided_slice %106 {offsets = [1, 1, 0, 0], sizes = [1, 1, 16, 64], strides = [1, 1, 1, 1]} : vector<2x2x16x64xf32> to vector<1x1x16x64xf32>
    %128 = vector.shape_cast %127 : vector<1x1x16x64xf32> to vector<16x64xf32>
    %c3_96 = arith.constant 3 : index
    %c0_97 = arith.constant 0 : index
    %c0_98 = arith.constant 0 : index
    %129 = vector.load %arg8[%c3_96, %c0_97, %c0_98] : memref<4x64x8xf32, #tpu.memory_space<vmem>>, vector<1x64x8xf32>
    %130 = vector.shape_cast %129 : vector<1x64x8xf32> to vector<64x8xf32>
    %cst_99 = arith.constant dense<0.000000e+00> : vector<16x8xf32>
    %131 = tpu.matmul %128, %130, %cst_99 {dimension_numbers = #tpu.dot_dimension_numbers<[1], [0], [0], [1], [0, 0, 1, 1], [], []>} : vector<16x64xf32>, vector<64x8xf32>, vector<16x8xf32> -> vector<16x8xf32>
    %132 = arith.addf %126, %131 : vector<16x8xf32>
    %cst_100 = arith.constant 0.000000e+00 : f32
    %133 = vector.broadcast %cst_100 : f32 to vector<16x8xf32>
    %134 = arith.maximumf %132, %133 : vector<16x8xf32>
    %c0_101 = arith.constant 0 : index
    %c0_102 = arith.constant 0 : index
    %135 = vector.load %arg10[%c0_101, %c0_102] : memref<1x8xf32, #tpu.memory_space<vmem>>, vector<1x8xf32>
    %136 = vector.broadcast %135 : vector<1x8xf32> to vector<16x8xf32>
    %137 = arith.mulf %134, %136 : vector<16x8xf32>
    %cst_103 = arith.constant dense<0.000000e+00> : vector<16xf32>
    %138 = vector.multi_reduction <add>, %137, %cst_103 [1] : vector<16x8xf32> to vector<16xf32>
    %139 = vector.shape_cast %138 : vector<16xf32> to vector<16x1xf32>
    %c0_104 = arith.constant 0 : index
    %c0_105 = arith.constant 0 : index
    %140 = vector.load %arg11[%c0_104, %c0_105] : memref<1x1xf32, #tpu.memory_space<vmem>>, vector<1x1xf32>
    %141 = vector.broadcast %140 : vector<1x1xf32> to vector<16x1xf32>
    %142 = arith.addf %139, %141 : vector<16x1xf32>
    %cst_106 = arith.constant 0.000000e+00 : f32
    %143 = vector.broadcast %cst_106 : f32 to vector<16x1xf32>
    %144 = arith.subf %143, %142 : vector<16x1xf32>
    %145 = math.exp %144 : vector<16x1xf32>
    %cst_107 = arith.constant 1.000000e+00 : f32
    %146 = vector.broadcast %cst_107 : f32 to vector<16x1xf32>
    %147 = arith.addf %146, %145 : vector<16x1xf32>
    %cst_108 = arith.constant 1.000000e+00 : f32
    %148 = vector.broadcast %cst_108 : f32 to vector<16x1xf32>
    %149 = arith.divf %148, %147 : vector<16x1xf32>
    %150 = vector.shape_cast %149 : vector<16x1xf32> to vector<16x1xf32>
    %151 = vector.broadcast %150 : vector<16x1xf32> to vector<16x128xf32>
    %c0_109 = arith.constant 0 : index
    %c0_110 = arith.constant 0 : index
    %152 = vector.load %arg12[%c0_109, %c0_110] : memref<16x128xf32, #tpu.memory_space<vmem>>, vector<16x128xf32>
    tpu.vector_store %arg12[%c0_109, %c0_110], %151 {strides = array<i32>} : memref<16x128xf32, #tpu.memory_space<vmem>>, vector<16x128xf32>,
    return
  }
  func.func @transform_0(%arg0: i32) -> (i32, i32, i32, i32) {
    %c0_i32 = arith.constant 0 : i32
    %c0_i32_0 = arith.constant 0 : i32
    %c0_i32_1 = arith.constant 0 : i32
    %c0_i32_2 = arith.constant 0 : i32
    return %c0_i32, %c0_i32_0, %arg0, %c0_i32_1 : i32, i32, i32, i32
  }
  func.func @transform_1(%arg0: i32) -> (i32, i32) {
    %c0_i32 = arith.constant 0 : i32
    %c0_i32_0 = arith.constant 0 : i32
    %c0_i32_1 = arith.constant 0 : i32
    return %c0_i32, %c0_i32_0 : i32, i32
  }
  func.func @transform_2(%arg0: i32) -> (i32, i32) {
    %c0_i32 = arith.constant 0 : i32
    %c0_i32_0 = arith.constant 0 : i32
    %c0_i32_1 = arith.constant 0 : i32
    return %c0_i32, %c0_i32_0 : i32, i32
  }
  func.func @transform_3(%arg0: i32) -> (i32, i32) {
    %c0_i32 = arith.constant 0 : i32
    %c0_i32_0 = arith.constant 0 : i32
    %c0_i32_1 = arith.constant 0 : i32
    return %c0_i32, %c0_i32_0 : i32, i32
  }
  func.func @transform_4(%arg0: i32) -> (i32, i32, i32) {
    %c0_i32 = arith.constant 0 : i32
    %c0_i32_0 = arith.constant 0 : i32
    %c0_i32_1 = arith.constant 0 : i32
    %c0_i32_2 = arith.constant 0 : i32
    return %c0_i32, %c0_i32_0, %c0_i32_1 : i32, i32, i32
  }
  func.func @transform_5(%arg0: i32) -> (i32, i32) {
    %c0_i32 = arith.constant 0 : i32
    %c0_i32_0 = arith.constant 0 : i32
    %c0_i32_1 = arith.constant 0 : i32
    return %c0_i32, %c0_i32_0 : i32, i32
  }
  func.func @transform_6(%arg0: i32) -> (i32, i32) {
    %c0_i32 = arith.constant 0 : i32
    %c0_i32_0 = arith.constant 0 : i32
    %c0_i32_1 = arith.constant 0 : i32
    return %c0_i32, %c0_i32_0 : i32, i32
  }
  func.func @transform_7(%arg0: i32) -> (i32, i32, i32) {
    %c0_i32 = arith.constant 0 : i32
    %c0_i32_0 = arith.constant 0 : i32
    %c0_i32_1 = arith.constant 0 : i32
    %c0_i32_2 = arith.constant 0 : i32
    return %c0_i32, %c0_i32_0, %c0_i32_1 : i32, i32, i32
  }
  func.func @transform_8(%arg0: i32) -> (i32, i32) {
    %c0_i32 = arith.constant 0 : i32
    %c0_i32_0 = arith.constant 0 : i32
    %c0_i32_1 = arith.constant 0 : i32
    return %c0_i32, %c0_i32_0 : i32, i32
  }
  func.func @transform_9(%arg0: i32) -> (i32, i32) {
    %c0_i32 = arith.constant 0 : i32
    %c0_i32_0 = arith.constant 0 : i32
    %c0_i32_1 = arith.constant 0 : i32
    return %c0_i32, %c0_i32_0 : i32, i32
  }
  func.func @transform_10(%arg0: i32) -> (i32, i32) {
    %c0_i32 = arith.constant 0 : i32
    %c0_i32_0 = arith.constant 0 : i32
    %c0_i32_1 = arith.constant 0 : i32
    return %c0_i32, %c0_i32_0 : i32, i32
  }
  func.func @transform_11(%arg0: i32) -> (i32, i32) {
    %c0_i32 = arith.constant 0 : i32
    %c0_i32_0 = arith.constant 0 : i32
    return %arg0, %c0_i32 : i32, i32
  }
}

</mosaic_0001>

<bundles_post_ra>
// kernel: relation_network_forward.1
= control target key start
LH: loop header
LB: loop body
LE: loop exit
PB: predicated region body
PF: predicated region fallthrough
CT: control target
= control target key end

     0   :  { %s20428_s0 = inlined_call_operand.vmem [shape: bf16[10,10,32,128], index: 0, kind: input, shape index: {}]   ;;  %s20429_s1 = inlined_call_operand.vmem [shape: bf16[1152,64], index: 1, kind: input, shape index: {}]   ;;  %s20430_s2 = inlined_call_operand.vmem [shape: f32[1,64], index: 2, kind: input, shape index: {}]   ;;  %s20431_s3 = inlined_call_operand.vmem [shape: f32[1,64], index: 3, kind: input, shape index: {}]   ;;  %s20432_s4 = inlined_call_operand.vmem [shape: bf16[9,64,64], index: 4, kind: input, shape index: {}]   ;;  %s20433_s5 = inlined_call_operand.vmem [shape: f32[1,64], index: 5, kind: input, shape index: {}]   ;;  %s20434_s6 = inlined_call_operand.vmem [shape: f32[1,64], index: 6, kind: input, shape index: {}]   ;;  %s20435_s7 = inlined_call_operand.vmem [shape: f32[4,64,8], index: 7, kind: input, shape index: {}]   ;;  %s20436_s8 = inlined_call_operand.vmem [shape: f32[1,8], index: 8, kind: input, shape index: {}]   ;;  %s20437_s9 = inlined_call_operand.vmem [shape: f32[1,8], index: 9, kind: input, shape index: {}]   ;;  %s20438_s10 = inlined_call_operand.<no memory space> [shape: f32[1,1], index: 10, kind: input, shape index: {}]   ;;  %s20439_s11 = inlined_call_operand.vmem [shape: f32[32,128], index: 11, kind: output, shape index: {}]  }
   0x1   :  { %v16_v0 = vstv %s20438_s10 }
   0x2   :  { %17 = vst [vmem:[#allocation2] sm:$0x1] %v16_v0 }
   0x3   :  { %s17163_s19 = smov 0   ;;  %s17165_s20 = smov 0  }
   0x4   :  { %s17167_s21 = smov 0  }
   0x5 LB: > { %s12539_s10 = sadd.s32 4294967295, %s17097_s21   ;;  %s17180_s22 = sadd.s32 1, %s17097_s21   ;;  %s17097_s21 = sphi %s17167_s21, %s20731_s21   ;;  %s17093_s20 = sphi %s17165_s20, %s20730_s20   ;;  %s17089_s19 = sphi %s17163_s19, %s20729_s19  }
   0x6   : > { %s27_s23 = ssub.s32 %s17097_s21, %s17180_s22  ;;  %s30_s24 = sadd.s32 1, %s17093_s20 }
   0x7   : > { %p28_p0 = scmp.eq.s32.totalorder %s27_s23, 0  ;;  %p37_p1 = scmp.ne.s32.totalorder %s17093_s20, %s17089_s19 }
   0x8   : > { %p38_p2 = scmp.eq.s32.totalorder %s17097_s21, 0  ;;  %p12542_p4 = scmp.ge.s32.totalorder %s17097_s21, 2 }
   0x9   : > { %s17189_s25 = scalar_select %p28_p0, %s17093_s20, %s30_s24  }
   0xa   : > { %p39_p3 = por %p38_p2, %p37_p1  ;;  %329 = sbr.rel (%p12542_p4) target bundleno = 71 (0x47), region = 56 }
  0x11   : > { %332 = sbr.rel (!%p39_p3) target bundleno = 71 (0x47), region = 60  ;;  %s334_s26 = sand.u32 (%p39_p3), 1, %s17093_s20  }
  0x12   : > { %s14461_s27 = sshll.u32 (%p39_p3), %s17097_s21, 3  ;;  %s16334_s28 = smul.u32 (%p39_p3), 800, %s334_s26 }
  0x13   : > { %s17197_s12 = scalar_lea.vmem (%p39_p3), %s20428_s0, %s14461_s27 }
  0x14   : > { %v355_v1 = vld [vmem:[%s17197_s12] sm:$0xff] (%p39_p3)   ;;  %v359_v2 = vld [vmem:[%s17197_s12 + $0x10] sm:$0xff] (%p39_p3)   ;;  %s17205_s13 = scalar_lea.vmem (%p39_p3), [#allocation3], %s16334_s28 }
  0x15   : > { %v363_v3 = vld [vmem:[%s17197_s12 + $0x20] sm:$0xff] (%p39_p3)   ;;  %v367_v4 = vld [vmem:[%s17197_s12 + $0x30] sm:$0xff] (%p39_p3)   ;;  %356 = vst [vmem:[%s17205_s13] sm:$0xff] (%p39_p3), %v355_v1   ;;  %360 = vst [vmem:[%s17205_s13 + $0x8] sm:$0xff] (%p39_p3), %v359_v2  }
  0x16   : > { %v371_v5 = vld [vmem:[%s17197_s12 + $0x40] sm:$0xff] (%p39_p3)   ;;  %v375_v6 = vld [vmem:[%s17197_s12 + $0x50] sm:$0xff] (%p39_p3)   ;;  %364 = vst [vmem:[%s17205_s13 + $0x10] sm:$0xff] (%p39_p3), %v363_v3   ;;  %368 = vst [vmem:[%s17205_s13 + $0x18] sm:$0xff] (%p39_p3), %v367_v4  }
  0x17   : > { %372 = vst [vmem:[%s17205_s13 + $0x20] sm:$0xff] (%p39_p3), %v371_v5   ;;  %376 = vst [vmem:[%s17205_s13 + $0x28] sm:$0xff] (%p39_p3), %v375_v6   ;;  %v379_v7 = vld [vmem:[%s17197_s12 + $0x60] sm:$0xff] (%p39_p3)   ;;  %v383_v8 = vld [vmem:[%s17197_s12 + $0x70] sm:$0xff] (%p39_p3)  }
  0x18   : > { %v387_v9 = vld [vmem:[%s17197_s12 + $0x80] sm:$0xff]   ;;  %380 = vst [vmem:[%s17205_s13 + $0x30] sm:$0xff] %v379_v7   ;;  %384 = vst [vmem:[%s17205_s13 + $0x38] sm:$0xff] %v383_v8   ;;  %v391_v10 = vld [vmem:[%s17197_s12 + $0x90] sm:$0xff]  }
  0x19   : > { %388 = vst [vmem:[%s17205_s13 + $0x40] sm:$0xff] %v387_v9   ;;  %v395_v11 = vld [vmem:[%s17197_s12 + $0xa0] sm:$0xff]   ;;  %v399_v12 = vld [vmem:[%s17197_s12 + $0xb0] sm:$0xff]   ;;  %392 = vst [vmem:[%s17205_s13 + $0x48] sm:$0xff] %v391_v10  }
  0x1a   : > { %396 = vst [vmem:[%s17205_s13 + $0x50] sm:$0xff] %v395_v11   ;;  %400 = vst [vmem:[%s17205_s13 + $0x58] sm:$0xff] %v399_v12   ;;  %v403_v13 = vld [vmem:[%s17197_s12 + $0xc0] sm:$0xff]   ;;  %v407_v14 = vld [vmem:[%s17197_s12 + $0xd0] sm:$0xff]  }
  0x1b   : > { %v411_v15 = vld [vmem:[%s17197_s12 + $0xe0] sm:$0xff]   ;;  %404 = vst [vmem:[%s17205_s13 + $0x60] sm:$0xff] %v403_v13   ;;  %408 = vst [vmem:[%s17205_s13 + $0x68] sm:$0xff] %v407_v14   ;;  %v415_v16 = vld [vmem:[%s17197_s12 + $0xf0] sm:$0xff]  }
  0x1c   : > { %412 = vst [vmem:[%s17205_s13 + $0x70] sm:$0xff] %v411_v15   ;;  %v419_v17 = vld [vmem:[%s17197_s12 + $0x100] sm:$0xff]   ;;  %v423_v18 = vld [vmem:[%s17197_s12 + $0x110] sm:$0xff]   ;;  %416 = vst [vmem:[%s17205_s13 + $0x78] sm:$0xff] %v415_v16  }
  0x1d   : > { %420 = vst [vmem:[%s17205_s13 + $0x80] sm:$0xff] %v419_v17   ;;  %424 = vst [vmem:[%s17205_s13 + $0x88] sm:$0xff] %v423_v18   ;;  %v427_v19 = vld [vmem:[%s17197_s12 + $0x120] sm:$0xff]   ;;  %v431_v20 = vld [vmem:[%s17197_s12 + $0x130] sm:$0xff]  }
  0x1e   : > { %v435_v21 = vld [vmem:[%s17197_s12 + $0x140] sm:$0xff]   ;;  %428 = vst [vmem:[%s17205_s13 + $0x90] sm:$0xff] %v427_v19   ;;  %432 = vst [vmem:[%s17205_s13 + $0x98] sm:$0xff] %v431_v20   ;;  %v439_v22 = vld [vmem:[%s17197_s12 + $0x150] sm:$0xff]  }
  0x1f   : > { %436 = vst [vmem:[%s17205_s13 + $0xa0] sm:$0xff] %v435_v21   ;;  %v443_v23 = vld [vmem:[%s17197_s12 + $0x160] sm:$0xff]   ;;  %v447_v24 = vld [vmem:[%s17197_s12 + $0x170] sm:$0xff]   ;;  %440 = vst [vmem:[%s17205_s13 + $0xa8] sm:$0xff] %v439_v22  }
  0x20   : > { %444 = vst [vmem:[%s17205_s13 + $0xb0] sm:$0xff] %v443_v23   ;;  %448 = vst [vmem:[%s17205_s13 + $0xb8] sm:$0xff] %v447_v24   ;;  %v451_v25 = vld [vmem:[%s17197_s12 + $0x180] sm:$0xff]   ;;  %v455_v26 = vld [vmem:[%s17197_s12 + $0x190] sm:$0xff]  }
  0x21   : > { %v459_v27 = vld [vmem:[%s17197_s12 + $0x1a0] sm:$0xff]   ;;  %452 = vst [vmem:[%s17205_s13 + $0xc0] sm:$0xff] %v451_v25   ;;  %456 = vst [vmem:[%s17205_s13 + $0xc8] sm:$0xff] %v455_v26   ;;  %v463_v28 = vld [vmem:[%s17197_s12 + $0x1b0] sm:$0xff]  }
  0x22   : > { %460 = vst [vmem:[%s17205_s13 + $0xd0] sm:$0xff] %v459_v27   ;;  %v467_v29 = vld [vmem:[%s17197_s12 + $0x1c0] sm:$0xff]   ;;  %v471_v30 = vld [vmem:[%s17197_s12 + $0x1d0] sm:$0xff]   ;;  %464 = vst [vmem:[%s17205_s13 + $0xd8] sm:$0xff] %v463_v28  }
  0x23   : > { %468 = vst [vmem:[%s17205_s13 + $0xe0] sm:$0xff] %v467_v29   ;;  %472 = vst [vmem:[%s17205_s13 + $0xe8] sm:$0xff] %v471_v30   ;;  %v475_v31 = vld [vmem:[%s17197_s12 + $0x1e0] sm:$0xff]   ;;  %v479_v32 = vld [vmem:[%s17197_s12 + $0x1f0] sm:$0xff]  }
  0x24   : > { %v483_v33 = vld [vmem:[%s17197_s12 + $0x200] sm:$0xff]   ;;  %476 = vst [vmem:[%s17205_s13 + $0xf0] sm:$0xff] %v475_v31   ;;  %480 = vst [vmem:[%s17205_s13 + $0xf8] sm:$0xff] %v479_v32   ;;  %v487_v34 = vld [vmem:[%s17197_s12 + $0x210] sm:$0xff]  }
  0x25   : > { %484 = vst [vmem:[%s17205_s13 + $0x100] sm:$0xff] %v483_v33   ;;  %v491_v35 = vld [vmem:[%s17197_s12 + $0x220] sm:$0xff]   ;;  %v495_v36 = vld [vmem:[%s17197_s12 + $0x230] sm:$0xff]   ;;  %488 = vst [vmem:[%s17205_s13 + $0x108] sm:$0xff] %v487_v34  }
  0x26   : > { %492 = vst [vmem:[%s17205_s13 + $0x110] sm:$0xff] %v491_v35   ;;  %496 = vst [vmem:[%s17205_s13 + $0x118] sm:$0xff] %v495_v36   ;;  %v499_v37 = vld [vmem:[%s17197_s12 + $0x240] sm:$0xff]   ;;  %v503_v38 = vld [vmem:[%s17197_s12 + $0x250] sm:$0xff]  }
  0x27   : > { %v507_v39 = vld [vmem:[%s17197_s12 + $0x260] sm:$0xff]   ;;  %500 = vst [vmem:[%s17205_s13 + $0x120] sm:$0xff] %v499_v37   ;;  %504 = vst [vmem:[%s17205_s13 + $0x128] sm:$0xff] %v503_v38   ;;  %v511_v40 = vld [vmem:[%s17197_s12 + $0x270] sm:$0xff]  }
  0x28   : > { %508 = vst [vmem:[%s17205_s13 + $0x130] sm:$0xff] %v507_v39   ;;  %v515_v41 = vld [vmem:[%s17197_s12 + $0x280] sm:$0xff]   ;;  %v519_v42 = vld [vmem:[%s17197_s12 + $0x290] sm:$0xff]   ;;  %512 = vst [vmem:[%s17205_s13 + $0x138] sm:$0xff] %v511_v40  }
  0x29   : > { %516 = vst [vmem:[%s17205_s13 + $0x140] sm:$0xff] %v515_v41   ;;  %520 = vst [vmem:[%s17205_s13 + $0x148] sm:$0xff] %v519_v42   ;;  %v523_v43 = vld [vmem:[%s17197_s12 + $0x2a0] sm:$0xff]   ;;  %v527_v44 = vld [vmem:[%s17197_s12 + $0x2b0] sm:$0xff]  }
  0x2a   : > { %v531_v45 = vld [vmem:[%s17197_s12 + $0x2c0] sm:$0xff]   ;;  %524 = vst [vmem:[%s17205_s13 + $0x150] sm:$0xff] %v523_v43   ;;  %528 = vst [vmem:[%s17205_s13 + $0x158] sm:$0xff] %v527_v44   ;;  %v535_v46 = vld [vmem:[%s17197_s12 + $0x2d0] sm:$0xff]  }
  0x2b   : > { %532 = vst [vmem:[%s17205_s13 + $0x160] sm:$0xff] %v531_v45   ;;  %v539_v47 = vld [vmem:[%s17197_s12 + $0x2e0] sm:$0xff]   ;;  %v543_v48 = vld [vmem:[%s17197_s12 + $0x2f0] sm:$0xff]   ;;  %536 = vst [vmem:[%s17205_s13 + $0x168] sm:$0xff] %v535_v46  }
  0x2c   : > { %540 = vst [vmem:[%s17205_s13 + $0x170] sm:$0xff] %v539_v47   ;;  %544 = vst [vmem:[%s17205_s13 + $0x178] sm:$0xff] %v543_v48   ;;  %v547_v49 = vld [vmem:[%s17197_s12 + $0x300] sm:$0xff]   ;;  %v551_v50 = vld [vmem:[%s17197_s12 + $0x310] sm:$0xff]  }
  0x2d   : > { %v555_v51 = vld [vmem:[%s17197_s12 + $0x320] sm:$0xff]   ;;  %548 = vst [vmem:[%s17205_s13 + $0x180] sm:$0xff] %v547_v49   ;;  %552 = vst [vmem:[%s17205_s13 + $0x188] sm:$0xff] %v551_v50   ;;  %v559_v52 = vld [vmem:[%s17197_s12 + $0x330] sm:$0xff]  }
  0x2e   : > { %556 = vst [vmem:[%s17205_s13 + $0x190] sm:$0xff] %v555_v51   ;;  %v563_v53 = vld [vmem:[%s17197_s12 + $0x340] sm:$0xff]   ;;  %v567_v54 = vld [vmem:[%s17197_s12 + $0x350] sm:$0xff]   ;;  %560 = vst [vmem:[%s17205_s13 + $0x198] sm:$0xff] %v559_v52  }
  0x2f   : > { %564 = vst [vmem:[%s17205_s13 + $0x1a0] sm:$0xff] %v563_v53   ;;  %568 = vst [vmem:[%s17205_s13 + $0x1a8] sm:$0xff] %v567_v54   ;;  %v571_v55 = vld [vmem:[%s17197_s12 + $0x360] sm:$0xff]   ;;  %v575_v56 = vld [vmem:[%s17197_s12 + $0x370] sm:$0xff]  }
  0x30   : > { %v579_v57 = vld [vmem:[%s17197_s12 + $0x380] sm:$0xff]   ;;  %572 = vst [vmem:[%s17205_s13 + $0x1b0] sm:$0xff] %v571_v55   ;;  %576 = vst [vmem:[%s17205_s13 + $0x1b8] sm:$0xff] %v575_v56   ;;  %v583_v58 = vld [vmem:[%s17197_s12 + $0x390] sm:$0xff]  }
  0x31   : > { %580 = vst [vmem:[%s17205_s13 + $0x1c0] sm:$0xff] %v579_v57   ;;  %v587_v59 = vld [vmem:[%s17197_s12 + $0x3a0] sm:$0xff]   ;;  %v591_v60 = vld [vmem:[%s17197_s12 + $0x3b0] sm:$0xff]   ;;  %584 = vst [vmem:[%s17205_s13 + $0x1c8] sm:$0xff] %v583_v58  }
  0x32   : > { %588 = vst [vmem:[%s17205_s13 + $0x1d0] sm:$0xff] %v587_v59   ;;  %592 = vst [vmem:[%s17205_s13 + $0x1d8] sm:$0xff] %v591_v60   ;;  %v595_v61 = vld [vmem:[%s17197_s12 + $0x3c0] sm:$0xff]   ;;  %v599_v62 = vld [vmem:[%s17197_s12 + $0x3d0] sm:$0xff]  }
  0x33   : > { %v603_v63 = vld [vmem:[%s17197_s12 + $0x3e0] sm:$0xff]   ;;  %596 = vst [vmem:[%s17205_s13 + $0x1e0] sm:$0xff] %v595_v61   ;;  %600 = vst [vmem:[%s17205_s13 + $0x1e8] sm:$0xff] %v599_v62   ;;  %v607_v0 = vld [vmem:[%s17197_s12 + $0x3f0] sm:$0xff]  }
  0x34   : > { %604 = vst [vmem:[%s17205_s13 + $0x1f0] sm:$0xff] %v603_v63   ;;  %v611_v1 = vld [vmem:[%s17197_s12 + $0x400] sm:$0xff]   ;;  %v615_v2 = vld [vmem:[%s17197_s12 + $0x410] sm:$0xff]   ;;  %608 = vst [vmem:[%s17205_s13 + $0x1f8] sm:$0xff] %v607_v0  }
  0x35   : > { %612 = vst [vmem:[%s17205_s13 + $0x200] sm:$0xff] %v611_v1   ;;  %616 = vst [vmem:[%s17205_s13 + $0x208] sm:$0xff] %v615_v2   ;;  %v619_v3 = vld [vmem:[%s17197_s12 + $0x420] sm:$0xff]   ;;  %v623_v4 = vld [vmem:[%s17197_s12 + $0x430] sm:$0xff]  }
  0x36   : > { %v627_v5 = vld [vmem:[%s17197_s12 + $0x440] sm:$0xff]   ;;  %620 = vst [vmem:[%s17205_s13 + $0x210] sm:$0xff] %v619_v3   ;;  %624 = vst [vmem:[%s17205_s13 + $0x218] sm:$0xff] %v623_v4   ;;  %v631_v6 = vld [vmem:[%s17197_s12 + $0x450] sm:$0xff]  }
  0x37   : > { %628 = vst [vmem:[%s17205_s13 + $0x220] sm:$0xff] %v627_v5   ;;  %v635_v7 = vld [vmem:[%s17197_s12 + $0x460] sm:$0xff]   ;;  %v639_v8 = vld [vmem:[%s17197_s12 + $0x470] sm:$0xff]   ;;  %632 = vst [vmem:[%s17205_s13 + $0x228] sm:$0xff] %v631_v6  }
  0x38   : > { %636 = vst [vmem:[%s17205_s13 + $0x230] sm:$0xff] %v635_v7   ;;  %640 = vst [vmem:[%s17205_s13 + $0x238] sm:$0xff] %v639_v8   ;;  %v643_v9 = vld [vmem:[%s17197_s12 + $0x480] sm:$0xff]   ;;  %v647_v10 = vld [vmem:[%s17197_s12 + $0x490] sm:$0xff]  }
  0x39   : > { %v651_v11 = vld [vmem:[%s17197_s12 + $0x4a0] sm:$0xff]   ;;  %644 = vst [vmem:[%s17205_s13 + $0x240] sm:$0xff] %v643_v9   ;;  %648 = vst [vmem:[%s17205_s13 + $0x248] sm:$0xff] %v647_v10   ;;  %v655_v12 = vld [vmem:[%s17197_s12 + $0x4b0] sm:$0xff]  }
  0x3a   : > { %652 = vst [vmem:[%s17205_s13 + $0x250] sm:$0xff] %v651_v11   ;;  %v659_v13 = vld [vmem:[%s17197_s12 + $0x4c0] sm:$0xff]   ;;  %v663_v14 = vld [vmem:[%s17197_s12 + $0x4d0] sm:$0xff]   ;;  %656 = vst [vmem:[%s17205_s13 + $0x258] sm:$0xff] %v655_v12  }
  0x3b   : > { %660 = vst [vmem:[%s17205_s13 + $0x260] sm:$0xff] %v659_v13   ;;  %664 = vst [vmem:[%s17205_s13 + $0x268] sm:$0xff] %v663_v14   ;;  %v667_v15 = vld [vmem:[%s17197_s12 + $0x4e0] sm:$0xff]   ;;  %v671_v16 = vld [vmem:[%s17197_s12 + $0x4f0] sm:$0xff]  }
  0x3c   : > { %v675_v17 = vld [vmem:[%s17197_s12 + $0x500] sm:$0xff]   ;;  %668 = vst [vmem:[%s17205_s13 + $0x270] sm:$0xff] %v667_v15   ;;  %672 = vst [vmem:[%s17205_s13 + $0x278] sm:$0xff] %v671_v16   ;;  %v679_v18 = vld [vmem:[%s17197_s12 + $0x510] sm:$0xff]  }
  0x3d   : > { %676 = vst [vmem:[%s17205_s13 + $0x280] sm:$0xff] %v675_v17   ;;  %v683_v19 = vld [vmem:[%s17197_s12 + $0x520] sm:$0xff]   ;;  %v687_v20 = vld [vmem:[%s17197_s12 + $0x530] sm:$0xff]   ;;  %680 = vst [vmem:[%s17205_s13 + $0x288] sm:$0xff] %v679_v18  }
  0x3e   : > { %684 = vst [vmem:[%s17205_s13 + $0x290] sm:$0xff] %v683_v19   ;;  %688 = vst [vmem:[%s17205_s13 + $0x298] sm:$0xff] %v687_v20   ;;  %v691_v21 = vld [vmem:[%s17197_s12 + $0x540] sm:$0xff]   ;;  %v695_v22 = vld [vmem:[%s17197_s12 + $0x550] sm:$0xff]  }
  0x3f   : > { %v699_v23 = vld [vmem:[%s17197_s12 + $0x560] sm:$0xff]   ;;  %692 = vst [vmem:[%s17205_s13 + $0x2a0] sm:$0xff] %v691_v21   ;;  %696 = vst [vmem:[%s17205_s13 + $0x2a8] sm:$0xff] %v695_v22   ;;  %v703_v24 = vld [vmem:[%s17197_s12 + $0x570] sm:$0xff]  }
  0x40   : > { %700 = vst [vmem:[%s17205_s13 + $0x2b0] sm:$0xff] %v699_v23   ;;  %v707_v25 = vld [vmem:[%s17197_s12 + $0x580] sm:$0xff]   ;;  %v711_v26 = vld [vmem:[%s17197_s12 + $0x590] sm:$0xff]   ;;  %704 = vst [vmem:[%s17205_s13 + $0x2b8] sm:$0xff] %v703_v24  }
  0x41   : > { %708 = vst [vmem:[%s17205_s13 + $0x2c0] sm:$0xff] %v707_v25   ;;  %712 = vst [vmem:[%s17205_s13 + $0x2c8] sm:$0xff] %v711_v26   ;;  %v715_v27 = vld [vmem:[%s17197_s12 + $0x5a0] sm:$0xff]   ;;  %v719_v28 = vld [vmem:[%s17197_s12 + $0x5b0] sm:$0xff]  }
  0x42   : > { %v723_v29 = vld [vmem:[%s17197_s12 + $0x5c0] sm:$0xff]   ;;  %716 = vst [vmem:[%s17205_s13 + $0x2d0] sm:$0xff] %v715_v27   ;;  %720 = vst [vmem:[%s17205_s13 + $0x2d8] sm:$0xff] %v719_v28   ;;  %v727_v30 = vld [vmem:[%s17197_s12 + $0x5d0] sm:$0xff]  }
  0x43   : > { %724 = vst [vmem:[%s17205_s13 + $0x2e0] sm:$0xff] %v723_v29   ;;  %v731_v31 = vld [vmem:[%s17197_s12 + $0x5e0] sm:$0xff]   ;;  %v735_v32 = vld [vmem:[%s17197_s12 + $0x5f0] sm:$0xff]   ;;  %728 = vst [vmem:[%s17205_s13 + $0x2e8] sm:$0xff] %v727_v30  }
  0x44   : > { %732 = vst [vmem:[%s17205_s13 + $0x2f0] sm:$0xff] %v731_v31   ;;  %736 = vst [vmem:[%s17205_s13 + $0x2f8] sm:$0xff] %v735_v32   ;;  %v739_v33 = vld [vmem:[%s17197_s12 + $0x600] sm:$0xff]   ;;  %v743_v34 = vld [vmem:[%s17197_s12 + $0x610] sm:$0xff]  }
  0x45   : > { %v747_v35 = vld [vmem:[%s17197_s12 + $0x620] sm:$0xff]   ;;  %740 = vst [vmem:[%s17205_s13 + $0x300] sm:$0xff] %v739_v33   ;;  %744 = vst [vmem:[%s17205_s13 + $0x308] sm:$0xff] %v743_v34   ;;  %v751_v36 = vld [vmem:[%s17197_s12 + $0x630] sm:$0xff]  }
  0x46   : > { %748 = vst [vmem:[%s17205_s13 + $0x310] sm:$0xff] %v747_v35   ;;  %752 = vst [vmem:[%s17205_s13 + $0x318] sm:$0xff] %v751_v36  }
  0x47 PF: > { %p12545_p5 = scmp.ge.s32.totalorder %s17097_s21, 1  ;;  %p1176_p6 = scmp.lt.s32.totalorder %s17097_s21, 3 }
  0x49   : > { %p1177_p7 = pnand %p12545_p5, %p1176_p6 }
  0x4b   : > { %1180 = sbr.rel (%p1177_p7) target bundleno = 2988 (0xbac), region = 101 }
  0x52   : > { %v16363_v37 = vld [vmem:[%s20429_s1 + $0x80] sm:$0xff]   ;;  %v20440_v38 = vmov 0   ;;  %v16364_v39 = vld [vmem:[%s20429_s1 + $0x88] sm:$0xff]   ;;  %v16365_v40 = vld [vmem:[%s20429_s1 + $0x90] sm:$0xff]   ;;  %s1183_s24 = sand.u32 1, %s17089_s19   ;;  %vm9547_vm0 = vcmask 523264  }
  0x53   : > { %6971 = vmatprep.subr.bf16.mxu0 %v20440_v38  ;;  %6426 = vmatprep.subr.bf16.mxu1 %v20440_v38  ;;  %s16335_s26 = smul.u32 800, %s1183_s24  ;;  %v16366_v41 = vld [vmem:[%s20429_s1 + $0x98] sm:$0xff]   ;;  %v16367_v42 = vld [vmem:[%s20429_s1 + $0xa0] sm:$0xff]   ;;  %v16368_v44 = vld [vmem:[%s20429_s1 + $0xa8] sm:$0xff]   ;;  %vm12437_vm1 = vcmask 64512   ;;  %s12546_s17 = sshll.u32 %s12539_s10, 1 }
  0x54   : > { %6972 = vmatpush1.bf16.msra.mxu0 %v16363_v37  ;;  %16361 = vset.pattern.permute.xlu1 %v20440_v38  ;;  %v16369_v45 = vld [vmem:[%s20429_s1 + $0xb0] sm:$0xff]   ;;  %v16370_v46 = vld [vmem:[%s20429_s1 + $0xb8] sm:$0xff]   ;;  %v16371_v47 = vld [vmem:[%s20429_s1 + $0xc0] sm:$0xff]   ;;  %p1224_p8 = scmp.lt.s32.totalorder %s12546_s17, 3 }
  0x55   : > { %6973 = vmatprep.subr.bf16.mxu0 %v20440_v38  ;;  %16362 = vset.pattern.permute.xlu0 %v20440_v38  ;;  %s17427_s12 = scalar_lea.vmem [#allocation3], %s16335_s26  ;;  %v16372_v48 = vld [vmem:[%s20429_s1 + $0xc8] sm:$0xff]   ;;  %v16373_v49 = vld [vmem:[%s20429_s1 + $0xd0] sm:$0xff]   ;;  %v16374_v50 = vld [vmem:[%s20429_s1 + $0xd8] sm:$0xff]  }
  0x56   : > { %v16379_v43 = vld [vmem:[%s17427_s12 + $0x50] sm:$0xff]   ;;  %v16375_v51 = vld [vmem:[%s20429_s1 + $0xe0] sm:$0xff]   ;;  %v16376_v52 = vld [vmem:[%s20429_s1 + $0xe8] sm:$0xff]   ;;  %s20733_s17 = smov (!%p1224_p8, %s12546_s17), 3 }
  0x57   : > { %7003 = vmatprep.mubr.bf16.mxu0 %v16379_v43  ;;  %v16377_v53 = vld [vmem:[%s20429_s1 + $0xf0] sm:$0xff]   ;;  %v16378_v54 = vld [vmem:[%s20429_s1 + $0xf8] sm:$0xff]   ;;  %v16381_v56 = vld [vmem:[%s20429_s1 + $0x100] sm:$0xff]   ;;  %s12547_s18 = sshll.u32 %s20733_s17, 3 }
  0x58   : > { %6974 = vmatpush1.bf16.msra.mxu0 %v16364_v39  ;;  %v16380_v55 = vld [vmem:[%s17427_s12 + $0x10] sm:$0xff]   ;;  %v16382_v57 = vld [vmem:[%s17427_s12 + $0x58] sm:$0xff]   ;;  %v16388_v58 = vld [vmem:[%s20429_s1 + $0x108] sm:$0xff]   ;;  %s1227_s26 = scalar_lea.vmem %s20439_s11, %s12547_s18 }
  0x59   : > { %6975 = vmatprep.subr.bf16.mxu0 %v20440_v38  ;;  %v16383_v59 = vld [vmem:[%s17427_s12 + $0x18] sm:$0xff]   ;;  %v16384_v60 = vld [vmem:[%s17427_s12 + $0x60] sm:$0xff]   ;;  %v16397_v61 = vld [vmem:[%s20429_s1 + $0x110] sm:$0xff]  }
  0x5a   : > { %v16404_v62 = vld [vmem:[%s20429_s1 + $0x118] sm:$0xff]   ;;  %v16385_v63 = vld [vmem:[%s17427_s12 + $0x20] sm:$0xff]   ;;  %v16386_v0 = vld [vmem:[%s17427_s12 + $0x68] sm:$0xff]  }
  0x5b   : > { %v16413_v1 = vld [vmem:[%s20429_s1 + $0x120] sm:$0xff]   ;;  %v16420_v2 = vld [vmem:[%s20429_s1 + $0x128] sm:$0xff]   ;;  %v16389_v4 = vld [vmem:[%s17427_s12 + $0x70] sm:$0xff]  }
  0x5c   : > { %6976 = vmatpush1.bf16.msra.mxu0 %v16365_v40  ;;  %v16387_v3 = vld [vmem:[%s17427_s12 + $0x28] sm:$0xff]   ;;  %v16390_v5 = vld [vmem:[%s17427_s12 + $0x30] sm:$0xff]   ;;  %v16391_v6 = vld [vmem:[%s17427_s12 + $0x78] sm:$0xff]  }
  0x5d   : > { %6977 = vmatprep.subr.bf16.mxu0 %v20440_v38  ;;  %v16392_v7 = vld [vmem:[%s17427_s12 + $0x38] sm:$0xff]   ;;  %v16393_v8 = vld [vmem:[%s17427_s12 + $0x80] sm:$0xff]   ;;  %v16429_v9 = vld [vmem:[%s20429_s1 + $0x130] sm:$0xff]  }
  0x5e   : > { %v16394_v10 = vld [vmem:[%s17427_s12 + $0x40] sm:$0xff]   ;;  %v16395_v11 = vld [vmem:[%s17427_s12 + $0x88] sm:$0xff]   ;;  %v16436_v16 = vld [vmem:[%s20429_s1 + $0x138] sm:$0xff]  }
  0x5f   : > { %v16396_v12 = vld [vmem:[%s17427_s12 + $0x48] sm:$0xff]   ;;  %v16398_v13 = vld [vmem:[%s17427_s12 + $0xa0] sm:$0xff]   ;;  %v16402_v18 = vld [vmem:[%s17427_s12 + $0xb0] sm:$0xff]  }
  0x60   : > { %6978 = vmatpush1.bf16.msra.mxu0 %v16366_v41  ;;  %v16399_v14 = vld [vmem:[%s17427_s12 + $0x60] sm:$0xff]   ;;  %v16400_v15 = vld [vmem:[%s17427_s12 + $0xa8] sm:$0xff]   ;;  %v16403_v19 = vld [vmem:[%s17427_s12 + $0x70] sm:$0xff]  }
  0x61   : > { %6979 = vmatprep.subr.bf16.mxu0 %v20440_v38  ;;  %v16401_v17 = vld [vmem:[%s17427_s12 + $0x68] sm:$0xff]   ;;  %v16405_v20 = vld [vmem:[%s17427_s12 + $0xb8] sm:$0xff]   ;;  %v16407_v22 = vld [vmem:[%s17427_s12 + $0xc0] sm:$0xff]  }
  0x62   : > { %v16406_v21 = vld [vmem:[%s17427_s12 + $0x78] sm:$0xff]   ;;  %v16408_v23 = vld [vmem:[%s17427_s12 + $0x80] sm:$0xff]   ;;  %v16409_v24 = vld [vmem:[%s17427_s12 + $0xc8] sm:$0xff]  }
  0x63   : > { %v16445_v25 = vld [vmem:[%s20429_s1 + $0x140] sm:$0xff]   ;;  %v16410_v26 = vld [vmem:[%s17427_s12 + $0x88] sm:$0xff]   ;;  %v16411_v27 = vld [vmem:[%s17427_s12 + $0xd0] sm:$0xff]  }
  0x64   : > { %6980 = vmatpush1.bf16.msra.mxu0 %v16367_v42  ;;  %v16412_v28 = vld [vmem:[%s17427_s12 + $0x90] sm:$0xff]   ;;  %v16414_v29 = vld [vmem:[%s17427_s12 + $0xd8] sm:$0xff]   ;;  %v16452_v32 = vld [vmem:[%s20429_s1 + $0x148] sm:$0xff]  }
  0x65   : > { %6981 = vmatprep.subr.bf16.mxu0 %v20440_v38  ;;  %v16415_v30 = vld [vmem:[%s17427_s12 + $0x98] sm:$0xff]   ;;  %v16416_v31 = vld [vmem:[%s17427_s12 + $0xf0] sm:$0xff]   ;;  %v16421_v36 = vld [vmem:[%s17427_s12 + $0x100] sm:$0xff]  }
  0x66   : > { %v16417_v33 = vld [vmem:[%s17427_s12 + $0xb0] sm:$0xff]   ;;  %v16418_v34 = vld [vmem:[%s17427_s12 + $0xf8] sm:$0xff]   ;;  %v16422_v37 = vld [vmem:[%s17427_s12 + $0xc0] sm:$0xff]  }
  0x67   : > { %v16419_v35 = vld [vmem:[%s17427_s12 + $0xb8] sm:$0xff]   ;;  %v16423_v39 = vld [vmem:[%s17427_s12 + $0x108] sm:$0xff]   ;;  %v16425_v41 = vld [vmem:[%s17427_s12 + $0x110] sm:$0xff]  }
  0x68   : > { %6982 = vmatpush1.bf16.msra.mxu0 %v16368_v44  ;;  %v16424_v40 = vld [vmem:[%s17427_s12 + $0xc8] sm:$0xff]   ;;  %v16426_v43 = vld [vmem:[%s17427_s12 + $0xd0] sm:$0xff]   ;;  %v16427_v44 = vld [vmem:[%s17427_s12 + $0x118] sm:$0xff]  }
  0x69   : > { %6983 = vmatprep.subr.bf16.mxu0 %v20440_v38  ;;  %v16461_v42 = vld [vmem:[%s20429_s1 + $0x150] sm:$0xff]  }
  0x6c   : > { %6984 = vmatpush1.bf16.msra.mxu0 %v16369_v45  ;;  %v16428_v45 = vld [vmem:[%s17427_s12 + $0xd8] sm:$0xff]  }
  0x6d   : > { %6985 = vmatprep.subr.bf16.mxu0 %v20440_v38 }
  0x70   : > { %6986 = vmatpush1.bf16.msra.mxu0 %v16370_v46  ;;  %v16430_v46 = vld [vmem:[%s17427_s12 + $0x120] sm:$0xff]  }
  0x71   : > { %6987 = vmatprep.subr.bf16.mxu0 %v20440_v38 }
  0x74   : > { %6988 = vmatpush1.bf16.msra.mxu0 %v16371_v47  ;;  %v16431_v47 = vld [vmem:[%s17427_s12 + $0xe0] sm:$0xff]  }
  0x75   : > { %6989 = vmatprep.subr.bf16.mxu0 %v20440_v38 }
  0x78   : > { %6990 = vmatpush1.bf16.msra.mxu0 %v16372_v48  ;;  %v16432_v48 = vld [vmem:[%s17427_s12 + $0x128] sm:$0xff]  }
  0x79   : > { %6991 = vmatprep.subr.bf16.mxu0 %v20440_v38 }
  0x7c   : > { %6992 = vmatpush1.bf16.msra.mxu0 %v16373_v49  ;;  %v16468_v49 = vld [vmem:[%s20429_s1 + $0x158] sm:$0xff]  }
  0x7d   : > { %6993 = vmatprep.subr.bf16.mxu0 %v20440_v38 }
  0x80   : > { %6994 = vmatpush1.bf16.msra.mxu0 %v16374_v50  ;;  %v16433_v50 = vld [vmem:[%s17427_s12 + $0xe8] sm:$0xff]  }
  0x81   : > { %6995 = vmatprep.subr.bf16.mxu0 %v20440_v38 }
  0x84   : > { %6996 = vmatpush1.bf16.msra.mxu0 %v16375_v51  ;;  %v16434_v51 = vld [vmem:[%s17427_s12 + $0x140] sm:$0xff]  }
  0x85   : > { %6997 = vmatprep.subr.bf16.mxu0 %v20440_v38 }
  0x88   : > { %6998 = vmatpush1.bf16.msra.mxu0 %v16376_v52  ;;  %v16435_v52 = vld [vmem:[%s17427_s12 + $0x100] sm:$0xff]  }
  0x89   : > { %6999 = vmatprep.subr.bf16.mxu0 %v20440_v38 }
  0x8c   : > { %7000 = vmatpush1.bf16.msra.mxu0 %v16377_v53  ;;  %v16437_v53 = vld [vmem:[%s17427_s12 + $0x148] sm:$0xff]  }
  0x8d   : > { %7001 = vmatprep.subr.bf16.mxu0 %v20440_v38 }
  0x90   : > { %7002 = vmatpush1.bf16.msra.mxu0 %v16378_v54  ;;  %v16473_v54 = vld [vmem:[%s20429_s1] sm:$0xff]  }
  0x91   : > { %7516 = vmatprep.subr.bf16.mxu0 %v20440_v38  ;;  %6427 = vmatpush1.bf16.msra.mxu1 %v16473_v54  ;;  %v16465_v54 = vld [vmem:[%s17427_s12 + $0x178] sm:$0xff]  }
  0x92   : > { %6428 = vmatprep.subr.bf16.mxu1 %v20440_v38 }
  0x93   : > { %7004 = vmatmul.mubr.bf16.vlgmr.msra.gmra.mrb[0].mxu0 %v16380_v55  ;;  %v16474_v55 = vld [vmem:[%s20429_s1 + $0x8] sm:$0xff]  }
  0x94   : > { %7517 = vmatpush1.bf16.msra.mxu0 %v16381_v56  ;;  %7011 = vmatprep.mubr.bf16.mxu0 %v16382_v57  ;;  %v16438_v56 = vld [vmem:[%s17427_s12 + $0x108] sm:$0xff]   ;;  %v16439_v57 = vld [vmem:[%s17427_s12 + $0x150] sm:$0xff]  }
  0x95   : > { %7518 = vmatprep.subr.bf16.mxu0 %v20440_v38  ;;  %6429 = vmatpush1.bf16.msra.mxu1 %v16474_v55  ;;  %v17063_v55 = vld [vmem:[%s20429_s1 + $0xc0] sm:$0xff]  }
  0x96   : > { %6430 = vmatprep.subr.bf16.mxu1 %v20440_v38 }
  0x98   : > { %7519 = vmatpush1.bf16.msra.mxu0 %v16388_v58  ;;  %v16477_v58 = vld [vmem:[%s20429_s1 + $0x10] sm:$0xff]  }
  0x99   : > { %7520 = vmatprep.subr.bf16.mxu0 %v20440_v38  ;;  %6431 = vmatpush1.bf16.msra.mxu1 %v16477_v58  ;;  %v16530_v58 = vld [vmem:[%s17427_s12 + $0x28] sm:$0xff]  }
  0x9a   : > { %6432 = vmatprep.subr.bf16.mxu1 %v20440_v38 }
  0x9b   : > { %7012 = vmatmul.mubr.bf16.gmra.mrb[4].mxu0 %v16383_v59  ;;  %v16478_v59 = vld [vmem:[%s20429_s1 + $0x18] sm:$0xff]  }
  0x9c   : > { %7019 = vmatprep.mubr.bf16.mxu0 %v16384_v60  ;;  %7521 = vmatpush1.bf16.msra.mxu0 %v16397_v61  ;;  %v16440_v60 = vld [vmem:[%s17427_s12 + $0x110] sm:$0xff]   ;;  %v16441_v61 = vld [vmem:[%s17427_s12 + $0x158] sm:$0xff]  }
  0x9d   : > { %7522 = vmatprep.subr.bf16.mxu0 %v20440_v38  ;;  %6433 = vmatpush1.bf16.msra.mxu1 %v16478_v59  ;;  %v16532_v59 = vld [vmem:[%s17427_s12 + $0x38] sm:$0xff]  }
  0x9e   : > { %6434 = vmatprep.subr.bf16.mxu1 %v20440_v38 }
  0xa0   : > { %7523 = vmatpush1.bf16.msra.mxu0 %v16404_v62  ;;  %v16481_v62 = vld [vmem:[%s20429_s1 + $0x160] sm:$0xff]  }
  0xa1   : > { %7524 = vmatprep.subr.bf16.mxu0 %v20440_v38 }
  0xa3   : > { %7020 = vmatmul.mubr.bf16.gmra.mrb[8].mxu0 %v16385_v63  ;;  %v16482_v63 = vld [vmem:[%s20429_s1 + $0x20] sm:$0xff]  }
  0xa4   : > { %7027 = vmatprep.mubr.bf16.mxu0 %v16386_v0  ;;  %7525 = vmatpush1.bf16.msra.mxu0 %v16413_v1  ;;  %v16483_v0 = vld [vmem:[%s20429_s1 + $0x28] sm:$0xff]   ;;  %v16442_v1 = vld [vmem:[%s17427_s12 + $0x118] sm:$0xff]  }
  0xa5   : > { %7526 = vmatprep.subr.bf16.mxu0 %v20440_v38  ;;  %6435 = vmatpush1.bf16.msra.mxu1 %v16482_v63  ;;  %v17066_v63 = vld [vmem:[%s20429_s1 + $0xd8] sm:$0xff]  }
  0xa6   : > { %6436 = vmatprep.subr.bf16.mxu1 %v20440_v38 }
  0xa8   : > { %7527 = vmatpush1.bf16.msra.mxu0 %v16420_v2  ;;  %v16443_v2 = vld [vmem:[%s17427_s12 + $0x160] sm:$0xff]  }
  0xa9   : > { %7528 = vmatprep.subr.bf16.mxu0 %v20440_v38  ;;  %6437 = vmatpush1.bf16.msra.mxu1 %v16483_v0  ;;  %v16534_v0 = vld [vmem:[%s17427_s12 + $0x30] sm:$0xff]  }
  0xaa   : > { %6438 = vmatprep.subr.bf16.mxu1 %v20440_v38 }
  0xab   : > { %7028 = vmatmul.mubr.bf16.gmra.mrb[12].mxu0 %v16387_v3  ;;  %v16486_v3 = vld [vmem:[%s20429_s1 + $0x30] sm:$0xff]  }
  0xac   : > { %7035 = vmatprep.mubr.bf16.mxu0 %v16389_v4  ;;  %7529 = vmatpush1.bf16.msra.mxu0 %v16429_v9  ;;  %v16487_v4 = vld [vmem:[%s20429_s1 + $0x38] sm:$0xff]   ;;  %v16447_v9 = vld [vmem:[%s17427_s12 + $0x128] sm:$0xff]  }
  0xad   : > { %7530 = vmatprep.subr.bf16.mxu0 %v20440_v38  ;;  %6439 = vmatpush1.bf16.msra.mxu1 %v16486_v3  ;;  %v17067_v3 = vld [vmem:[%s20429_s1 + $0xe0] sm:$0xff]  }
  0xae   : > { %6440 = vmatprep.subr.bf16.mxu1 %v20440_v38 }
  0xb0   : > { %7531 = vmatpush1.bf16.msra.mxu0 %v16436_v16  ;;  %v16499_v16 = vld [vmem:[%s20429_s1 + $0x60] sm:$0xff]  }
  0xb1   : > { %7532 = vmatprep.subr.bf16.mxu0 %v20440_v38  ;;  %6441 = vmatpush1.bf16.msra.mxu1 %v16487_v4  ;;  %v16471_v4 = vld [vmem:[%s17427_s12 + $0x1e0] sm:$0xff]  }
  0xb2   : > { %6442 = vmatprep.subr.bf16.mxu1 %v20440_v38 }
  0xb3   : > { %7036 = vmatmul.mubr.bf16.gmra.mrb[16].mxu0 %v16390_v5  ;;  %v16444_v5 = vld [vmem:[%s17427_s12 + $0x120] sm:$0xff]  }
  0xb4   : > { %7043 = vmatprep.mubr.bf16.mxu0 %v16391_v6  ;;  %7533 = vmatpush1.bf16.msra.mxu0 %v16445_v25  ;;  %v16446_v6 = vld [vmem:[%s17427_s12 + $0x168] sm:$0xff]   ;;  %v16508_v25 = vld [vmem:[%s17427_s12] sm:$0xff]  }
  0xb5   : > { %7534 = vmatprep.subr.bf16.mxu0 %v20440_v38 }
  0xb8   : > { %7535 = vmatpush1.bf16.msra.mxu0 %v16452_v32  ;;  %v16513_v32 = vld [vmem:[%s20429_s1 + $0x170] sm:$0xff]  }
  0xb9   : > { %7536 = vmatprep.subr.bf16.mxu0 %v20440_v38 }
  0xbb   : > { %7044 = vmatmul.mubr.bf16.gmra.mrb[20].mxu0 %v16392_v7  ;;  %v16490_v7 = vld [vmem:[%s20429_s1 + $0x40] sm:$0xff]  }
  0xbc   : > { %7051 = vmatprep.mubr.bf16.mxu0 %v16393_v8  ;;  %7537 = vmatpush1.bf16.msra.mxu0 %v16461_v42  ;;  %v16491_v8 = vld [vmem:[%s20429_s1 + $0x48] sm:$0xff]   ;;  %v17059_v42 = vld [vmem:[%s20429_s1 + $0xa0] sm:$0xff]  }
  0xbd   : > { %7538 = vmatprep.subr.bf16.mxu0 %v20440_v38  ;;  %6443 = vmatpush1.bf16.msra.mxu1 %v16490_v7  ;;  %v16540_v7 = vld [vmem:[%s17427_s12 + $0x58] sm:$0xff]  }
  0xbe   : > { %6444 = vmatprep.subr.bf16.mxu1 %v20440_v38 }
  0xc0   : > { %7539 = vmatpush1.bf16.msra.mxu0 %v16468_v49  ;;  %v16464_v49 = vld [vmem:[%s17427_s12 + $0x1b8] sm:$0xff]  }
  0xc1   : > { %7540 = vmatprep.subr.bf16.mxu0 %v20440_v38  ;;  %6445 = vmatpush1.bf16.msra.mxu1 %v16491_v8  ;;  %v16472_v8 = vld [vmem:[%s17427_s12 + $0x1a0] sm:$0xff]  }
  0xc2   : > { %6446 = vmatprep.subr.bf16.mxu1 %v20440_v38 }
  0xc3   : > { %7052 = vmatmul.mubr.bf16.gmra.mrb[24].mxu0 %v16394_v10  ;;  %v16448_v10 = vld [vmem:[%s17427_s12 + $0x170] sm:$0xff]  }
  0xc4   : > { %7059 = vmatprep.mubr.bf16.mxu0 %v16395_v11  ;;  %7541 = vmatpush1.bf16.msra.mxu0 %v16481_v62  ;;  %v16494_v11 = vld [vmem:[%s20429_s1 + $0x50] sm:$0xff]  }
  0xc5   : > { %7542 = vmatprep.subr.bf16.mxu0 %v20440_v38  ;;  %6447 = vmatpush1.bf16.msra.mxu1 %v16494_v11  ;;  %v16469_v62 = vld [vmem:[%s17427_s12 + $0x1c8] sm:$0xff]   ;;  %v17070_v11 = vld [vmem:[%s20429_s1 + $0xf8] sm:$0xff]  }
  0xc6   : > { %6448 = vmatprep.subr.bf16.mxu1 %v20440_v38 }
  0xcb   : > { %7060 = vmatmul.mubr.bf16.gmra.mrb[28].mxu0 %v16396_v12  ;;  %v16495_v12 = vld [vmem:[%s20429_s1 + $0x168] sm:$0xff]  }
  0xcc   : > { %7067 = vmatprep.mubr.bf16.mxu0 %v16398_v13  ;;  %v16496_v13 = vld [vmem:[%s20429_s1 + $0x58] sm:$0xff]   ;;  %7543 = vmatpush1.bf16.msra.mxu0 %v16495_v12 }
  0xcd   : > { %7544 = vmatprep.subr.bf16.mxu0 %v20440_v38  ;;  %6449 = vmatpush1.bf16.msra.mxu1 %v16496_v13  ;;  %v16542_v12 = vld [vmem:[%s17427_s12 + $0x50] sm:$0xff]   ;;  %v16545_v13 = vld [vmem:[%s17427_s12 + $0x60] sm:$0xff]  }
  0xce   : > { %6450 = vmatprep.subr.bf16.mxu1 %v20440_v38 }
  0xd0   : > { %7545 = vmatpush1.bf16.msra.mxu0 %v16513_v32  ;;  %v16564_v32 = vld [vmem:[%s17427_s12 + $0x78] sm:$0xff]  }
  0xd1   : > { %6451 = vmatpush1.bf16.msra.mxu1 %v16499_v16  ;;  %7546 = vmatprep.subr.bf16.mxu0 %v20440_v38  ;;  %v16547_v16 = vld [vmem:[%s17427_s12 + $0x58] sm:$0xff]  }
  0xd2   : > { %6452 = vmatprep.subr.bf16.mxu1 %v20440_v38 }
  0xd3   : > { %7068 = vmatmul.mubr.bf16.gmra.mrb[32].mxu0 %v16399_v14  ;;  %v16449_v14 = vld [vmem:[%s17427_s12 + $0x130] sm:$0xff]  }
  0xd4   : > { %7075 = vmatprep.mubr.bf16.mxu0 %v16400_v15  ;;  %v16450_v15 = vld [vmem:[%s17427_s12 + $0x178] sm:$0xff]  }
  0xdb   : > { %7076 = vmatmul.mubr.bf16.gmra.mrb[36].mxu0 %v16401_v17  ;;  %v16500_v17 = vld [vmem:[%s20429_s1 + $0x68] sm:$0xff]  }
  0xdc   : > { %7083 = vmatprep.mubr.bf16.mxu0 %v16402_v18  ;;  %v16451_v18 = vld [vmem:[%s17427_s12 + $0x138] sm:$0xff]   ;;  %6453 = vmatpush1.bf16.msra.mxu1 %v16500_v17  ;;  %v16549_v17 = vld [vmem:[%s17427_s12 + $0x68] sm:$0xff]  }
  0xdd   : > { %6454 = vmatprep.subr.bf16.mxu1 %v20440_v38 }
  0xe3   : > { %7084 = vmatmul.mubr.bf16.gmra.mrb[40].mxu0 %v16403_v19  ;;  %v16453_v19 = vld [vmem:[%s17427_s12 + $0x190] sm:$0xff]  }
  0xe4   : > { %7091 = vmatprep.mubr.bf16.mxu0 %v16405_v20  ;;  %v16503_v20 = vld [vmem:[%s20429_s1 + $0x70] sm:$0xff]  }
  0xe5   : > { %6455 = vmatpush1.bf16.msra.mxu1 %v16503_v20  ;;  %v16551_v20 = vld [vmem:[%s17427_s12 + $0x60] sm:$0xff]  }
  0xe6   : > { %6456 = vmatprep.subr.bf16.mxu1 %v20440_v38 }
  0xeb   : > { %7092 = vmatmul.mubr.bf16.gmra.mrb[44].mxu0 %v16406_v21  ;;  %v16504_v21 = vld [vmem:[%s20429_s1 + $0x78] sm:$0xff]  }
  0xec   : > { %7099 = vmatprep.mubr.bf16.mxu0 %v16407_v22  ;;  %v16506_v22 = vld [vmem:[%s17427_s12 + $0x8] sm:$0xff]   ;;  %6457 = vmatpush1.bf16.msra.mxu1 %v16504_v21  ;;  %v16553_v21 = vld [vmem:[%s17427_s12 + $0x70] sm:$0xff]  }
  0xed   : > { %6458 = vmatprep.mubr.bf16.mxu1 %v16506_v22  ;;  %15398 = vmatprep.subr.bf16.mxu1 %v20440_v38  ;;  %v16485_v22 = vld [vmem:[%s17427_s12 + $0x1b8] sm:$0xff]  }
  0xef   : > { %6459 = vmatmul.mubr.bf16.vlgmr.msra.gmra.mrb[0].mxu1 %v16508_v25  ;;  %v16557_v25 = vld [vmem:[%s17427_s12 + $0x78] sm:$0xff]  }
  0xf3   : > { %7100 = vmatmul.mubr.bf16.gmra.mrb[48].mxu0 %v16408_v23  ;;  %v16454_v23 = vld [vmem:[%s17427_s12 + $0x150] sm:$0xff]  }
  0xf4   : > { %7107 = vmatprep.mubr.bf16.mxu0 %v16409_v24  ;;  %v16455_v24 = vld [vmem:[%s17427_s12 + $0x198] sm:$0xff]  }
  0xfb   : > { %7108 = vmatmul.mubr.bf16.gmra.mrb[52].mxu0 %v16410_v26  ;;  %v16510_v26 = vld [vmem:[%s17427_s12 + $0x10] sm:$0xff]  }
  0xfc   : > { %7115 = vmatprep.mubr.bf16.mxu0 %v16411_v27  ;;  %v16456_v27 = vld [vmem:[%s17427_s12 + $0x158] sm:$0xff]   ;;  %6466 = vmatprep.mubr.bf16.mxu1 %v16510_v26  ;;  %v16489_v26 = vld [vmem:[%s17427_s12 + $0x1c0] sm:$0xff]  }
 0x103   : > { %7116 = vmatmul.mubr.bf16.gmra.mrb[56].mxu0 %v16412_v28  ;;  %v17055_v28 = vld [vmem:[%s20429_s1 + $0x80] sm:$0xff]  }
 0x104   : > { %7123 = vmatprep.mubr.bf16.mxu0 %v16414_v29  ;;  %15414 = vmatpush1.bf16.msra.mxu1 %v17055_v28  ;;  %v16457_v29 = vld [vmem:[%s17427_s12 + $0x1a0] sm:$0xff]   ;;  %v16559_v28 = vld [vmem:[%s17427_s12 + $0x70] sm:$0xff]  }
 0x105   : > { %15399 = vmatprep.subr.bf16.mxu1 %v20440_v38 }
 0x10b   : > { %7124 = vmatmul.mubr.bf16.gmra.mrb[60].mxu0 %v16415_v30  ;;  %v17056_v30 = vld [vmem:[%s20429_s1 + $0x88] sm:$0xff]  }
 0x10c   : > { %7131 = vmatprep.mubr.bf16.mxu0 %v16416_v31  ;;  %15415 = vmatpush1.bf16.msra.mxu1 %v17056_v30  ;;  %v16512_v31 = vld [vmem:[%s17427_s12 + $0x8] sm:$0xff]  }
 0x10d   : > { %15400 = vmatprep.subr.bf16.mxu1 %v20440_v38  ;;  %6467 = vmatmul.mubr.bf16.gmra.mrb[4].mxu1 %v16512_v31  ;;  %v16493_v30 = vld [vmem:[%s17427_s12 + $0x1c8] sm:$0xff]   ;;  %v16497_v31 = vld [vmem:[%s17427_s12 + $0x210] sm:$0xff]  }
 0x113   : > { %7132 = vmatmul.mubr.bf16.gmra.mrb[64].mxu0 %v16417_v33  ;;  %v16515_v33 = vld [vmem:[%s17427_s12 + $0x18] sm:$0xff]  }
 0x114   : > { %7139 = vmatprep.mubr.bf16.mxu0 %v16418_v34  ;;  %v16458_v34 = vld [vmem:[%s17427_s12 + $0x160] sm:$0xff]   ;;  %6474 = vmatprep.mubr.bf16.mxu1 %v16515_v33  ;;  %v16566_v33 = vld [vmem:[%s17427_s12 + $0x88] sm:$0xff]  }
 0x11b   : > { %7140 = vmatmul.mubr.bf16.gmra.mrb[68].mxu0 %v16419_v35  ;;  %v17057_v35 = vld [vmem:[%s20429_s1 + $0x90] sm:$0xff]  }
 0x11c   : > { %7147 = vmatprep.mubr.bf16.mxu0 %v16421_v36  ;;  %15416 = vmatpush1.bf16.msra.mxu1 %v17057_v35  ;;  %v16459_v36 = vld [vmem:[%s17427_s12 + $0x1a8] sm:$0xff]   ;;  %v16501_v35 = vld [vmem:[%s17427_s12 + $0x218] sm:$0xff]  }
 0x11d   : > { %15401 = vmatprep.subr.bf16.mxu1 %v20440_v38 }
 0x123   : > { %7148 = vmatmul.mubr.bf16.gmra.mrb[72].mxu0 %v16422_v37  ;;  %v17058_v37 = vld [vmem:[%s20429_s1 + $0x98] sm:$0xff]  }
 0x124   : > { %7155 = vmatprep.mubr.bf16.mxu0 %v16423_v39  ;;  %15417 = vmatpush1.bf16.msra.mxu1 %v17058_v37  ;;  %v16517_v39 = vld [vmem:[%s17427_s12 + $0x10] sm:$0xff]  }
 0x125   : > { %15402 = vmatprep.subr.bf16.mxu1 %v20440_v38  ;;  %6475 = vmatmul.mubr.bf16.gmra.mrb[8].mxu1 %v16517_v39  ;;  %v16570_v37 = vld [vmem:[%s17427_s12 + $0x90] sm:$0xff]   ;;  %v16502_v39 = vld [vmem:[%s17427_s12 + $0x1d8] sm:$0xff]  }
 0x128   : > { %15418 = vmatpush1.bf16.msra.mxu1 %v17059_v42  ;;  %v16574_v42 = vld [vmem:[%s17427_s12 + $0xa8] sm:$0xff]  }
 0x129   : > { %15403 = vmatprep.subr.bf16.mxu1 %v20440_v38 }
 0x12b   : > { %7156 = vmatmul.mubr.bf16.gmra.mrb[76].mxu0 %v16424_v40  ;;  %v16519_v40 = vld [vmem:[%s17427_s12 + $0x20] sm:$0xff]  }
 0x12c   : > { %7163 = vmatprep.mubr.bf16.mxu0 %v16425_v41  ;;  %v16460_v41 = vld [vmem:[%s17427_s12 + $0x168] sm:$0xff]   ;;  %6482 = vmatprep.mubr.bf16.mxu1 %v16519_v40  ;;  %v16505_v40 = vld [vmem:[%s17427_s12 + $0x230] sm:$0xff]  }
 0x133   : > { %7164 = vmatmul.mubr.bf16.gmra.mrb[80].mxu0 %v16426_v43  ;;  %v16462_v43 = vld [vmem:[%s17427_s12 + $0x1b0] sm:$0xff]  }
 0x134   : > { %7171 = vmatprep.mubr.bf16.mxu0 %v16427_v44  ;;  %v17060_v44 = vld [vmem:[%s20429_s1 + $0xa8] sm:$0xff]  }
 0x135   : > { %15419 = vmatpush1.bf16.msra.mxu1 %v17060_v44  ;;  %v16509_v44 = vld [vmem:[%s17427_s12 + $0x238] sm:$0xff]  }
 0x136   : > { %15404 = vmatprep.subr.bf16.mxu1 %v20440_v38 }
 0x13b   : > { %7172 = vmatmul.mubr.bf16.gmra.mrb[84].mxu0 %v16428_v45  ;;  %v16521_v45 = vld [vmem:[%s17427_s12 + $0x18] sm:$0xff]  }
 0x13c   : > { %7179 = vmatprep.mubr.bf16.mxu0 %v16430_v46  ;;  %6483 = vmatmul.mubr.bf16.gmra.mrb[12].mxu1 %v16521_v45  ;;  %v16523_v46 = vld [vmem:[%s17427_s12 + $0x28] sm:$0xff]   ;;  %v16576_v45 = vld [vmem:[%s17427_s12 + $0xa0] sm:$0xff]  }
 0x13d   : > { %6490 = vmatprep.mubr.bf16.mxu1 %v16523_v46  ;;  %v16579_v46 = vld [vmem:[%s17427_s12 + $0xb0] sm:$0xff]  }
 0x143   : > { %7180 = vmatmul.mubr.bf16.gmra.mrb[88].mxu0 %v16431_v47  ;;  %v16463_v47 = vld [vmem:[%s17427_s12 + $0x170] sm:$0xff]  }
 0x144   : > { %7187 = vmatprep.mubr.bf16.mxu0 %v16432_v48  ;;  %v17061_v48 = vld [vmem:[%s20429_s1 + $0xb0] sm:$0xff]  }
 0x145   : > { %15420 = vmatpush1.bf16.msra.mxu1 %v17061_v48  ;;  %v16514_v48 = vld [vmem:[%s17427_s12 + $0x240] sm:$0xff]  }
 0x146   : > { %15405 = vmatprep.subr.bf16.mxu1 %v20440_v38 }
 0x14b   : > { %7188 = vmatmul.mubr.bf16.gmra.mrb[92].mxu0 %v16433_v50  ;;  %v17062_v50 = vld [vmem:[%s20429_s1 + $0xb8] sm:$0xff]  }
 0x14c   : > { %7195 = vmatprep.mubr.bf16.mxu0 %v16434_v51  ;;  %15421 = vmatpush1.bf16.msra.mxu1 %v17062_v50  ;;  %v16525_v51 = vld [vmem:[%s17427_s12 + $0x20] sm:$0xff]   ;;  %v16583_v50 = vld [vmem:[%s17427_s12 + $0xb8] sm:$0xff]  }
 0x14d   : > { %15406 = vmatprep.subr.bf16.mxu1 %v20440_v38  ;;  %6491 = vmatmul.mubr.bf16.gmra.mrb[16].mxu1 %v16525_v51  ;;  %v16516_v51 = vld [vmem:[%s17427_s12 + $0x200] sm:$0xff]  }
 0x150   : > { %15422 = vmatpush1.bf16.msra.mxu1 %v17063_v55  ;;  %v16520_v55 = vld [vmem:[%s17427_s12 + $0x208] sm:$0xff]  }
 0x151   : > { %15407 = vmatprep.subr.bf16.mxu1 %v20440_v38 }
 0x153   : > { %7196 = vmatmul.mubr.bf16.gmra.mrb[96].mxu0 %v16435_v52  ;;  %v16526_v52 = vld [vmem:[%s20429_s1 + $0x178] sm:$0xff]  }
 0x154   : > { %7203 = vmatprep.mubr.bf16.mxu0 %v16437_v53  ;;  %v16528_v53 = vld [vmem:[%s17427_s12 + $0x30] sm:$0xff]   ;;  %7547 = vmatpush1.bf16.msra.mxu0 %v16526_v52  ;;  %v16518_v52 = vld [vmem:[%s17427_s12 + $0x248] sm:$0xff]  }
 0x155   : > { %6498 = vmatprep.mubr.bf16.mxu1 %v16528_v53  ;;  %8061 = vmatprep.subr.bf16.mxu0 %v20440_v38  ;;  %v16585_v53 = vld [vmem:[%s17427_s12 + $0xb0] sm:$0xff]  }
 0x156   : > { %6499 = vmatmul.mubr.bf16.gmra.mrb[20].mxu1 %v16530_v58  ;;  %v16591_v58 = vld [vmem:[%s17427_s12 + $0xc8] sm:$0xff]  }
 0x157   : > { %6506 = vmatprep.mubr.bf16.mxu1 %v16532_v59  ;;  %v16524_v59 = vld [vmem:[%s17427_s12 + $0x210] sm:$0xff]  }
 0x15b   : > { %7204 = vmatmul.mubr.bf16.gmra.mrb[100].mxu0 %v16438_v56  ;;  %v16466_v56 = vld [vmem:[%s17427_s12 + $0x1c0] sm:$0xff]  }
 0x15c   : > { %7211 = vmatprep.mubr.bf16.mxu0 %v16439_v57  ;;  %v17064_v57 = vld [vmem:[%s20429_s1 + $0xc8] sm:$0xff]  }
 0x15d   : > { %15423 = vmatpush1.bf16.msra.mxu1 %v17064_v57  ;;  %v16589_v57 = vld [vmem:[%s17427_s12 + $0xb8] sm:$0xff]  }
 0x15e   : > { %15408 = vmatprep.subr.bf16.mxu1 %v20440_v38  ;;  %6507 = vmatmul.mubr.bf16.gmra.mrb[24].mxu1 %v16534_v0  ;;  %v16531_v0 = vld [vmem:[%s17427_s12 + $0x260] sm:$0xff]  }
 0x163   : > { %7212 = vmatmul.mubr.bf16.gmra.mrb[104].mxu0 %v16440_v60  ;;  %v16467_v60 = vld [vmem:[%s17427_s12 + $0x180] sm:$0xff]  }
 0x164   : > { %7219 = vmatprep.mubr.bf16.mxu0 %v16441_v61  ;;  %v17065_v61 = vld [vmem:[%s20429_s1 + $0xd0] sm:$0xff]  }
 0x165   : > { %15424 = vmatpush1.bf16.msra.mxu1 %v17065_v61  ;;  %v16593_v61 = vld [vmem:[%s17427_s12 + $0xc0] sm:$0xff]  }
 0x166   : > { %15409 = vmatprep.subr.bf16.mxu1 %v20440_v38 }
 0x169   : > { %15425 = vmatpush1.bf16.msra.mxu1 %v17066_v63  ;;  %v16529_v63 = vld [vmem:[%s17427_s12 + $0x218] sm:$0xff]  }
 0x16a   : > { %15410 = vmatprep.subr.bf16.mxu1 %v20440_v38 }
 0x16b   : > { %7220 = vmatmul.mubr.bf16.gmra.mrb[108].mxu0 %v16442_v1  ;;  %v16536_v1 = vld [vmem:[%s17427_s12 + $0x40] sm:$0xff]  }
 0x16c   : > { %7227 = vmatprep.mubr.bf16.mxu0 %v16443_v2  ;;  %v16470_v2 = vld [vmem:[%s17427_s12 + $0x188] sm:$0xff]   ;;  %6514 = vmatprep.mubr.bf16.mxu1 %v16536_v1 }
 0x16d   : > { %15426 = vmatpush1.bf16.msra.mxu1 %v17067_v3  ;;  %v16598_v1 = vld [vmem:[%s17427_s12 + $0xc8] sm:$0xff]   ;;  %v16533_v3 = vld [vmem:[%s17427_s12 + $0x220] sm:$0xff]  }
 0x16e   : > { %15411 = vmatprep.subr.bf16.mxu1 %v20440_v38 }
 0x173   : > { %7228 = vmatmul.mubr.bf16.gmra.mrb[112].mxu0 %v16444_v5  ;;  %v17068_v5 = vld [vmem:[%s20429_s1 + $0xe8] sm:$0xff]  }
 0x174   : > { %7235 = vmatprep.mubr.bf16.mxu0 %v16446_v6  ;;  %15427 = vmatpush1.bf16.msra.mxu1 %v17068_v5  ;;  %v16538_v6 = vld [vmem:[%s17427_s12 + $0x38] sm:$0xff]   ;;  %v16602_v5 = vld [vmem:[%s17427_s12 + $0xd0] sm:$0xff]  }
 0x175   : > { %15412 = vmatprep.subr.bf16.mxu1 %v20440_v38  ;;  %6515 = vmatmul.mubr.bf16.gmra.mrb[28].mxu1 %v16538_v6  ;;  %v16604_v6 = vld [vmem:[%s17427_s12 + $0xe0] sm:$0xff]  }
 0x176   : > { %6522 = vmatprep.mubr.bf16.mxu1 %v16540_v7  ;;  %v16537_v7 = vld [vmem:[%s17427_s12 + $0x228] sm:$0xff]  }
 0x17b   : > { %7236 = vmatmul.mubr.bf16.gmra.mrb[116].mxu0 %v16447_v9  ;;  %v17069_v9 = vld [vmem:[%s20429_s1 + $0xf0] sm:$0xff]  }
 0x17c   : > { %7243 = vmatprep.mubr.bf16.mxu0 %v16448_v10  ;;  %15428 = vmatpush1.bf16.msra.mxu1 %v17069_v9  ;;  %v16475_v10 = vld [vmem:[%s17427_s12 + $0x1e8] sm:$0xff]   ;;  %v16606_v9 = vld [vmem:[%s17427_s12 + $0xd8] sm:$0xff]  }
 0x17d   : > { %15413 = vmatprep.subr.bf16.mxu1 %v20440_v38  ;;  %6523 = vmatmul.mubr.bf16.gmra.mrb[32].mxu1 %v16542_v12  ;;  %v16543_v12 = vld [vmem:[%s20429_s1 + $0x180] sm:$0xff]  }
 0x17e   : > { %6530 = vmatprep.mubr.bf16.mxu1 %v16545_v13  ;;  %v16544_v13 = vld [vmem:[%s17427_s12 + $0x68] sm:$0xff]  }
 0x180   : > { %15429 = vmatpush1.bf16.msra.mxu1 %v17070_v11  ;;  %v16541_v11 = vld [vmem:[%s17427_s12 + $0x58] sm:$0xff]  }
 0x183   : > { %7244 = vmatmul.mubr.bf16.gmra.mrb[120].mxu0 %v16449_v14  ;;  %v16476_v14 = vld [vmem:[%s17427_s12 + $0x1a8] sm:$0xff]  }
 0x184   : > { %7251 = vmatprep.mubr.bf16.mxu0 %v16450_v15  ;;  %v16479_v15 = vld [vmem:[%s17427_s12 + $0x1f0] sm:$0xff]  }
 0x185   : > { %6531 = vmatmul.mubr.bf16.gmra.mrb[36].mxu1 %v16547_v16  ;;  %v16613_v16 = vld [vmem:[%s17427_s12 + $0x100] sm:$0xff]  }
 0x186   : > { %6538 = vmatprep.mubr.bf16.mxu1 %v16549_v17  ;;  %v16546_v17 = vld [vmem:[%s17427_s12 + $0x60] sm:$0xff]  }
 0x18b   : > { %7252 = vmatmul.mubr.bf16.gmra.mrb[124].mxu0 %v16451_v18  ;;  %v16480_v18 = vld [vmem:[%s17427_s12 + $0x1b0] sm:$0xff]  }
 0x18c   : > { %7259 = vmatprep.mubr.bf16.mxu0 %v16453_v19  ;;  %v16484_v19 = vld [vmem:[%s17427_s12 + $0x1f8] sm:$0xff]  }
 0x18d   : > { %6539 = vmatmul.mubr.bf16.gmra.mrb[40].mxu1 %v16551_v20  ;;  %v16615_v20 = vld [vmem:[%s17427_s12 + $0xf8] sm:$0xff]  }
 0x18e   : > { %6546 = vmatprep.mubr.bf16.mxu1 %v16553_v21  ;;  %v16594_v21 = vld [vmem:[%s20429_s1 + $0x198] sm:$0xff]  }
 0x193   : > { %7260 = vmatmul.mubr.bf16.gmra.mrb[128].mxu0 %v16454_v23  ;;  %v16488_v23 = vld [vmem:[%s17427_s12 + $0x200] sm:$0xff]  }
 0x194   : > { %7267 = vmatprep.mubr.bf16.mxu0 %v16455_v24  ;;  %v16555_v24 = vld [vmem:[%s17427_s12 + $0x68] sm:$0xff]  }
 0x195   : > { %6547 = vmatmul.mubr.bf16.gmra.mrb[44].mxu1 %v16555_v24  ;;  %v16552_v24 = vld [vmem:[%s17427_s12 + $0x78] sm:$0xff]  }
 0x196   : > { %6554 = vmatprep.mubr.bf16.mxu1 %v16557_v25  ;;  %v16611_v25 = vld [vmem:[%s20429_s1 + $0x1a0] sm:$0xff]  }
 0x19b   : > { %7268 = vmatmul.mubr.bf16.gmra.mrb[132].mxu0 %v16456_v27  ;;  %v16492_v27 = vld [vmem:[%s17427_s12 + $0x208] sm:$0xff]  }
 0x19c   : > { %7275 = vmatprep.mubr.bf16.mxu0 %v16457_v29  ;;  %v16562_v29 = vld [vmem:[%s17427_s12 + $0x80] sm:$0xff]  }
 0x19d   : > { %6555 = vmatmul.mubr.bf16.gmra.mrb[48].mxu1 %v16559_v28  ;;  %v16554_v28 = vld [vmem:[%s17427_s12 + $0x70] sm:$0xff]  }
 0x19e   : > { %6562 = vmatprep.mubr.bf16.mxu1 %v16562_v29  ;;  %v16556_v29 = vld [vmem:[%s17427_s12 + $0x80] sm:$0xff]  }
 0x1a3   : > { %7276 = vmatmul.mubr.bf16.gmra.mrb[136].mxu0 %v16458_v34  ;;  %v16498_v34 = vld [vmem:[%s17427_s12 + $0x1d0] sm:$0xff]  }
 0x1a4   : > { %7283 = vmatprep.mubr.bf16.mxu0 %v16459_v36  ;;  %v16568_v36 = vld [vmem:[%s17427_s12 + $0x80] sm:$0xff]  }
 0x1a5   : > { %6563 = vmatmul.mubr.bf16.gmra.mrb[52].mxu1 %v16564_v32  ;;  %v16558_v32 = vld [vmem:[%s17427_s12 + $0x78] sm:$0xff]  }
 0x1a6   : > { %6570 = vmatprep.mubr.bf16.mxu1 %v16566_v33  ;;  %v16561_v33 = vld [vmem:[%s17427_s12 + $0x88] sm:$0xff]  }
 0x1ab   : > { %7284 = vmatmul.mubr.bf16.gmra.mrb[140].mxu0 %v16460_v41  ;;  %v16572_v41 = vld [vmem:[%s17427_s12 + $0x88] sm:$0xff]  }
 0x1ac   : > { %7291 = vmatprep.mubr.bf16.mxu0 %v16462_v43  ;;  %v16507_v43 = vld [vmem:[%s17427_s12 + $0x1f0] sm:$0xff]  }
 0x1ad   : > { %6571 = vmatmul.mubr.bf16.gmra.mrb[56].mxu1 %v16568_v36  ;;  %v16630_v36 = vld [vmem:[%s17427_s12 + $0x120] sm:$0xff]  }
 0x1ae   : > { %6578 = vmatprep.mubr.bf16.mxu1 %v16570_v37  ;;  %v16563_v37 = vld [vmem:[%s17427_s12 + $0x80] sm:$0xff]  }
 0x1b3   : > { %7292 = vmatmul.mubr.bf16.gmra.mrb[144].mxu0 %v16463_v47  ;;  %v16511_v47 = vld [vmem:[%s17427_s12 + $0x1f8] sm:$0xff]  }
 0x1b4   : > { %7299 = vmatprep.mubr.bf16.mxu0 %v16464_v49  ;;  %v16581_v49 = vld [vmem:[%s17427_s12 + $0xa8] sm:$0xff]  }
 0x1b5   : > { %6579 = vmatmul.mubr.bf16.gmra.mrb[60].mxu1 %v16572_v41  ;;  %v16634_v41 = vld [vmem:[%s17427_s12 + $0x128] sm:$0xff]  }
 0x1b6   : > { %6586 = vmatprep.mubr.bf16.mxu1 %v16574_v42  ;;  %v16567_v42 = vld [vmem:[%s17427_s12 + $0x88] sm:$0xff]  }
 0x1bb   : > { %7300 = vmatmul.mubr.bf16.gmra.mrb[148].mxu0 %v16465_v54  ;;  %v16587_v54 = vld [vmem:[%s17427_s12 + $0xc0] sm:$0xff]  }
 0x1bc   : > { %7307 = vmatprep.mubr.bf16.mxu0 %v16466_v56  ;;  %v16522_v56 = vld [vmem:[%s17427_s12 + $0x250] sm:$0xff]  }
 0x1bd   : > { %6587 = vmatmul.mubr.bf16.gmra.mrb[64].mxu1 %v16576_v45  ;;  %v16638_v45 = vld [vmem:[%s17427_s12 + $0x130] sm:$0xff]  }
 0x1be   : > { %6594 = vmatprep.mubr.bf16.mxu1 %v16579_v46  ;;  %v16571_v46 = vld [vmem:[%s17427_s12 + $0x90] sm:$0xff]  }
 0x1c3   : > { %7308 = vmatmul.mubr.bf16.gmra.mrb[152].mxu0 %v16467_v60  ;;  %v16527_v60 = vld [vmem:[%s17427_s12 + $0x258] sm:$0xff]  }
 0x1c4   : > { %7315 = vmatprep.mubr.bf16.mxu0 %v16469_v62  ;;  %v16596_v62 = vld [vmem:[%s17427_s12 + $0xd0] sm:$0xff]  }
 0x1c5   : > { %6595 = vmatmul.mubr.bf16.gmra.mrb[68].mxu1 %v16581_v49  ;;  %v16642_v49 = vld [vmem:[%s17427_s12 + $0x148] sm:$0xff]  }
 0x1c6   : > { %6602 = vmatprep.mubr.bf16.mxu1 %v16583_v50  ;;  %v16575_v50 = vld [vmem:[%s17427_s12 + $0xa8] sm:$0xff]  }
 0x1cb   : > { %7316 = vmatmul.mubr.bf16.gmra.mrb[156].mxu0 %v16470_v2  ;;  %v16600_v2 = vld [vmem:[%s17427_s12 + $0xd8] sm:$0xff]  }
 0x1cc   : > { %7323 = vmatprep.mubr.bf16.mxu0 %v16471_v4  ;;  %v16535_v4 = vld [vmem:[%s17427_s12 + $0x268] sm:$0xff]  }
 0x1cd   : > { %6603 = vmatmul.mubr.bf16.gmra.mrb[72].mxu1 %v16585_v53  ;;  %v16645_v53 = vld [vmem:[%s20429_s1 + $0x1b0] sm:$0xff]  }
 0x1ce   : > { %6610 = vmatprep.mubr.bf16.mxu1 %v16587_v54  ;;  %v16647_v54 = vld [vmem:[%s17427_s12 + $0x150] sm:$0xff]  }
 0x1d3   : > { %7324 = vmatmul.mubr.bf16.gmra.mrb[160].mxu0 %v16472_v8  ;;  %v16539_v8 = vld [vmem:[%s17427_s12 + $0x60] sm:$0xff]  }
 0x1d4   : > { %7331 = vmatprep.mubr.bf16.mxu0 %v16475_v10  ;;  %v16608_v10 = vld [vmem:[%s17427_s12 + $0xf8] sm:$0xff]  }
 0x1d5   : > { %6611 = vmatmul.mubr.bf16.gmra.mrb[76].mxu1 %v16589_v57  ;;  %v16649_v57 = vld [vmem:[%s17427_s12 + $0x148] sm:$0xff]  }
 0x1d6   : > { %6618 = vmatprep.mubr.bf16.mxu1 %v16591_v58  ;;  %v16651_v58 = vld [vmem:[%s17427_s12 + $0x158] sm:$0xff]  }
 0x1db   : > { %7332 = vmatmul.mubr.bf16.gmra.mrb[164].mxu0 %v16476_v14  ;;  %v16610_v14 = vld [vmem:[%s17427_s12 + $0xf0] sm:$0xff]  }
 0x1dc   : > { %7339 = vmatprep.mubr.bf16.mxu0 %v16479_v15  ;;  %v16560_v15 = vld [vmem:[%s20429_s1 + $0x188] sm:$0xff]  }
 0x1dd   : > { %6619 = vmatmul.mubr.bf16.gmra.mrb[80].mxu1 %v16593_v61  ;;  %v16653_v61 = vld [vmem:[%s17427_s12 + $0x150] sm:$0xff]  }
 0x1de   : > { %6626 = vmatprep.mubr.bf16.mxu1 %v16596_v62  ;;  %v16655_v62 = vld [vmem:[%s17427_s12 + $0x160] sm:$0xff]  }
 0x1e3   : > { %7340 = vmatmul.mubr.bf16.gmra.mrb[168].mxu0 %v16480_v18  ;;  %v16548_v18 = vld [vmem:[%s17427_s12 + $0x70] sm:$0xff]  }
 0x1e4   : > { %7347 = vmatprep.mubr.bf16.mxu0 %v16484_v19  ;;  %v16577_v19 = vld [vmem:[%s20429_s1 + $0x190] sm:$0xff]  }
 0x1e5   : > { %6627 = vmatmul.mubr.bf16.gmra.mrb[84].mxu1 %v16598_v1  ;;  %v16657_v1 = vld [vmem:[%s17427_s12 + $0x158] sm:$0xff]  }
 0x1e6   : > { %6634 = vmatprep.mubr.bf16.mxu1 %v16600_v2  ;;  %v16659_v2 = vld [vmem:[%s17427_s12 + $0x168] sm:$0xff]  }
 0x1eb   : > { %7348 = vmatmul.mubr.bf16.gmra.mrb[172].mxu0 %v16485_v22  ;;  %v16617_v22 = vld [vmem:[%s17427_s12 + $0x108] sm:$0xff]  }
 0x1ec   : > { %7355 = vmatprep.mubr.bf16.mxu0 %v16488_v23  ;;  %v16550_v23 = vld [vmem:[%s17427_s12 + $0x68] sm:$0xff]  }
 0x1ed   : > { %6635 = vmatmul.mubr.bf16.gmra.mrb[88].mxu1 %v16602_v5  ;;  %v16661_v5 = vld [vmem:[%s17427_s12 + $0x160] sm:$0xff]  }
 0x1ee   : > { %6642 = vmatprep.mubr.bf16.mxu1 %v16604_v6  ;;  %v16662_v6 = vld [vmem:[%s20429_s1 + $0x1b8] sm:$0xff]  }
 0x1f3   : > { %7356 = vmatmul.mubr.bf16.gmra.mrb[176].mxu0 %v16489_v26  ;;  %v16619_v26 = vld [vmem:[%s17427_s12 + $0x100] sm:$0xff]  }
 0x1f4   : > { %7363 = vmatprep.mubr.bf16.mxu0 %v16492_v27  ;;  %v16621_v27 = vld [vmem:[%s17427_s12 + $0x110] sm:$0xff]  }
 0x1f5   : > { %6643 = vmatmul.mubr.bf16.gmra.mrb[92].mxu1 %v16606_v9  ;;  %v16599_v9 = vld [vmem:[%s17427_s12 + $0xe0] sm:$0xff]  }
 0x1f6   : > { %6650 = vmatprep.mubr.bf16.mxu1 %v16608_v10  ;;  %v16666_v10 = vld [vmem:[%s17427_s12 + $0x168] sm:$0xff]  }
 0x1fb   : > { %7364 = vmatmul.mubr.bf16.gmra.mrb[180].mxu0 %v16493_v30  ;;  %v16623_v30 = vld [vmem:[%s17427_s12 + $0x108] sm:$0xff]  }
 0x1fc   : > { %7371 = vmatprep.mubr.bf16.mxu0 %v16497_v31  ;;  %v16625_v31 = vld [vmem:[%s17427_s12 + $0x118] sm:$0xff]  }
 0x1fd   : > { %6651 = vmatmul.mubr.bf16.gmra.mrb[96].mxu1 %v16610_v14  ;;  %v16670_v14 = vld [vmem:[%s17427_s12 + $0x170] sm:$0xff]  }
 0x1fe   : > { %6658 = vmatprep.mubr.bf16.mxu1 %v16613_v16  ;;  %v16605_v16 = vld [vmem:[%s17427_s12 + $0xe0] sm:$0xff]  }
 0x203   : > { %7372 = vmatmul.mubr.bf16.gmra.mrb[184].mxu0 %v16498_v34  ;;  %v16627_v34 = vld [vmem:[%s17427_s12 + $0x110] sm:$0xff]  }
 0x204   : > { %7379 = vmatprep.mubr.bf16.mxu0 %v16501_v35  ;;  %v16628_v35 = vld [vmem:[%s20429_s1 + $0x1a8] sm:$0xff]  }
 0x205   : > { %6659 = vmatmul.mubr.bf16.gmra.mrb[100].mxu1 %v16615_v20  ;;  %v16609_v20 = vld [vmem:[%s17427_s12 + $0xf8] sm:$0xff]  }
 0x206   : > { %6666 = vmatprep.mubr.bf16.mxu1 %v16617_v22  ;;  %v16678_v22 = vld [vmem:[%s17427_s12 + $0x190] sm:$0xff]  }
 0x20b   : > { %7380 = vmatmul.mubr.bf16.gmra.mrb[188].mxu0 %v16502_v39  ;;  %v16565_v39 = vld [vmem:[%s17427_s12 + $0x90] sm:$0xff]  }
 0x20c   : > { %7387 = vmatprep.mubr.bf16.mxu0 %v16505_v40  ;;  %v16632_v40 = vld [vmem:[%s17427_s12 + $0x118] sm:$0xff]  }
 0x20d   : > { %6667 = vmatmul.mubr.bf16.gmra.mrb[104].mxu1 %v16619_v26  ;;  %v16616_v26 = vld [vmem:[%s17427_s12 + $0x110] sm:$0xff]  }
 0x20e   : > { %6674 = vmatprep.mubr.bf16.mxu1 %v16621_v27  ;;  %v16683_v27 = vld [vmem:[%s17427_s12 + $0x198] sm:$0xff]  }
 0x213   : > { %7388 = vmatmul.mubr.bf16.gmra.mrb[192].mxu0 %v16507_v43  ;;  %v16569_v43 = vld [vmem:[%s17427_s12 + $0x98] sm:$0xff]  }
 0x214   : > { %7395 = vmatprep.mubr.bf16.mxu0 %v16509_v44  ;;  %v16636_v44 = vld [vmem:[%s17427_s12 + $0x120] sm:$0xff]  }
 0x215   : > { %6675 = vmatmul.mubr.bf16.gmra.mrb[108].mxu1 %v16623_v30  ;;  %v16620_v30 = vld [vmem:[%s17427_s12 + $0x118] sm:$0xff]  }
 0x216   : > { %6682 = vmatprep.mubr.bf16.mxu1 %v16625_v31  ;;  %v16687_v31 = vld [vmem:[%s17427_s12 + $0x1a0] sm:$0xff]  }
 0x21b   : > { %7396 = vmatmul.mubr.bf16.gmra.mrb[196].mxu0 %v16511_v47  ;;  %v16573_v47 = vld [vmem:[%s17427_s12 + $0xb0] sm:$0xff]  }
 0x21c   : > { %7403 = vmatprep.mubr.bf16.mxu0 %v16514_v48  ;;  %v16640_v48 = vld [vmem:[%s17427_s12 + $0x128] sm:$0xff]  }
 0x21d   : > { %6683 = vmatmul.mubr.bf16.gmra.mrb[112].mxu1 %v16627_v34  ;;  %v16624_v34 = vld [vmem:[%s17427_s12 + $0x120] sm:$0xff]  }
 0x21e   : > { %6690 = vmatprep.mubr.bf16.mxu1 %v16630_v36  ;;  %v16693_v36 = vld [vmem:[%s17427_s12 + $0x1b8] sm:$0xff]  }
 0x223   : > { %7404 = vmatmul.mubr.bf16.gmra.mrb[200].mxu0 %v16516_v51  ;;  %v16578_v51 = vld [vmem:[%s17427_s12 + $0xb8] sm:$0xff]  }
 0x224   : > { %7411 = vmatprep.mubr.bf16.mxu0 %v16518_v52  ;;  %v16644_v52 = vld [vmem:[%s17427_s12 + $0x140] sm:$0xff]  }
 0x225   : > { %6691 = vmatmul.mubr.bf16.gmra.mrb[116].mxu1 %v16632_v40  ;;  %v16695_v40 = vld [vmem:[%s17427_s12 + $0x1b0] sm:$0xff]  }
 0x226   : > { %6698 = vmatprep.mubr.bf16.mxu1 %v16634_v41  ;;  %v16696_v41 = vld [vmem:[%s20429_s1 + $0x1c8] sm:$0xff]  }
 0x22b   : > { %7412 = vmatmul.mubr.bf16.gmra.mrb[204].mxu0 %v16520_v55  ;;  %v16580_v55 = vld [vmem:[%s17427_s12 + $0xb0] sm:$0xff]  }
 0x22c   : > { %7419 = vmatprep.mubr.bf16.mxu0 %v16522_v56  ;;  %v16582_v56 = vld [vmem:[%s17427_s12 + $0xc0] sm:$0xff]  }
 0x22d   : > { %6699 = vmatmul.mubr.bf16.gmra.mrb[120].mxu1 %v16636_v44  ;;  %v16633_v44 = vld [vmem:[%s17427_s12 + $0x130] sm:$0xff]  }
 0x22e   : > { %6706 = vmatprep.mubr.bf16.mxu1 %v16638_v45  ;;  %v16700_v45 = vld [vmem:[%s17427_s12 + $0x1b8] sm:$0xff]  }
 0x233   : > { %7420 = vmatmul.mubr.bf16.gmra.mrb[208].mxu0 %v16524_v59  ;;  %v16584_v59 = vld [vmem:[%s17427_s12 + $0xb8] sm:$0xff]  }
 0x234   : > { %7427 = vmatprep.mubr.bf16.mxu0 %v16527_v60  ;;  %v16586_v60 = vld [vmem:[%s17427_s12 + $0xc8] sm:$0xff]  }
 0x235   : > { %6707 = vmatmul.mubr.bf16.gmra.mrb[124].mxu1 %v16640_v48  ;;  %v16637_v48 = vld [vmem:[%s17427_s12 + $0x138] sm:$0xff]  }
 0x236   : > { %6714 = vmatprep.mubr.bf16.mxu1 %v16642_v49  ;;  %v16704_v49 = vld [vmem:[%s17427_s12 + $0x1c0] sm:$0xff]  }
 0x23b   : > { %7428 = vmatmul.mubr.bf16.gmra.mrb[212].mxu0 %v16529_v63  ;;  %v16588_v63 = vld [vmem:[%s17427_s12 + $0xc0] sm:$0xff]  }
 0x23c   : > { %7435 = vmatprep.mubr.bf16.mxu0 %v16531_v0  ;;  %v16590_v0 = vld [vmem:[%s17427_s12 + $0xd0] sm:$0xff]  }
 0x23d   : > { %6715 = vmatmul.mubr.bf16.gmra.mrb[128].mxu1 %v16644_v52  ;;  %v16641_v52 = vld [vmem:[%s17427_s12 + $0x150] sm:$0xff]  }
 0x23e   : > { %6722 = vmatprep.mubr.bf16.mxu1 %v16647_v54  ;;  %v16710_v54 = vld [vmem:[%s17427_s12 + $0x1e8] sm:$0xff]  }
 0x243   : > { %7436 = vmatmul.mubr.bf16.gmra.mrb[216].mxu0 %v16533_v3  ;;  %v16592_v3 = vld [vmem:[%s17427_s12 + $0xc8] sm:$0xff]  }
 0x244   : > { %7443 = vmatprep.mubr.bf16.mxu0 %v16535_v4  ;;  %v16595_v4 = vld [vmem:[%s17427_s12 + $0xd8] sm:$0xff]  }
 0x245   : > { %6723 = vmatmul.mubr.bf16.gmra.mrb[132].mxu1 %v16649_v57  ;;  %v16712_v57 = vld [vmem:[%s17427_s12 + $0x1e0] sm:$0xff]  }
 0x246   : > { %6730 = vmatprep.mubr.bf16.mxu1 %v16651_v58  ;;  %v16713_v58 = vld [vmem:[%s20429_s1 + $0x1d0] sm:$0xff]  }
 0x24b   : > { %7444 = vmatmul.mubr.bf16.gmra.mrb[220].mxu0 %v16537_v7  ;;  %v16664_v7 = vld [vmem:[%s17427_s12 + $0x170] sm:$0xff]  }
 0x24c   : > { %7548 = vmatprep.mubr.bf16.mxu0 %v16539_v8  ;;  %v16597_v8 = vld [vmem:[%s17427_s12 + $0xd0] sm:$0xff]  }
 0x24d   : > { %6731 = vmatmul.mubr.bf16.gmra.mrb[136].mxu1 %v16653_v61  ;;  %v16650_v61 = vld [vmem:[%s17427_s12 + $0x160] sm:$0xff]  }
 0x24e   : > { %6738 = vmatprep.mubr.bf16.mxu1 %v16655_v62  ;;  %v16717_v62 = vld [vmem:[%s17427_s12 + $0x1e8] sm:$0xff]  }
 0x253   : > { %7549 = vmatmul.mubr.bf16.vlgmr.msra.gmra.mrb[0].mxu0 %v16541_v11  ;;  %v16668_v11 = vld [vmem:[%s17427_s12 + $0x178] sm:$0xff]  }
 0x254   : > { %8062 = vmatpush1.bf16.msra.mxu0 %v16543_v12  ;;  %7556 = vmatprep.mubr.bf16.mxu0 %v16544_v13  ;;  %v16601_v12 = vld [vmem:[%s17427_s12 + $0xd8] sm:$0xff]   ;;  %v16603_v13 = vld [vmem:[%s17427_s12 + $0xe8] sm:$0xff]  }
 0x255   : > { %8063 = vmatprep.subr.bf16.mxu0 %v20440_v38  ;;  %6739 = vmatmul.mubr.bf16.gmra.mrb[140].mxu1 %v16657_v1  ;;  %v16654_v1 = vld [vmem:[%s17427_s12 + $0x168] sm:$0xff]  }
 0x256   : > { %6746 = vmatprep.mubr.bf16.mxu1 %v16659_v2  ;;  %v16721_v2 = vld [vmem:[%s17427_s12 + $0x1f0] sm:$0xff]  }
 0x258   : > { %8064 = vmatpush1.bf16.msra.mxu0 %v16560_v15  ;;  %v16672_v15 = vld [vmem:[%s17427_s12 + $0x180] sm:$0xff]  }
 0x259   : > { %8065 = vmatprep.subr.bf16.mxu0 %v20440_v38 }
 0x25b   : > { %7557 = vmatmul.mubr.bf16.gmra.mrb[4].mxu0 %v16546_v17  ;;  %v16607_v17 = vld [vmem:[%s17427_s12 + $0x100] sm:$0xff]  }
 0x25c   : > { %7564 = vmatprep.mubr.bf16.mxu0 %v16548_v18  ;;  %8066 = vmatpush1.bf16.msra.mxu0 %v16577_v19  ;;  %v16674_v18 = vld [vmem:[%s17427_s12 + $0x178] sm:$0xff]  }
 0x25d   : > { %8067 = vmatprep.subr.bf16.mxu0 %v20440_v38  ;;  %6747 = vmatmul.mubr.bf16.gmra.mrb[144].mxu1 %v16661_v5  ;;  %v16676_v19 = vld [vmem:[%s17427_s12 + $0x198] sm:$0xff]   ;;  %v16723_v5 = vld [vmem:[%s17427_s12 + $0x200] sm:$0xff]  }
 0x25e   : > { %6754 = vmatprep.mubr.bf16.mxu1 %v16664_v7 }
 0x260   : > { %8068 = vmatpush1.bf16.msra.mxu0 %v16594_v21  ;;  %v16612_v21 = vld [vmem:[%s17427_s12 + $0x108] sm:$0xff]  }
 0x261   : > { %8069 = vmatprep.subr.bf16.mxu0 %v20440_v38 }
 0x263   : > { %7565 = vmatmul.mubr.bf16.gmra.mrb[8].mxu0 %v16550_v23  ;;  %v16679_v23 = vld [vmem:[%s20429_s1 + $0x1c0] sm:$0xff]  }
 0x264   : > { %7572 = vmatprep.mubr.bf16.mxu0 %v16552_v24  ;;  %8070 = vmatpush1.bf16.msra.mxu0 %v16611_v25  ;;  %v16681_v24 = vld [vmem:[%s17427_s12 + $0x1a0] sm:$0xff]  }
 0x265   : > { %8071 = vmatprep.subr.bf16.mxu0 %v20440_v38  ;;  %6755 = vmatmul.mubr.bf16.gmra.mrb[148].mxu1 %v16666_v10  ;;  %v16614_v25 = vld [vmem:[%s17427_s12 + $0x100] sm:$0xff]   ;;  %v16725_v10 = vld [vmem:[%s17427_s12 + $0x1f8] sm:$0xff]  }
 0x266   : > { %6762 = vmatprep.mubr.bf16.mxu1 %v16668_v11 }
 0x268   : > { %8072 = vmatpush1.bf16.msra.mxu0 %v16628_v35  ;;  %v16691_v35 = vld [vmem:[%s17427_s12 + $0x1a8] sm:$0xff]  }
 0x269   : > { %8073 = vmatprep.subr.bf16.mxu0 %v20440_v38 }
 0x26b   : > { %7573 = vmatmul.mubr.bf16.gmra.mrb[12].mxu0 %v16554_v28  ;;  %v16685_v28 = vld [vmem:[%s17427_s12 + $0x1a8] sm:$0xff]  }
 0x26c   : > { %7580 = vmatprep.mubr.bf16.mxu0 %v16556_v29  ;;  %8074 = vmatpush1.bf16.msra.mxu0 %v16645_v53  ;;  %v16618_v29 = vld [vmem:[%s17427_s12 + $0x108] sm:$0xff]  }
 0x26d   : > { %8075 = vmatprep.subr.bf16.mxu0 %v20440_v38  ;;  %6763 = vmatmul.mubr.bf16.gmra.mrb[152].mxu1 %v16670_v14  ;;  %v16708_v53 = vld [vmem:[%s17427_s12 + $0x1c8] sm:$0xff]  }
 0x26e   : > { %6770 = vmatprep.mubr.bf16.mxu1 %v16672_v15 }
 0x270   : > { %8076 = vmatpush1.bf16.msra.mxu0 %v16662_v6 }
 0x271   : > { %8077 = vmatprep.subr.bf16.mxu0 %v20440_v38 }
 0x273   : > { %7581 = vmatmul.mubr.bf16.gmra.mrb[16].mxu0 %v16558_v32  ;;  %v16689_v32 = vld [vmem:[%s17427_s12 + $0x1b0] sm:$0xff]  }
 0x274   : > { %7588 = vmatprep.mubr.bf16.mxu0 %v16561_v33  ;;  %8078 = vmatpush1.bf16.msra.mxu0 %v16679_v23  ;;  %v16622_v33 = vld [vmem:[%s17427_s12 + $0x110] sm:$0xff]  }
 0x275   : > { %6771 = vmatmul.mubr.bf16.gmra.mrb[156].mxu1 %v16674_v18  ;;  %8079 = vmatprep.subr.bf16.mxu0 %v20440_v38  ;;  %v16729_v18 = vld [vmem:[%s17427_s12 + $0x200] sm:$0xff]  }
 0x276   : > { %6778 = vmatprep.mubr.bf16.mxu1 %v16676_v19  ;;  %v16730_v19 = vld [vmem:[%s20429_s1 + $0x1d8] sm:$0xff]  }
 0x278   : > { %8080 = vmatpush1.bf16.msra.mxu0 %v16696_v41 }
 0x279   : > { %8081 = vmatprep.subr.bf16.mxu0 %v20440_v38 }
 0x27b   : > { %7589 = vmatmul.mubr.bf16.gmra.mrb[20].mxu0 %v16563_v37  ;;  %v16626_v37 = vld [vmem:[%s17427_s12 + $0x118] sm:$0xff]  }
 0x27c   : > { %7596 = vmatprep.mubr.bf16.mxu0 %v16565_v39  ;;  %v16629_v39 = vld [vmem:[%s17427_s12 + $0x128] sm:$0xff]   ;;  %8082 = vmatpush1.bf16.msra.mxu0 %v16713_v58 }
 0x27d   : > { %6779 = vmatmul.mubr.bf16.gmra.mrb[160].mxu1 %v16678_v22  ;;  %8083 = vmatprep.subr.bf16.mxu0 %v20440_v38  ;;  %v16732_v22 = vld [vmem:[%s17427_s12 + $0x210] sm:$0xff]  }
 0x27e   : > { %6786 = vmatprep.mubr.bf16.mxu1 %v16681_v24 }
 0x280   : > { %8084 = vmatpush1.bf16.msra.mxu0 %v16730_v19 }
 0x281   : > { %8085 = vmatprep.subr.bf16.mxu0 %v20440_v38 }
 0x283   : > { %7597 = vmatmul.mubr.bf16.gmra.mrb[24].mxu0 %v16567_v42  ;;  %v16698_v42 = vld [vmem:[%s17427_s12 + $0x1c0] sm:$0xff]  }
 0x284   : > { %7604 = vmatprep.mubr.bf16.mxu0 %v16569_v43  ;;  %v16631_v43 = vld [vmem:[%s17427_s12 + $0x120] sm:$0xff]  }
 0x285   : > { %6787 = vmatmul.mubr.bf16.gmra.mrb[164].mxu1 %v16683_v27  ;;  %v16734_v27 = vld [vmem:[%s17427_s12 + $0x208] sm:$0xff]  }
 0x286   : > { %6794 = vmatprep.mubr.bf16.mxu1 %v16685_v28 }
 0x28b   : > { %7605 = vmatmul.mubr.bf16.gmra.mrb[28].mxu0 %v16571_v46  ;;  %v16702_v46 = vld [vmem:[%s17427_s12 + $0x1c8] sm:$0xff]  }
 0x28c   : > { %7612 = vmatprep.mubr.bf16.mxu0 %v16573_v47  ;;  %v16635_v47 = vld [vmem:[%s17427_s12 + $0x128] sm:$0xff]  }
 0x28d   : > { %6795 = vmatmul.mubr.bf16.gmra.mrb[168].mxu1 %v16687_v31 }
 0x28e   : > { %6802 = vmatprep.mubr.bf16.mxu1 %v16689_v32 }
 0x293   : > { %7613 = vmatmul.mubr.bf16.gmra.mrb[32].mxu0 %v16575_v50  ;;  %v16706_v50 = vld [vmem:[%s17427_s12 + $0x1d0] sm:$0xff]  }
 0x294   : > { %7620 = vmatprep.mubr.bf16.mxu0 %v16578_v51  ;;  %v16639_v51 = vld [vmem:[%s17427_s12 + $0x130] sm:$0xff]  }
 0x295   : > { %6803 = vmatmul.mubr.bf16.gmra.mrb[172].mxu1 %v16691_v35  ;;  %v16738_v35 = vld [vmem:[%s17427_s12 + $0x210] sm:$0xff]  }
 0x296   : > { %6810 = vmatprep.mubr.bf16.mxu1 %v16693_v36 }
 0x29b   : > { %7621 = vmatmul.mubr.bf16.gmra.mrb[36].mxu0 %v16580_v55  ;;  %v16643_v55 = vld [vmem:[%s17427_s12 + $0x148] sm:$0xff]  }
 0x29c   : > { %7628 = vmatprep.mubr.bf16.mxu0 %v16582_v56  ;;  %v16646_v56 = vld [vmem:[%s17427_s12 + $0x158] sm:$0xff]  }
 0x29d   : > { %6811 = vmatmul.mubr.bf16.gmra.mrb[176].mxu1 %v16695_v40 }
 0x29e   : > { %6818 = vmatprep.mubr.bf16.mxu1 %v16698_v42  ;;  %v16673_v42 = vld [vmem:[%s17427_s12 + $0x180] sm:$0xff]  }
 0x2a3   : > { %7629 = vmatmul.mubr.bf16.gmra.mrb[40].mxu0 %v16584_v59  ;;  %v16715_v59 = vld [vmem:[%s17427_s12 + $0x1f0] sm:$0xff]  }
 0x2a4   : > { %7636 = vmatprep.mubr.bf16.mxu0 %v16586_v60  ;;  %v16648_v60 = vld [vmem:[%s17427_s12 + $0x150] sm:$0xff]  }
 0x2a5   : > { %6819 = vmatmul.mubr.bf16.gmra.mrb[180].mxu1 %v16700_v45 }
 0x2a6   : > { %6826 = vmatprep.mubr.bf16.mxu1 %v16702_v46 }
 0x2ab   : > { %7637 = vmatmul.mubr.bf16.gmra.mrb[44].mxu0 %v16588_v63  ;;  %v16719_v63 = vld [vmem:[%s17427_s12 + $0x1f8] sm:$0xff]  }
 0x2ac   : > { %7644 = vmatprep.mubr.bf16.mxu0 %v16590_v0  ;;  %v16652_v0 = vld [vmem:[%s17427_s12 + $0x158] sm:$0xff]  }
 0x2ad   : > { %6827 = vmatmul.mubr.bf16.gmra.mrb[184].mxu1 %v16704_v49 }
 0x2ae   : > { %6834 = vmatprep.mubr.bf16.mxu1 %v16706_v50  ;;  %v16677_v50 = vld [vmem:[%s17427_s12 + $0x198] sm:$0xff]  }
 0x2b3   : > { %7645 = vmatmul.mubr.bf16.gmra.mrb[48].mxu0 %v16592_v3  ;;  %v17978_v3 = vpop.f32.mrb[0].mxu1 }
 0x2b4   : > { %7652 = vmatprep.mubr.bf16.mxu0 %v16595_v4  ;;  %v6462_v4 = vpop.f32.mrb[1].mxu1 }
 0x2b5   : > { %6835 = vmatmul.mubr.bf16.gmra.mrb[188].mxu1 %v16708_v53  ;;  %v17981_v6 = vpop.f32.mrb[2].mxu1  ;;  %v16747_v53 = vld [vmem:[%s20429_s1 + $0x1e0] sm:$0xff]   ;;  %v16686_v4 = vld [vmem:[%s17427_s12 + $0x1a8] sm:$0xff]  }
 0x2b6   : > { %6842 = vmatprep.mubr.bf16.mxu1 %v16710_v54  ;;  %v6465_v7 = vpop.f32.mrb[3].mxu1  ;;  %8086 = vmatpush1.bf16.msra.mxu0 %v16747_v53 }
 0x2b7   : > { %v17986_v11 = vpop.f32.mrb[4].mxu1  ;;  %8087 = vmatprep.subr.bf16.mxu0 %v20440_v38  ;;  %v16755_v7 = vld [vmem:[%s17427_s12 + $0x240] sm:$0xff]  }
 0x2bb   : > { %7653 = vmatmul.mubr.bf16.gmra.mrb[52].mxu0 %v16597_v8  ;;  %v16656_v8 = vld [vmem:[%s17427_s12 + $0x160] sm:$0xff]  }
 0x2bc   : > { %7660 = vmatprep.mubr.bf16.mxu0 %v16599_v9  ;;  %v16658_v9 = vld [vmem:[%s17427_s12 + $0x170] sm:$0xff]  }
 0x2bd   : > { %6843 = vmatmul.mubr.bf16.gmra.mrb[192].mxu1 %v16712_v57 }
 0x2be   : > { %6850 = vmatprep.mubr.bf16.mxu1 %v16715_v59  ;;  %v16682_v59 = vld [vmem:[%s17427_s12 + $0x1a0] sm:$0xff]  }
 0x2c3   : > { %7661 = vmatmul.mubr.bf16.gmra.mrb[56].mxu0 %v16601_v12  ;;  %v6470_v12 = vpop.f32.mrb[5].mxu1 }
 0x2c4   : > { %7668 = vmatprep.mubr.bf16.mxu0 %v16603_v13  ;;  %v16727_v13 = vld [vmem:[%s17427_s12 + $0x208] sm:$0xff]   ;;  %v17989_v14 = vpop.f32.mrb[6].mxu1 }
 0x2c5   : > { %6851 = vmatmul.mubr.bf16.gmra.mrb[196].mxu1 %v16717_v62  ;;  %v6473_v15 = vpop.f32.mrb[7].mxu1 }
 0x2c6   : > { %6858 = vmatprep.mubr.bf16.mxu1 %v16719_v63  ;;  %v16690_v15 = vld [vmem:[%s17427_s12 + $0x1b0] sm:$0xff]  }
 0x2cb   : > { %7669 = vmatmul.mubr.bf16.gmra.mrb[60].mxu0 %v16605_v16  ;;  %v16660_v16 = vld [vmem:[%s17427_s12 + $0x168] sm:$0xff]  }
 0x2cc   : > { %7676 = vmatprep.mubr.bf16.mxu0 %v16607_v17  ;;  %v16663_v17 = vld [vmem:[%s17427_s12 + $0x178] sm:$0xff]  }
 0x2cd   : > { %6859 = vmatmul.mubr.bf16.gmra.mrb[200].mxu1 %v16721_v2 }
 0x2ce   : > { %6866 = vmatprep.mubr.bf16.mxu1 %v16723_v5  ;;  %v16688_v5 = vld [vmem:[%s17427_s12 + $0x1b8] sm:$0xff]  }
 0x2d3   : > { %7677 = vmatmul.mubr.bf16.gmra.mrb[64].mxu0 %v16609_v20  ;;  %v17997_v20 = vpop.f32.mrb[8].mxu1 }
 0x2d4   : > { %7684 = vmatprep.mubr.bf16.mxu0 %v16612_v21  ;;  %v6478_v21 = vpop.f32.mrb[9].mxu1 }
 0x2d5   : > { %6867 = vmatmul.mubr.bf16.gmra.mrb[204].mxu1 %v16725_v10  ;;  %v18000_v23 = vpop.f32.mrb[10].mxu1  ;;  %v16757_v10 = vld [vmem:[%s17427_s12 + $0x250] sm:$0xff]   ;;  %v16761_v21 = vld [vmem:[%s17427_s12 + $0x258] sm:$0xff]  }
 0x2d6   : > { %6874 = vmatprep.mubr.bf16.mxu1 %v16727_v13  ;;  %v6481_v24 = vpop.f32.mrb[11].mxu1 }
 0x2d7   : > { %v18006_v28 = vpop.f32.mrb[12].mxu1 }
 0x2db   : > { %7685 = vmatmul.mubr.bf16.gmra.mrb[68].mxu0 %v16614_v25  ;;  %v16665_v25 = vld [vmem:[%s17427_s12 + $0x170] sm:$0xff]  }
 0x2dc   : > { %7692 = vmatprep.mubr.bf16.mxu0 %v16616_v26  ;;  %v16667_v26 = vld [vmem:[%s17427_s12 + $0x180] sm:$0xff]  }
 0x2dd   : > { %6875 = vmatmul.mubr.bf16.gmra.mrb[208].mxu1 %v16729_v18 }
 0x2de   : > { %6882 = vmatprep.mubr.bf16.mxu1 %v16732_v22 }
 0x2e3   : > { %7693 = vmatmul.mubr.bf16.gmra.mrb[72].mxu0 %v16618_v29  ;;  %v6486_v29 = vpop.f32.mrb[13].mxu1 }
 0x2e4   : > { %7700 = vmatprep.mubr.bf16.mxu0 %v16620_v30  ;;  %v16736_v30 = vld [vmem:[%s17427_s12 + $0x218] sm:$0xff]   ;;  %v18009_v31 = vpop.f32.mrb[14].mxu1  ;;  %v16764_v29 = vld [vmem:[%s20429_s1 + $0x1e8] sm:$0xff]  }
 0x2e5   : > { %6883 = vmatmul.mubr.bf16.gmra.mrb[212].mxu1 %v16734_v27  ;;  %v6489_v32 = vpop.f32.mrb[15].mxu1  ;;  %v16763_v27 = vld [vmem:[%s17427_s12 + $0x250] sm:$0xff]   ;;  %8088 = vmatpush1.bf16.msra.mxu0 %v16764_v29 }
 0x2e6   : > { %6890 = vmatprep.mubr.bf16.mxu1 %v16736_v30  ;;  %v18014_v36 = vpop.f32.mrb[16].mxu1  ;;  %8089 = vmatprep.subr.bf16.mxu0 %v20440_v38 }
 0x2eb   : > { %7701 = vmatmul.mubr.bf16.gmra.mrb[76].mxu0 %v16622_v33  ;;  %v16669_v33 = vld [vmem:[%s17427_s12 + $0x178] sm:$0xff]  }
 0x2ec   : > { %7708 = vmatprep.mubr.bf16.mxu0 %v16624_v34  ;;  %v16671_v34 = vld [vmem:[%s17427_s12 + $0x188] sm:$0xff]  }
 0x2ed   : > { %6891 = vmatmul.mubr.bf16.gmra.mrb[216].mxu1 %v16738_v35 }
 0x2f3   : > { %7709 = vmatmul.mubr.bf16.gmra.mrb[80].mxu0 %v16626_v37  ;;  %v6494_v37 = vpop.f32.mrb[17].mxu1 }
 0x2f4   : > { %7716 = vmatprep.mubr.bf16.mxu0 %v16629_v39  ;;  %v16740_v39 = vld [vmem:[%s17427_s12 + $0x220] sm:$0xff]   ;;  %v18017_v40 = vpop.f32.mrb[18].mxu1 }
 0x2f5   : > { %v6497_v41 = vpop.f32.mrb[19].mxu1  ;;  %6898 = vmatprep.mubr.bf16.mxu1 %v16740_v39  ;;  %v16699_v37 = vld [vmem:[%s17427_s12 + $0x1c0] sm:$0xff]   ;;  %v16701_v39 = vld [vmem:[%s17427_s12 + $0x1d0] sm:$0xff]  }
 0x2f6   : > { %v18022_v45 = vpop.f32.mrb[20].mxu1  ;;  %v16768_v41 = vld [vmem:[%s17427_s12 + $0x258] sm:$0xff]  }
 0x2f7   : > { %v6502_v46 = vpop.f32.mrb[21].mxu1 }
 0x2fb   : > { %7717 = vmatmul.mubr.bf16.gmra.mrb[84].mxu0 %v16631_v43  ;;  %v16675_v43 = vld [vmem:[%s17427_s12 + $0x1a0] sm:$0xff]  }
 0x2fc   : > { %7724 = vmatprep.mubr.bf16.mxu0 %v16633_v44  ;;  %v16742_v44 = vld [vmem:[%s17427_s12 + $0x218] sm:$0xff]  }
 0x2fd   : > { %6899 = vmatmul.mubr.bf16.gmra.mrb[220].mxu1 %v16742_v44  ;;  %v16770_v44 = vld [vmem:[%s17427_s12 + $0x268] sm:$0xff]  }
 0x303   : > { %7725 = vmatmul.mubr.bf16.gmra.mrb[88].mxu0 %v16635_v47  ;;  %v16744_v47 = vld [vmem:[%s17427_s12 + $0x238] sm:$0xff]  }
 0x304   : > { %7732 = vmatprep.mubr.bf16.mxu0 %v16637_v48  ;;  %v18025_v48 = vpop.f32.mrb[22].mxu1  ;;  %6906 = vmatprep.mubr.bf16.mxu1 %v16744_v47 }
 0x305   : > { %v6505_v49 = vpop.f32.mrb[23].mxu1 }
 0x306   : > { %v18033_v54 = vpop.f32.mrb[24].mxu1  ;;  %v16703_v49 = vld [vmem:[%s17427_s12 + $0x1c8] sm:$0xff]  }
 0x30b   : > { %7733 = vmatmul.mubr.bf16.gmra.mrb[92].mxu0 %v16639_v51  ;;  %v16680_v51 = vld [vmem:[%s17427_s12 + $0x1a8] sm:$0xff]  }
 0x30c   : > { %7740 = vmatprep.mubr.bf16.mxu0 %v16641_v52  ;;  %v16746_v52 = vld [vmem:[%s17427_s12 + $0x230] sm:$0xff]  }
 0x30d   : > { %6907 = vmatmul.mubr.bf16.gmra.mrb[224].mxu1 %v16746_v52 }
 0x313   : > { %7741 = vmatmul.mubr.bf16.gmra.mrb[96].mxu0 %v16643_v55  ;;  %v6510_v55 = vpop.f32.mrb[25].mxu1 }
 0x314   : > { %7748 = vmatprep.mubr.bf16.mxu0 %v16646_v56  ;;  %v16749_v56 = vld [vmem:[%s17427_s12 + $0x240] sm:$0xff]   ;;  %v18036_v57 = vpop.f32.mrb[26].mxu1  ;;  %v16774_v55 = vld [vmem:[%s17427_s12 + $0x270] sm:$0xff]  }
 0x315   : > { %v6513_v58 = vpop.f32.mrb[27].mxu1  ;;  %6914 = vmatprep.mubr.bf16.mxu1 %v16749_v56 }
 0x316   : > { %v18042_v62 = vpop.f32.mrb[28].mxu1 }
 0x317   : > { %v6518_v63 = vpop.f32.mrb[29].mxu1 }
 0x31b   : > { %7749 = vmatmul.mubr.bf16.gmra.mrb[100].mxu0 %v16648_v60  ;;  %v16684_v60 = vld [vmem:[%s17427_s12 + $0x1b0] sm:$0xff]  }
 0x31c   : > { %7756 = vmatprep.mubr.bf16.mxu0 %v16650_v61  ;;  %v16751_v61 = vld [vmem:[%s17427_s12 + $0x238] sm:$0xff]  }
 0x31d   : > { %6915 = vmatmul.mubr.bf16.gmra.mrb[228].mxu1 %v16751_v61  ;;  %v16776_v61 = vld [vmem:[%s17427_s12 + $0x268] sm:$0xff]  }
 0x323   : > { %7757 = vmatmul.mubr.bf16.gmra.mrb[104].mxu0 %v16652_v0  ;;  %v16753_v0 = vld [vmem:[%s17427_s12 + $0x248] sm:$0xff]  }
 0x324   : > { %7764 = vmatprep.mubr.bf16.mxu0 %v16654_v1  ;;  %v18045_v1 = vpop.f32.mrb[30].mxu1  ;;  %6922 = vmatprep.mubr.bf16.mxu1 %v16753_v0 }
 0x325   : > { %v6521_v2 = vpop.f32.mrb[31].mxu1  ;;  %6923 = vmatmul.mubr.bf16.gmra.mrb[232].mxu1 %v16755_v7  ;;  %v16711_v7 = vld [vmem:[%s17427_s12 + $0x1e8] sm:$0xff]  }
 0x326   : > { %6930 = vmatprep.mubr.bf16.mxu1 %v16757_v10  ;;  %v16778_v2 = vld [vmem:[%s17427_s12 + $0x280] sm:$0xff]  }
 0x327   : > { %v16780_v10 = vld [vmem:[%s17427_s12 + $0x240] sm:$0xff]  }
 0x32b   : > { %7765 = vmatmul.mubr.bf16.gmra.mrb[108].mxu0 %v16656_v8  ;;  %v18050_v8 = vpop.f32.mrb[32].mxu1 }
 0x32c   : > { %7772 = vmatprep.mubr.bf16.mxu0 %v16658_v9  ;;  %v6526_v9 = vpop.f32.mrb[33].mxu1 }
 0x32d   : > { %v18053_v12 = vpop.f32.mrb[34].mxu1  ;;  %v16714_v9 = vld [vmem:[%s17427_s12 + $0x1f8] sm:$0xff]  }
 0x32e   : > { %v6529_v13 = vpop.f32.mrb[35].mxu1 }
 0x32f   : > { %v18058_v18 = vpop.f32.mrb[36].mxu1  ;;  %v16781_v13 = vld [vmem:[%s20429_s1 + $0x1f0] sm:$0xff]  }
 0x330   : > { %v6534_v19 = vpop.f32.mrb[37].mxu1  ;;  %8090 = vmatpush1.bf16.msra.mxu0 %v16781_v13 }
 0x331   : > { %v18061_v22 = vpop.f32.mrb[38].mxu1  ;;  %8091 = vmatprep.subr.bf16.mxu0 %v20440_v38 }
 0x332   : > { %v6537_v24 = vpop.f32.mrb[39].mxu1 }
 0x333   : > { %7773 = vmatmul.mubr.bf16.gmra.mrb[112].mxu0 %v16660_v16  ;;  %v16692_v16 = vld [vmem:[%s17427_s12 + $0x1c0] sm:$0xff]   ;;  %v18069_v30 = vpop.f32.mrb[40].mxu1  ;;  %v16716_v24 = vld [vmem:[%s17427_s12 + $0x1f0] sm:$0xff]  }
 0x334   : > { %7780 = vmatprep.mubr.bf16.mxu0 %v16663_v17  ;;  %v16759_v17 = vld [vmem:[%s17427_s12 + $0x248] sm:$0xff]   ;;  %v6542_v32 = vpop.f32.mrb[41].mxu1 }
 0x335   : > { %6931 = vmatmul.mubr.bf16.gmra.mrb[236].mxu1 %v16759_v17  ;;  %v16783_v17 = vld [vmem:[%s17427_s12 + $0x288] sm:$0xff]   ;;  %v16787_v32 = vld [vmem:[%s17427_s12 + $0x290] sm:$0xff]  }
 0x336   : > { %6938 = vmatprep.mubr.bf16.mxu1 %v16761_v21 }
 0x33b   : > { %7781 = vmatmul.mubr.bf16.gmra.mrb[116].mxu0 %v16665_v25  ;;  %v16694_v25 = vld [vmem:[%s17427_s12 + $0x1b8] sm:$0xff]  }
 0x33c   : > { %7788 = vmatprep.mubr.bf16.mxu0 %v16667_v26  ;;  %v16697_v26 = vld [vmem:[%s17427_s12 + $0x1c8] sm:$0xff]  }
 0x33d   : > { %6939 = vmatmul.mubr.bf16.gmra.mrb[240].mxu1 %v16763_v27 }
 0x343   : > { %7789 = vmatmul.mubr.bf16.gmra.mrb[120].mxu0 %v16669_v33  ;;  %v16766_v33 = vld [vmem:[%s17427_s12 + $0x260] sm:$0xff]  }
 0x344   : > { %7796 = vmatprep.mubr.bf16.mxu0 %v16671_v34  ;;  %v18072_v34 = vpop.f32.mrb[42].mxu1  ;;  %6946 = vmatprep.mubr.bf16.mxu1 %v16766_v33 }
 0x345   : > { %v6545_v35 = vpop.f32.mrb[43].mxu1  ;;  %6947 = vmatmul.mubr.bf16.gmra.mrb[244].mxu1 %v16768_v41  ;;  %v16789_v41 = vld [vmem:[%s17427_s12 + $0x250] sm:$0xff]  }
 0x346   : > { %6954 = vmatprep.mubr.bf16.mxu1 %v16770_v44 }
 0x34b   : > { %7797 = vmatmul.mubr.bf16.gmra.mrb[124].mxu0 %v16673_v42  ;;  %v18078_v42 = vpop.f32.mrb[44].mxu1 }
 0x34c   : > { %7804 = vmatprep.mubr.bf16.mxu0 %v16675_v43  ;;  %v6550_v43 = vpop.f32.mrb[45].mxu1 }
 0x34d   : > { %v18081_v46 = vpop.f32.mrb[46].mxu1 }
 0x34e   : > { %v6553_v47 = vpop.f32.mrb[47].mxu1 }
 0x34f   : > { %v18086_v52 = vpop.f32.mrb[48].mxu1  ;;  %v16791_v47 = vld [vmem:[%s17427_s12 + $0x298] sm:$0xff]  }
 0x350   : > { %v6558_v53 = vpop.f32.mrb[49].mxu1 }
 0x351   : > { %v18089_v56 = vpop.f32.mrb[50].mxu1  ;;  %v16726_v53 = vld [vmem:[%s17427_s12 + $0x210] sm:$0xff]  }
 0x352   : > { %v6561_v58 = vpop.f32.mrb[51].mxu1 }
 0x353   : > { %7805 = vmatmul.mubr.bf16.gmra.mrb[128].mxu0 %v16677_v50  ;;  %v16705_v50 = vld [vmem:[%s17427_s12 + $0x1d8] sm:$0xff]   ;;  %v18094_v63 = vpop.f32.mrb[52].mxu1 }
 0x354   : > { %7812 = vmatprep.mubr.bf16.mxu0 %v16680_v51  ;;  %v16772_v51 = vld [vmem:[%s17427_s12 + $0x260] sm:$0xff]   ;;  %20459 = vst [vmem:[#allocation4_spill] sm:$0xff] %v18094_v63  ;;  %v6566_v0 = vpop.f32.mrb[53].mxu1  ;;  %v16920_v63 = vld [vmem:[%s17427_s12 + $0x1a8] sm:$0xff]  }
 0x355   : > { %6955 = vmatmul.mubr.bf16.gmra.mrb[248].mxu1 %v16772_v51  ;;  %v16724_v51 = vld [vmem:[%s17427_s12 + $0x200] sm:$0xff]  }
 0x356   : > { %6962 = vmatprep.mubr.bf16.mxu1 %v16774_v55  ;;  %v16793_v55 = vld [vmem:[%s17427_s12 + $0x258] sm:$0xff]  }
 0x35b   : > { %7813 = vmatmul.mubr.bf16.gmra.mrb[132].mxu0 %v16682_v59  ;;  %v16707_v59 = vld [vmem:[%s17427_s12 + $0x1d0] sm:$0xff]  }
 0x35c   : > { %7820 = vmatprep.mubr.bf16.mxu0 %v16684_v60  ;;  %v16709_v60 = vld [vmem:[%s17427_s12 + $0x1f0] sm:$0xff]  }
 0x35d   : > { %6963 = vmatmul.mubr.bf16.gmra.mrb[252].mxu1 %v16776_v61 }
 0x35e   : > { %7451 = vmatprep.mubr.bf16.mxu1 %v16778_v2  ;;  %v16728_v2 = vld [vmem:[%s17427_s12 + $0x208] sm:$0xff]  }
 0x363   : > { %7821 = vmatmul.mubr.bf16.gmra.mrb[136].mxu0 %v16686_v4  ;;  %v18097_v4 = vpop.f32.mrb[54].mxu1 }
 0x364   : > { %7828 = vmatprep.mubr.bf16.mxu0 %v16688_v5  ;;  %20460 = vst [vmem:[#allocation5_spill] sm:$0xff] %v18097_v4  ;;  %v6569_v5 = vpop.f32.mrb[55].mxu1 }
 0x365   : > { %7452 = vmatmul.mubr.bf16.vlgmr.msra.gmra.mrb[224].mxu1 %v16780_v10  ;;  %v16731_v5 = vld [vmem:[%s17427_s12 + $0x218] sm:$0xff]  }
 0x366   : > { %7459 = vmatprep.mubr.bf16.mxu1 %v16783_v17  ;;  %v16798_v10 = vld [vmem:[%s20429_s1 + $0x1f8] sm:$0xff]  }
 0x367   : > { %8092 = vmatpush1.bf16.msra.mxu0 %v16798_v10  ;;  %v16741_v10 = vld [vmem:[%s17427_s12 + $0x220] sm:$0xff]  }
 0x36b   : > { %7829 = vmatmul.mubr.bf16.gmra.mrb[140].mxu0 %v16690_v15  ;;  %v18105_v15 = vpop.f32.mrb[56].mxu1 }
 0x36c   : > { %7836 = vmatprep.mubr.bf16.mxu0 %v16692_v16  ;;  %20461 = vst [vmem:[#allocation6_spill] sm:$0xff] %v18105_v15  ;;  %v6574_v16 = vpop.f32.mrb[57].mxu1 }
 0x36d   : > { %v18108_v19 = vpop.f32.mrb[58].mxu1  ;;  %v16800_v16 = vld [vmem:[%s20429_s1 + $0x208] sm:$0xff]  }
 0x36e   : > { %20462 = vst [vmem:[#allocation7_spill] sm:$0xff] %v18108_v19  ;;  %v6577_v21 = vpop.f32.mrb[59].mxu1  ;;  %v16910_v19 = vld [vmem:[%s17427_s12 + $0x1a0] sm:$0xff]  }
 0x36f   : > { %v18114_v27 = vpop.f32.mrb[60].mxu1  ;;  %v16802_v21 = vld [vmem:[%s17427_s12 + $0x2a8] sm:$0xff]  }
 0x370   : > { %20463 = vst [vmem:[#allocation8_spill] sm:$0xff] %v18114_v27  ;;  %v6582_v29 = vpop.f32.mrb[61].mxu1  ;;  %v16908_v27 = vld [vmem:[%s17427_s12 + $0x190] sm:$0xff]  }
 0x371   : > { %v18117_v33 = vpop.f32.mrb[62].mxu1  ;;  %v16735_v29 = vld [vmem:[%s17427_s12 + $0x220] sm:$0xff]  }
 0x372   : > { %20464 = vst [vmem:[#allocation9_spill] sm:$0xff] %v18117_v33  ;;  %v6585_v35 = vpop.f32.mrb[63].mxu1 }
 0x373   : > { %7837 = vmatmul.mubr.bf16.gmra.mrb[144].mxu0 %v16694_v25  ;;  %v16718_v25 = vld [vmem:[%s17427_s12 + $0x200] sm:$0xff]   ;;  %v18122_v43 = vpop.f32.mrb[64].mxu1  ;;  %v16805_v35 = vld [vmem:[%s20429_s1 + $0x210] sm:$0xff]  }
 0x374   : > { %7844 = vmatprep.mubr.bf16.mxu0 %v16697_v26  ;;  %v16785_v26 = vld [vmem:[%s17427_s12 + $0x248] sm:$0xff]   ;;  %20465 = vst [vmem:[#allocation10_spill] sm:$0xff] %v18122_v43  ;;  %v6590_v44 = vpop.f32.mrb[65].mxu1 }
 0x375   : > { %7460 = vmatmul.mubr.bf16.gmra.mrb[228].mxu1 %v16785_v26  ;;  %v16733_v26 = vld [vmem:[%s17427_s12 + $0x210] sm:$0xff]  }
 0x376   : > { %7467 = vmatprep.mubr.bf16.mxu1 %v16787_v32  ;;  %v16804_v32 = vld [vmem:[%s17427_s12 + $0x268] sm:$0xff]   ;;  %v16808_v44 = vld [vmem:[%s17427_s12 + $0x2b0] sm:$0xff]  }
 0x37b   : > { %7845 = vmatmul.mubr.bf16.gmra.mrb[148].mxu0 %v16699_v37  ;;  %v16720_v37 = vld [vmem:[%s17427_s12 + $0x1f8] sm:$0xff]  }
 0x37c   : > { %7852 = vmatprep.mubr.bf16.mxu0 %v16701_v39  ;;  %v16722_v39 = vld [vmem:[%s17427_s12 + $0x208] sm:$0xff]  }
 0x37d   : > { %7468 = vmatmul.mubr.bf16.gmra.mrb[232].mxu1 %v16789_v41 }
 0x37e   : > { %7475 = vmatprep.mubr.bf16.mxu1 %v16791_v47 }
 0x383   : > { %7853 = vmatmul.mubr.bf16.gmra.mrb[152].mxu0 %v16703_v49  ;;  %v18125_v49 = vpop.f32.mrb[66].mxu1 }
 0x384   : > { %7860 = vmatprep.mubr.bf16.mxu0 %v16705_v50  ;;  %20466 = vst [vmem:[#allocation11_spill] sm:$0xff] %v18125_v49  ;;  %v6593_v50 = vpop.f32.mrb[67].mxu1  ;;  %v16906_v49 = vld [vmem:[%s17427_s12 + $0x198] sm:$0xff]  }
 0x385   : > { %v18130_v58 = vpop.f32.mrb[68].mxu1  ;;  %7476 = vmatmul.mubr.bf16.gmra.mrb[236].mxu1 %v16793_v55  ;;  %v16810_v55 = vld [vmem:[%s17427_s12 + $0x270] sm:$0xff]  }
 0x386   : > { %20467 = vst [vmem:[#allocation12_spill] sm:$0xff] %v18130_v58  ;;  %v16957_v58 = vld [vmem:[%s17427_s12 + $0x318] sm:$0xff]  }
 0x38b   : > { %7861 = vmatmul.mubr.bf16.gmra.mrb[156].mxu0 %v16707_v59  ;;  %v6598_v59 = vpop.f32.mrb[69].mxu1 }
 0x38c   : > { %7868 = vmatprep.mubr.bf16.mxu0 %v16709_v60  ;;  %v16795_v60 = vld [vmem:[%s17427_s12 + $0x2a0] sm:$0xff]   ;;  %v18133_v61 = vpop.f32.mrb[70].mxu1 }
 0x38d   : > { %20468 = vst [vmem:[#allocation13_spill] sm:$0xff] %v18133_v61  ;;  %v6601_v0 = vpop.f32.mrb[71].mxu1  ;;  %7483 = vmatprep.mubr.bf16.mxu1 %v16795_v60  ;;  %v16811_v59 = vld [vmem:[%s20429_s1 + $0x220] sm:$0xff]   ;;  %v16894_v61 = vld [vmem:[%s17427_s12 + $0x170] sm:$0xff]  }
 0x38e   : > { %v18144_v13 = vpop.f32.mrb[72].mxu1  ;;  %v16812_v0 = vld [vmem:[%s20429_s1 + $0x228] sm:$0xff]  }
 0x38f   : > { %20469 = vst [vmem:[#allocation14_spill] sm:$0xff] %v18144_v13  ;;  %v6606_v17 = vpop.f32.mrb[73].mxu1 }
 0x390   : > { %v16816_v17 = vld [vmem:[%s17427_s12 + $0x278] sm:$0xff]  }
 0x393   : > { %7869 = vmatmul.mubr.bf16.gmra.mrb[160].mxu0 %v16711_v7  ;;  %v16797_v7 = vld [vmem:[%s17427_s12 + $0x260] sm:$0xff]  }
 0x394   : > { %7876 = vmatprep.mubr.bf16.mxu0 %v16714_v9  ;;  %v16799_v9 = vld [vmem:[%s20429_s1 + $0x200] sm:$0xff]   ;;  %7484 = vmatmul.mubr.bf16.gmra.mrb[240].mxu1 %v16797_v7 }
 0x395   : > { %14754 = vmatprep.subr.bf16.mxu1 %v16799_v9  ;;  %7491 = vmatprep.mubr.bf16.mxu1 %v16802_v21  ;;  %v16817_v21 = vld [vmem:[%s20429_s1 + $0x230] sm:$0xff]  }
 0x396   : > { %14755 = vmatpush3.bf16.msra.mxu1 %v16799_v9 }
 0x397   : > { %14756 = vmatprep.subr.bf16.mxu1 %v16800_v16 }
 0x39a   : > { %14757 = vmatpush3.bf16.msra.mxu1 %v16800_v16  ;;  %v16743_v16 = vld [vmem:[%s17427_s12 + $0x240] sm:$0xff]  }
 0x39b   : > { %7877 = vmatmul.mubr.bf16.gmra.mrb[164].mxu0 %v16716_v24  ;;  %v18150_v24 = vpop.f32.mrb[74].mxu1  ;;  %14758 = vmatprep.subr.bf16.mxu1 %v16805_v35 }
 0x39c   : > { %7884 = vmatprep.mubr.bf16.mxu0 %v16718_v25  ;;  %20470 = vst [vmem:[#allocation15_spill] sm:$0xff] %v18150_v24  ;;  %v6609_v25 = vpop.f32.mrb[75].mxu1  ;;  %7492 = vmatmul.mubr.bf16.gmra.mrb[244].mxu1 %v16804_v32  ;;  %v16890_v24 = vld [vmem:[%s17427_s12 + $0x168] sm:$0xff]  }
 0x39d   : > { %7499 = vmatprep.mubr.bf16.mxu1 %v16808_v44  ;;  %v16821_v44 = vld [vmem:[%s17427_s12 + $0xb0] sm:$0xff]  }
 0x39e   : > { %14759 = vmatpush3.bf16.msra.mxu1 %v16805_v35 }
 0x3a3   : > { %7885 = vmatmul.mubr.bf16.gmra.mrb[168].mxu0 %v16720_v37  ;;  %v18158_v37 = vpop.f32.mrb[76].mxu1 }
 0x3a4   : > { %7892 = vmatprep.mubr.bf16.mxu0 %v16722_v39  ;;  %20471 = vst [vmem:[#allocation16_spill] sm:$0xff] %v18158_v37  ;;  %v16806_v39 = vld [vmem:[%s20429_s1 + $0x218] sm:$0xff]   ;;  %v6614_v41 = vpop.f32.mrb[77].mxu1  ;;  %7500 = vmatmul.mubr.bf16.gmra.mrb[248].mxu1 %v16810_v55 }
 0x3a5   : > { %v18164_v47 = vpop.f32.mrb[78].mxu1  ;;  %14760 = vmatprep.subr.bf16.mxu1 %v16806_v39  ;;  %v16748_v41 = vld [vmem:[%s17427_s12 + $0x248] sm:$0xff]  }
 0x3a6   : > { %20472 = vst [vmem:[#allocation17_spill] sm:$0xff] %v18164_v47  ;;  %v6617_v50 = vpop.f32.mrb[79].mxu1  ;;  %14761 = vmatpush3.bf16.msra.mxu1 %v16806_v39  ;;  %v16745_v39 = vld [vmem:[%s17427_s12 + $0x238] sm:$0xff]  }
 0x3a7   : > { %v18172_v60 = vpop.f32.mrb[80].mxu1  ;;  %14762 = vmatprep.subr.bf16.mxu1 %v16811_v59  ;;  %v16822_v50 = vld [vmem:[%s17427_s12 + $0xb8] sm:$0xff]  }
 0x3a8   : > { %20473 = vst [vmem:[#allocation18_spill] sm:$0xff] %v18172_v60  ;;  %v16947_v60 = vld [vmem:[%s17427_s12 + $0x2f8] sm:$0xff]  }
 0x3a9   : > { %v16888_v47 = vld [vmem:[%s17427_s12 + $0x158] sm:$0xff]  }
 0x3aa   : > { %14763 = vmatpush3.bf16.msra.mxu1 %v16811_v59 }
 0x3ab   : > { %7893 = vmatmul.mubr.bf16.gmra.mrb[172].mxu0 %v16724_v51  ;;  %v16737_v51 = vld [vmem:[%s17427_s12 + $0x218] sm:$0xff]   ;;  %14764 = vmatprep.subr.bf16.mxu1 %v16812_v0 }
 0x3ac   : > { %7900 = vmatprep.mubr.bf16.mxu0 %v16726_v53  ;;  %v16739_v53 = vld [vmem:[%s17427_s12 + $0x228] sm:$0xff]  }
 0x3ae   : > { %14765 = vmatpush3.bf16.msra.mxu1 %v16812_v0  ;;  %v16750_v0 = vld [vmem:[%s17427_s12 + $0x240] sm:$0xff]  }
 0x3af   : > { %14766 = vmatprep.subr.bf16.mxu1 %v16817_v21 }
 0x3b2   : > { %14767 = vmatpush3.bf16.msra.mxu1 %v16817_v21  ;;  %v16756_v21 = vld [vmem:[%s17427_s12 + $0x258] sm:$0xff]  }
 0x3b3   : > { %7901 = vmatmul.mubr.bf16.gmra.mrb[176].mxu0 %v16728_v2  ;;  %v6622_v2 = vpop.f32.mrb[81].mxu1 }
 0x3b4   : > { %7908 = vmatprep.mubr.bf16.mxu0 %v16731_v5  ;;  %v16814_v5 = vld [vmem:[%s17427_s12 + $0x2b8] sm:$0xff]   ;;  %v18178_v7 = vpop.f32.mrb[82].mxu1  ;;  %v16752_v2 = vld [vmem:[%s17427_s12 + $0x250] sm:$0xff]  }
 0x3b5   : > { %20474 = vst [vmem:[#allocation19_spill] sm:$0xff] %v18178_v7  ;;  %v6625_v9 = vpop.f32.mrb[83].mxu1  ;;  %7507 = vmatprep.mubr.bf16.mxu1 %v16814_v5 }
 0x3b6   : > { %v18186_v25 = vpop.f32.mrb[84].mxu1  ;;  %7508 = vmatmul.mubr.bf16.gmra.mrb[252].mxu1 %v16816_v17  ;;  %v16754_v17 = vld [vmem:[%s17427_s12 + $0x248] sm:$0xff]  }
 0x3b7   : > { %20475 = vst [vmem:[#allocation20_spill] sm:$0xff] %v18186_v25  ;;  %14770 = vmatprep.mubr.bf16.mxu1 %v16821_v44  ;;  %v16941_v25 = vld [vmem:[%s17427_s12 + $0x2e0] sm:$0xff]  }
 0x3bb   : > { %7909 = vmatmul.mubr.bf16.gmra.mrb[180].mxu0 %v16733_v26  ;;  %v16818_v26 = vld [vmem:[%s20429_s1 + $0x238] sm:$0xff]  }
 0x3bc   : > { %7916 = vmatprep.mubr.bf16.mxu0 %v16735_v29  ;;  %v6630_v29 = vpop.f32.mrb[85].mxu1  ;;  %14768 = vmatprep.subr.bf16.mxu1 %v16818_v26 }
 0x3bd   : > { %v18191_v32 = vpop.f32.mrb[86].mxu1  ;;  %14769 = vmatpush3.bf16.msra.mxu1 %v16818_v26  ;;  %v16827_v26 = vld [vmem:[%s17427_s12 + $0xc0] sm:$0xff]   ;;  %v16828_v29 = vld [vmem:[%s17427_s12 + $0xc8] sm:$0xff]  }
 0x3be   : > { %20476 = vst [vmem:[#allocation21_spill] sm:$0xff] %v18191_v32  ;;  %v6633_v35 = vpop.f32.mrb[87].mxu1 }
 0x3c0   : > { %14771 = vmatmul.mubr.bf16.vlgmr.msra.gmra.mrb[0].mxu1 %v16822_v50  ;;  %v16758_v50 = vld [vmem:[%s17427_s12 + $0x250] sm:$0xff]  }
 0x3c1   : > { %14774 = vmatprep.mubr.bf16.mxu1 %v16827_v26  ;;  %v16834_v26 = vld [vmem:[%s17427_s12 + $0xd8] sm:$0xff]  }
 0x3c3   : > { %7917 = vmatmul.mubr.bf16.gmra.mrb[184].mxu0 %v16737_v51  ;;  %v18197_v51 = vpop.f32.mrb[88].mxu1 }
 0x3c4   : > { %7924 = vmatprep.mubr.bf16.mxu0 %v16739_v53  ;;  %20477 = vst [vmem:[#allocation22_spill] sm:$0xff] %v18197_v51  ;;  %v6638_v53 = vpop.f32.mrb[89].mxu1  ;;  %v16939_v51 = vld [vmem:[%s17427_s12 + $0x2c8] sm:$0xff]  }
 0x3c5   : > { %v18199_v55 = vpop.f32.mrb[90].mxu1  ;;  %v16760_v53 = vld [vmem:[%s17427_s12 + $0x260] sm:$0xff]  }
 0x3c6   : > { %20478 = vst [vmem:[#allocation23_spill] sm:$0xff] %v18199_v55  ;;  %v6641_v59 = vpop.f32.mrb[91].mxu1 }
 0x3c7   : > { %v18203_v5 = vpop.f32.mrb[92].mxu1 }
 0x3c8   : > { %20479 = vst [vmem:[#allocation24_spill] sm:$0xff] %v18203_v5  ;;  %v6646_v9 = vpop.f32.mrb[93].mxu1  ;;  %14775 = vmatmul.mubr.bf16.gmra.mrb[4].mxu1 %v16828_v29  ;;  %v16933_v5 = vld [vmem:[%s17427_s12 + $0x2b0] sm:$0xff]  }
 0x3cb   : > { %7925 = vmatmul.mubr.bf16.gmra.mrb[188].mxu0 %v16741_v10  ;;  %v18205_v10 = vpop.f32.mrb[94].mxu1 }
 0x3cc   : > { %7932 = vmatprep.mubr.bf16.mxu0 %v16743_v16  ;;  %20480 = vst [vmem:[#allocation25_spill] sm:$0xff] %v18205_v10  ;;  %v6649_v16 = vpop.f32.mrb[95].mxu1 }
 0x3cd   : > { %v18211_v35 = vpop.f32.mrb[96].mxu1  ;;  %v16762_v16 = vld [vmem:[%s17427_s12 + $0x258] sm:$0xff]  }
 0x3ce   : > { %20481 = vst [vmem:[#allocation26_spill] sm:$0xff] %v18211_v35  ;;  %v16931_v35 = vld [vmem:[%s17427_s12 + $0x2a8] sm:$0xff]  }
 0x3d3   : > { %7933 = vmatmul.mubr.bf16.gmra.mrb[192].mxu0 %v16745_v39  ;;  %v6654_v39 = vpop.f32.mrb[97].mxu1 }
 0x3d4   : > { %7940 = vmatprep.mubr.bf16.mxu0 %v16748_v41  ;;  %v18213_v41 = vpop.f32.mrb[98].mxu1 }
 0x3d5   : > { %20482 = vst [vmem:[#allocation27_spill] sm:$0xff] %v18213_v41  ;;  %v6657_v44 = vpop.f32.mrb[99].mxu1 }
 0x3d6   : > { %v18217_v59 = vpop.f32.mrb[100].mxu1 }
 0x3d7   : > { %20483 = vst [vmem:[#allocation28_spill] sm:$0xff] %v18217_v59 }
 0x3db   : > { %7941 = vmatmul.mubr.bf16.gmra.mrb[196].mxu0 %v16750_v0  ;;  %v6662_v0 = vpop.f32.mrb[101].mxu1 }
 0x3dc   : > { %7948 = vmatprep.mubr.bf16.mxu0 %v16752_v2  ;;  %v18219_v2 = vpop.f32.mrb[102].mxu1  ;;  %v16769_v0 = vld [vmem:[%s17427_s12 + $0x270] sm:$0xff]  }
 0x3dd   : > { %20484 = vst [vmem:[#allocation29_spill] sm:$0xff] %v18219_v2  ;;  %v6665_v9 = vpop.f32.mrb[103].mxu1  ;;  %v16839_v2 = vld [vmem:[%s17427_s12 + $0xe0] sm:$0xff]  }
 0x3de   : > { %v18225_v29 = vpop.f32.mrb[104].mxu1 }
 0x3df   : > { %20485 = vst [vmem:[#allocation30_spill] sm:$0xff] %v18225_v29  ;;  %v6670_v39 = vpop.f32.mrb[105].mxu1  ;;  %v16771_v29 = vld [vmem:[%s17427_s12 + $0x268] sm:$0xff]  }
 0x3e0   : > { %v18227_v44 = vpop.f32.mrb[106].mxu1 }
 0x3e1   : > { %20486 = vst [vmem:[#allocation31_spill] sm:$0xff] %v18227_v44 }
 0x3e3   : > { %7949 = vmatmul.mubr.bf16.gmra.mrb[200].mxu0 %v16754_v17  ;;  %v16765_v17 = vld [vmem:[%s17427_s12 + $0x268] sm:$0xff]  }
 0x3e4   : > { %7956 = vmatprep.mubr.bf16.mxu0 %v16756_v21  ;;  %v16833_v21 = vld [vmem:[%s17427_s12 + $0xd0] sm:$0xff]  }
 0x3e5   : > { %14778 = vmatprep.mubr.bf16.mxu1 %v16833_v21 }
 0x3e6   : > { %14779 = vmatmul.mubr.bf16.gmra.mrb[8].mxu1 %v16834_v26  ;;  %v16840_v26 = vld [vmem:[%s17427_s12 + $0xe8] sm:$0xff]  }
 0x3e7   : > { %14782 = vmatprep.mubr.bf16.mxu1 %v16839_v2 }
 0x3eb   : > { %7957 = vmatmul.mubr.bf16.gmra.mrb[204].mxu0 %v16758_v50  ;;  %v6673_v50 = vpop.f32.mrb[107].mxu1 }
 0x3ec   : > { %7964 = vmatprep.mubr.bf16.mxu0 %v16760_v53  ;;  %v16767_v53 = vld [vmem:[%s17427_s12 + $0x260] sm:$0xff]   ;;  %v18231_v9 = vpop.f32.mrb[108].mxu1 }
 0x3ed   : > { %20487 = vst [vmem:[#allocation32_spill] sm:$0xff] %v18231_v9  ;;  %v16779_v9 = vld [vmem:[%s17427_s12 + $0x288] sm:$0xff]  }
 0x3ee   : > { %14783 = vmatmul.mubr.bf16.gmra.mrb[12].mxu1 %v16840_v26  ;;  %v16845_v26 = vld [vmem:[%s17427_s12 + $0x100] sm:$0xff]  }
 0x3ef   : > { %14786 = vmatprep.mubr.bf16.mxu1 %v16845_v26  ;;  %v16851_v26 = vld [vmem:[%s17427_s12 + $0x118] sm:$0xff]  }
 0x3f3   : > { %7965 = vmatmul.mubr.bf16.gmra.mrb[208].mxu0 %v16762_v16  ;;  %v6678_v16 = vpop.f32.mrb[109].mxu1 }
 0x3f4   : > { %7972 = vmatprep.mubr.bf16.mxu0 %v16765_v17  ;;  %v18233_v21 = vpop.f32.mrb[110].mxu1  ;;  %v16773_v17 = vld [vmem:[%s17427_s12 + $0x278] sm:$0xff]   ;;  %v16775_v16 = vld [vmem:[%s17427_s12 + $0x270] sm:$0xff]  }
 0x3f5   : > { %20488 = vst [vmem:[#allocation33_spill] sm:$0xff] %v18233_v21  ;;  %v6681_v38 = vpop.f32.mrb[111].mxu1 }
 0x3f6   : > { %v18239_v39 = vpop.f32.mrb[112].mxu1  ;;  %v16777_v38 = vld [vmem:[%s17427_s12 + $0x290] sm:$0xff]  }
 0x3f7   : > { %20489 = vst [vmem:[#allocation34_spill] sm:$0xff] %v18239_v39  ;;  %v6686_v50 = vpop.f32.mrb[113].mxu1 }
 0x3f8   : > { %v16846_v50 = vld [vmem:[%s17427_s12 + $0x108] sm:$0xff]  }
 0x3f9   : > { %14787 = vmatmul.mubr.bf16.gmra.mrb[16].mxu1 %v16846_v50  ;;  %v16788_v50 = vld [vmem:[%s17427_s12 + $0x298] sm:$0xff]  }
 0x3fb   : > { %7973 = vmatmul.mubr.bf16.gmra.mrb[212].mxu0 %v16767_v53  ;;  %v18241_v53 = vpop.f32.mrb[114].mxu1 }
 0x3fc   : > { %7980 = vmatprep.mubr.bf16.mxu0 %v16769_v0  ;;  %20490 = vst [vmem:[#allocation35_spill] sm:$0xff] %v18241_v53  ;;  %v6689_v0 = vpop.f32.mrb[115].mxu1  ;;  %v16849_v53 = vld [vmem:[%s17427_s12 + $0x110] sm:$0xff]  }
 0x3fd   : > { %v18245_v21 = vpop.f32.mrb[116].mxu1  ;;  %14790 = vmatprep.mubr.bf16.mxu1 %v16849_v53  ;;  %v16792_v53 = vld [vmem:[%s17427_s12 + $0x2a0] sm:$0xff]  }
 0x3fe   : > { %20491 = vst [vmem:[#allocation36_spill] sm:$0xff] %v18245_v21 }
 0x401   : > { %14791 = vmatmul.mubr.bf16.gmra.mrb[20].mxu1 %v16851_v26 }
 0x403   : > { %7981 = vmatmul.mubr.bf16.gmra.mrb[216].mxu0 %v16771_v29  ;;  %v6694_v29 = vpop.f32.mrb[117].mxu1 }
 0x404   : > { %7988 = vmatprep.mubr.bf16.mxu0 %v16773_v17  ;;  %v18247_v2 = vpop.f32.mrb[118].mxu1  ;;  %v16782_v17 = vld [vmem:[%s17427_s12 + $0x298] sm:$0xff]  }
 0x405   : > { %20492 = vst [vmem:[#allocation37_spill] sm:$0xff] %v18247_v2  ;;  %v6697_v39 = vpop.f32.mrb[119].mxu1  ;;  %v16784_v2 = vld [vmem:[%s17427_s12 + $0x290] sm:$0xff]  }
 0x406   : > { %v18253_v0 = vpop.f32.mrb[120].mxu1  ;;  %v16786_v39 = vld [vmem:[%s17427_s12 + $0x2a0] sm:$0xff]  }
 0x407   : > { %20493 = vst [vmem:[#allocation38_spill] sm:$0xff] %v18253_v0 }
 0x40b   : > { %7989 = vmatmul.mubr.bf16.gmra.mrb[220].mxu0 %v16775_v16  ;;  %v6702_v16 = vpop.f32.mrb[121].mxu1 }
 0x40c   : > { %7996 = vmatprep.mubr.bf16.mxu0 %v16777_v38  ;;  %v18255_v38 = vpop.f32.mrb[122].mxu1  ;;  %v16790_v16 = vld [vmem:[%s17427_s12 + $0x2a8] sm:$0xff]  }
 0x40d   : > { %20494 = vst [vmem:[#allocation39_spill] sm:$0xff] %v18255_v38  ;;  %v6705_v29 = vpop.f32.mrb[123].mxu1 }
 0x40e   : > { %v18259_v21 = vpop.f32.mrb[124].mxu1 }
 0x40f   : > { %20495 = vst [vmem:[#allocation40_spill] sm:$0xff] %v18259_v21 }
 0x413   : > { %7997 = vmatmul.mubr.bf16.gmra.mrb[224].mxu0 %v16779_v9  ;;  %v6710_v9 = vpop.f32.mrb[125].mxu1 }
 0x414   : > { %8004 = vmatprep.mubr.bf16.mxu0 %v16782_v17  ;;  %v18263_v0 = vpop.f32.mrb[126].mxu1 }
 0x415   : > { %20496 = vst [vmem:[#allocation41_spill] sm:$0xff] %v18263_v0  ;;  %v6713_v17 = vpop.f32.mrb[127].mxu1 }
 0x416   : > { %v18267_v29 = vpop.f32.mrb[128].mxu1  ;;  %v16794_v17 = vld [vmem:[%s17427_s12 + $0x2b0] sm:$0xff]  }
 0x417   : > { %20497 = vst [vmem:[#allocation42_spill] sm:$0xff] %v18267_v29  ;;  %v6718_v21 = vpop.f32.mrb[129].mxu1  ;;  %v16857_v29 = vld [vmem:[%s17427_s12 + $0x130] sm:$0xff]  }
 0x418   : > { %v18271_v9 = vpop.f32.mrb[130].mxu1 }
 0x419   : > { %20498 = vst [vmem:[#allocation43_spill] sm:$0xff] %v18271_v9  ;;  %v6721_v0 = vpop.f32.mrb[131].mxu1 }
 0x41a   : > { %v18274_v26 = vpop.f32.mrb[132].mxu1 }
 0x41b   : > { %8005 = vmatmul.mubr.bf16.gmra.mrb[228].mxu0 %v16784_v2  ;;  %v16853_v2 = vld [vmem:[%s17427_s12 + $0x120] sm:$0xff]   ;;  %20499 = vst [vmem:[#allocation44_spill] sm:$0xff] %v18274_v26  ;;  %v16801_v26 = vld [vmem:[%s17427_s12 + $0x2b8] sm:$0xff]  }
 0x41c   : > { %8012 = vmatprep.mubr.bf16.mxu0 %v16786_v39  ;;  %v16855_v39 = vld [vmem:[%s17427_s12 + $0x128] sm:$0xff]   ;;  %14794 = vmatprep.mubr.bf16.mxu1 %v16853_v2 }
 0x41d   : > { %14795 = vmatmul.mubr.bf16.gmra.mrb[24].mxu1 %v16855_v39  ;;  %v16796_v2 = vld [vmem:[%s17427_s12 + $0x2a8] sm:$0xff]  }
 0x41e   : > { %14798 = vmatprep.mubr.bf16.mxu1 %v16857_v29  ;;  %v16863_v29 = vld [vmem:[%s17427_s12 + $0x158] sm:$0xff]  }
 0x423   : > { %8013 = vmatmul.mubr.bf16.gmra.mrb[232].mxu0 %v16788_v50  ;;  %v6726_v50 = vpop.f32.mrb[133].mxu1 }
 0x424   : > { %8020 = vmatprep.mubr.bf16.mxu0 %v16790_v16  ;;  %v18277_v38 = vpop.f32.mrb[134].mxu1  ;;  %v16859_v16 = vld [vmem:[%s17427_s12 + $0x138] sm:$0xff]  }
 0x425   : > { %20500 = vst [vmem:[#allocation45_spill] sm:$0xff] %v18277_v38  ;;  %v6729_v21 = vpop.f32.mrb[135].mxu1  ;;  %14799 = vmatmul.mubr.bf16.gmra.mrb[28].mxu1 %v16859_v16 }
 0x426   : > { %v18281_v9 = vpop.f32.mrb[136].mxu1  ;;  %v16861_v21 = vld [vmem:[%s17427_s12 + $0x150] sm:$0xff]  }
 0x427   : > { %20501 = vst [vmem:[#allocation46_spill] sm:$0xff] %v18281_v9  ;;  %v6734_v0 = vpop.f32.mrb[137].mxu1  ;;  %14802 = vmatprep.mubr.bf16.mxu1 %v16861_v21  ;;  %v16867_v21 = vld [vmem:[%s17427_s12 + $0x168] sm:$0xff]  }
 0x428   : > { %v18284_v39 = vpop.f32.mrb[138].mxu1 }
 0x429   : > { %20502 = vst [vmem:[#allocation47_spill] sm:$0xff] %v18284_v39  ;;  %v16803_v39 = vld [vmem:[%s17427_s12 + $0x2b0] sm:$0xff]  }
 0x42b   : > { %8021 = vmatmul.mubr.bf16.gmra.mrb[236].mxu0 %v16792_v53  ;;  %v6737_v53 = vpop.f32.mrb[139].mxu1 }
 0x42c   : > { %8028 = vmatprep.mubr.bf16.mxu0 %v16794_v17  ;;  %v18287_v50 = vpop.f32.mrb[140].mxu1 }
 0x42d   : > { %20503 = vst [vmem:[#allocation48_spill] sm:$0xff] %v18287_v50  ;;  %v6742_v38 = vpop.f32.mrb[141].mxu1  ;;  %14803 = vmatmul.mubr.bf16.gmra.mrb[32].mxu1 %v16863_v29  ;;  %v16807_v50 = vld [vmem:[%s17427_s12 + $0x2c0] sm:$0xff]  }
 0x42e   : > { %v18289_v17 = vpop.f32.mrb[142].mxu1 }
 0x42f   : > { %20504 = vst [vmem:[#allocation49_spill] sm:$0xff] %v18289_v17  ;;  %v6745_v9 = vpop.f32.mrb[143].mxu1 }
 0x430   : > { %v18293_v16 = vpop.f32.mrb[144].mxu1  ;;  %v16865_v9 = vld [vmem:[%s17427_s12 + $0x160] sm:$0xff]  }
 0x431   : > { %20505 = vst [vmem:[#allocation50_spill] sm:$0xff] %v18293_v16  ;;  %v6750_v0 = vpop.f32.mrb[145].mxu1  ;;  %14806 = vmatprep.mubr.bf16.mxu1 %v16865_v9  ;;  %v16871_v9 = vld [vmem:[%s17427_s12 + $0x178] sm:$0xff]  }
 0x432   : > { %v18296_v53 = vpop.f32.mrb[146].mxu1 }
 0x433   : > { %8029 = vmatmul.mubr.bf16.gmra.mrb[240].mxu0 %v16796_v2  ;;  %20506 = vst [vmem:[#allocation51_spill] sm:$0xff] %v18296_v53  ;;  %v6753_v38 = vpop.f32.mrb[147].mxu1  ;;  %v16809_v53 = vld [vmem:[%s17427_s12 + $0x2b8] sm:$0xff]  }
 0x434   : > { %8036 = vmatprep.mubr.bf16.mxu0 %v16801_v26  ;;  %v18299_v2 = vpop.f32.mrb[148].mxu1 }
 0x435   : > { %20507 = vst [vmem:[#allocation52_spill] sm:$0xff] %v18299_v2  ;;  %v6758_v17 = vpop.f32.mrb[149].mxu1  ;;  %14807 = vmatmul.mubr.bf16.gmra.mrb[36].mxu1 %v16867_v21  ;;  %v16813_v2 = vld [vmem:[%s17427_s12 + $0x2c8] sm:$0xff]  }
 0x436   : > { %v18301_v26 = vpop.f32.mrb[150].mxu1 }
 0x437   : > { %20508 = vst [vmem:[#allocation53_spill] sm:$0xff] %v18301_v26  ;;  %v6761_v16 = vpop.f32.mrb[151].mxu1 }
 0x438   : > { %v18305_v29 = vpop.f32.mrb[152].mxu1  ;;  %v16869_v16 = vld [vmem:[%s17427_s12 + $0x170] sm:$0xff]  }
 0x439   : > { %20509 = vst [vmem:[#allocation54_spill] sm:$0xff] %v18305_v29  ;;  %v6766_v0 = vpop.f32.mrb[153].mxu1  ;;  %14810 = vmatprep.mubr.bf16.mxu1 %v16869_v16  ;;  %v16875_v16 = vld [vmem:[%s17427_s12 + $0x188] sm:$0xff]  }
 0x43a   : > { %v18308_v38 = vpop.f32.mrb[154].mxu1 }
 0x43b   : > { %8037 = vmatmul.mubr.bf16.gmra.mrb[244].mxu0 %v16803_v39  ;;  %20510 = vst [vmem:[#allocation55_spill] sm:$0xff] %v18308_v38  ;;  %v6769_v39 = vpop.f32.mrb[155].mxu1  ;;  %v16815_v38 = vld [vmem:[%s17427_s12 + $0x2c0] sm:$0xff]  }
 0x43c   : > { %8044 = vmatprep.mubr.bf16.mxu0 %v16807_v50  ;;  %v18311_v17 = vpop.f32.mrb[156].mxu1 }
 0x43d   : > { %20511 = vst [vmem:[#allocation56_spill] sm:$0xff] %v18311_v17  ;;  %v6774_v26 = vpop.f32.mrb[157].mxu1  ;;  %14811 = vmatmul.mubr.bf16.gmra.mrb[40].mxu1 %v16871_v9  ;;  %v16819_v17 = vld [vmem:[%s17427_s12 + $0xa8] sm:$0xff]  }
 0x43e   : > { %v18313_v50 = vpop.f32.mrb[158].mxu1 }
 0x43f   : > { %20512 = vst [vmem:[#allocation57_spill] sm:$0xff] %v18313_v50  ;;  %v6777_v29 = vpop.f32.mrb[159].mxu1 }
 0x440   : > { %v18317_v21 = vpop.f32.mrb[160].mxu1  ;;  %v16873_v29 = vld [vmem:[%s17427_s12 + $0x180] sm:$0xff]  }
 0x441   : > { %20513 = vst [vmem:[#allocation58_spill] sm:$0xff] %v18317_v21  ;;  %v6782_v0 = vpop.f32.mrb[161].mxu1  ;;  %14814 = vmatprep.mubr.bf16.mxu1 %v16873_v29  ;;  %v16879_v29 = vld [vmem:[%s17427_s12 + $0x1a8] sm:$0xff]  }
 0x442   : > { %v18320_v39 = vpop.f32.mrb[162].mxu1 }
 0x443   : > { %8045 = vmatmul.mubr.bf16.gmra.mrb[248].mxu0 %v16809_v53  ;;  %20514 = vst [vmem:[#allocation59_spill] sm:$0xff] %v18320_v39  ;;  %v6785_v53 = vpop.f32.mrb[163].mxu1  ;;  %v16820_v39 = vld [vmem:[%s17427_s12 + $0xa0] sm:$0xff]  }
 0x444   : > { %8052 = vmatprep.mubr.bf16.mxu0 %v16813_v2  ;;  %v18323_v26 = vpop.f32.mrb[164].mxu1 }
 0x445   : > { %20515 = vst [vmem:[#allocation60_spill] sm:$0xff] %v18323_v26  ;;  %v6790_v50 = vpop.f32.mrb[165].mxu1  ;;  %14815 = vmatmul.mubr.bf16.gmra.mrb[44].mxu1 %v16875_v16  ;;  %v16823_v26 = vld [vmem:[%s17427_s12 + $0xb0] sm:$0xff]  }
 0x446   : > { %v18325_v2 = vpop.f32.mrb[166].mxu1 }
 0x447   : > { %20516 = vst [vmem:[#allocation61_spill] sm:$0xff] %v18325_v2  ;;  %v6793_v21 = vpop.f32.mrb[167].mxu1 }
 0x448   : > { %v18329_v9 = vpop.f32.mrb[168].mxu1  ;;  %v16877_v21 = vld [vmem:[%s17427_s12 + $0x1a0] sm:$0xff]  }
 0x449   : > { %20517 = vst [vmem:[#allocation62_spill] sm:$0xff] %v18329_v9  ;;  %v6798_v0 = vpop.f32.mrb[169].mxu1  ;;  %14818 = vmatprep.mubr.bf16.mxu1 %v16877_v21  ;;  %v16883_v21 = vld [vmem:[%s17427_s12 + $0x1b8] sm:$0xff]  }
 0x44a   : > { %v18332_v53 = vpop.f32.mrb[170].mxu1 }
 0x44b   : > { %8053 = vmatmul.mubr.bf16.gmra.mrb[252].mxu0 %v16815_v38  ;;  %20518 = vst [vmem:[#allocation63_spill] sm:$0xff] %v18332_v53  ;;  %v6801_v38 = vpop.f32.mrb[171].mxu1  ;;  %v16824_v53 = vld [vmem:[%s17427_s12 + $0xa8] sm:$0xff]  }
 0x44c   : > { %8093 = vmatprep.mubr.bf16.mxu0 %v16819_v17  ;;  %v18335_v50 = vpop.f32.mrb[172].mxu1 }
 0x44d   : > { %20519 = vst [vmem:[#allocation64_spill] sm:$0xff] %v18335_v50  ;;  %v6806_v2 = vpop.f32.mrb[173].mxu1  ;;  %14819 = vmatmul.mubr.bf16.gmra.mrb[48].mxu1 %v16879_v29  ;;  %v16825_v50 = vld [vmem:[%s17427_s12 + $0xb8] sm:$0xff]  }
 0x44e   : > { %v18337_v17 = vpop.f32.mrb[174].mxu1 }
 0x44f   : > { %20520 = vst [vmem:[#allocation65_spill] sm:$0xff] %v18337_v17  ;;  %v6809_v9 = vpop.f32.mrb[175].mxu1 }
 0x450   : > { %v18341_v16 = vpop.f32.mrb[176].mxu1  ;;  %v16881_v9 = vld [vmem:[%s17427_s12 + $0x1b0] sm:$0xff]  }
 0x451   : > { %20521 = vst [vmem:[#allocation66_spill] sm:$0xff] %v18341_v16  ;;  %v6814_v0 = vpop.f32.mrb[177].mxu1  ;;  %14822 = vmatprep.mubr.bf16.mxu1 %v16881_v9  ;;  %v16887_v9 = vld [vmem:[%s17427_s12 + $0x1c8] sm:$0xff]  }
 0x452   : > { %v18344_v38 = vpop.f32.mrb[178].mxu1 }
 0x453   : > { %8094 = vmatmul.mubr.bf16.vlgmr.msra.gmra.mrb[0].mxu0 %v16820_v39  ;;  %20522 = vst [vmem:[#allocation67_spill] sm:$0xff] %v18344_v38  ;;  %v6817_v39 = vpop.f32.mrb[179].mxu1  ;;  %v16826_v38 = vld [vmem:[%s17427_s12 + $0xb0] sm:$0xff]  }
 0x454   : > { %8101 = vmatprep.mubr.bf16.mxu0 %v16823_v26  ;;  %v18347_v2 = vpop.f32.mrb[180].mxu1 }
 0x455   : > { %20523 = vst [vmem:[#allocation68_spill] sm:$0xff] %v18347_v2  ;;  %v6822_v17 = vpop.f32.mrb[181].mxu1  ;;  %14823 = vmatmul.mubr.bf16.gmra.mrb[52].mxu1 %v16883_v21  ;;  %v16829_v2 = vld [vmem:[%s17427_s12 + $0xc0] sm:$0xff]  }
 0x456   : > { %v18349_v26 = vpop.f32.mrb[182].mxu1 }
 0x457   : > { %20524 = vst [vmem:[#allocation69_spill] sm:$0xff] %v18349_v26  ;;  %v6825_v16 = vpop.f32.mrb[183].mxu1 }
 0x458   : > { %v18353_v29 = vpop.f32.mrb[184].mxu1  ;;  %v16885_v16 = vld [vmem:[%s17427_s12 + $0x1c0] sm:$0xff]  }
 0x459   : > { %20525 = vst [vmem:[#allocation70_spill] sm:$0xff] %v18353_v29  ;;  %v6830_v0 = vpop.f32.mrb[185].mxu1  ;;  %14826 = vmatprep.mubr.bf16.mxu1 %v16885_v16  ;;  %v16891_v16 = vld [vmem:[%s17427_s12 + $0x1d8] sm:$0xff]  }
 0x45a   : > { %v18356_v39 = vpop.f32.mrb[186].mxu1 }
 0x45b   : > { %8102 = vmatmul.mubr.bf16.gmra.mrb[4].mxu0 %v16824_v53  ;;  %20526 = vst [vmem:[#allocation71_spill] sm:$0xff] %v18356_v39  ;;  %v6833_v53 = vpop.f32.mrb[187].mxu1  ;;  %v16830_v39 = vld [vmem:[%s17427_s12 + $0xb8] sm:$0xff]  }
 0x45c   : > { %8109 = vmatprep.mubr.bf16.mxu0 %v16825_v50  ;;  %v18359_v17 = vpop.f32.mrb[188].mxu1 }
 0x45d   : > { %20527 = vst [vmem:[#allocation72_spill] sm:$0xff] %v18359_v17  ;;  %v6838_v26 = vpop.f32.mrb[189].mxu1  ;;  %14827 = vmatmul.mubr.bf16.gmra.mrb[56].mxu1 %v16887_v9  ;;  %v16831_v17 = vld [vmem:[%s17427_s12 + $0xc8] sm:$0xff]  }
 0x45e   : > { %v18361_v50 = vpop.f32.mrb[190].mxu1 }
 0x45f   : > { %20528 = vst [vmem:[#allocation73_spill] sm:$0xff] %v18361_v50  ;;  %v6841_v29 = vpop.f32.mrb[191].mxu1 }
 0x460   : > { %v18365_v21 = vpop.f32.mrb[192].mxu1  ;;  %v16889_v29 = vld [vmem:[%s17427_s12 + $0x1d0] sm:$0xff]  }
 0x461   : > { %20529 = vst [vmem:[#allocation74_spill] sm:$0xff] %v18365_v21  ;;  %v6846_v0 = vpop.f32.mrb[193].mxu1  ;;  %14830 = vmatprep.mubr.bf16.mxu1 %v16889_v29  ;;  %v16895_v29 = vld [vmem:[%s17427_s12 + $0x1f8] sm:$0xff]  }
 0x462   : > { %v18368_v53 = vpop.f32.mrb[194].mxu1 }
 0x463   : > { %8110 = vmatmul.mubr.bf16.gmra.mrb[8].mxu0 %v16826_v38  ;;  %20530 = vst [vmem:[#allocation75_spill] sm:$0xff] %v18368_v53  ;;  %v6849_v38 = vpop.f32.mrb[195].mxu1  ;;  %v16832_v53 = vld [vmem:[%s17427_s12 + $0xc0] sm:$0xff]  }
 0x464   : > { %8117 = vmatprep.mubr.bf16.mxu0 %v16829_v2  ;;  %v18371_v26 = vpop.f32.mrb[196].mxu1 }
 0x465   : > { %20531 = vst [vmem:[#allocation76_spill] sm:$0xff] %v18371_v26  ;;  %v6854_v50 = vpop.f32.mrb[197].mxu1  ;;  %14831 = vmatmul.mubr.bf16.gmra.mrb[60].mxu1 %v16891_v16  ;;  %v16835_v26 = vld [vmem:[%s17427_s12 + $0xd0] sm:$0xff]  }
 0x466   : > { %v18373_v2 = vpop.f32.mrb[198].mxu1 }
 0x467   : > { %20532 = vst [vmem:[#allocation77_spill] sm:$0xff] %v18373_v2  ;;  %v6857_v21 = vpop.f32.mrb[199].mxu1 }
 0x468   : > { %v18377_v9 = vpop.f32.mrb[200].mxu1  ;;  %v16893_v21 = vld [vmem:[%s17427_s12 + $0x1f0] sm:$0xff]  }
 0x469   : > { %20533 = vst [vmem:[#allocation78_spill] sm:$0xff] %v18377_v9  ;;  %v6862_v0 = vpop.f32.mrb[201].mxu1  ;;  %14834 = vmatprep.mubr.bf16.mxu1 %v16893_v21  ;;  %v16899_v21 = vld [vmem:[%s17427_s12 + $0x208] sm:$0xff]  }
 0x46a   : > { %v18380_v38 = vpop.f32.mrb[202].mxu1 }
 0x46b   : > { %8118 = vmatmul.mubr.bf16.gmra.mrb[12].mxu0 %v16830_v39  ;;  %20534 = vst [vmem:[#allocation79_spill] sm:$0xff] %v18380_v38  ;;  %v6865_v39 = vpop.f32.mrb[203].mxu1  ;;  %v16836_v38 = vld [vmem:[%s17427_s12 + $0xc8] sm:$0xff]  }
 0x46c   : > { %8125 = vmatprep.mubr.bf16.mxu0 %v16831_v17  ;;  %v18383_v50 = vpop.f32.mrb[204].mxu1 }
 0x46d   : > { %20535 = vst [vmem:[#allocation80_spill] sm:$0xff] %v18383_v50  ;;  %v6870_v2 = vpop.f32.mrb[205].mxu1  ;;  %14835 = vmatmul.mubr.bf16.gmra.mrb[64].mxu1 %v16895_v29  ;;  %v16837_v50 = vld [vmem:[%s17427_s12 + $0xd8] sm:$0xff]  }
 0x46e   : > { %v18385_v17 = vpop.f32.mrb[206].mxu1 }
 0x46f   : > { %20536 = vst [vmem:[#allocation81_spill] sm:$0xff] %v18385_v17  ;;  %v6873_v9 = vpop.f32.mrb[207].mxu1 }
 0x470   : > { %v18389_v16 = vpop.f32.mrb[208].mxu1  ;;  %v16897_v9 = vld [vmem:[%s17427_s12 + $0x200] sm:$0xff]  }
 0x471   : > { %20537 = vst [vmem:[#allocation82_spill] sm:$0xff] %v18389_v16  ;;  %v6878_v0 = vpop.f32.mrb[209].mxu1  ;;  %14838 = vmatprep.mubr.bf16.mxu1 %v16897_v9  ;;  %v16903_v9 = vld [vmem:[%s17427_s12 + $0x218] sm:$0xff]  }
 0x472   : > { %v18392_v39 = vpop.f32.mrb[210].mxu1 }
 0x473   : > { %8126 = vmatmul.mubr.bf16.gmra.mrb[16].mxu0 %v16832_v53  ;;  %20538 = vst [vmem:[#allocation83_spill] sm:$0xff] %v18392_v39  ;;  %v6881_v53 = vpop.f32.mrb[211].mxu1  ;;  %v16838_v39 = vld [vmem:[%s17427_s12 + $0xd0] sm:$0xff]  }
 0x474   : > { %8133 = vmatprep.mubr.bf16.mxu0 %v16835_v26  ;;  %v18395_v2 = vpop.f32.mrb[212].mxu1 }
 0x475   : > { %20539 = vst [vmem:[#allocation84_spill] sm:$0xff] %v18395_v2  ;;  %v6886_v17 = vpop.f32.mrb[213].mxu1  ;;  %14839 = vmatmul.mubr.bf16.gmra.mrb[68].mxu1 %v16899_v21  ;;  %v16841_v2 = vld [vmem:[%s17427_s12 + $0xe0] sm:$0xff]  }
 0x476   : > { %v18397_v26 = vpop.f32.mrb[214].mxu1 }
 0x477   : > { %20540 = vst [vmem:[#allocation85_spill] sm:$0xff] %v18397_v26  ;;  %v6889_v16 = vpop.f32.mrb[215].mxu1 }
 0x478   : > { %v18401_v29 = vpop.f32.mrb[216].mxu1  ;;  %v16901_v16 = vld [vmem:[%s17427_s12 + $0x210] sm:$0xff]  }
 0x479   : > { %20541 = vst [vmem:[#allocation86_spill] sm:$0xff] %v18401_v29  ;;  %v6894_v0 = vpop.f32.mrb[217].mxu1  ;;  %14842 = vmatprep.mubr.bf16.mxu1 %v16901_v16  ;;  %v16907_v16 = vld [vmem:[%s17427_s12 + $0x228] sm:$0xff]  }
 0x47a   : > { %v18404_v53 = vpop.f32.mrb[218].mxu1 }
 0x47b   : > { %8134 = vmatmul.mubr.bf16.gmra.mrb[20].mxu0 %v16836_v38  ;;  %20542 = vst [vmem:[#allocation87_spill] sm:$0xff] %v18404_v53  ;;  %v6897_v38 = vpop.f32.mrb[219].mxu1  ;;  %v16842_v53 = vld [vmem:[%s17427_s12 + $0xd8] sm:$0xff]  }
 0x47c   : > { %8141 = vmatprep.mubr.bf16.mxu0 %v16837_v50  ;;  %v18407_v17 = vpop.f32.mrb[220].mxu1 }
 0x47d   : > { %20543 = vst [vmem:[#allocation88_spill] sm:$0xff] %v18407_v17  ;;  %v6902_v26 = vpop.f32.mrb[221].mxu1  ;;  %14843 = vmatmul.mubr.bf16.gmra.mrb[72].mxu1 %v16903_v9  ;;  %v16843_v17 = vld [vmem:[%s17427_s12 + $0xf8] sm:$0xff]  }
 0x47e   : > { %v18409_v50 = vpop.f32.mrb[222].mxu1 }
 0x47f   : > { %20544 = vst [vmem:[#allocation89_spill] sm:$0xff] %v18409_v50  ;;  %v6905_v29 = vpop.f32.mrb[223].mxu1 }
 0x480   : > { %v18413_v21 = vpop.f32.mrb[224].mxu1  ;;  %v16905_v29 = vld [vmem:[%s17427_s12 + $0x220] sm:$0xff]  }
 0x481   : > { %20545 = vst [vmem:[#allocation90_spill] sm:$0xff] %v18413_v21  ;;  %v7455_v0 = vpop.f32.mrb[225].mxu1  ;;  %14846 = vmatprep.mubr.bf16.mxu1 %v16905_v29  ;;  %v16911_v29 = vld [vmem:[%s17427_s12 + $0x248] sm:$0xff]  }
 0x482   : > { %v18416_v38 = vpop.f32.mrb[226].mxu1 }
 0x483   : > { %8142 = vmatmul.mubr.bf16.gmra.mrb[24].mxu0 %v16838_v39  ;;  %20546 = vst [vmem:[#allocation91_spill] sm:$0xff] %v18416_v38  ;;  %v7458_v39 = vpop.f32.mrb[227].mxu1  ;;  %v16844_v38 = vld [vmem:[%s17427_s12 + $0xf0] sm:$0xff]  }
 0x484   : > { %8149 = vmatprep.mubr.bf16.mxu0 %v16841_v2  ;;  %v18419_v26 = vpop.f32.mrb[228].mxu1 }
 0x485   : > { %20547 = vst [vmem:[#allocation92_spill] sm:$0xff] %v18419_v26  ;;  %v7463_v50 = vpop.f32.mrb[229].mxu1  ;;  %14847 = vmatmul.mubr.bf16.gmra.mrb[76].mxu1 %v16907_v16  ;;  %v16847_v26 = vld [vmem:[%s17427_s12 + $0x100] sm:$0xff]  }
 0x486   : > { %v18421_v2 = vpop.f32.mrb[230].mxu1 }
 0x487   : > { %20548 = vst [vmem:[#allocation93_spill] sm:$0xff] %v18421_v2  ;;  %v7466_v21 = vpop.f32.mrb[231].mxu1 }
 0x488   : > { %v18425_v9 = vpop.f32.mrb[232].mxu1  ;;  %v16909_v21 = vld [vmem:[%s17427_s12 + $0x240] sm:$0xff]  }
 0x489   : > { %20549 = vst [vmem:[#allocation94_spill] sm:$0xff] %v18425_v9  ;;  %v7471_v0 = vpop.f32.mrb[233].mxu1  ;;  %14850 = vmatprep.mubr.bf16.mxu1 %v16909_v21  ;;  %v16915_v21 = vld [vmem:[%s17427_s12 + $0x258] sm:$0xff]  }
 0x48a   : > { %v18428_v39 = vpop.f32.mrb[234].mxu1 }
 0x48b   : > { %8150 = vmatmul.mubr.bf16.gmra.mrb[28].mxu0 %v16842_v53  ;;  %20550 = vst [vmem:[#allocation95_spill] sm:$0xff] %v18428_v39  ;;  %v7474_v53 = vpop.f32.mrb[235].mxu1  ;;  %v16848_v39 = vld [vmem:[%s17427_s12 + $0xf8] sm:$0xff]  }
 0x48c   : > { %8157 = vmatprep.mubr.bf16.mxu0 %v16843_v17  ;;  %v18431_v50 = vpop.f32.mrb[236].mxu1 }
 0x48d   : > { %20551 = vst [vmem:[#allocation96_spill] sm:$0xff] %v18431_v50  ;;  %v7479_v2 = vpop.f32.mrb[237].mxu1  ;;  %14851 = vmatmul.mubr.bf16.gmra.mrb[80].mxu1 %v16911_v29  ;;  %v16850_v50 = vld [vmem:[%s17427_s12 + $0x108] sm:$0xff]  }
 0x48e   : > { %v18433_v17 = vpop.f32.mrb[238].mxu1 }
 0x48f   : > { %20552 = vst [vmem:[#allocation97_spill] sm:$0xff] %v18433_v17  ;;  %v7482_v9 = vpop.f32.mrb[239].mxu1 }
 0x490   : > { %v18437_v16 = vpop.f32.mrb[240].mxu1  ;;  %v16913_v9 = vld [vmem:[%s17427_s12 + $0x250] sm:$0xff]  }
 0x491   : > { %20553 = vst [vmem:[#allocation98_spill] sm:$0xff] %v18437_v16  ;;  %v7487_v0 = vpop.f32.mrb[241].mxu1  ;;  %14854 = vmatprep.mubr.bf16.mxu1 %v16913_v9  ;;  %v16856_v9 = vld [vmem:[%s17427_s12 + $0x108] sm:$0xff]  }
 0x492   : > { %v18440_v53 = vpop.f32.mrb[242].mxu1 }
 0x493   : > { %8158 = vmatmul.mubr.bf16.gmra.mrb[32].mxu0 %v16844_v38  ;;  %20554 = vst [vmem:[#allocation99_spill] sm:$0xff] %v18440_v53  ;;  %v7490_v38 = vpop.f32.mrb[243].mxu1 }
 0x494   : > { %8165 = vmatprep.mubr.bf16.mxu0 %v16847_v26  ;;  %v18443_v2 = vpop.f32.mrb[244].mxu1  ;;  %v16852_v38 = vld [vmem:[%s17427_s12 + $0x100] sm:$0xff]  }
 0x495   : > { %20555 = vst [vmem:[#allocation100_spill] sm:$0xff] %v18443_v2  ;;  %v7495_v17 = vpop.f32.mrb[245].mxu1  ;;  %14855 = vmatmul.mubr.bf16.gmra.mrb[84].mxu1 %v16915_v21  ;;  %v16858_v21 = vld [vmem:[%s17427_s12 + $0x118] sm:$0xff]  }
 0x496   : > { %v18445_v26 = vpop.f32.mrb[246].mxu1  ;;  %v16854_v17 = vld [vmem:[%s17427_s12 + $0x110] sm:$0xff]  }
 0x497   : > { %20556 = vst [vmem:[#allocation101_spill] sm:$0xff] %v18445_v26  ;;  %v7498_v44 = vpop.f32.mrb[247].mxu1 }
 0x498   : > { %v18449_v29 = vpop.f32.mrb[248].mxu1 }
 0x499   : > { %20557 = vst [vmem:[#allocation102_spill] sm:$0xff] %v18449_v29  ;;  %v7503_v0 = vpop.f32.mrb[249].mxu1 }
 0x49a   : > { %v18452_v53 = vpop.f32.mrb[250].mxu1  ;;  %v16917_v0 = vld [vmem:[%s17427_s12 + $0x260] sm:$0xff]  }
 0x49b   : > { %8166 = vmatmul.mubr.bf16.gmra.mrb[36].mxu0 %v16848_v39  ;;  %20558 = vst [vmem:[#allocation103_spill] sm:$0xff] %v18452_v53  ;;  %v7506_v39 = vpop.f32.mrb[251].mxu1  ;;  %v16919_v53 = vld [vmem:[%s17427_s12 + $0x268] sm:$0xff]   ;;  %14858 = vmatprep.mubr.bf16.mxu1 %v16917_v0  ;;  %v16864_v0 = vld [vmem:[%s17427_s12 + $0x118] sm:$0xff]  }
 0x49c   : > { %8173 = vmatprep.mubr.bf16.mxu0 %v16850_v50  ;;  %v18455_v2 = vpop.f32.mrb[252].mxu1 }
 0x49d   : > { %20559 = vst [vmem:[#allocation104_spill] sm:$0xff] %v18455_v2  ;;  %v7511_v26 = vpop.f32.mrb[253].mxu1  ;;  %14859 = vmatmul.mubr.bf16.gmra.mrb[88].mxu1 %v16919_v53  ;;  %v16923_v2 = vld [vmem:[%s17427_s12 + $0x278] sm:$0xff]   ;;  %v16925_v53 = vld [vmem:[%s17427_s12 + $0x290] sm:$0xff]  }
 0x49e   : > { %v18457_v44 = vpop.f32.mrb[254].mxu1 }
 0x49f   : > { %20560 = vst [vmem:[#allocation105_spill] sm:$0xff] %v18457_v44  ;;  %v7514_v50 = vpop.f32.mrb[255].mxu1  ;;  %v16862_v44 = vld [vmem:[%s17427_s12 + $0x120] sm:$0xff]  }
 0x4a0   : > { %v18462_v29 = vpop.f32.mrb[0].mxu1  ;;  %v16921_v50 = vld [vmem:[%s17427_s12 + $0x270] sm:$0xff]  }
 0x4a1   : > { %v18465_v39 = vpop.f32.mrb[1].mxu1  ;;  %14862 = vmatprep.mubr.bf16.mxu1 %v16921_v50  ;;  %v16870_v50 = vld [vmem:[%s17427_s12 + $0x130] sm:$0xff]  }
 0x4a2   : > { %v18467_v26 = vpop.f32.mrb[2].mxu1 }
 0x4a3   : > { %8174 = vmatmul.mubr.bf16.gmra.mrb[40].mxu0 %v16852_v38  ;;  %v18469_v38 = vpop.f32.mrb[3].mxu1 }
 0x4a4   : > { %8181 = vmatprep.mubr.bf16.mxu0 %v16854_v17  ;;  %v16860_v17 = vld [vmem:[%s17427_s12 + $0x110] sm:$0xff]   ;;  %v18476_v16 = vpop.f32.mrb[4].mxu1 }
 0x4a5   : > { %14863 = vmatmul.mubr.bf16.gmra.mrb[92].mxu1 %v16923_v2  ;;  %v18480_v59 = vpop.f32.mrb[5].mxu1 }
 0x4a6   : > { %v18483_v41 = vpop.f32.mrb[6].mxu1  ;;  %14866 = vmatprep.mubr.bf16.mxu1 %v16925_v53  ;;  %v16872_v53 = vld [vmem:[%s17427_s12 + $0x128] sm:$0xff]  }
 0x4a7   : > { %v18485_v2 = vpop.f32.mrb[7].mxu1 }
 0x4ab   : > { %8182 = vmatmul.mubr.bf16.gmra.mrb[44].mxu0 %v16856_v9  ;;  %v16866_v9 = vld [vmem:[%s17427_s12 + $0x128] sm:$0xff]  }
 0x4ac   : > { %8189 = vmatprep.mubr.bf16.mxu0 %v16858_v21  ;;  %v16927_v21 = vld [vmem:[%s17427_s12 + $0x298] sm:$0xff]  }
 0x4ad   : > { %14867 = vmatmul.mubr.bf16.gmra.mrb[96].mxu1 %v16927_v21  ;;  %v16874_v21 = vld [vmem:[%s17427_s12 + $0x148] sm:$0xff]  }
 0x4b3   : > { %8190 = vmatmul.mubr.bf16.gmra.mrb[48].mxu0 %v16860_v17  ;;  %v16929_v17 = vld [vmem:[%s17427_s12 + $0x2a0] sm:$0xff]  }
 0x4b4   : > { %8197 = vmatprep.mubr.bf16.mxu0 %v16862_v44  ;;  %v16868_v44 = vld [vmem:[%s17427_s12 + $0x120] sm:$0xff]   ;;  %14870 = vmatprep.mubr.bf16.mxu1 %v16929_v17 }
 0x4b5   : > { %14871 = vmatmul.mubr.bf16.gmra.mrb[100].mxu1 %v16931_v35  ;;  %v16937_v17 = vld [vmem:[%s17427_s12 + $0x2c0] sm:$0xff]  }
 0x4b6   : > { %14874 = vmatprep.mubr.bf16.mxu1 %v16933_v5  ;;  %v16880_v5 = vld [vmem:[%s17427_s12 + $0x148] sm:$0xff]  }
 0x4b9   : > { %v18492_v10 = vpop.f32.mrb[8].mxu1 }
 0x4ba   : > { %v18496_v55 = vpop.f32.mrb[9].mxu1 }
 0x4bb   : > { %8198 = vmatmul.mubr.bf16.gmra.mrb[52].mxu0 %v16864_v0  ;;  %v16935_v0 = vld [vmem:[%s17427_s12 + $0x2b8] sm:$0xff]  }
 0x4bc   : > { %8205 = vmatprep.mubr.bf16.mxu0 %v16866_v9  ;;  %v18499_v9 = vpop.f32.mrb[10].mxu1 }
 0x4bd   : > { %v18501_v35 = vpop.f32.mrb[11].mxu1  ;;  %14875 = vmatmul.mubr.bf16.gmra.mrb[104].mxu1 %v16935_v0  ;;  %v16882_v0 = vld [vmem:[%s17427_s12 + $0x158] sm:$0xff]  }
 0x4be   : > { %14878 = vmatprep.mubr.bf16.mxu1 %v16937_v17  ;;  %v16945_v17 = vld [vmem:[%s17427_s12 + $0x2f0] sm:$0xff]  }
 0x4c1   : > { %v18508_v32 = vpop.f32.mrb[12].mxu1 }
 0x4c2   : > { %v18512_v7 = vpop.f32.mrb[13].mxu1 }
 0x4c3   : > { %8206 = vmatmul.mubr.bf16.gmra.mrb[56].mxu0 %v16868_v44  ;;  %v16876_v44 = vld [vmem:[%s17427_s12 + $0x140] sm:$0xff]  }
 0x4c4   : > { %8213 = vmatprep.mubr.bf16.mxu0 %v16870_v50  ;;  %v16878_v50 = vld [vmem:[%s17427_s12 + $0x150] sm:$0xff]  }
 0x4c5   : > { %14879 = vmatmul.mubr.bf16.gmra.mrb[108].mxu1 %v16939_v51 }
 0x4c6   : > { %14882 = vmatprep.mubr.bf16.mxu1 %v16941_v25  ;;  %v16949_v25 = vld [vmem:[%s17427_s12 + $0x300] sm:$0xff]  }
 0x4cb   : > { %8214 = vmatmul.mubr.bf16.gmra.mrb[60].mxu0 %v16872_v53  ;;  %v16943_v53 = vld [vmem:[%s17427_s12 + $0x2e8] sm:$0xff]  }
 0x4cc   : > { %8221 = vmatprep.mubr.bf16.mxu0 %v16874_v21  ;;  %v18515_v21 = vpop.f32.mrb[14].mxu1 }
 0x4cd   : > { %v18517_v51 = vpop.f32.mrb[15].mxu1  ;;  %14883 = vmatmul.mubr.bf16.gmra.mrb[112].mxu1 %v16943_v53 }
 0x4ce   : > { %14886 = vmatprep.mubr.bf16.mxu1 %v16945_v17  ;;  %v18524_v37 = vpop.f32.mrb[16].mxu1  ;;  %v16892_v17 = vld [vmem:[%s17427_s12 + $0x160] sm:$0xff]  }
 0x4cf   : > { %v18528_v13 = vpop.f32.mrb[17].mxu1 }
 0x4d0   : > { %v18534_v53 = vpop.f32.mrb[18].mxu1 }
 0x4d3   : > { %8222 = vmatmul.mubr.bf16.gmra.mrb[64].mxu0 %v16876_v44  ;;  %v16884_v44 = vld [vmem:[%s17427_s12 + $0x150] sm:$0xff]  }
 0x4d4   : > { %8229 = vmatprep.mubr.bf16.mxu0 %v16878_v50  ;;  %v16886_v50 = vld [vmem:[%s17427_s12 + $0x160] sm:$0xff]  }
 0x4d5   : > { %14887 = vmatmul.mubr.bf16.gmra.mrb[116].mxu1 %v16947_v60  ;;  %v18536_v60 = vpop.f32.mrb[19].mxu1 }
 0x4d6   : > { %14890 = vmatprep.mubr.bf16.mxu1 %v16949_v25  ;;  %v16958_v25 = vld [vmem:[%s20432_s4 + $0x30] sm:$0xff]  }
 0x4db   : > { %8230 = vmatmul.mubr.bf16.gmra.mrb[68].mxu0 %v16880_v5  ;;  %v16951_v5 = vld [vmem:[%s17427_s12 + $0x308] sm:$0xff]  }
 0x4dc   : > { %8237 = vmatprep.mubr.bf16.mxu0 %v16882_v0  ;;  %v16952_v0 = vld [vmem:[%s20432_s4 + $0x20] sm:$0xff]  }
 0x4dd   : > { %14891 = vmatmul.mubr.bf16.gmra.mrb[120].mxu1 %v16951_v5  ;;  %14898 = vmatprep.subr.bf16.mxu1 %v16952_v0  ;;  %v16896_v5 = vld [vmem:[%s17427_s12 + $0x168] sm:$0xff]  }
 0x4de   : > { %14899 = vmatpush3.bf16.msra.mxu1 %v16952_v0  ;;  %v18553_v0 = vpop.f32.mrb[20].mxu1 }
 0x4e3   : > { %8238 = vmatmul.mubr.bf16.gmra.mrb[72].mxu0 %v16884_v44  ;;  %v16954_v44 = vld [vmem:[%s20432_s4 + $0x28] sm:$0xff]  }
 0x4e4   : > { %8245 = vmatprep.mubr.bf16.mxu0 %v16886_v50  ;;  %14900 = vmatprep.subr.bf16.mxu1 %v16954_v44  ;;  %v16955_v50 = vld [vmem:[%s17427_s12 + $0x310] sm:$0xff]  }
 0x4e5   : > { %14901 = vmatpush3.bf16.msra.mxu1 %v16954_v44  ;;  %14894 = vmatprep.mubr.bf16.mxu1 %v16955_v50  ;;  %v18556_v44 = vpop.f32.mrb[21].mxu1  ;;  %v16900_v50 = vld [vmem:[%s17427_s12 + $0x170] sm:$0xff]  }
 0x4e6   : > { %14895 = vmatmul.mubr.bf16.gmra.mrb[124].mxu1 %v16957_v58  ;;  %14902 = vmatprep.subr.bf16.mxu1 %v16958_v25  ;;  %v16898_v58 = vld [vmem:[%s17427_s12 + $0x178] sm:$0xff]  }
 0x4e9   : > { %14903 = vmatpush3.bf16.msra.mxu1 %v16958_v25  ;;  %v16902_v25 = vld [vmem:[%s17427_s12 + $0x180] sm:$0xff]  }
 0x4eb   : > { %8246 = vmatmul.mubr.bf16.gmra.mrb[76].mxu0 %v16888_v47  ;;  %v20561_v47 = vmov 0  }
 0x4ec   : > { %8253 = vmatprep.mubr.bf16.mxu0 %v16890_v24  ;;  %v16960_v24 = vld [vmem:[%s20432_s4 + $0x38] sm:$0xff]   ;;  %14906 = vmatprep.mubr.bf16.mxu1 %v20561_v47 }
 0x4ed   : > { %14904 = vmatprep.subr.bf16.mxu1 %v16960_v24 }
 0x4ee   : > { %14905 = vmatpush3.bf16.msra.mxu1 %v16960_v24  ;;  %v16904_v24 = vld [vmem:[%s17427_s12 + $0x178] sm:$0xff]  }
 0x4f1   : > { %14907 = vmatmul.mubr.bf16.vlgmr.msra.gmra.mrb[128].mxu1 %v20561_v47 }
 0x4f2   : > { %14910 = vmatprep.mubr.bf16.mxu1 %v20561_v47 }
 0x4f3   : > { %8254 = vmatmul.mubr.bf16.gmra.mrb[80].mxu0 %v16892_v17  ;;  %v18558_v17 = vpop.f32.mrb[22].mxu1 }
 0x4f4   : > { %8261 = vmatprep.mubr.bf16.mxu0 %v16894_v61  ;;  %v18560_v61 = vpop.f32.mrb[23].mxu1 }
 0x4f5   : > { %v18569_v43 = vpop.f32.mrb[24].mxu1 }
 0x4f6   : > { %20562 = vst [vmem:[#allocation106_spill] sm:$0xff] %v18569_v43  ;;  %v18571_v33 = vpop.f32.mrb[25].mxu1 }
 0x4f9   : > { %14911 = vmatmul.mubr.bf16.gmra.mrb[132].mxu1 %v20561_v47 }
 0x4fb   : > { %8262 = vmatmul.mubr.bf16.gmra.mrb[84].mxu0 %v16896_v5  ;;  %v18573_v5 = vpop.f32.mrb[26].mxu1 }
 0x4fc   : > { %8269 = vmatprep.mubr.bf16.mxu0 %v16898_v58  ;;  %20563 = vst [vmem:[#allocation107_spill] sm:$0xff] %v18573_v5  ;;  %v18575_v58 = vpop.f32.mrb[27].mxu1  ;;  %v16916_v5 = vld [vmem:[%s17427_s12 + $0x1a0] sm:$0xff]  }
 0x4fd   : > { %20564 = vst [vmem:[#allocation108_spill] sm:$0xff] %v18575_v58  ;;  %v18581_v47 = vpop.f32.mrb[28].mxu1 }
 0x4fe   : > { %20565 = vst [vmem:[#allocation109_spill] sm:$0xff] %v18581_v47  ;;  %v18583_v15 = vpop.f32.mrb[29].mxu1  ;;  %v16922_v47 = vld [vmem:[%s17427_s12 + $0x1b8] sm:$0xff]  }
 0x4ff   : > { %20566 = vst [vmem:[#allocation110_spill] sm:$0xff] %v18583_v15  ;;  %v18585_v4 = vpop.f32.mrb[30].mxu1 }
 0x500   : > { %20567 = vst [vmem:[#allocation111_spill] sm:$0xff] %v18585_v4 }
 0x503   : > { %8270 = vmatmul.mubr.bf16.gmra.mrb[88].mxu0 %v16900_v50  ;;  %v16912_v50 = vld [vmem:[%s17427_s12 + $0x198] sm:$0xff]  }
 0x504   : > { %8277 = vmatprep.mubr.bf16.mxu0 %v16902_v25  ;;  %v16914_v25 = vld [vmem:[%s17427_s12 + $0x1a8] sm:$0xff]  }
 0x50b   : > { %8278 = vmatmul.mubr.bf16.gmra.mrb[92].mxu0 %v16904_v24  ;;  %v18587_v24 = vpop.f32.mrb[31].mxu1 }
 0x50c   : > { %8285 = vmatprep.mubr.bf16.mxu0 %v16906_v49  ;;  %20568 = vst [vmem:[#allocation112_spill] sm:$0xff] %v18587_v24  ;;  %v16918_v49 = vld [vmem:[%s17427_s12 + $0x1b0] sm:$0xff]   ;;  %v18594_v15 = vpop.f32.mrb[32].mxu1 }
 0x50d   : > { %20569 = vst [vmem:[#allocation113_spill] sm:$0xff] %v18594_v15  ;;  %v18600_v24 = vpop.f32.mrb[33].mxu1  ;;  %v16930_v15 = vld [vmem:[%s17427_s12 + $0x1c8] sm:$0xff]  }
 0x513   : > { %8286 = vmatmul.mubr.bf16.gmra.mrb[96].mxu0 %v16908_v27 }
 0x514   : > { %8293 = vmatprep.mubr.bf16.mxu0 %v16910_v19 }
 0x51b   : > { %8294 = vmatmul.mubr.bf16.gmra.mrb[100].mxu0 %v16912_v50 }
 0x51c   : > { %8301 = vmatprep.mubr.bf16.mxu0 %v16914_v25 }
 0x523   : > { %8302 = vmatmul.mubr.bf16.gmra.mrb[104].mxu0 %v16916_v5  ;;  %v18602_v5 = vpop.f32.mrb[34].mxu1 }
 0x524   : > { %8309 = vmatprep.mubr.bf16.mxu0 %v16918_v49  ;;  %20570 = vst [vmem:[#allocation114_spill] sm:$0xff] %v18602_v5 }
 0x526   : > { %v8095_v27 = vpop.f32.mrb[0].mxu0 }
 0x527   : > { %v15430_v19 = vadd.f32 %v8095_v27, %v17978_v3  ;;  %v8097_v43 = vpop.f32.mrb[1].mxu0 }
 0x528   : > { %v8098_v58 = vpop.f32.mrb[2].mxu0  ;;  %v18607_v43 = vpop.f32.mrb[35].mxu1 }
 0x529   : > { %v15431_v50 = vadd.f32 %v8098_v58, %v17981_v6  ;;  %v18598_v4 = vadd.f32 %v15430_v19, %v18465_v39  ;;  %v8100_v25 = vpop.f32.mrb[3].mxu0  ;;  %20571 = vst [vmem:[#allocation115_spill] sm:$0xff] %v18607_v43  ;;  %v16924_v39 = vld [vmem:[%s17427_s12 + $0x1b0] sm:$0xff]   ;;  %v16926_v19 = vld [vmem:[%s17427_s12 + $0x1c0] sm:$0xff]   ;;  %v18622_v43 = vpop.f32.mrb[36].mxu1 }
 0x52b   : > { %v18605_v3 = vadd.f32 %v15431_v50, %v18469_v38  ;;  %8310 = vmatmul.mubr.bf16.gmra.mrb[108].mxu0 %v16920_v63 }
 0x52c   : > { %8317 = vmatprep.mubr.bf16.mxu0 %v16922_v47 }
 0x52e   : > { %v8103_v49 = vpop.f32.mrb[4].mxu0 }
 0x52f   : > { %v15432_v27 = vadd.f32 %v8103_v49, %v17986_v11  ;;  %v8105_v6 = vpop.f32.mrb[5].mxu0  ;;  %v16928_v49 = vld [vmem:[%s17427_s12 + $0x1b8] sm:$0xff]  }
 0x530   : > { %v8106_v58 = vpop.f32.mrb[6].mxu0 }
 0x531   : > { %v18613_v25 = vadd.f32 %v15432_v27, %v18462_v29  ;;  %v15433_v5 = vadd.f32 %v8106_v58, %v17989_v14  ;;  %v8108_v38 = vpop.f32.mrb[7].mxu0 }
 0x533   : > { %v18617_v63 = vadd.f32 %v15433_v5, %v18467_v26  ;;  %8318 = vmatmul.mubr.bf16.gmra.mrb[112].mxu0 %v16924_v39  ;;  %v18628_v5 = vpop.f32.mrb[37].mxu1 }
 0x534   : > { %8325 = vmatprep.mubr.bf16.mxu0 %v16926_v19  ;;  %v18630_v27 = vpop.f32.mrb[38].mxu1 }
 0x535   : > { %v18635_v39 = vpop.f32.mrb[39].mxu1 }
 0x536   : > { %v8111_v47 = vpop.f32.mrb[8].mxu0 }
 0x537   : > { %v15434_v50 = vadd.f32 %v8111_v47, %v17997_v20  ;;  %v8113_v11 = vpop.f32.mrb[9].mxu0  ;;  %v16934_v47 = vld [vmem:[%s17427_s12 + $0x1d0] sm:$0xff]  }
 0x538   : > { %v8114_v6 = vpop.f32.mrb[10].mxu0 }
 0x539   : > { %v15435_v29 = vadd.f32 %v8114_v6, %v18000_v23  ;;  %v18626_v14 = vadd.f32 %v15434_v50, %v18480_v59  ;;  %v8116_v26 = vpop.f32.mrb[11].mxu0  ;;  %v16932_v59 = vld [vmem:[%s17427_s12 + $0x1c0] sm:$0xff]  }
 0x53b   : > { %v18633_v20 = vadd.f32 %v15435_v29, %v18485_v2  ;;  %8326 = vmatmul.mubr.bf16.gmra.mrb[116].mxu0 %v16928_v49  ;;  %v16936_v29 = vld [vmem:[%s17427_s12 + $0x1c8] sm:$0xff]  }
 0x53c   : > { %8333 = vmatprep.mubr.bf16.mxu0 %v16930_v15 }
 0x53e   : > { %v8119_v58 = vpop.f32.mrb[12].mxu0 }
 0x53f   : > { %v15436_v19 = vadd.f32 %v8119_v58, %v18006_v28  ;;  %v8121_v23 = vpop.f32.mrb[13].mxu0  ;;  %v16938_v58 = vld [vmem:[%s17427_s12 + $0x1e8] sm:$0xff]  }
 0x540   : > { %v8122_v38 = vpop.f32.mrb[14].mxu0  ;;  %v18650_v23 = vpop.f32.mrb[40].mxu1 }
 0x541   : > { %v18641_v50 = vadd.f32 %v15436_v19, %v18476_v16  ;;  %v15437_v11 = vadd.f32 %v8122_v38, %v18009_v31  ;;  %v8124_v2 = vpop.f32.mrb[15].mxu0  ;;  %v18656_v19 = vpop.f32.mrb[41].mxu1 }
 0x543   : > { %v18645_v49 = vadd.f32 %v15437_v11, %v18483_v41  ;;  %8334 = vmatmul.mubr.bf16.gmra.mrb[120].mxu0 %v16932_v59  ;;  %v18658_v59 = vpop.f32.mrb[42].mxu1 }
 0x544   : > { %8341 = vmatprep.mubr.bf16.mxu0 %v16934_v47  ;;  %v18663_v38 = vpop.f32.mrb[43].mxu1 }
 0x546   : > { %v8127_v15 = vpop.f32.mrb[16].mxu0 }
 0x547   : > { %v15438_v6 = vadd.f32 %v8127_v15, %v18014_v36  ;;  %v8129_v28 = vpop.f32.mrb[17].mxu0  ;;  %v16942_v15 = vld [vmem:[%s17427_s12 + $0x1f0] sm:$0xff]  }
 0x548   : > { %v8130_v26 = vpop.f32.mrb[18].mxu0 }
 0x549   : > { %v15439_v16 = vadd.f32 %v8130_v26, %v18017_v40  ;;  %v18654_v31 = vadd.f32 %v15438_v6, %v18496_v55  ;;  %v8132_v41 = vpop.f32.mrb[19].mxu0  ;;  %v16940_v55 = vld [vmem:[%s17427_s12 + $0x1e0] sm:$0xff]  }
 0x54b   : > { %v18661_v36 = vadd.f32 %v15439_v16, %v18501_v35  ;;  %8342 = vmatmul.mubr.bf16.gmra.mrb[124].mxu0 %v16936_v29  ;;  %v16944_v16 = vld [vmem:[%s17427_s12 + $0x1e8] sm:$0xff]  }
 0x54c   : > { %8349 = vmatprep.mubr.bf16.mxu0 %v16938_v58 }
 0x54e   : > { %v8135_v47 = vpop.f32.mrb[20].mxu0 }
 0x54f   : > { %v15440_v11 = vadd.f32 %v8135_v47, %v18022_v45  ;;  %v8137_v40 = vpop.f32.mrb[21].mxu0  ;;  %v16946_v47 = vld [vmem:[%s17427_s12 + $0x1f8] sm:$0xff]  }
 0x550   : > { %v8138_v2 = vpop.f32.mrb[22].mxu0  ;;  %v18678_v40 = vpop.f32.mrb[44].mxu1 }
 0x551   : > { %v18669_v6 = vadd.f32 %v15440_v11, %v18492_v10  ;;  %v15441_v28 = vadd.f32 %v8138_v2, %v18025_v48  ;;  %v8140_v35 = vpop.f32.mrb[23].mxu0  ;;  %v18684_v11 = vpop.f32.mrb[45].mxu1 }
 0x553   : > { %v18673_v29 = vadd.f32 %v15441_v28, %v18499_v9  ;;  %8350 = vmatmul.mubr.bf16.gmra.mrb[128].mxu0 %v16940_v55  ;;  %v18686_v55 = vpop.f32.mrb[46].mxu1 }
 0x554   : > { %8357 = vmatprep.mubr.bf16.mxu0 %v16942_v15  ;;  %v18691_v2 = vpop.f32.mrb[47].mxu1 }
 0x556   : > { %v8143_v26 = vpop.f32.mrb[24].mxu0 }
 0x557   : > { %v15442_v58 = vadd.f32 %v8143_v26, %v18033_v54  ;;  %v8145_v45 = vpop.f32.mrb[25].mxu0  ;;  %v16950_v26 = vld [vmem:[%s17427_s12 + $0x200] sm:$0xff]  }
 0x558   : > { %v8146_v41 = vpop.f32.mrb[26].mxu0 }
 0x559   : > { %v15443_v10 = vadd.f32 %v8146_v41, %v18036_v57  ;;  %v18682_v48 = vadd.f32 %v15442_v58, %v18512_v7  ;;  %v8148_v9 = vpop.f32.mrb[27].mxu0  ;;  %v16948_v57 = vld [vmem:[%s17427_s12 + $0x1f0] sm:$0xff]   ;;  %v18699_v58 = vld [vmem:[%s20430_s2] ss:$0 sm:$0xff] }
 0x55b   : > { %v18689_v54 = vadd.f32 %v15443_v10, %v18517_v51  ;;  %8358 = vmatmul.mubr.bf16.gmra.mrb[132].mxu0 %v16944_v16 }
 0x55c   : > { %8365 = vmatprep.mubr.bf16.mxu0 %v16946_v47  ;;  %v18713_v47 = vld [vmem:[%s20431_s3] ss:$0 sm:$0xff] }
 0x55e   : > { %v8151_v15 = vpop.f32.mrb[28].mxu0 }
 0x55f   : > { %v15444_v28 = vadd.f32 %v8151_v15, %v18042_v62  ;;  %v8153_v35 = vpop.f32.mrb[29].mxu0  ;;  %v9157_v62 = vmul.f32 %v18699_v58, %v18598_v4  ;;  %v16953_v15 = vld [vmem:[%s17427_s12 + $0x1f8] sm:$0xff]  }
 0x560   : > { %v8154_v7 = vpop.f32.mrb[30].mxu0  ;;  %v16956_v35 = vld [vmem:[%s17427_s12 + $0x208] sm:$0xff]  }
 0x561   : > { %v18702_v51 = vadd.f32 %v15444_v28, %v18508_v32  ;;  %v15445_v45 = vadd.f32 %v8154_v7, %v18045_v1  ;;  %v8156_v16 = vpop.f32.mrb[31].mxu0  ;;  %v9158_v32 = vmul.f32 %v18699_v58, %v18605_v3 }
 0x563   : > { %v18706_v41 = vadd.f32 %v15445_v45, %v18515_v21  ;;  %8366 = vmatmul.mubr.bf16.gmra.mrb[136].mxu0 %v16948_v57  ;;  %v9291_v21 = vadd.f32 %v18713_v47, %v9157_v62  ;;  %v18721_v57 = vpop.f32.mrb[48].mxu1  ;;  %v9292_v3 = vadd.f32 %v18713_v47, %v9158_v32 }
 0x564   : > { %8373 = vmatprep.mubr.bf16.mxu0 %v16950_v26  ;;  %20572 = vst [vmem:[#allocation116_spill] sm:$0xff] %v18721_v57  ;;  %v18725_v45 = vpop.f32.mrb[49].mxu1 }
 0x565   : > { %v18728_v16 = vpop.f32.mrb[50].mxu1 }
 0x566   : > { %v8159_v10 = vpop.f32.mrb[32].mxu0  ;;  %20573 = vst [vmem:[#allocation117_spill] sm:$0xff] %v18728_v16  ;;  %v18732_v62 = vpop.f32.mrb[51].mxu1 }
 0x567   : > { %v15446_v1 = vadd.f32 %v8159_v10, %v18050_v8  ;;  %v8161_v9 = vpop.f32.mrb[33].mxu0 }
 0x568   : > { %v8162_v28 = vpop.f32.mrb[34].mxu0  ;;  %v9419_v9 = vmax.f32 %v9291_v21, 0.0 }
 0x569   : > { %v15447_v4 = vadd.f32 %v8162_v28, %v18053_v12  ;;  %v8705_v7 = vadd.f32 %v15446_v1, %v18528_v13  ;;  %v8164_v26 = vpop.f32.mrb[35].mxu0  ;;  %v9159_v12 = vmul.f32 %v18699_v58, %v18613_v25  ;;  %v9420_v1 = vmax.f32 %v9292_v3, 0.0 }
 0x56a   : > { %v9160_v28 = vmul.f32 %v18699_v58, %v18617_v63  ;;  %v16959_v26 = vld [vmem:[%s17427_s12 + $0x200] sm:$0xff]   ;;  %v9548_v25 = vsel %vm9547_vm0, %v9419_v9, -inf  ;;  %v9161_v9 = vmul.f32 %v18699_v58, %v18626_v14  ;;  %v9162_v14 = vmul.f32 %v18699_v58, %v18633_v20 }
 0x56b   : > { %v9173_v8 = vmul.f32 %v18699_v58, %v8705_v7  ;;  %v8708_v10 = vadd.f32 %v15447_v4, %v18536_v60  ;;  %8374 = vmatmul.mubr.bf16.gmra.mrb[140].mxu0 %v16953_v15 }
 0x56c   : > { %8381 = vmatprep.mubr.bf16.mxu0 %v16956_v35  ;;  %v9293_v35 = vadd.f32 %v18713_v47, %v9159_v12 }
 0x56d   : > { %v9307_v13 = vadd.f32 %v18713_v47, %v9173_v8  ;;  %v9174_v32 = vmul.f32 %v18699_v58, %v8708_v10  ;;  %v16961_v8 = vld [vmem:[%s17427_s12 + $0x210] sm:$0xff]  }
 0x56e   : > { %v8167_v60 = vpop.f32.mrb[36].mxu0 }
 0x56f   : > { %v9435_v4 = vmax.f32 %v9307_v13, 0.0  ;;  %v9308_v15 = vadd.f32 %v18713_v47, %v9174_v32  ;;  %v15448_v21 = vadd.f32 %v8167_v60, %v18058_v18  ;;  %v8169_v7 = vpop.f32.mrb[37].mxu0  ;;  %v9551_v32 = vsel %vm9547_vm0, %v9420_v1, -inf }
 0x570   : > { %v8170_v16 = vpop.f32.mrb[38].mxu0  ;;  %v9294_v18 = vadd.f32 %v18713_v47, %v9160_v28 }
 0x571   : > { %v9549_v10 = vsel %vm9547_vm0, %v9435_v4, -inf  ;;  %v9436_v3 = vmax.f32 %v9308_v15, 0.0  ;;  %v8713_v57 = vadd.f32 %v15448_v21, %v18524_v37  ;;  %v15449_v63 = vadd.f32 %v8170_v16, %v18061_v22  ;;  %v8172_v13 = vpop.f32.mrb[39].mxu0 }
 0x572   : > { %v9550_v60 = vmax.f32 %v9548_v25, %v9549_v10  ;;  %v9421_v37 = vmax.f32 %v9293_v35, 0.0  ;;  %v9422_v28 = vmax.f32 %v9294_v18, 0.0  ;;  %v9295_v21 = vadd.f32 %v18713_v47, %v9161_v9  ;;  %v16962_v35 = vld [vmem:[%s17427_s12 + $0x208] sm:$0xff]  }
 0x573   : > { %v9552_v12 = vsel %vm9547_vm0, %v9436_v3, -inf  ;;  %v9175_v7 = vmul.f32 %v18699_v58, %v8713_v57  ;;  %v8716_v4 = vadd.f32 %v15449_v63, %v18534_v53  ;;  %8382 = vmatmul.mubr.bf16.gmra.mrb[144].mxu0 %v16959_v26  ;;  %v16963_v3 = vld [vmem:[%s17427_s12 + $0x218] sm:$0xff]   ;;  %v18766_v63 = vpop.f32.mrb[52].mxu1 }
 0x574   : > { %v9553_v22 = vmax.f32 %v9551_v32, %v9552_v12  ;;  %8389 = vmatprep.mubr.bf16.mxu0 %v16961_v8  ;;  %v9554_v8 = vsel %vm9547_vm0, %v9421_v37, -inf  ;;  %v18771_v12 = vpop.f32.mrb[53].mxu1 }
 0x575   : > { %v9309_v16 = vadd.f32 %v18713_v47, %v9175_v7  ;;  %v9176_v1 = vmul.f32 %v18699_v58, %v8716_v4  ;;  %v9296_v7 = vadd.f32 %v18713_v47, %v9162_v14  ;;  %v18775_v37 = vpop.f32.mrb[54].mxu1 }
 0x576   : > { %v8175_v15 = vpop.f32.mrb[40].mxu0 }
 0x577   : > { %v9437_v57 = vmax.f32 %v9309_v16, 0.0  ;;  %v9310_v25 = vadd.f32 %v18713_v47, %v9176_v1  ;;  %v15450_v53 = vadd.f32 %v8175_v15, %v18069_v30  ;;  %v8177_v26 = vpop.f32.mrb[41].mxu0  ;;  %v9557_v30 = vsel %vm9547_vm0, %v9422_v28, -inf }
 0x578   : > { %v8178_v10 = vpop.f32.mrb[42].mxu0  ;;  %v9423_v16 = vmax.f32 %v9295_v21, 0.0  ;;  %v9740_v28 = vsel %vm9547_vm0, %v9550_v60, -inf }
 0x579   : > { %v9555_v13 = vsel %vm9547_vm0, %v9437_v57, -inf  ;;  %v9438_v32 = vmax.f32 %v9310_v25, 0.0  ;;  %v15451_v20 = vadd.f32 %v8178_v10, %v18072_v34  ;;  %v8721_v18 = vadd.f32 %v15450_v53, %v18556_v44  ;;  %v8180_v9 = vpop.f32.mrb[43].mxu0  ;;  %v18780_v34 = vpop.f32.mrb[55].mxu1 }
 0x57a   : > { %v9556_v4 = vmax.f32 %v9554_v8, %v9555_v13  ;;  %v9163_v44 = vmul.f32 %v18699_v58, %v18641_v50  ;;  %v9743_v8 = vsel %vm9547_vm0, %v9553_v22, -inf  ;;  %v9560_v9 = vsel %vm9547_vm0, %v9423_v16, -inf }
 0x57b   : > { %v9558_v1 = vsel %vm9547_vm0, %v9438_v32, -inf  ;;  %v9177_v15 = vmul.f32 %v18699_v58, %v8721_v18  ;;  %v8724_v57 = vadd.f32 %v15451_v20, %v18560_v61  ;;  %8390 = vmatmul.mubr.bf16.gmra.mrb[148].mxu0 %v16962_v35  ;;  %v9424_v61 = vmax.f32 %v9296_v7, 0.0  ;;  %v16964_v20 = vld [vmem:[%s17427_s12 + $0x210] sm:$0xff]  }
 0x57c   : > { %v9559_v14 = vmax.f32 %v9557_v30, %v9558_v1  ;;  %8397 = vmatprep.mubr.bf16.mxu0 %v16963_v3  ;;  %v9741_v25 = vsel %vm9547_vm0, %v9556_v4, -inf  ;;  %v9164_v35 = vmul.f32 %v18699_v58, %v18645_v49  ;;  %v9297_v30 = vadd.f32 %v18713_v47, %v9163_v44  ;;  %v16965_v4 = vld [vmem:[%s17427_s12 + $0x220] sm:$0xff]  }
 0x57d   : > { %v9311_v21 = vadd.f32 %v18713_v47, %v9177_v15  ;;  %v9178_v53 = vmul.f32 %v18699_v58, %v8724_v57  ;;  %v9742_v26 = vmax.f32 %v9740_v28, %v9741_v25  ;;  %v9563_v28 = vsel %vm9547_vm0, %v9424_v61, -inf }
 0x57e   : > { %v8183_v50 = vpop.f32.mrb[44].mxu0  ;;  %v9744_v60 = vsel %vm9547_vm0, %v9559_v14, -inf  ;;  %v9165_v16 = vmul.f32 %v18699_v58, %v18654_v31 }
 0x57f   : > { %v9439_v10 = vmax.f32 %v9311_v21, 0.0  ;;  %v9312_v3 = vadd.f32 %v18713_v47, %v9178_v53  ;;  %v15452_v13 = vadd.f32 %v8183_v50, %v18078_v42  ;;  %v8185_v32 = vpop.f32.mrb[45].mxu0  ;;  %v9745_v18 = vmax.f32 %v9743_v8, %v9744_v60 }
 0x580   : > { %v8186_v7 = vpop.f32.mrb[46].mxu0  ;;  %v9298_v42 = vadd.f32 %v18713_v47, %v9164_v35  ;;  %v9166_v35 = vmul.f32 %v18699_v58, %v18661_v36 }
 0x581   : > { %v9561_v49 = vsel %vm9547_vm0, %v9439_v10, -inf  ;;  %v9440_v22 = vmax.f32 %v9312_v3, 0.0  ;;  %v8729_v1 = vadd.f32 %v15452_v13, %v18553_v0  ;;  %v15453_v15 = vadd.f32 %v8186_v7, %v18081_v46  ;;  %v8188_v57 = vpop.f32.mrb[47].mxu0  ;;  %v16966_v13 = vld [vmem:[%s17427_s12 + $0x218] sm:$0xff]  }
 0x582   : > { %v9562_v14 = vmax.f32 %v9560_v9, %v9561_v49  ;;  %v18803_v25 = vpack.c.bf16 %v9745_v18, %v9742_v26  ;;  %v9425_v46 = vmax.f32 %v9297_v30, 0.0  ;;  %v9426_v31 = vmax.f32 %v9298_v42, 0.0  ;;  %v16967_v18 = vld [vmem:[%s17427_s12 + $0x238] sm:$0xff]   ;;  %v18822_v9 = vpop.f32.mrb[56].mxu1 }
 0x583   : > { %v9564_v44 = vsel %vm9547_vm0, %v9440_v22, -inf  ;;  %v9179_v21 = vmul.f32 %v18699_v58, %v8729_v1  ;;  %v8732_v53 = vadd.f32 %v15453_v15, %v18558_v17  ;;  %8398 = vmatmul.mubr.bf16.gmra.mrb[152].mxu0 %v16964_v20  ;;  %v9299_v17 = vadd.f32 %v18713_v47, %v9165_v16  ;;  %v18827_v22 = vpop.f32.mrb[57].mxu1 }
 0x584   : > { %20574 = vst [vmem:[#allocation118_spill] sm:$0xff] %v18803_v25  ;;  %v9565_v0 = vmax.f32 %v9563_v28, %v9564_v44  ;;  %14914 = vmatprep.mubr.msk.bf16.mxu1 %vm9547_vm0, %v18803_v25  ;;  %8405 = vmatprep.mubr.bf16.mxu0 %v16965_v4  ;;  %v9566_v32 = vsel %vm9547_vm0, %v9425_v46, -inf  ;;  %v9300_v1 = vadd.f32 %v18713_v47, %v9166_v35  ;;  %v18831_v57 = vpop.f32.mrb[58].mxu1  ;;  %v20575_v44 = vld [vmem:[#allocation108_spill] sm:$0xff] }
 0x585   : > { %v9313_v26 = vadd.f32 %v18713_v47, %v9179_v21  ;;  %v9180_v61 = vmul.f32 %v18699_v58, %v8732_v53  ;;  %v9427_v28 = vmax.f32 %v9299_v17, 0.0  ;;  %v9746_v53 = vsel %vm9547_vm0, %v9562_v14, -inf }
 0x586   : > { %v8191_v8 = vpop.f32.mrb[48].mxu0  ;;  %v9168_v17 = vmul.f32 %v18699_v58, %v18673_v29 }
 0x587   : > { %v9441_v50 = vmax.f32 %v9313_v26, 0.0  ;;  %v9314_v60 = vadd.f32 %v18713_v47, %v9180_v61  ;;  %v15454_v10 = vadd.f32 %v8191_v8, %v18086_v52  ;;  %v8193_v3 = vpop.f32.mrb[49].mxu0  ;;  %v9569_v52 = vsel %vm9547_vm0, %v9426_v31, -inf }
 0x588   : > { %v8194_v20 = vpop.f32.mrb[50].mxu0  ;;  %v9428_v8 = vmax.f32 %v9300_v1, 0.0 }
 0x589   : > { %v9567_v30 = vsel %vm9547_vm0, %v9441_v50, -inf  ;;  %v9442_v7 = vmax.f32 %v9314_v60, 0.0  ;;  %v15455_v36 = vadd.f32 %v8194_v20, %v18089_v56  ;;  %v8737_v4 = vadd.f32 %v15454_v10, %v18571_v33  ;;  %v8196_v49 = vpop.f32.mrb[51].mxu0  ;;  %v18836_v56 = vpop.f32.mrb[59].mxu1 }
 0x58a   : > { %v9568_v15 = vmax.f32 %v9566_v32, %v9567_v30  ;;  %v9167_v33 = vmul.f32 %v18699_v58, %v18669_v6  ;;  %v9749_v50 = vsel %vm9547_vm0, %v9565_v0, -inf  ;;  %v9572_v30 = vsel %vm9547_vm0, %v9427_v28, -inf }
 0x58b   : > { %v9570_v42 = vsel %vm9547_vm0, %v9442_v7, -inf  ;;  %v9181_v16 = vmul.f32 %v18699_v58, %v8737_v4  ;;  %v8740_v21 = vadd.f32 %v15455_v36, %v20575_v44  ;;  %8406 = vmatmul.mubr.bf16.gmra.mrb[156].mxu0 %v16966_v13  ;;  %v20576_v13 = vld [vmem:[#allocation4_spill] sm:$0xff]  ;;  %v20579_v44 = vld [vmem:[#allocation5_spill] sm:$0xff]  ;;  %v9169_v28 = vmul.f32 %v18699_v58, %v18682_v48 }
 0x58c   : > { %v9747_v46 = vsel %vm9547_vm0, %v9568_v15, -inf  ;;  %v9571_v26 = vmax.f32 %v9569_v52, %v9570_v42  ;;  %8413 = vmatprep.mubr.bf16.mxu0 %v16967_v18  ;;  %v16968_v18 = vld [vmem:[%s17427_s12 + $0x230] sm:$0xff]   ;;  %v9301_v7 = vadd.f32 %v18713_v47, %v9167_v33  ;;  %v16969_v4 = vld [vmem:[%s17427_s12 + $0x240] sm:$0xff]   ;;  %v9575_v42 = vsel %vm9547_vm0, %v9428_v8, -inf }
 0x58d   : > { %v9748_v61 = vmax.f32 %v9746_v53, %v9747_v46  ;;  %v9315_v31 = vadd.f32 %v18713_v47, %v9181_v16  ;;  %v9182_v35 = vmul.f32 %v18699_v58, %v8740_v21  ;;  %v20578_v52 = vld [vmem:[#allocation106_spill] sm:$0xff]  ;;  %v9302_v53 = vadd.f32 %v18713_v47, %v9168_v17 }
 0x58e   : > { %v9750_v6 = vsel %vm9547_vm0, %v9571_v26, -inf  ;;  %v8199_v14 = vpop.f32.mrb[52].mxu0  ;;  %v9170_v48 = vmul.f32 %v18699_v58, %v18689_v54 }
 0x58f   : > { %v9751_v60 = vmax.f32 %v9749_v50, %v9750_v6  ;;  %v9443_v10 = vmax.f32 %v9315_v31, 0.0  ;;  %v9316_v3 = vadd.f32 %v18713_v47, %v9182_v35  ;;  %v15456_v32 = vadd.f32 %v8199_v14, %v20576_v13  ;;  %v8201_v20 = vpop.f32.mrb[53].mxu0 }
 0x590   : > { %v8202_v36 = vpop.f32.mrb[54].mxu0  ;;  %v9429_v35 = vmax.f32 %v9301_v7, 0.0  ;;  %v9430_v6 = vmax.f32 %v9302_v53, 0.0  ;;  %v9303_v14 = vadd.f32 %v18713_v47, %v9169_v28  ;;  %v18877_v7 = vpop.f32.mrb[60].mxu1 }
 0x591   : > { %v18854_v29 = vpack.c.bf16 %v9751_v60, %v9748_v61  ;;  %v9573_v0 = vsel %vm9547_vm0, %v9443_v10, -inf  ;;  %v9444_v49 = vmax.f32 %v9316_v3, 0.0  ;;  %v8745_v1 = vadd.f32 %v15456_v32, %v20578_v52  ;;  %v8204_v15 = vpop.f32.mrb[55].mxu0  ;;  %v20580_v61 = vld [vmem:[#allocation107_spill] sm:$0xff]  ;;  %v20581_v10 = vld [vmem:[#allocation6_spill] sm:$0xff] }
 0x592   : > { %v9574_v16 = vmax.f32 %v9572_v30, %v9573_v0  ;;  %v15457_v21 = vadd.f32 %v8202_v36, %v20579_v44  ;;  %v16970_v32 = vld [vmem:[%s17427_s12 + $0x238] sm:$0xff]   ;;  %v16971_v30 = vld [vmem:[%s17427_s12 + $0x248] sm:$0xff]   ;;  %v9578_v36 = vsel %vm9547_vm0, %v9429_v35, -inf  ;;  %v18883_v15 = vpop.f32.mrb[61].mxu1  ;;  %v9581_v28 = vsel %vm9547_vm0, %v9430_v6, -inf }
 0x593   : > { %20577 = vst [vmem:[#allocation108_spill] sm:$0xff] %v18854_v29  ;;  %v9576_v33 = vsel %vm9547_vm0, %v9444_v49, -inf  ;;  %v9183_v46 = vmul.f32 %v18699_v58, %v8745_v1  ;;  %8414 = vmatmul.mubr.bf16.gmra.mrb[160].mxu0 %v16968_v18  ;;  %14915 = vmatmul.mubr.msk.bf16.gmra.mrb[136].mxu1 %vm9547_vm0, %v18854_v29  ;;  %v20583_v49 = vld [vmem:[#allocation110_spill] sm:$0xff]  ;;  %v18886_v53 = vpop.f32.mrb[62].mxu1 }
 0x594   : > { %v9577_v26 = vmax.f32 %v9575_v42, %v9576_v33  ;;  %v8748_v31 = vadd.f32 %v15457_v21, %v20580_v61  ;;  %8421 = vmatprep.mubr.bf16.mxu0 %v16969_v4  ;;  %v20582_v4 = vld [vmem:[#allocation7_spill] sm:$0xff]  ;;  %v9304_v42 = vadd.f32 %v18713_v47, %v9170_v48  ;;  %v9431_v33 = vmax.f32 %v9303_v14, 0.0  ;;  %v20584_v61 = vld [vmem:[#allocation112_spill] sm:$0xff]  ;;  %v18891_v35 = vpop.f32.mrb[63].mxu1 }
 0x595   : > { %v9317_v8 = vadd.f32 %v18713_v47, %v9183_v46 }
 0x596   : > { %v9184_v17 = vmul.f32 %v18699_v58, %v8748_v31  ;;  %v8207_v50 = vpop.f32.mrb[56].mxu0 }
 0x597   : > { %v9445_v60 = vmax.f32 %v9317_v8, 0.0  ;;  %v15458_v3 = vadd.f32 %v8207_v50, %v20581_v10  ;;  %v8209_v13 = vpop.f32.mrb[57].mxu0  ;;  %v9171_v8 = vmul.f32 %v18699_v58, %v18702_v51  ;;  %v9755_v51 = vsel %vm9547_vm0, %v9577_v26, -inf }
 0x598   : > { %v9318_v20 = vadd.f32 %v18713_v47, %v9184_v17  ;;  %v8210_v18 = vpop.f32.mrb[58].mxu0  ;;  %v9752_v17 = vsel %vm9547_vm0, %v9574_v16, -inf  ;;  %v9172_v13 = vmul.f32 %v18699_v58, %v18706_v41 }
 0x599   : > { %v9579_v54 = vsel %vm9547_vm0, %v9445_v60, -inf  ;;  %v15459_v0 = vadd.f32 %v8210_v18, %v20582_v4  ;;  %v8753_v52 = vadd.f32 %v15458_v3, %v20583_v49  ;;  %v8212_v1 = vpop.f32.mrb[59].mxu0  ;;  %v9432_v3 = vmax.f32 %v9304_v42, 0.0  ;;  %v16972_v4 = vld [vmem:[%s17427_s12 + $0x240] sm:$0xff]   ;;  %v16973_v42 = vld [vmem:[%s17427_s12 + $0x250] sm:$0xff]  }
 0x59a   : > { %v9580_v44 = vmax.f32 %v9578_v36, %v9579_v54  ;;  %v9446_v21 = vmax.f32 %v9318_v20, 0.0  ;;  %v9305_v49 = vadd.f32 %v18713_v47, %v9171_v8 }
 0x59b   : > { %v9185_v46 = vmul.f32 %v18699_v58, %v8753_v52  ;;  %v8756_v31 = vadd.f32 %v15459_v0, %v20584_v61  ;;  %8422 = vmatmul.mubr.bf16.gmra.mrb[164].mxu0 %v16970_v32  ;;  %v9584_v0 = vsel %vm9547_vm0, %v9431_v33, -inf  ;;  %v9306_v33 = vadd.f32 %v18713_v47, %v9172_v13 }
 0x59c   : > { %v9753_v48 = vsel %vm9547_vm0, %v9580_v44, -inf  ;;  %v9582_v50 = vsel %vm9547_vm0, %v9446_v21, -inf  ;;  %8429 = vmatprep.mubr.bf16.mxu0 %v16971_v30  ;;  %v20585_v30 = vld [vmem:[#allocation8_spill] sm:$0xff]  ;;  %v20586_v44 = vld [vmem:[#allocation109_spill] sm:$0xff] }
 0x59d   : > { %v9754_v6 = vmax.f32 %v9752_v17, %v9753_v48  ;;  %v9583_v14 = vmax.f32 %v9581_v28, %v9582_v50  ;;  %v9319_v60 = vadd.f32 %v18713_v47, %v9185_v46  ;;  %v9186_v10 = vmul.f32 %v18699_v58, %v8756_v31  ;;  %v20587_v28 = vld [vmem:[#allocation9_spill] sm:$0xff] }
 0x59e   : > { %v8215_v16 = vpop.f32.mrb[60].mxu0  ;;  %v9587_v31 = vsel %vm9547_vm0, %v9432_v3, -inf }
 0x59f   : > { %v9756_v32 = vsel %vm9547_vm0, %v9583_v14, -inf  ;;  %v9447_v20 = vmax.f32 %v9319_v60, 0.0  ;;  %v9320_v18 = vadd.f32 %v18713_v47, %v9186_v10  ;;  %v15460_v36 = vadd.f32 %v8215_v16, %v20585_v30  ;;  %v8217_v54 = vpop.f32.mrb[61].mxu0  ;;  %v20589_v14 = vld [vmem:[#allocation111_spill] sm:$0xff] }
 0x5a0   : > { %v9757_v52 = vmax.f32 %v9755_v51, %v9756_v32  ;;  %v8218_v1 = vpop.f32.mrb[62].mxu0  ;;  %v9433_v10 = vmax.f32 %v9305_v49, 0.0  ;;  %v9434_v16 = vmax.f32 %v9306_v33, 0.0  ;;  %v16974_v54 = vld [vmem:[%s17427_s12 + $0x248] sm:$0xff]   ;;  %v16975_v49 = vld [vmem:[%s17427_s12 + $0x258] sm:$0xff]  }
 0x5a1   : > { %v9585_v41 = vsel %vm9547_vm0, %v9447_v20, -inf  ;;  %v9448_v26 = vmax.f32 %v9320_v18, 0.0  ;;  %v8761_v21 = vadd.f32 %v15460_v36, %v20586_v44  ;;  %v15461_v46 = vadd.f32 %v8218_v1, %v20587_v28  ;;  %v8220_v61 = vpop.f32.mrb[63].mxu0  ;;  %v20590_v18 = vld [vmem:[#allocation10_spill] sm:$0xff] }
 0x5a2   : > { %v18914_v17 = vpack.c.bf16 %v9757_v52, %v9754_v6  ;;  %v9586_v48 = vmax.f32 %v9584_v0, %v9585_v41  ;;  %v18929_v52 = vpop.f32.mrb[64].mxu1  ;;  %v20591_v41 = vld [vmem:[#allocation11_spill] sm:$0xff] }
 0x5a3   : > { %v9588_v8 = vsel %vm9547_vm0, %v9448_v26, -inf  ;;  %v9187_v50 = vmul.f32 %v18699_v58, %v8761_v21  ;;  %v8764_v60 = vadd.f32 %v15461_v46, %v20589_v14  ;;  %8430 = vmatmul.mubr.bf16.gmra.mrb[168].mxu0 %v16972_v4  ;;  %v9590_v4 = vsel %vm9547_vm0, %v9433_v10, -inf  ;;  %v18936_v28 = vpop.f32.mrb[65].mxu1 }
 0x5a4   : > { %20588 = vst [vmem:[#allocation4_spill] sm:$0xff] %v18914_v17  ;;  %v9589_v51 = vmax.f32 %v9587_v31, %v9588_v8  ;;  %14918 = vmatprep.mubr.msk.bf16.mxu1 %vm9547_vm0, %v18914_v17  ;;  %8437 = vmatprep.mubr.bf16.mxu0 %v16973_v42  ;;  %v18938_v61 = vpop.f32.mrb[66].mxu1  ;;  %v9593_v31 = vsel %vm9547_vm0, %v9434_v16, -inf  ;;  %v20592_v8 = vld [vmem:[#allocation115_spill] sm:$0xff] }
 0x5a5   : > { %v9321_v6 = vadd.f32 %v18713_v47, %v9187_v50  ;;  %v9188_v3 = vmul.f32 %v18699_v58, %v8764_v60  ;;  %v18945_v14 = vpop.f32.mrb[67].mxu1 }
 0x5a6   : > { %v8223_v13 = vpop.f32.mrb[64].mxu0 }
 0x5a7   : > { %v9449_v32 = vmax.f32 %v9321_v6, 0.0  ;;  %v9322_v20 = vadd.f32 %v18713_v47, %v9188_v3  ;;  %v15462_v30 = vadd.f32 %v8223_v13, %v20590_v18  ;;  %v8225_v36 = vpop.f32.mrb[65].mxu0  ;;  %v9761_v3 = vsel %vm9547_vm0, %v9589_v51, -inf }
 0x5a8   : > { %v8226_v0 = vpop.f32.mrb[66].mxu0  ;;  %v16976_v36 = vld [vmem:[%s17427_s12 + $0x250] sm:$0xff]  }
 0x5a9   : > { %v9591_v1 = vsel %vm9547_vm0, %v9449_v32, -inf  ;;  %v9450_v42 = vmax.f32 %v9322_v20, 0.0  ;;  %v15463_v26 = vadd.f32 %v8226_v0, %v20591_v41  ;;  %v18934_v44 = vadd.f32 %v15462_v30, %v18600_v24  ;;  %v8228_v21 = vpop.f32.mrb[67].mxu0  ;;  %v20593_v20 = vld [vmem:[#allocation12_spill] sm:$0xff]  ;;  %v20595_v0 = vld [vmem:[#allocation113_spill] sm:$0xff]  ;;  %v20597_v41 = vld [vmem:[#allocation114_spill] sm:$0xff] }
 0x5aa   : > { %v9592_v46 = vmax.f32 %v9590_v4, %v9591_v1  ;;  %v9758_v24 = vsel %vm9547_vm0, %v9586_v48, -inf  ;;  %v16977_v4 = vld [vmem:[%s17427_s12 + $0x260] sm:$0xff]  }
 0x5ab   : > { %v9594_v33 = vsel %vm9547_vm0, %v9450_v42, -inf  ;;  %v18943_v50 = vadd.f32 %v15463_v26, %v20592_v8  ;;  %8438 = vmatmul.mubr.bf16.gmra.mrb[172].mxu0 %v16974_v54  ;;  %v20596_v42 = vld [vmem:[#allocation13_spill] sm:$0xff]  ;;  %v16978_v8 = vld [vmem:[%s17427_s12 + $0x258] sm:$0xff]  }
 0x5ac   : > { %v9759_v60 = vsel %vm9547_vm0, %v9592_v46, -inf  ;;  %v9595_v10 = vmax.f32 %v9593_v31, %v9594_v33  ;;  %8445 = vmatprep.mubr.bf16.mxu0 %v16975_v49  ;;  %v20598_v46 = vld [vmem:[#allocation14_spill] sm:$0xff] }
 0x5ad   : > { %v9760_v6 = vmax.f32 %v9758_v24, %v9759_v60  ;;  %v16979_v60 = vld [vmem:[%s17427_s12 + $0x268] sm:$0xff]  }
 0x5ae   : > { %v9762_v13 = vsel %vm9547_vm0, %v9595_v10, -inf  ;;  %v8231_v16 = vpop.f32.mrb[68].mxu0  ;;  %v18968_v10 = vpop.f32.mrb[68].mxu1 }
 0x5af   : > { %v9763_v32 = vmax.f32 %v9761_v3, %v9762_v13  ;;  %v15464_v18 = vadd.f32 %v8231_v16, %v20593_v20  ;;  %v8233_v30 = vpop.f32.mrb[69].mxu0 }
 0x5b0   : > { %v8234_v54 = vpop.f32.mrb[70].mxu0 }
 0x5b1   : > { %v18954_v48 = vpack.c.bf16 %v9763_v32, %v9760_v6  ;;  %v18957_v1 = vadd.f32 %v15464_v18, %v20595_v0  ;;  %v8236_v49 = vpop.f32.mrb[71].mxu0  ;;  %v15465_v51 = vadd.f32 %v8234_v54, %v20596_v42  ;;  %v20599_v6 = vld [vmem:[#allocation15_spill] sm:$0xff]  ;;  %v18974_v32 = vpop.f32.mrb[69].mxu1  ;;  %v20600_v54 = vld [vmem:[#allocation16_spill] sm:$0xff]  ;;  %v16981_v42 = vld [vmem:[%s17427_s12 + $0x270] sm:$0xff]  }
 0x5b2   : > { %v18976_v20 = vpop.f32.mrb[70].mxu1 }
 0x5b3   : > { %20594 = vst [vmem:[#allocation106_spill] sm:$0xff] %v18954_v48  ;;  %8446 = vmatmul.mubr.bf16.gmra.mrb[176].mxu0 %v16976_v36  ;;  %14919 = vmatmul.mubr.msk.bf16.gmra.mrb[140].mxu1 %vm9547_vm0, %v18954_v48  ;;  %v18963_v26 = vadd.f32 %v15465_v51, %v20597_v41  ;;  %v18981_v30 = vpop.f32.mrb[71].mxu1  ;;  %v20601_v41 = vld [vmem:[#allocation17_spill] sm:$0xff] }
 0x5b4   : > { %8453 = vmatprep.mubr.bf16.mxu0 %v16977_v4 }
 0x5b6   : > { %v8239_v21 = vpop.f32.mrb[72].mxu0 }
 0x5b7   : > { %v15466_v31 = vadd.f32 %v8239_v21, %v20598_v46  ;;  %v8241_v33 = vpop.f32.mrb[73].mxu0 }
 0x5b8   : > { %v8242_v24 = vpop.f32.mrb[74].mxu0  ;;  %v20602_v33 = vld [vmem:[#allocation18_spill] sm:$0xff] }
 0x5b9   : > { %v15467_v3 = vadd.f32 %v8242_v24, %v20599_v6  ;;  %v18972_v13 = vadd.f32 %v15466_v31, %v18628_v5  ;;  %v8244_v16 = vpop.f32.mrb[75].mxu0  ;;  %v16980_v5 = vld [vmem:[%s17427_s12 + $0x260] sm:$0xff]  }
 0x5ba   : > { %v18996_v16 = vpop.f32.mrb[72].mxu1 }
 0x5bb   : > { %v18979_v18 = vadd.f32 %v15467_v3, %v18635_v39  ;;  %8454 = vmatmul.mubr.bf16.gmra.mrb[180].mxu0 %v16978_v8  ;;  %v16983_v3 = vld [vmem:[%s17427_s12 + $0x288] sm:$0xff]  }
 0x5bc   : > { %8461 = vmatprep.mubr.bf16.mxu0 %v16979_v60  ;;  %v16982_v60 = vld [vmem:[%s17427_s12 + $0x268] sm:$0xff]  }
 0x5be   : > { %v8247_v36 = vpop.f32.mrb[76].mxu0 }
 0x5bf   : > { %v15468_v4 = vadd.f32 %v8247_v36, %v20600_v54  ;;  %v8249_v0 = vpop.f32.mrb[77].mxu0 }
 0x5c0   : > { %v8250_v49 = vpop.f32.mrb[78].mxu0 }
 0x5c1   : > { %v18987_v51 = vadd.f32 %v15468_v4, %v18622_v43  ;;  %v15469_v21 = vadd.f32 %v8250_v49, %v20601_v41  ;;  %v8252_v39 = vpop.f32.mrb[79].mxu0  ;;  %v20603_v43 = vld [vmem:[#allocation19_spill] sm:$0xff]  ;;  %v19002_v4 = vpop.f32.mrb[73].mxu1  ;;  %v20604_v41 = vld [vmem:[#allocation20_spill] sm:$0xff] }
 0x5c2   : > { %v19004_v0 = vpop.f32.mrb[74].mxu1 }
 0x5c3   : > { %v18991_v46 = vadd.f32 %v15469_v21, %v18630_v27  ;;  %8462 = vmatmul.mubr.bf16.gmra.mrb[184].mxu0 %v16980_v5  ;;  %v19009_v49 = vpop.f32.mrb[75].mxu1 }
 0x5c4   : > { %8469 = vmatprep.mubr.bf16.mxu0 %v16981_v42  ;;  %v19024_v48 = vpop.f32.mrb[76].mxu1 }
 0x5c5   : > { %20607 = vst [vmem:[#allocation5_spill] sm:$0xff] %v19024_v48  ;;  %v20621_v48 = vld [vmem:[#allocation117_spill] sm:$0xff] }
 0x5c6   : > { %v8255_v31 = vpop.f32.mrb[80].mxu0 }
 0x5c7   : > { %v15470_v8 = vadd.f32 %v8255_v31, %v20602_v33  ;;  %v8257_v24 = vpop.f32.mrb[81].mxu0  ;;  %v16985_v33 = vld [vmem:[%s17427_s12 + $0x290] sm:$0xff]  }
 0x5c8   : > { %v8258_v6 = vpop.f32.mrb[82].mxu0  ;;  %v20605_v24 = vld [vmem:[#allocation21_spill] sm:$0xff] }
 0x5c9   : > { %v15471_v36 = vadd.f32 %v8258_v6, %v20603_v43  ;;  %v19000_v54 = vadd.f32 %v15470_v8, %v18656_v19  ;;  %v8260_v27 = vpop.f32.mrb[83].mxu0  ;;  %v16984_v19 = vld [vmem:[%s17427_s12 + $0x280] sm:$0xff]   ;;  %v20606_v43 = vld [vmem:[#allocation22_spill] sm:$0xff] }
 0x5cb   : > { %v19007_v5 = vadd.f32 %v15471_v36, %v18663_v38  ;;  %8470 = vmatmul.mubr.bf16.gmra.mrb[188].mxu0 %v16982_v60 }
 0x5cc   : > { %8477 = vmatprep.mubr.bf16.mxu0 %v16983_v3 }
 0x5ce   : > { %v8263_v42 = vpop.f32.mrb[84].mxu0 }
 0x5cf   : > { %v15472_v21 = vadd.f32 %v8263_v42, %v20604_v41  ;;  %v8265_v39 = vpop.f32.mrb[85].mxu0  ;;  %v16986_v42 = vld [vmem:[%s17427_s12 + $0x288] sm:$0xff]  }
 0x5d0   : > { %v8266_v31 = vpop.f32.mrb[86].mxu0  ;;  %v16987_v39 = vld [vmem:[%s17427_s12 + $0x298] sm:$0xff]  }
 0x5d1   : > { %v19015_v8 = vadd.f32 %v15472_v21, %v18650_v23  ;;  %v15473_v6 = vadd.f32 %v8266_v31, %v20605_v24  ;;  %v8268_v38 = vpop.f32.mrb[87].mxu0  ;;  %v20608_v23 = vld [vmem:[#allocation23_spill] sm:$0xff]  ;;  %v19030_v24 = vpop.f32.mrb[77].mxu1 }
 0x5d3   : > { %v19019_v60 = vadd.f32 %v15473_v6, %v18658_v59  ;;  %8478 = vmatmul.mubr.bf16.gmra.mrb[192].mxu0 %v16984_v19  ;;  %v19032_v19 = vpop.f32.mrb[78].mxu1 }
 0x5d4   : > { %8485 = vmatprep.mubr.bf16.mxu0 %v16985_v33  ;;  %20609 = vst [vmem:[#allocation107_spill] sm:$0xff] %v19032_v19  ;;  %v19037_v6 = vpop.f32.mrb[79].mxu1 }
 0x5d6   : > { %v8271_v3 = vpop.f32.mrb[88].mxu0 }
 0x5d7   : > { %v15474_v36 = vadd.f32 %v8271_v3, %v20606_v43  ;;  %v8273_v27 = vpop.f32.mrb[89].mxu0  ;;  %v20610_v3 = vld [vmem:[#allocation24_spill] sm:$0xff] }
 0x5d8   : > { %v8274_v41 = vpop.f32.mrb[90].mxu0 }
 0x5d9   : > { %v15475_v21 = vadd.f32 %v8274_v41, %v20608_v23  ;;  %v19028_v31 = vadd.f32 %v15474_v36, %v18684_v11  ;;  %v8276_v59 = vpop.f32.mrb[91].mxu0  ;;  %v16988_v41 = vld [vmem:[%s17427_s12 + $0x290] sm:$0xff]   ;;  %v16989_v36 = vld [vmem:[%s17427_s12 + $0x2a0] sm:$0xff]  }
 0x5da   : > { %v20611_v59 = vld [vmem:[#allocation25_spill] sm:$0xff] }
 0x5db   : > { %v19035_v33 = vadd.f32 %v15475_v21, %v18691_v2  ;;  %8486 = vmatmul.mubr.bf16.gmra.mrb[196].mxu0 %v16986_v42  ;;  %v9190_v21 = vmul.f32 %v18699_v58, %v18943_v50 }
 0x5dc   : > { %8493 = vmatprep.mubr.bf16.mxu0 %v16987_v39  ;;  %v9189_v39 = vmul.f32 %v18699_v58, %v18934_v44 }
 0x5dd   : > { %v9324_v50 = vadd.f32 %v18713_v47, %v9190_v21 }
 0x5de   : > { %v8279_v38 = vpop.f32.mrb[92].mxu0 }
 0x5df   : > { %v15476_v43 = vadd.f32 %v8279_v38, %v20610_v3  ;;  %v8281_v27 = vpop.f32.mrb[93].mxu0  ;;  %v20612_v3 = vld [vmem:[#allocation26_spill] sm:$0xff] }
 0x5e0   : > { %v8282_v11 = vpop.f32.mrb[94].mxu0 }
 0x5e1   : > { %v19043_v23 = vadd.f32 %v15476_v43, %v18678_v40  ;;  %v15477_v17 = vadd.f32 %v8282_v11, %v20611_v59  ;;  %v8284_v2 = vpop.f32.mrb[95].mxu0  ;;  %v16990_v40 = vld [vmem:[%s17427_s12 + $0x298] sm:$0xff]   ;;  %v9323_v43 = vadd.f32 %v18713_v47, %v9189_v39  ;;  %v16991_v59 = vld [vmem:[%s17427_s12 + $0x2a8] sm:$0xff]  }
 0x5e2   : > { %v19057_v2 = vpop.f32.mrb[80].mxu1 }
 0x5e3   : > { %v19047_v42 = vadd.f32 %v15477_v17, %v18686_v55  ;;  %8494 = vmatmul.mubr.bf16.gmra.mrb[200].mxu0 %v16988_v41  ;;  %20613 = vst [vmem:[#allocation6_spill] sm:$0xff] %v19057_v2  ;;  %v20614_v55 = vld [vmem:[#allocation27_spill] sm:$0xff] }
 0x5e4   : > { %8501 = vmatprep.mubr.bf16.mxu0 %v16989_v36  ;;  %v19061_v36 = vpop.f32.mrb[81].mxu1 }
 0x5e5   : > { %20615 = vst [vmem:[#allocation7_spill] sm:$0xff] %v19061_v36  ;;  %v19064_v25 = vpop.f32.mrb[82].mxu1 }
 0x5e6   : > { %v8287_v38 = vpop.f32.mrb[96].mxu0  ;;  %20616 = vst [vmem:[#allocation110_spill] sm:$0xff] %v19064_v25  ;;  %v16992_v25 = vld [vmem:[%s17427_s12 + $0x2a0] sm:$0xff]  }
 0x5e7   : > { %v15478_v27 = vadd.f32 %v8287_v38, %v20612_v3  ;;  %v8289_v29 = vpop.f32.mrb[97].mxu0  ;;  %v19068_v38 = vpop.f32.mrb[83].mxu1  ;;  %v9451_v3 = vmax.f32 %v9323_v43, 0.0 }
 0x5e8   : > { %v8290_v11 = vpop.f32.mrb[98].mxu0  ;;  %20617 = vst [vmem:[#allocation112_spill] sm:$0xff] %v19068_v38  ;;  %v20619_v38 = vld [vmem:[#allocation116_spill] sm:$0xff] }
 0x5e9   : > { %v15479_v17 = vadd.f32 %v8290_v11, %v20614_v55  ;;  %v8833_v41 = vadd.f32 %v15478_v27, %v18725_v45  ;;  %v8292_v44 = vpop.f32.mrb[99].mxu0  ;;  %v9191_v45 = vmul.f32 %v18699_v58, %v18957_v1  ;;  %v9452_v11 = vmax.f32 %v9324_v50, 0.0 }
 0x5ea   : > { %v9192_v55 = vmul.f32 %v18699_v58, %v18963_v26  ;;  %v9596_v2 = vsel %vm9547_vm0, %v9451_v3, -inf  ;;  %v20620_v26 = vld [vmem:[#allocation29_spill] sm:$0xff]  ;;  %v9193_v3 = vmul.f32 %v18699_v58, %v18972_v13  ;;  %v9194_v13 = vmul.f32 %v18699_v58, %v18979_v18  ;;  %v20623_v18 = vld [vmem:[#allocation31_spill] sm:$0xff] }
 0x5eb   : > { %v9205_v29 = vmul.f32 %v18699_v58, %v8833_v41  ;;  %v8836_v39 = vadd.f32 %v15479_v17, %v18732_v62  ;;  %8502 = vmatmul.mubr.bf16.gmra.mrb[204].mxu0 %v16990_v40  ;;  %v20618_v40 = vld [vmem:[#allocation28_spill] sm:$0xff]  ;;  %v9325_v1 = vadd.f32 %v18713_v47, %v9191_v45 }
 0x5ec   : > { %8509 = vmatprep.mubr.bf16.mxu0 %v16991_v59 }
 0x5ed   : > { %v9339_v27 = vadd.f32 %v18713_v47, %v9205_v29  ;;  %v9206_v21 = vmul.f32 %v18699_v58, %v8836_v39  ;;  %v16993_v29 = vld [vmem:[%s17427_s12 + $0x2b0] sm:$0xff]  }
 0x5ee   : > { %v8295_v41 = vpop.f32.mrb[100].mxu0 }
 0x5ef   : > { %v9467_v44 = vmax.f32 %v9339_v27, 0.0  ;;  %v9340_v62 = vadd.f32 %v18713_v47, %v9206_v21  ;;  %v15480_v17 = vadd.f32 %v8295_v41, %v20618_v40  ;;  %v8297_v43 = vpop.f32.mrb[101].mxu0  ;;  %v9599_v21 = vsel %vm9547_vm0, %v9452_v11, -inf }
 0x5f0   : > { %v8298_v59 = vpop.f32.mrb[102].mxu0  ;;  %v9326_v41 = vadd.f32 %v18713_v47, %v9192_v55 }
 0x5f1   : > { %v9597_v39 = vsel %vm9547_vm0, %v9467_v44, -inf  ;;  %v9468_v50 = vmax.f32 %v9340_v62, 0.0  ;;  %v8841_v36 = vadd.f32 %v15480_v17, %v20619_v38  ;;  %v15481_v19 = vadd.f32 %v8298_v59, %v20620_v26  ;;  %v8300_v27 = vpop.f32.mrb[103].mxu0  ;;  %v16995_v26 = vld [vmem:[%s17427_s12 + $0x2b8] sm:$0xff]  }
 0x5f2   : > { %v9598_v40 = vmax.f32 %v9596_v2, %v9597_v39  ;;  %v9453_v38 = vmax.f32 %v9325_v1, 0.0  ;;  %v9454_v2 = vmax.f32 %v9326_v41, 0.0  ;;  %v9327_v59 = vadd.f32 %v18713_v47, %v9193_v3  ;;  %v16994_v1 = vld [vmem:[%s17427_s12 + $0x2a8] sm:$0xff]   ;;  %v19102_v27 = vpop.f32.mrb[84].mxu1 }
 0x5f3   : > { %v9600_v45 = vsel %vm9547_vm0, %v9468_v50, -inf  ;;  %v9207_v43 = vmul.f32 %v18699_v58, %v8841_v36  ;;  %v8844_v44 = vadd.f32 %v15481_v19, %v20621_v48  ;;  %8510 = vmatmul.mubr.bf16.gmra.mrb[208].mxu0 %v16992_v25  ;;  %v20622_v48 = vld [vmem:[#allocation30_spill] sm:$0xff] }
 0x5f4   : > { %v9601_v62 = vmax.f32 %v9599_v21, %v9600_v45  ;;  %8517 = vmatprep.mubr.bf16.mxu0 %v16993_v29  ;;  %v9602_v29 = vsel %vm9547_vm0, %v9453_v38, -inf }
 0x5f5   : > { %v9341_v11 = vadd.f32 %v18713_v47, %v9207_v43  ;;  %v9208_v55 = vmul.f32 %v18699_v58, %v8844_v44  ;;  %v19107_v44 = vpop.f32.mrb[85].mxu1 }
 0x5f6   : > { %v8303_v17 = vpop.f32.mrb[104].mxu0  ;;  %v19111_v38 = vpop.f32.mrb[86].mxu1 }
 0x5f7   : > { %v9469_v36 = vmax.f32 %v9341_v11, 0.0  ;;  %v9342_v39 = vadd.f32 %v18713_v47, %v9208_v55  ;;  %v15482_v25 = vadd.f32 %v8303_v17, %v20622_v48  ;;  %v8305_v19 = vpop.f32.mrb[105].mxu0  ;;  %v9605_v11 = vsel %vm9547_vm0, %v9454_v2, -inf }
 0x5f8   : > { %v8306_v50 = vpop.f32.mrb[106].mxu0  ;;  %v9328_v55 = vadd.f32 %v18713_v47, %v9194_v13  ;;  %v9455_v48 = vmax.f32 %v9327_v59, 0.0  ;;  %v9764_v2 = vsel %vm9547_vm0, %v9598_v40, -inf }
 0x5f9   : > { %v9603_v21 = vsel %vm9547_vm0, %v9469_v36, -inf  ;;  %v9470_v41 = vmax.f32 %v9342_v39, 0.0  ;;  %v15483_v45 = vadd.f32 %v8306_v50, %v20623_v18  ;;  %v8849_v3 = vadd.f32 %v15482_v25, %v18771_v12  ;;  %v8308_v43 = vpop.f32.mrb[107].mxu0  ;;  %v19116_v50 = vpop.f32.mrb[87].mxu1 }
 0x5fa   : > { %v9604_v17 = vmax.f32 %v9602_v29, %v9603_v21  ;;  %v9195_v12 = vmul.f32 %v18699_v58, %v18987_v51 }
 0x5fb   : > { %v9606_v19 = vsel %vm9547_vm0, %v9470_v41, -inf  ;;  %v9209_v36 = vmul.f32 %v18699_v58, %v8849_v3  ;;  %v8852_v39 = vadd.f32 %v15483_v45, %v18780_v34  ;;  %8518 = vmatmul.mubr.bf16.gmra.mrb[212].mxu0 %v16994_v1  ;;  %v9456_v34 = vmax.f32 %v9328_v55, 0.0 }
 0x5fc   : > { %v9765_v13 = vsel %vm9547_vm0, %v9604_v17, -inf  ;;  %v9607_v25 = vmax.f32 %v9605_v11, %v9606_v19  ;;  %8525 = vmatprep.mubr.bf16.mxu0 %v16995_v26  ;;  %v9196_v1 = vmul.f32 %v18699_v58, %v18991_v46  ;;  %v9767_v41 = vsel %vm9547_vm0, %v9601_v62, -inf  ;;  %v20624_v26 = vld [vmem:[#allocation32_spill] sm:$0xff]  ;;  %v16996_v17 = vld [vmem:[%s17427_s12 + $0x2b0] sm:$0xff]  }
 0x5fd   : > { %v9766_v59 = vmax.f32 %v9764_v2, %v9765_v13  ;;  %v9343_v29 = vadd.f32 %v18713_v47, %v9209_v36  ;;  %v9210_v21 = vmul.f32 %v18699_v58, %v8852_v39  ;;  %v9608_v19 = vsel %vm9547_vm0, %v9455_v48, -inf  ;;  %v16997_v39 = vld [vmem:[%s17427_s12 + $0x2c0] sm:$0xff]   ;;  %v19143_v48 = vld [vmem:[%s20431_s3] ss:$0 sm:$0xff] }
 0x5fe   : > { %v9768_v51 = vsel %vm9547_vm0, %v9607_v25, -inf  ;;  %v8311_v40 = vpop.f32.mrb[108].mxu0  ;;  %v9329_v55 = vadd.f32 %v18713_v47, %v9195_v12  ;;  %v9611_v25 = vsel %vm9547_vm0, %v9456_v34, -inf  ;;  %v19149_v12 = vld [vmem:[%s20430_s2] ss:$0 sm:$0xff] }
 0x5ff   : > { %v9769_v18 = vmax.f32 %v9767_v41, %v9768_v51  ;;  %v9471_v45 = vmax.f32 %v9343_v29, 0.0  ;;  %v9344_v3 = vadd.f32 %v18713_v47, %v9210_v21  ;;  %v15484_v43 = vadd.f32 %v8311_v40, %v20624_v26  ;;  %v8313_v11 = vpop.f32.mrb[109].mxu0  ;;  %v20626_v21 = vld [vmem:[#allocation33_spill] sm:$0xff]  ;;  %v17015_v26 = vld [vmem:[%s20432_s4] sm:$0xff]  }
 0x600   : > { %v8314_v36 = vpop.f32.mrb[110].mxu0  ;;  %v9330_v47 = vadd.f32 %v19143_v48, %v9196_v1  ;;  %v9457_v40 = vmax.f32 %v9329_v55, 0.0  ;;  %v16998_v55 = vld [vmem:[%s17427_s12 + $0x2b8] sm:$0xff]   ;;  %14938 = vmatprep.subr.bf16.mxu1 %v17015_v26 }
 0x601   : > { %v19134_v58 = vpack.c.bf16 %v9769_v18, %v9766_v59  ;;  %v9609_v46 = vsel %vm9547_vm0, %v9471_v45, -inf  ;;  %v9472_v62 = vmax.f32 %v9344_v3, 0.0  ;;  %v8857_v2 = vadd.f32 %v15484_v43, %v18766_v63  ;;  %v8316_v13 = vpop.f32.mrb[111].mxu0  ;;  %14939 = vmatpush3.bf16.msra.mxu1 %v17015_v26 }
 0x602   : > { %v9610_v29 = vmax.f32 %v9608_v19, %v9609_v46  ;;  %v15485_v41 = vadd.f32 %v8314_v36, %v20626_v21  ;;  %v9197_v63 = vmul.f32 %v19149_v12, %v19000_v54  ;;  %v9198_v54 = vmul.f32 %v19149_v12, %v19007_v5  ;;  %v19170_v5 = vpop.f32.mrb[88].mxu1 }
 0x603   : > { %20625 = vst [vmem:[#allocation8_spill] sm:$0xff] %v19134_v58  ;;  %v9612_v59 = vsel %vm9547_vm0, %v9472_v62, -inf  ;;  %v9211_v34 = vmul.f32 %v19149_v12, %v8857_v2  ;;  %8526 = vmatmul.mubr.bf16.gmra.mrb[216].mxu0 %v16996_v17  ;;  %14922 = vmatprep.mubr.msk.bf16.mxu1 %vm9547_vm0, %v19134_v58  ;;  %v9458_v43 = vmax.f32 %v9330_v47, 0.0  ;;  %v16999_v62 = vld [vmem:[%s17427_s12 + $0x2d8] sm:$0xff]   ;;  %v9614_v2 = vsel %vm9547_vm0, %v9457_v40, -inf }
 0x604   : > { %v9613_v51 = vmax.f32 %v9611_v25, %v9612_v59  ;;  %v8860_v1 = vadd.f32 %v15485_v41, %v18775_v37  ;;  %8533 = vmatprep.mubr.bf16.mxu0 %v16997_v39  ;;  %v9331_v11 = vadd.f32 %v19143_v48, %v9197_v63  ;;  %v20627_v37 = vld [vmem:[#allocation34_spill] sm:$0xff]  ;;  %v20628_v25 = vld [vmem:[#allocation35_spill] sm:$0xff]  ;;  %v19176_v63 = vpop.f32.mrb[89].mxu1  ;;  %v9332_v59 = vadd.f32 %v19143_v48, %v9198_v54 }
 0x605   : > { %v9345_v18 = vadd.f32 %v19143_v48, %v9211_v34  ;;  %v9770_v26 = vsel %vm9547_vm0, %v9610_v29, -inf }
 0x606   : > { %v9212_v45 = vmul.f32 %v19149_v12, %v8860_v1  ;;  %v8319_v3 = vpop.f32.mrb[112].mxu0 }
 0x607   : > { %v9473_v17 = vmax.f32 %v9345_v18, 0.0  ;;  %v15486_v19 = vadd.f32 %v8319_v3, %v20627_v37  ;;  %v8321_v36 = vpop.f32.mrb[113].mxu0  ;;  %v19179_v18 = vpop.f32.mrb[90].mxu1  ;;  %v9459_v3 = vmax.f32 %v9331_v11, 0.0 }
 0x608   : > { %v9346_v39 = vadd.f32 %v19143_v48, %v9212_v45  ;;  %v8322_v46 = vpop.f32.mrb[114].mxu0  ;;  %v9617_v45 = vsel %vm9547_vm0, %v9458_v43, -inf  ;;  %v19184_v37 = vpop.f32.mrb[91].mxu1 }
 0x609   : > { %v9615_v13 = vsel %vm9547_vm0, %v9473_v17, -inf  ;;  %v15487_v21 = vadd.f32 %v8322_v46, %v20628_v25  ;;  %v8865_v41 = vadd.f32 %v15486_v19, %v18827_v22  ;;  %v8324_v47 = vpop.f32.mrb[115].mxu0  ;;  %v9199_v22 = vmul.f32 %v19149_v12, %v19015_v8 }
 0x60a   : > { %v9616_v34 = vmax.f32 %v9614_v2, %v9615_v13  ;;  %v9474_v1 = vmax.f32 %v9346_v39, 0.0  ;;  %v9200_v39 = vmul.f32 %v19149_v12, %v19019_v60  ;;  %v9773_v8 = vsel %vm9547_vm0, %v9613_v51, -inf }
 0x60b   : > { %v9213_v40 = vmul.f32 %v19149_v12, %v8865_v41  ;;  %v8868_v17 = vadd.f32 %v15487_v21, %v18836_v56  ;;  %8534 = vmatmul.mubr.bf16.gmra.mrb[220].mxu0 %v16998_v55  ;;  %v9460_v55 = vmax.f32 %v9332_v59, 0.0  ;;  %v17000_v41 = vld [vmem:[%s17427_s12 + $0x2d0] sm:$0xff]   ;;  %v9620_v47 = vsel %vm9547_vm0, %v9459_v3, -inf }
 0x60c   : > { %v9771_v54 = vsel %vm9547_vm0, %v9616_v34, -inf  ;;  %v9618_v19 = vsel %vm9547_vm0, %v9474_v1, -inf  ;;  %8541 = vmatprep.mubr.bf16.mxu0 %v16999_v62  ;;  %v20629_v62 = vld [vmem:[#allocation36_spill] sm:$0xff]  ;;  %v9333_v34 = vadd.f32 %v19143_v48, %v9199_v22  ;;  %v9201_v22 = vmul.f32 %v19149_v12, %v19028_v31 }
 0x60d   : > { %v9772_v43 = vmax.f32 %v9770_v26, %v9771_v54  ;;  %v9619_v11 = vmax.f32 %v9617_v45, %v9618_v19  ;;  %v9347_v36 = vadd.f32 %v19143_v48, %v9213_v40  ;;  %v9214_v56 = vmul.f32 %v19149_v12, %v8868_v17  ;;  %v17001_v45 = vld [vmem:[%s17427_s12 + $0x2e0] sm:$0xff]   ;;  %v20630_v17 = vld [vmem:[#allocation37_spill] sm:$0xff] }
 0x60e   : > { %v8327_v29 = vpop.f32.mrb[116].mxu0  ;;  %v9623_v19 = vsel %vm9547_vm0, %v9460_v55, -inf }
 0x60f   : > { %v9774_v46 = vsel %vm9547_vm0, %v9619_v11, -inf  ;;  %v9475_v2 = vmax.f32 %v9347_v36, 0.0  ;;  %v9348_v13 = vadd.f32 %v19143_v48, %v9214_v56  ;;  %v15488_v25 = vadd.f32 %v8327_v29, %v20629_v62  ;;  %v8329_v21 = vpop.f32.mrb[117].mxu0 }
 0x610   : > { %v9775_v59 = vmax.f32 %v9773_v8, %v9774_v46  ;;  %v8330_v1 = vpop.f32.mrb[118].mxu0  ;;  %v9334_v11 = vadd.f32 %v19143_v48, %v9200_v39  ;;  %v9202_v39 = vmul.f32 %v19149_v12, %v19035_v33  ;;  %v20632_v21 = vld [vmem:[#allocation38_spill] sm:$0xff]  ;;  %v19230_v33 = vpop.f32.mrb[92].mxu1 }
 0x611   : > { %v9621_v60 = vsel %vm9547_vm0, %v9475_v2, -inf  ;;  %v9476_v51 = vmax.f32 %v9348_v13, 0.0  ;;  %v8873_v40 = vadd.f32 %v15488_v25, %v18822_v9  ;;  %v15489_v26 = vadd.f32 %v8330_v1, %v20630_v17  ;;  %v8332_v54 = vpop.f32.mrb[119].mxu0 }
 0x612   : > { %v19208_v36 = vpack.c.bf16 %v9775_v59, %v9772_v43  ;;  %v9622_v3 = vmax.f32 %v9620_v47, %v9621_v60  ;;  %v9461_v9 = vmax.f32 %v9333_v34, 0.0  ;;  %v9462_v31 = vmax.f32 %v9334_v11, 0.0  ;;  %v17002_v34 = vld [vmem:[%s17427_s12 + $0x2d8] sm:$0xff]  }
 0x613   : > { %v9624_v56 = vsel %vm9547_vm0, %v9476_v51, -inf  ;;  %v9215_v8 = vmul.f32 %v19149_v12, %v8873_v40  ;;  %v8876_v29 = vadd.f32 %v15489_v26, %v18831_v57  ;;  %8542 = vmatmul.mubr.bf16.gmra.mrb[224].mxu0 %v17000_v41  ;;  %v17016_v57 = vld [vmem:[%s20432_s4 + $0x8] sm:$0xff]   ;;  %v9335_v13 = vadd.f32 %v19143_v48, %v9201_v22  ;;  %v20633_v40 = vld [vmem:[#allocation39_spill] sm:$0xff] }
 0x614   : > { %20631 = vst [vmem:[#allocation109_spill] sm:$0xff] %v19208_v36  ;;  %v9625_v46 = vmax.f32 %v9623_v19, %v9624_v56  ;;  %14923 = vmatmul.mubr.msk.bf16.gmra.mrb[144].mxu1 %vm9547_vm0, %v19208_v36  ;;  %8549 = vmatprep.mubr.bf16.mxu0 %v17001_v45  ;;  %v9626_v59 = vsel %vm9547_vm0, %v9461_v9, -inf  ;;  %v17003_v45 = vld [vmem:[%s17427_s12 + $0x2e8] sm:$0xff]   ;;  %v19235_v19 = vpop.f32.mrb[93].mxu1  ;;  %v9629_v11 = vsel %vm9547_vm0, %v9462_v31, -inf  ;;  %v9336_v22 = vadd.f32 %v19143_v48, %v9202_v39 }
 0x615   : > { %v9349_v43 = vadd.f32 %v19143_v48, %v9215_v8  ;;  %v9216_v55 = vmul.f32 %v19149_v12, %v8876_v29  ;;  %14940 = vmatprep.subr.bf16.mxu1 %v17016_v57  ;;  %v19239_v8 = vpop.f32.mrb[94].mxu1  ;;  %v9463_v29 = vmax.f32 %v9335_v13, 0.0  ;;  %v9776_v31 = vsel %vm9547_vm0, %v9622_v3, -inf }
 0x616   : > { %v8335_v2 = vpop.f32.mrb[120].mxu0  ;;  %14941 = vmatpush3.bf16.msra.mxu1 %v17016_v57 }
 0x617   : > { %v9477_v62 = vmax.f32 %v9349_v43, 0.0  ;;  %v9350_v25 = vadd.f32 %v19143_v48, %v9216_v55  ;;  %v15490_v41 = vadd.f32 %v8335_v2, %v20632_v21  ;;  %v8337_v47 = vpop.f32.mrb[121].mxu0  ;;  %v9203_v2 = vmul.f32 %v19149_v12, %v19043_v23 }
 0x618   : > { %v8338_v1 = vpop.f32.mrb[122].mxu0  ;;  %v9779_v21 = vsel %vm9547_vm0, %v9625_v46, -inf  ;;  %v17005_v46 = vld [vmem:[%s17427_s12 + $0x2f0] sm:$0xff]  }
 0x619   : > { %v9627_v60 = vsel %vm9547_vm0, %v9477_v62, -inf  ;;  %v9478_v51 = vmax.f32 %v9350_v25, 0.0  ;;  %v15491_v17 = vadd.f32 %v8338_v1, %v20633_v40  ;;  %v8881_v26 = vadd.f32 %v15490_v41, %v18883_v15  ;;  %v8340_v54 = vpop.f32.mrb[123].mxu0  ;;  %v19244_v15 = vpop.f32.mrb[95].mxu1 }
 0x61a   : > { %v9628_v56 = vmax.f32 %v9626_v59, %v9627_v60  ;;  %v20634_v59 = vld [vmem:[#allocation40_spill] sm:$0xff]  ;;  %v9337_v40 = vadd.f32 %v19143_v48, %v9203_v2 }
 0x61b   : > { %v9630_v9 = vsel %vm9547_vm0, %v9478_v51, -inf  ;;  %v9217_v43 = vmul.f32 %v19149_v12, %v8881_v26  ;;  %v8884_v55 = vadd.f32 %v15491_v17, %v18891_v35  ;;  %8550 = vmatmul.mubr.bf16.gmra.mrb[228].mxu0 %v17002_v34  ;;  %v9464_v35 = vmax.f32 %v9336_v22, 0.0 }
 0x61c   : > { %v9777_v39 = vsel %vm9547_vm0, %v9628_v56, -inf  ;;  %v9631_v57 = vmax.f32 %v9629_v11, %v9630_v9  ;;  %8557 = vmatprep.mubr.bf16.mxu0 %v17003_v45  ;;  %v17004_v45 = vld [vmem:[%s17427_s12 + $0x2e0] sm:$0xff]   ;;  %v9632_v51 = vsel %vm9547_vm0, %v9463_v29, -inf  ;;  %v9204_v17 = vmul.f32 %v19149_v12, %v19047_v42 }
 0x61d   : > { %v9778_v13 = vmax.f32 %v9776_v31, %v9777_v39  ;;  %v9351_v62 = vadd.f32 %v19143_v48, %v9217_v43  ;;  %v9218_v25 = vmul.f32 %v19149_v12, %v8884_v55  ;;  %v20636_v55 = vld [vmem:[#allocation41_spill] sm:$0xff]  ;;  %v9635_v29 = vsel %vm9547_vm0, %v9464_v35, -inf }
 0x61e   : > { %v9780_v41 = vsel %vm9547_vm0, %v9631_v57, -inf  ;;  %v8343_v47 = vpop.f32.mrb[124].mxu0  ;;  %v9338_v39 = vadd.f32 %v19143_v48, %v9204_v17  ;;  %v20638_v17 = vld [vmem:[#allocation43_spill] sm:$0xff] }
 0x61f   : > { %v9781_v23 = vmax.f32 %v9779_v21, %v9780_v41  ;;  %v9479_v34 = vmax.f32 %v9351_v62, 0.0  ;;  %v9352_v3 = vadd.f32 %v19143_v48, %v9218_v25  ;;  %v15492_v1 = vadd.f32 %v8343_v47, %v20634_v59  ;;  %v8345_v60 = vpop.f32.mrb[125].mxu0  ;;  %v17017_v21 = vld [vmem:[%s20432_s4 + $0x10] sm:$0xff]  }
 0x620   : > { %v8346_v26 = vpop.f32.mrb[126].mxu0  ;;  %v20637_v47 = vld [vmem:[#allocation42_spill] sm:$0xff]  ;;  %v9466_v59 = vmax.f32 %v9338_v39, 0.0  ;;  %v17007_v60 = vld [vmem:[%s17427_s12 + $0x2f8] sm:$0xff]   ;;  %14942 = vmatprep.subr.bf16.mxu1 %v17017_v21 }
 0x621   : > { %v19262_v54 = vpack.c.bf16 %v9781_v23, %v9778_v13  ;;  %v9633_v11 = vsel %vm9547_vm0, %v9479_v34, -inf  ;;  %v9480_v22 = vmax.f32 %v9352_v3, 0.0  ;;  %v8889_v56 = vadd.f32 %v15492_v1, %v18877_v7  ;;  %v8348_v9 = vpop.f32.mrb[127].mxu0  ;;  %v17006_v3 = vld [vmem:[%s17427_s12 + $0x2e8] sm:$0xff]   ;;  %14943 = vmatpush3.bf16.msra.mxu1 %v17017_v21 }
 0x622   : > { %v9634_v43 = vmax.f32 %v9632_v51, %v9633_v11  ;;  %v15493_v31 = vadd.f32 %v8346_v26, %v20636_v55  ;;  %v9465_v13 = vmax.f32 %v9337_v40, 0.0 }
 0x623   : > { %20635 = vst [vmem:[#allocation9_spill] sm:$0xff] %v19262_v54  ;;  %v9636_v2 = vsel %vm9547_vm0, %v9480_v22, -inf  ;;  %v9219_v42 = vmul.f32 %v19149_v12, %v8889_v56  ;;  %8558 = vmatmul.mubr.bf16.gmra.mrb[232].mxu0 %v17004_v45  ;;  %14926 = vmatprep.mubr.msk.bf16.mxu1 %vm9547_vm0, %v19262_v54  ;;  %v19283_v45 = vpop.f32.mrb[96].mxu1 }
 0x624   : > { %v9637_v57 = vmax.f32 %v9635_v29, %v9636_v2  ;;  %v8892_v7 = vadd.f32 %v15493_v31, %v18886_v53  ;;  %8565 = vmatprep.mubr.bf16.mxu0 %v17005_v46  ;;  %v9638_v51 = vsel %vm9547_vm0, %v9465_v13, -inf  ;;  %v19291_v22 = vpop.f32.mrb[97].mxu1  ;;  %v9641_v2 = vsel %vm9547_vm0, %v9466_v59, -inf  ;;  %v20640_v59 = vld [vmem:[#allocation45_spill] sm:$0xff] }
 0x625   : > { %v9353_v62 = vadd.f32 %v19143_v48, %v9219_v42  ;;  %v19293_v55 = vpop.f32.mrb[98].mxu1 }
 0x626   : > { %v9220_v25 = vmul.f32 %v19149_v12, %v8892_v7  ;;  %v8351_v35 = vpop.f32.mrb[128].mxu0  ;;  %v19298_v29 = vpop.f32.mrb[99].mxu1 }
 0x627   : > { %v9481_v41 = vmax.f32 %v9353_v62, 0.0  ;;  %v15494_v23 = vadd.f32 %v8351_v35, %v20637_v47  ;;  %v8353_v34 = vpop.f32.mrb[129].mxu0  ;;  %v20639_v35 = vld [vmem:[#allocation44_spill] sm:$0xff]  ;;  %v17008_v47 = vld [vmem:[%s17427_s12 + $0x2f0] sm:$0xff]  }
 0x628   : > { %v9354_v1 = vadd.f32 %v19143_v48, %v9220_v25  ;;  %v8354_v53 = vpop.f32.mrb[130].mxu0  ;;  %v9785_v25 = vsel %vm9547_vm0, %v9637_v57, -inf }
 0x629   : > { %v9639_v40 = vsel %vm9547_vm0, %v9481_v41, -inf  ;;  %v15495_v26 = vadd.f32 %v8354_v53, %v20638_v17  ;;  %v19289_v46 = vadd.f32 %v15494_v23, %v18936_v28  ;;  %v8356_v11 = vpop.f32.mrb[131].mxu0  ;;  %v9782_v28 = vsel %vm9547_vm0, %v9634_v43, -inf  ;;  %v17009_v43 = vld [vmem:[%s17427_s12 + $0x300] sm:$0xff]  }
 0x62a   : > { %v9640_v56 = vmax.f32 %v9638_v51, %v9639_v40  ;;  %v9482_v9 = vmax.f32 %v9354_v1, 0.0  ;;  %v17018_v51 = vld [vmem:[%s20432_s4 + $0x18] sm:$0xff]  }
 0x62b   : > { %v19296_v31 = vadd.f32 %v15495_v26, %v18945_v14  ;;  %8566 = vmatmul.mubr.bf16.gmra.mrb[236].mxu0 %v17006_v3  ;;  %14944 = vmatprep.subr.bf16.mxu1 %v17018_v51  ;;  %v20642_v40 = vld [vmem:[#allocation46_spill] sm:$0xff]  ;;  %v17010_v11 = vld [vmem:[%s17427_s12 + $0x2f8] sm:$0xff]  }
 0x62c   : > { %v9783_v42 = vsel %vm9547_vm0, %v9640_v56, -inf  ;;  %v9642_v39 = vsel %vm9547_vm0, %v9482_v9, -inf  ;;  %8573 = vmatprep.mubr.bf16.mxu0 %v17007_v60  ;;  %14945 = vmatpush3.bf16.msra.mxu1 %v17018_v51  ;;  %v19326_v9 = vpop.f32.mrb[100].mxu1 }
 0x62d   : > { %v9784_v7 = vmax.f32 %v9782_v28, %v9783_v42  ;;  %v9643_v13 = vmax.f32 %v9641_v2, %v9642_v39  ;;  %v20643_v2 = vld [vmem:[#allocation47_spill] sm:$0xff] }
 0x62e   : > { %v8359_v62 = vpop.f32.mrb[132].mxu0 }
 0x62f   : > { %v9786_v14 = vsel %vm9547_vm0, %v9643_v13, -inf  ;;  %v15496_v21 = vadd.f32 %v8359_v62, %v20639_v35  ;;  %v8361_v41 = vpop.f32.mrb[133].mxu0  ;;  %v20644_v35 = vld [vmem:[#allocation48_spill] sm:$0xff] }
 0x630   : > { %v9787_v23 = vmax.f32 %v9785_v25, %v9786_v14  ;;  %v8362_v34 = vpop.f32.mrb[134].mxu0 }
 0x631   : > { %v19310_v3 = vadd.f32 %v15496_v21, %v18929_v52  ;;  %v15497_v1 = vadd.f32 %v8362_v34, %v20640_v59  ;;  %v8364_v53 = vpop.f32.mrb[135].mxu0 }
 0x632   : > { %v19313_v60 = vpack.c.bf16 %v9787_v23, %v9784_v7  ;;  %v19332_v7 = vpop.f32.mrb[101].mxu1  ;;  %v17013_v23 = vld [vmem:[%s17427_s12 + $0x310] sm:$0xff]   ;;  %v19354_v53 = vld [vmem:[%s20432_s4 + $0x40] sm:$0xff]  }
 0x633   : > { %v19316_v57 = vadd.f32 %v15497_v1, %v18938_v61  ;;  %8574 = vmatmul.mubr.bf16.gmra.mrb[240].mxu0 %v17008_v47  ;;  %v17011_v61 = vld [vmem:[%s17427_s12 + $0x308] sm:$0xff]   ;;  %v19334_v13 = vpop.f32.mrb[102].mxu1  ;;  %v17012_v47 = vld [vmem:[%s17427_s12 + $0x300] sm:$0xff]   ;;  %14978 = vmatprep.subr.bf16.mxu1 %v19354_v53 }
 0x634   : > { %20641 = vst [vmem:[#allocation111_spill] sm:$0xff] %v19313_v60  ;;  %14927 = vmatmul.mubr.msk.bf16.gmra.mrb[148].mxu1 %vm9547_vm0, %v19313_v60  ;;  %8581 = vmatprep.mubr.bf16.mxu0 %v17009_v43  ;;  %v19339_v25 = vpop.f32.mrb[103].mxu1  ;;  %v20645_v43 = vld [vmem:[#allocation49_spill] sm:$0xff]  ;;  %v20658_v60 = vld [vmem:[#allocation58_spill] sm:$0xff] }
 0x636   : > { %v8367_v52 = vpop.f32.mrb[136].mxu0 }
 0x637   : > { %v15498_v17 = vadd.f32 %v8367_v52, %v20642_v40  ;;  %v8369_v26 = vpop.f32.mrb[137].mxu0  ;;  %v20646_v52 = vld [vmem:[#allocation50_spill] sm:$0xff] }
 0x638   : > { %v8370_v56 = vpop.f32.mrb[138].mxu0 }
 0x639   : > { %v15499_v28 = vadd.f32 %v8370_v56, %v20643_v2  ;;  %v19330_v42 = vadd.f32 %v15498_v17, %v18974_v32  ;;  %v8372_v39 = vpop.f32.mrb[139].mxu0  ;;  %v17014_v17 = vld [vmem:[%s17427_s12 + $0x308] sm:$0xff]   ;;  %v20647_v56 = vld [vmem:[#allocation51_spill] sm:$0xff] }
 0x63b   : > { %v19337_v62 = vadd.f32 %v15499_v28, %v18981_v30  ;;  %8582 = vmatmul.mubr.bf16.gmra.mrb[244].mxu0 %v17010_v11  ;;  %v19359_v11 = vpop.f32.mrb[104].mxu1 }
 0x63c   : > { %8589 = vmatprep.mubr.bf16.mxu0 %v17011_v61  ;;  %v19365_v28 = vpop.f32.mrb[105].mxu1 }
 0x63d   : > { %v19367_v39 = vpop.f32.mrb[106].mxu1 }
 0x63e   : > { %v8375_v14 = vpop.f32.mrb[140].mxu0 }
 0x63f   : > { %v15500_v21 = vadd.f32 %v8375_v14, %v20644_v35  ;;  %v8377_v41 = vpop.f32.mrb[141].mxu0  ;;  %v19372_v35 = vpop.f32.mrb[107].mxu1 }
 0x640   : > { %v8378_v32 = vpop.f32.mrb[142].mxu0  ;;  %v20648_v41 = vld [vmem:[#allocation52_spill] sm:$0xff] }
 0x641   : > { %v19345_v34 = vadd.f32 %v15500_v21, %v18968_v10  ;;  %v15501_v59 = vadd.f32 %v8378_v32, %v20645_v43  ;;  %v8380_v1 = vpop.f32.mrb[143].mxu0 }
 0x643   : > { %v19349_v30 = vadd.f32 %v15501_v59, %v18976_v20  ;;  %8590 = vmatmul.mubr.bf16.gmra.mrb[248].mxu0 %v17012_v47 }
 0x644   : > { %8597 = vmatprep.mubr.bf16.mxu0 %v17013_v23 }
 0x646   : > { %v8383_v51 = vpop.f32.mrb[144].mxu0 }
 0x647   : > { %v15502_v40 = vadd.f32 %v8383_v51, %v20646_v52  ;;  %v8385_v10 = vpop.f32.mrb[145].mxu0 }
 0x648   : > { %v8386_v26 = vpop.f32.mrb[146].mxu0 }
 0x649   : > { %v15503_v20 = vadd.f32 %v8386_v26, %v20647_v56  ;;  %v19363_v61 = vadd.f32 %v15502_v40, %v19002_v4  ;;  %v8388_v2 = vpop.f32.mrb[147].mxu0  ;;  %v20649_v4 = vld [vmem:[#allocation53_spill] sm:$0xff]  ;;  %v19383_v26 = vpop.f32.mrb[108].mxu1  ;;  %v20652_v56 = vld [vmem:[#allocation55_spill] sm:$0xff] }
 0x64a   : > { %20651 = vst [vmem:[#allocation10_spill] sm:$0xff] %v19383_v26  ;;  %v20668_v26 = vld [vmem:[#allocation61_spill] sm:$0xff] }
 0x64b   : > { %v19370_v14 = vadd.f32 %v15503_v20, %v19009_v49  ;;  %8598 = vmatmul.mubr.bf16.gmra.mrb[252].mxu0 %v17014_v17  ;;  %v20650_v49 = vld [vmem:[#allocation54_spill] sm:$0xff] }
 0x64e   : > { %v8391_v21 = vpop.f32.mrb[148].mxu0 }
 0x64f   : > { %v15504_v47 = vadd.f32 %v8391_v21, %v20648_v41  ;;  %v8393_v32 = vpop.f32.mrb[149].mxu0  ;;  %v19389_v21 = vpop.f32.mrb[109].mxu1 }
 0x650   : > { %v8394_v23 = vpop.f32.mrb[150].mxu0  ;;  %v19391_v41 = vpop.f32.mrb[110].mxu1 }
 0x651   : > { %v19376_v43 = vadd.f32 %v15504_v47, %v18996_v16  ;;  %v15505_v59 = vadd.f32 %v8394_v23, %v20649_v4  ;;  %v8396_v1 = vpop.f32.mrb[151].mxu0  ;;  %20653 = vst [vmem:[#allocation11_spill] sm:$0xff] %v19391_v41  ;;  %v19396_v47 = vpop.f32.mrb[111].mxu1  ;;  %v20654_v23 = vld [vmem:[#allocation56_spill] sm:$0xff] }
 0x653   : > { %v19380_v51 = vadd.f32 %v15505_v59, %v19004_v0 }
 0x656   : > { %v8399_v52 = vpop.f32.mrb[152].mxu0 }
 0x657   : > { %v15506_v40 = vadd.f32 %v8399_v52, %v20650_v49  ;;  %v8401_v10 = vpop.f32.mrb[153].mxu0  ;;  %v20655_v52 = vld [vmem:[#allocation5_spill] sm:$0xff] }
 0x658   : > { %v8402_v17 = vpop.f32.mrb[154].mxu0 }
 0x659   : > { %v15507_v20 = vadd.f32 %v8402_v17, %v20652_v56  ;;  %v19387_v2 = vadd.f32 %v15506_v40, %v19030_v24  ;;  %v8404_v16 = vpop.f32.mrb[155].mxu0  ;;  %v20656_v24 = vld [vmem:[#allocation57_spill] sm:$0xff]  ;;  %v20657_v17 = vld [vmem:[#allocation107_spill] sm:$0xff] }
 0x65b   : > { %v19394_v0 = vadd.f32 %v15507_v20, %v19037_v6  ;;  %v9221_v6 = vmul.f32 %v19149_v12, %v19289_v46  ;;  %v9222_v20 = vmul.f32 %v19149_v12, %v19296_v31 }
 0x65d   : > { %v9356_v46 = vadd.f32 %v19143_v48, %v9222_v20  ;;  %v9224_v20 = vmul.f32 %v19149_v12, %v19316_v57 }
 0x65e   : > { %v8407_v32 = vpop.f32.mrb[156].mxu0 }
 0x65f   : > { %v15508_v4 = vadd.f32 %v8407_v32, %v20654_v23  ;;  %v8409_v59 = vpop.f32.mrb[157].mxu0 }
 0x660   : > { %v8410_v1 = vpop.f32.mrb[158].mxu0  ;;  %v9355_v59 = vadd.f32 %v19143_v48, %v9221_v6 }
 0x661   : > { %v19400_v49 = vadd.f32 %v15508_v4, %v20655_v52  ;;  %v15509_v40 = vadd.f32 %v8410_v1, %v20656_v24  ;;  %v8412_v10 = vpop.f32.mrb[159].mxu0  ;;  %v19412_v52 = vpop.f32.mrb[112].mxu1  ;;  %v20660_v1 = vld [vmem:[#allocation59_spill] sm:$0xff] }
 0x662   : > { %20659 = vst [vmem:[#allocation115_spill] sm:$0xff] %v19412_v52  ;;  %v20661_v10 = vld [vmem:[#allocation7_spill] sm:$0xff]  ;;  %v19416_v54 = vpop.f32.mrb[113].mxu1  ;;  %v9483_v6 = vmax.f32 %v9355_v59, 0.0  ;;  %v9223_v52 = vmul.f32 %v19149_v12, %v19310_v3 }
 0x663   : > { %v19404_v56 = vadd.f32 %v15509_v40, %v20657_v17  ;;  %20662 = vst [vmem:[#allocation12_spill] sm:$0xff] %v19416_v54  ;;  %v19419_v41 = vpop.f32.mrb[114].mxu1 }
 0x664   : > { %20663 = vst [vmem:[#allocation113_spill] sm:$0xff] %v19419_v41  ;;  %v20666_v41 = vld [vmem:[#allocation60_spill] sm:$0xff]  ;;  %v9644_v59 = vsel %vm9547_vm0, %v9483_v6, -inf }
 0x666   : > { %v8415_v16 = vpop.f32.mrb[160].mxu0 }
 0x667   : > { %v15510_v32 = vadd.f32 %v8415_v16, %v20658_v60  ;;  %v8417_v23 = vpop.f32.mrb[161].mxu0  ;;  %v20664_v60 = vld [vmem:[#allocation112_spill] sm:$0xff] }
 0x668   : > { %v8418_v4 = vpop.f32.mrb[162].mxu0  ;;  %v19423_v23 = vpop.f32.mrb[115].mxu1 }
 0x669   : > { %v15511_v24 = vadd.f32 %v8418_v4, %v20660_v1  ;;  %v8961_v40 = vadd.f32 %v15510_v32, %v20661_v10  ;;  %v8420_v17 = vpop.f32.mrb[163].mxu0  ;;  %20665 = vst [vmem:[#allocation13_spill] sm:$0xff] %v19423_v23  ;;  %v9484_v1 = vmax.f32 %v9356_v46, 0.0  ;;  %v9357_v23 = vadd.f32 %v19143_v48, %v9223_v52 }
 0x66b   : > { %v9237_v31 = vmul.f32 %v19149_v12, %v8961_v40  ;;  %v8964_v16 = vadd.f32 %v15511_v24, %v20664_v60 }
 0x66d   : > { %v9371_v4 = vadd.f32 %v19143_v48, %v9237_v31  ;;  %v9238_v32 = vmul.f32 %v19149_v12, %v8964_v16  ;;  %v20667_v16 = vld [vmem:[#allocation6_spill] sm:$0xff] }
 0x66e   : > { %v8423_v10 = vpop.f32.mrb[164].mxu0 }
 0x66f   : > { %v9499_v17 = vmax.f32 %v9371_v4, 0.0  ;;  %v9372_v40 = vadd.f32 %v19143_v48, %v9238_v32  ;;  %v15512_v24 = vadd.f32 %v8423_v10, %v20666_v41  ;;  %v8425_v60 = vpop.f32.mrb[165].mxu0  ;;  %v9647_v4 = vsel %vm9547_vm0, %v9484_v1, -inf  ;;  %v20669_v10 = vld [vmem:[#allocation110_spill] sm:$0xff] }
 0x670   : > { %v8426_v3 = vpop.f32.mrb[166].mxu0  ;;  %v9358_v32 = vadd.f32 %v19143_v48, %v9224_v20  ;;  %v9225_v41 = vmul.f32 %v19149_v12, %v19330_v42  ;;  %v9226_v1 = vmul.f32 %v19149_v12, %v19337_v62 }
 0x671   : > { %v9645_v31 = vsel %vm9547_vm0, %v9499_v17, -inf  ;;  %v9500_v54 = vmax.f32 %v9372_v40, 0.0  ;;  %v8969_v46 = vadd.f32 %v15512_v24, %v20667_v16  ;;  %v15513_v36 = vadd.f32 %v8426_v3, %v20668_v26  ;;  %v8428_v57 = vpop.f32.mrb[167].mxu0 }
 0x672   : > { %v9646_v58 = vmax.f32 %v9644_v59, %v9645_v31  ;;  %v9485_v40 = vmax.f32 %v9357_v23, 0.0  ;;  %v9486_v3 = vmax.f32 %v9358_v32, 0.0  ;;  %v9359_v59 = vadd.f32 %v19143_v48, %v9225_v41  ;;  %v20670_v31 = vld [vmem:[#allocation62_spill] sm:$0xff]  ;;  %v19453_v57 = vpop.f32.mrb[116].mxu1 }
 0x673   : > { %v9648_v6 = vsel %vm9547_vm0, %v9500_v54, -inf  ;;  %v9239_v52 = vmul.f32 %v19149_v12, %v8969_v46  ;;  %v8972_v17 = vadd.f32 %v15513_v36, %v20669_v10  ;;  %v19458_v41 = vpop.f32.mrb[117].mxu1 }
 0x674   : > { %v9649_v60 = vmax.f32 %v9647_v4, %v9648_v6  ;;  %v9650_v36 = vsel %vm9547_vm0, %v9485_v40, -inf  ;;  %v20671_v6 = vld [vmem:[#allocation63_spill] sm:$0xff]  ;;  %v9487_v40 = vmax.f32 %v9359_v59, 0.0 }
 0x675   : > { %v9373_v24 = vadd.f32 %v19143_v48, %v9239_v52  ;;  %v9240_v26 = vmul.f32 %v19149_v12, %v8972_v17  ;;  %v9653_v17 = vsel %vm9547_vm0, %v9486_v3, -inf }
 0x676   : > { %v8431_v20 = vpop.f32.mrb[168].mxu0 }
 0x677   : > { %v9501_v42 = vmax.f32 %v9373_v24, 0.0  ;;  %v9374_v54 = vadd.f32 %v19143_v48, %v9240_v26  ;;  %v15514_v16 = vadd.f32 %v8431_v20, %v20670_v31  ;;  %v8433_v46 = vpop.f32.mrb[169].mxu0  ;;  %v9360_v24 = vadd.f32 %v19143_v48, %v9226_v1  ;;  %v19462_v20 = vpop.f32.mrb[118].mxu1 }
 0x678   : > { %v8434_v23 = vpop.f32.mrb[170].mxu0  ;;  %v19467_v46 = vpop.f32.mrb[119].mxu1 }
 0x679   : > { %v9651_v4 = vsel %vm9547_vm0, %v9501_v42, -inf  ;;  %v9502_v32 = vmax.f32 %v9374_v54, 0.0  ;;  %v15515_v52 = vadd.f32 %v8434_v23, %v20671_v6  ;;  %v8977_v62 = vadd.f32 %v15514_v16, %v19107_v44  ;;  %v8436_v10 = vpop.f32.mrb[171].mxu0 }
 0x67a   : > { %v9652_v26 = vmax.f32 %v9650_v36, %v9651_v4  ;;  %v9227_v44 = vmul.f32 %v19149_v12, %v19345_v34  ;;  %v9788_v16 = vsel %vm9547_vm0, %v9646_v58, -inf  ;;  %v9488_v4 = vmax.f32 %v9360_v24, 0.0  ;;  %v20672_v10 = vld [vmem:[#allocation64_spill] sm:$0xff] }
 0x67b   : > { %v9654_v31 = vsel %vm9547_vm0, %v9502_v32, -inf  ;;  %v9241_v42 = vmul.f32 %v19149_v12, %v8977_v62  ;;  %v8980_v54 = vadd.f32 %v15515_v52, %v19116_v50  ;;  %v9228_v32 = vmul.f32 %v19149_v12, %v19349_v30 }
 0x67c   : > { %v9789_v3 = vsel %vm9547_vm0, %v9652_v26, -inf  ;;  %v9655_v1 = vmax.f32 %v9653_v17, %v9654_v31  ;;  %v9791_v50 = vsel %vm9547_vm0, %v9649_v60, -inf  ;;  %v9656_v31 = vsel %vm9547_vm0, %v9487_v40, -inf }
 0x67d   : > { %v9790_v36 = vmax.f32 %v9788_v16, %v9789_v3  ;;  %v9375_v23 = vadd.f32 %v19143_v48, %v9241_v42  ;;  %v9242_v59 = vmul.f32 %v19149_v12, %v8980_v54  ;;  %v9361_v42 = vadd.f32 %v19143_v48, %v9227_v44 }
 0x67e   : > { %v9792_v6 = vsel %vm9547_vm0, %v9655_v1, -inf  ;;  %v8439_v52 = vpop.f32.mrb[172].mxu0  ;;  %v9659_v1 = vsel %vm9547_vm0, %v9488_v4, -inf  ;;  %v9229_v40 = vmul.f32 %v19149_v12, %v19363_v61 }
 0x67f   : > { %v9793_v34 = vmax.f32 %v9791_v50, %v9792_v6  ;;  %v9503_v62 = vmax.f32 %v9375_v23, 0.0  ;;  %v9376_v58 = vadd.f32 %v19143_v48, %v9242_v59  ;;  %v15516_v17 = vadd.f32 %v8439_v52, %v20672_v10  ;;  %v8441_v26 = vpop.f32.mrb[173].mxu0  ;;  %v20673_v59 = vld [vmem:[#allocation65_spill] sm:$0xff] }
 0x680   : > { %v8442_v24 = vpop.f32.mrb[174].mxu0  ;;  %v9362_v6 = vadd.f32 %v19143_v48, %v9228_v32  ;;  %v9363_v10 = vadd.f32 %v19143_v48, %v9229_v40  ;;  %v20674_v26 = vld [vmem:[#allocation66_spill] sm:$0xff] }
 0x681   : > { %v19483_v54 = vpack.c.bf16 %v9793_v34, %v9790_v36  ;;  %v9657_v30 = vsel %vm9547_vm0, %v9503_v62, -inf  ;;  %v9504_v60 = vmax.f32 %v9376_v58, 0.0  ;;  %v8985_v16 = vadd.f32 %v15516_v17, %v19102_v27  ;;  %v8444_v3 = vpop.f32.mrb[175].mxu0 }
 0x682   : > { %v9658_v23 = vmax.f32 %v9656_v31, %v9657_v30  ;;  %v15517_v50 = vadd.f32 %v8442_v24, %v20673_v59  ;;  %v9489_v34 = vmax.f32 %v9361_v42, 0.0  ;;  %v9230_v62 = vmul.f32 %v19149_v12, %v19370_v14  ;;  %v20675_v14 = vld [vmem:[#allocation67_spill] sm:$0xff] }
 0x683   : > { %v9660_v44 = vsel %vm9547_vm0, %v9504_v60, -inf  ;;  %v9243_v36 = vmul.f32 %v19149_v12, %v8985_v16  ;;  %14930 = vmatprep.mubr.msk.bf16.mxu1 %vm9547_vm0, %v19483_v54  ;;  %v9490_v61 = vmax.f32 %v9362_v6, 0.0 }
 0x684   : > { %v9661_v52 = vmax.f32 %v9659_v1, %v9660_v44  ;;  %v8988_v27 = vadd.f32 %v15517_v50, %v19111_v38  ;;  %v19504_v38 = vpop.f32.mrb[120].mxu1  ;;  %v9662_v42 = vsel %vm9547_vm0, %v9489_v34, -inf  ;;  %v9364_v6 = vadd.f32 %v19143_v48, %v9230_v62 }
 0x685   : > { %v9377_v4 = vadd.f32 %v19143_v48, %v9243_v36  ;;  %v19510_v50 = vpop.f32.mrb[121].mxu1 }
 0x686   : > { %v9244_v32 = vmul.f32 %v19149_v12, %v8988_v27  ;;  %v8447_v58 = vpop.f32.mrb[176].mxu0  ;;  %v19513_v36 = vpop.f32.mrb[122].mxu1  ;;  %v9665_v27 = vsel %vm9547_vm0, %v9490_v61, -inf }
 0x687   : > { %v9505_v17 = vmax.f32 %v9377_v4, 0.0  ;;  %v15518_v31 = vadd.f32 %v8447_v58, %v20674_v26  ;;  %v8449_v24 = vpop.f32.mrb[177].mxu0  ;;  %v9491_v4 = vmax.f32 %v9363_v10, 0.0  ;;  %v19518_v58 = vpop.f32.mrb[123].mxu1 }
 0x688   : > { %v9378_v30 = vadd.f32 %v19143_v48, %v9244_v32  ;;  %v8450_v60 = vpop.f32.mrb[178].mxu0 }
 0x689   : > { %v9663_v16 = vsel %vm9547_vm0, %v9505_v17, -inf  ;;  %v15519_v3 = vadd.f32 %v8450_v60, %v20675_v14  ;;  %v8993_v1 = vadd.f32 %v15518_v31, %v19176_v63  ;;  %v8452_v59 = vpop.f32.mrb[179].mxu0  ;;  %v9231_v63 = vmul.f32 %v19149_v12, %v19376_v43  ;;  %v20676_v14 = vld [vmem:[#allocation68_spill] sm:$0xff] }
 0x68a   : > { %v9664_v40 = vmax.f32 %v9662_v42, %v9663_v16  ;;  %v9506_v44 = vmax.f32 %v9378_v30, 0.0  ;;  %v9794_v17 = vsel %vm9547_vm0, %v9658_v23, -inf  ;;  %v9492_v30 = vmax.f32 %v9364_v6, 0.0 }
 0x68b   : > { %v9245_v34 = vmul.f32 %v19149_v12, %v8993_v1  ;;  %v8996_v32 = vadd.f32 %v15519_v3, %v19184_v37  ;;  %v9232_v37 = vmul.f32 %v19149_v12, %v19380_v51  ;;  %v9797_v60 = vsel %vm9547_vm0, %v9661_v52, -inf }
 0x68c   : > { %v9795_v62 = vsel %vm9547_vm0, %v9664_v40, -inf  ;;  %v9666_v26 = vsel %vm9547_vm0, %v9506_v44, -inf  ;;  %v9668_v59 = vsel %vm9547_vm0, %v9491_v4, -inf  ;;  %v9365_v40 = vadd.f32 %v19143_v48, %v9231_v63 }
 0x68d   : > { %v9796_v31 = vmax.f32 %v9794_v17, %v9795_v62  ;;  %v9667_v24 = vmax.f32 %v9665_v27, %v9666_v26  ;;  %v9379_v61 = vadd.f32 %v19143_v48, %v9245_v34  ;;  %v9246_v10 = vmul.f32 %v19149_v12, %v8996_v32  ;;  %v20677_v34 = vld [vmem:[#allocation69_spill] sm:$0xff] }
 0x68e   : > { %v8455_v42 = vpop.f32.mrb[180].mxu0  ;;  %v9671_v62 = vsel %vm9547_vm0, %v9492_v30, -inf  ;;  %v9366_v26 = vadd.f32 %v19143_v48, %v9232_v37  ;;  %v9233_v4 = vmul.f32 %v19149_v12, %v19387_v2 }
 0x68f   : > { %v9798_v43 = vsel %vm9547_vm0, %v9667_v24, -inf  ;;  %v9507_v23 = vmax.f32 %v9379_v61, 0.0  ;;  %v9380_v16 = vadd.f32 %v19143_v48, %v9246_v10  ;;  %v15520_v3 = vadd.f32 %v8455_v42, %v20676_v14  ;;  %v8457_v1 = vpop.f32.mrb[181].mxu0 }
 0x690   : > { %v9799_v44 = vmax.f32 %v9797_v60, %v9798_v43  ;;  %v8458_v6 = vpop.f32.mrb[182].mxu0  ;;  %v9494_v37 = vmax.f32 %v9366_v26, 0.0  ;;  %v9234_v43 = vmul.f32 %v19149_v12, %v19394_v0 }
 0x691   : > { %v9669_v27 = vsel %vm9547_vm0, %v9507_v23, -inf  ;;  %v9508_v51 = vmax.f32 %v9380_v16, 0.0  ;;  %v9001_v52 = vadd.f32 %v15520_v3, %v19170_v5  ;;  %v15521_v32 = vadd.f32 %v8458_v6, %v20677_v34  ;;  %v8460_v17 = vpop.f32.mrb[183].mxu0 }
 0x692   : > { %v19540_v24 = vpack.c.bf16 %v9799_v44, %v9796_v31  ;;  %v9670_v61 = vmax.f32 %v9668_v59, %v9669_v27  ;;  %v9493_v5 = vmax.f32 %v9365_v40, 0.0  ;;  %v9367_v23 = vadd.f32 %v19143_v48, %v9233_v4  ;;  %v19557_v44 = vpop.f32.mrb[124].mxu1 }
 0x693   : > { %v9672_v63 = vsel %vm9547_vm0, %v9508_v51, -inf  ;;  %v9247_v10 = vmul.f32 %v19149_v12, %v9001_v52  ;;  %v9004_v60 = vadd.f32 %v15521_v32, %v19179_v18  ;;  %v20678_v18 = vld [vmem:[#allocation70_spill] sm:$0xff]  ;;  %v20679_v51 = vld [vmem:[#allocation71_spill] sm:$0xff]  ;;  %v19562_v32 = vpop.f32.mrb[125].mxu1  ;;  %v9677_v17 = vsel %vm9547_vm0, %v9494_v37, -inf }
 0x694   : > { %v9673_v42 = vmax.f32 %v9671_v62, %v9672_v63  ;;  %14931 = vmatmul.mubr.msk.bf16.gmra.mrb[152].mxu1 %vm9547_vm0, %v19540_v24  ;;  %v9674_v59 = vsel %vm9547_vm0, %v9493_v5, -inf  ;;  %v9368_v62 = vadd.f32 %v19143_v48, %v9234_v43  ;;  %v19566_v4 = vpop.f32.mrb[126].mxu1  ;;  %v9495_v63 = vmax.f32 %v9367_v23, 0.0 }
 0x695   : > { %v9381_v30 = vadd.f32 %v19143_v48, %v9247_v10  ;;  %v9248_v31 = vmul.f32 %v19149_v12, %v9004_v60 }
 0x696   : > { %v8463_v2 = vpop.f32.mrb[184].mxu0 }
 0x697   : > { %v9509_v16 = vmax.f32 %v9381_v30, 0.0  ;;  %v9382_v14 = vadd.f32 %v19143_v48, %v9248_v31  ;;  %v15522_v3 = vadd.f32 %v8463_v2, %v20678_v18  ;;  %v8465_v1 = vpop.f32.mrb[185].mxu0  ;;  %v19571_v30 = vpop.f32.mrb[127].mxu1  ;;  %v9800_v31 = vsel %vm9547_vm0, %v9670_v61, -inf }
 0x698   : > { %v8466_v40 = vpop.f32.mrb[186].mxu0  ;;  %v9803_v18 = vsel %vm9547_vm0, %v9673_v42, -inf }
 0x699   : > { %v9675_v6 = vsel %vm9547_vm0, %v9509_v16, -inf  ;;  %v9510_v27 = vmax.f32 %v9382_v14, 0.0  ;;  %v15523_v52 = vadd.f32 %v8466_v40, %v20679_v51  ;;  %v9009_v0 = vadd.f32 %v15522_v3, %v19235_v19  ;;  %v8468_v34 = vpop.f32.mrb[187].mxu0  ;;  %v20680_v40 = vld [vmem:[#allocation72_spill] sm:$0xff] }
 0x69a   : > { %v9676_v26 = vmax.f32 %v9674_v59, %v9675_v6  ;;  %v9235_v19 = vmul.f32 %v19149_v12, %v19400_v49  ;;  %v9496_v14 = vmax.f32 %v9368_v62, 0.0 }
 0x69b   : > { %v9678_v10 = vsel %vm9547_vm0, %v9510_v27, -inf  ;;  %v9249_v60 = vmul.f32 %v19149_v12, %v9009_v0  ;;  %v9012_v5 = vadd.f32 %v15523_v52, %v19244_v15  ;;  %v9680_v27 = vsel %vm9547_vm0, %v9495_v63, -inf }
 0x69c   : > { %v9801_v37 = vsel %vm9547_vm0, %v9676_v26, -inf  ;;  %v9679_v43 = vmax.f32 %v9677_v17, %v9678_v10  ;;  %v9369_v51 = vadd.f32 %v19143_v48, %v9235_v19  ;;  %v9236_v52 = vmul.f32 %v19149_v12, %v19404_v56 }
 0x69d   : > { %v9802_v2 = vmax.f32 %v9800_v31, %v9801_v37  ;;  %v9383_v16 = vadd.f32 %v19143_v48, %v9249_v60  ;;  %v9250_v23 = vmul.f32 %v19149_v12, %v9012_v5  ;;  %v20681_v60 = vld [vmem:[#allocation73_spill] sm:$0xff]  ;;  %v9683_v31 = vsel %vm9547_vm0, %v9496_v14, -inf }
 0x69e   : > { %v9804_v15 = vsel %vm9547_vm0, %v9679_v43, -inf  ;;  %v8471_v3 = vpop.f32.mrb[188].mxu0  ;;  %v9497_v43 = vmax.f32 %v9369_v51, 0.0 }
 0x69f   : > { %v9805_v1 = vmax.f32 %v9803_v18, %v9804_v15  ;;  %v9511_v59 = vmax.f32 %v9383_v16, 0.0  ;;  %v9384_v49 = vadd.f32 %v19143_v48, %v9250_v23  ;;  %v15524_v61 = vadd.f32 %v8471_v3, %v20680_v40  ;;  %v8473_v6 = vpop.f32.mrb[189].mxu0  ;;  %v19597_v48 = vld [vmem:[%s20430_s2] ss:$0 sm:$0xff]  ;;  %v20682_v18 = vld [vmem:[#allocation74_spill] sm:$0xff] }
 0x6a0   : > { %v8474_v0 = vpop.f32.mrb[190].mxu0  ;;  %v9686_v40 = vsel %vm9547_vm0, %v9497_v43, -inf  ;;  %v20683_v6 = vld [vmem:[#allocation75_spill] sm:$0xff] }
 0x6a1   : > { %v19587_v34 = vpack.c.bf16 %v9805_v1, %v9802_v2  ;;  %v9681_v42 = vsel %vm9547_vm0, %v9511_v59, -inf  ;;  %v9512_v17 = vmax.f32 %v9384_v49, 0.0  ;;  %v9017_v62 = vadd.f32 %v15524_v61, %v19230_v33  ;;  %v8476_v26 = vpop.f32.mrb[191].mxu0  ;;  %v19605_v33 = vld [vmem:[%s20431_s3] ss:$0 sm:$0xff] }
 0x6a2   : > { %v9682_v10 = vmax.f32 %v9680_v27, %v9681_v42  ;;  %v15525_v5 = vadd.f32 %v8474_v0, %v20681_v60  ;;  %v9370_v56 = vadd.f32 %v19605_v33, %v9236_v52 }
 0x6a3   : > { %v9684_v63 = vsel %vm9547_vm0, %v9512_v17, -inf  ;;  %v9251_v12 = vmul.f32 %v19597_v48, %v9017_v62  ;;  %14934 = vmatprep.mubr.msk.bf16.mxu1 %vm9547_vm0, %v19587_v34 }
 0x6a4   : > { %v9685_v19 = vmax.f32 %v9683_v31, %v9684_v63  ;;  %v9020_v37 = vadd.f32 %v15525_v5, %v19239_v8  ;;  %v9498_v1 = vmax.f32 %v9370_v56, 0.0  ;;  %v9806_v62 = vsel %vm9547_vm0, %v9682_v10, -inf  ;;  %v20684_v56 = vld [vmem:[#allocation76_spill] sm:$0xff]  ;;  %v20685_v10 = vld [vmem:[#allocation77_spill] sm:$0xff] }
 0x6a5   : > { %v9385_v2 = vadd.f32 %v19605_v33, %v9251_v12 }
 0x6a6   : > { %v9252_v16 = vmul.f32 %v19597_v48, %v9020_v37  ;;  %v8479_v23 = vpop.f32.mrb[192].mxu0  ;;  %v9689_v17 = vsel %vm9547_vm0, %v9498_v1, -inf  ;;  %v20687_v1 = vld [vmem:[#allocation78_spill] sm:$0xff] }
 0x6a7   : > { %v9513_v14 = vmax.f32 %v9385_v2, 0.0  ;;  %v15526_v15 = vadd.f32 %v8479_v23, %v20682_v18  ;;  %v8481_v3 = vpop.f32.mrb[193].mxu0 }
 0x6a8   : > { %v9386_v59 = vadd.f32 %v19605_v33, %v9252_v16  ;;  %v8482_v49 = vpop.f32.mrb[194].mxu0 }
 0x6a9   : > { %v9687_v61 = vsel %vm9547_vm0, %v9513_v14, -inf  ;;  %v15527_v8 = vadd.f32 %v8482_v49, %v20683_v6  ;;  %v19617_v27 = vadd.f32 %v15526_v15, %v19291_v22  ;;  %v8484_v51 = vpop.f32.mrb[195].mxu0  ;;  %v9809_v22 = vsel %vm9547_vm0, %v9685_v19, -inf }
 0x6aa   : > { %v9688_v52 = vmax.f32 %v9686_v40, %v9687_v61  ;;  %v9514_v0 = vmax.f32 %v9386_v59, 0.0  ;;  %v20686_v19 = vmov 0  }
 0x6ab   : > { %v19620_v42 = vadd.f32 %v15527_v8, %v19298_v29 }
 0x6ac   : > { %v9807_v26 = vsel %vm9547_vm0, %v9688_v52, -inf  ;;  %v9690_v60 = vsel %vm9547_vm0, %v9514_v0, -inf  ;;  %v20689_v0 = vld [vmem:[#allocation80_spill] sm:$0xff] }
 0x6ad   : > { %v9808_v5 = vmax.f32 %v9806_v62, %v9807_v26  ;;  %v9691_v31 = vmax.f32 %v9689_v17, %v9690_v60 }
 0x6ae   : > { %v8487_v63 = vpop.f32.mrb[196].mxu0 }
 0x6af   : > { %v9810_v12 = vsel %vm9547_vm0, %v9691_v31, -inf  ;;  %v15528_v37 = vadd.f32 %v8487_v63, %v20684_v56  ;;  %v8489_v43 = vpop.f32.mrb[197].mxu0 }
 0x6b0   : > { %v9811_v29 = vmax.f32 %v9809_v22, %v9810_v12  ;;  %v8490_v2 = vpop.f32.mrb[198].mxu0  ;;  %v20691_v12 = vld [vmem:[#allocation82_spill] sm:$0xff] }
 0x6b1   : > { %v19630_v16 = vadd.f32 %v15528_v37, %v19283_v45  ;;  %v15529_v23 = vadd.f32 %v8490_v2, %v20685_v10  ;;  %v8492_v14 = vpop.f32.mrb[199].mxu0  ;;  %v20688_v45 = vld [vmem:[#allocation79_spill] sm:$0xff] }
 0x6b2   : > { %v19633_v18 = vpack.c.bf16 %v9811_v29, %v9808_v5  ;;  %v20692_v29 = vld [vmem:[#allocation83_spill] sm:$0xff]  ;;  %v20693_v14 = vld [vmem:[#allocation118_spill] sm:$0xff] }
 0x6b3   : > { %v19636_v15 = vadd.f32 %v15529_v23, %v19293_v55  ;;  %v17020_v55 = vld [vmem:[%s20432_s4 + $0x48] sm:$0xff]  }
 0x6b4   : > { %14935 = vmatmul.mubr.msk.bf16.gmra.mrb[156].mxu1 %vm9547_vm0, %v19633_v18 }
 0x6b5   : > { %14946 = vmatprep.mubr.bf16.mxu1 %v20686_v19 }
 0x6b6   : > { %v8495_v3 = vpop.f32.mrb[200].mxu0 }
 0x6b7   : > { %v15530_v59 = vadd.f32 %v8495_v3, %v20687_v1  ;;  %v8497_v49 = vpop.f32.mrb[201].mxu0  ;;  %v20694_v3 = vld [vmem:[#allocation108_spill] sm:$0xff] }
 0x6b8   : > { %v8498_v40 = vpop.f32.mrb[202].mxu0 }
 0x6b9   : > { %v15531_v61 = vadd.f32 %v8498_v40, %v20688_v45  ;;  %v19644_v6 = vadd.f32 %v15530_v59, %v19332_v7  ;;  %v8500_v8 = vpop.f32.mrb[203].mxu0  ;;  %v17021_v7 = vld [vmem:[%s20432_s4 + $0x50] sm:$0xff]   ;;  %v20695_v59 = vld [vmem:[#allocation84_spill] sm:$0xff] }
 0x6bb   : > { %v19650_v51 = vadd.f32 %v15531_v61, %v19339_v25  ;;  %v20690_v25 = vld [vmem:[#allocation81_spill] sm:$0xff] }
 0x6bc   : > { %14947 = vmatmul.mubr.bf16.vlgmr.msra.gmra.mrb[128].mxu1 %v20686_v19  ;;  %v20696_v61 = vld [vmem:[#allocation85_spill] sm:$0xff] }
 0x6bd   : > { %14979 = vmatpush3.bf16.msra.mxu1 %v19354_v53  ;;  %14950 = vmatprep.mubr.bf16.mxu1 %v20686_v19  ;;  %v17022_v53 = vld [vmem:[%s20432_s4 + $0x58] sm:$0xff]  }
 0x6be   : > { %v8503_v52 = vpop.f32.mrb[204].mxu0  ;;  %14980 = vmatprep.subr.bf16.mxu1 %v17020_v55 }
 0x6bf   : > { %v15532_v17 = vadd.f32 %v8503_v52, %v20689_v0  ;;  %v8505_v62 = vpop.f32.mrb[205].mxu0  ;;  %v20697_v52 = vld [vmem:[#allocation4_spill] sm:$0xff]  ;;  %v20698_v0 = vld [vmem:[#allocation86_spill] sm:$0xff] }
 0x6c0   : > { %v8506_v26 = vpop.f32.mrb[206].mxu0 }
 0x6c1   : > { %v19660_v60 = vadd.f32 %v15532_v17, %v19326_v9  ;;  %v15533_v5 = vadd.f32 %v8506_v26, %v20690_v25  ;;  %v8508_v31 = vpop.f32.mrb[207].mxu0  ;;  %14981 = vmatpush3.bf16.msra.mxu1 %v17020_v55  ;;  %v19674_v9 = vld [vmem:[%s20432_s4 + $0x60] sm:$0xff]  }
 0x6c2   : > { %14982 = vmatprep.subr.bf16.mxu1 %v17021_v7  ;;  %v20699_v25 = vld [vmem:[#allocation87_spill] sm:$0xff] }
 0x6c3   : > { %v19667_v63 = vadd.f32 %v15533_v5, %v19334_v13 }
 0x6c4   : > { %14951 = vmatmul.mubr.bf16.gmra.mrb[132].mxu1 %v20686_v19 }
 0x6c5   : > { %14954 = vmatprep.mubr.bf16.mxu1 %v20686_v19  ;;  %14983 = vmatpush3.bf16.msra.mxu1 %v17021_v7 }
 0x6c6   : > { %v8511_v22 = vpop.f32.mrb[208].mxu0  ;;  %14984 = vmatprep.subr.bf16.mxu1 %v17022_v53 }
 0x6c7   : > { %v15534_v56 = vadd.f32 %v8511_v22, %v20691_v12  ;;  %v8513_v37 = vpop.f32.mrb[209].mxu0  ;;  %v20701_v22 = vld [vmem:[#allocation109_spill] sm:$0xff] }
 0x6c8   : > { %v8514_v43 = vpop.f32.mrb[210].mxu0 }
 0x6c9   : > { %v15535_v2 = vadd.f32 %v8514_v43, %v20692_v29  ;;  %v19679_v13 = vadd.f32 %v15534_v56, %v19365_v28  ;;  %v8516_v10 = vpop.f32.mrb[211].mxu0  ;;  %14985 = vmatpush3.bf16.msra.mxu1 %v17022_v53  ;;  %v20702_v56 = vld [vmem:[#allocation88_spill] sm:$0xff] }
 0x6ca   : > { %15018 = vmatprep.subr.bf16.mxu1 %v19674_v9 }
 0x6cb   : > { %v19683_v23 = vadd.f32 %v15535_v2, %v19372_v35  ;;  %v20703_v2 = vld [vmem:[#allocation10_spill] sm:$0xff] }
 0x6cc   : > { %14955 = vmatmul.mubr.msk.bf16.gmra.mrb[136].mxu1 %vm9547_vm0, %v20693_v14 }
 0x6cd   : > { %14958 = vmatprep.mubr.msk.bf16.mxu1 %vm9547_vm0, %v20694_v3 }
 0x6ce   : > { %v8519_v1 = vpop.f32.mrb[212].mxu0 }
 0x6cf   : > { %v15536_v49 = vadd.f32 %v8519_v1, %v20695_v59  ;;  %v8521_v40 = vpop.f32.mrb[213].mxu0 }
 0x6d0   : > { %v8522_v45 = vpop.f32.mrb[214].mxu0  ;;  %v9253_v40 = vmul.f32 %v19597_v48, %v19617_v27 }
 0x6d1   : > { %v19691_v28 = vadd.f32 %v15536_v49, %v19359_v11  ;;  %v15537_v8 = vadd.f32 %v8522_v45, %v20696_v61  ;;  %v8524_v55 = vpop.f32.mrb[215].mxu0  ;;  %v20705_v49 = vld [vmem:[#allocation11_spill] sm:$0xff]  ;;  %v20706_v45 = vld [vmem:[#allocation9_spill] sm:$0xff]  ;;  %v9254_v61 = vmul.f32 %v19597_v48, %v19620_v42  ;;  %v9255_v42 = vmul.f32 %v19597_v48, %v19630_v16 }
 0x6d2   : > { %v20707_v55 = vld [vmem:[#allocation90_spill] sm:$0xff] }
 0x6d3   : > { %v19695_v35 = vadd.f32 %v15537_v8, %v19367_v39  ;;  %v20700_v39 = vld [vmem:[#allocation8_spill] sm:$0xff] }
 0x6d4   : > { %14959 = vmatmul.mubr.msk.bf16.gmra.mrb[140].mxu1 %vm9547_vm0, %v20697_v52 }
 0x6d5   : > { %14962 = vmatprep.mubr.bf16.mxu1 %v20686_v19 }
 0x6d6   : > { %v8527_v7 = vpop.f32.mrb[216].mxu0 }
 0x6d7   : > { %v15538_v17 = vadd.f32 %v8527_v7, %v20698_v0  ;;  %v8529_v62 = vpop.f32.mrb[217].mxu0 }
 0x6d8   : > { %v8530_v26 = vpop.f32.mrb[218].mxu0 }
 0x6d9   : > { %v15539_v5 = vadd.f32 %v8530_v26, %v20699_v25  ;;  %v19703_v11 = vadd.f32 %v15538_v17, %v19389_v21  ;;  %v8532_v31 = vpop.f32.mrb[219].mxu0  ;;  %v20704_v21 = vld [vmem:[#allocation89_spill] sm:$0xff]  ;;  %v9387_v17 = vadd.f32 %v19605_v33, %v9253_v40  ;;  %v20708_v26 = vld [vmem:[#allocation91_spill] sm:$0xff] }
 0x6db   : > { %v19706_v53 = vadd.f32 %v15539_v5, %v19396_v47  ;;  %v20709_v5 = vld [vmem:[#allocation12_spill] sm:$0xff] }
 0x6dc   : > { %14963 = vmatmul.mubr.msk.bf16.gmra.mrb[144].mxu1 %vm9547_vm0, %v20700_v39 }
 0x6dd   : > { %14966 = vmatprep.mubr.msk.bf16.mxu1 %vm9547_vm0, %v20701_v22 }
 0x6de   : > { %v8535_v12 = vpop.f32.mrb[220].mxu0 }
 0x6df   : > { %v15540_v37 = vadd.f32 %v8535_v12, %v20702_v56  ;;  %v8537_v43 = vpop.f32.mrb[221].mxu0  ;;  %v9388_v12 = vadd.f32 %v19605_v33, %v9254_v61 }
 0x6e0   : > { %v8538_v29 = vpop.f32.mrb[222].mxu0 }
 0x6e1   : > { %v19714_v10 = vadd.f32 %v15540_v37, %v20703_v2  ;;  %v15541_v1 = vadd.f32 %v8538_v29, %v20704_v21  ;;  %v8540_v59 = vpop.f32.mrb[223].mxu0  ;;  %v20710_v37 = vld [vmem:[#allocation13_spill] sm:$0xff]  ;;  %v9515_v29 = vmax.f32 %v9387_v17, 0.0 }
 0x6e2   : > { %v9256_v59 = vmul.f32 %v19597_v48, %v19636_v15 }
 0x6e3   : > { %v19718_v47 = vadd.f32 %v15541_v1, %v20705_v49  ;;  %v9516_v1 = vmax.f32 %v9388_v12, 0.0 }
 0x6e4   : > { %14967 = vmatmul.mubr.msk.bf16.gmra.mrb[148].mxu1 %vm9547_vm0, %v20706_v45 }
 0x6e5   : > { %14970 = vmatprep.mubr.bf16.mxu1 %v20686_v19  ;;  %v9695_v12 = vsel %vm9547_vm0, %v9516_v1, -inf }
 0x6e6   : > { %v8543_v8 = vpop.f32.mrb[224].mxu0 }
 0x6e7   : > { %v15542_v7 = vadd.f32 %v8543_v8, %v20707_v55  ;;  %v8545_v0 = vpop.f32.mrb[225].mxu0  ;;  %v20711_v8 = vld [vmem:[#allocation92_spill] sm:$0xff] }
 0x6e8   : > { %v8546_v62 = vpop.f32.mrb[226].mxu0  ;;  %v9389_v0 = vadd.f32 %v19605_v33, %v9255_v42 }
 0x6e9   : > { %v15543_v25 = vadd.f32 %v8546_v62, %v20708_v26  ;;  %v9089_v31 = vadd.f32 %v15542_v7, %v20709_v5  ;;  %v8548_v27 = vpop.f32.mrb[227].mxu0  ;;  %v9692_v7 = vsel %vm9547_vm0, %v9515_v29, -inf }
 0x6eb   : > { %v9269_v56 = vmul.f32 %v19597_v48, %v9089_v31  ;;  %v9092_v43 = vadd.f32 %v15543_v25, %v20710_v37  ;;  %v20712_v25 = vld [vmem:[#allocation115_spill] sm:$0xff]  ;;  %v20713_v31 = vld [vmem:[#allocation93_spill] sm:$0xff] }
 0x6ec   : > { %14971 = vmatmul.mubr.msk.bf16.gmra.mrb[152].mxu1 %vm9547_vm0, %v19483_v54 }
 0x6ed   : > { %v9403_v2 = vadd.f32 %v19605_v33, %v9269_v56  ;;  %v9270_v21 = vmul.f32 %v19597_v48, %v9092_v43  ;;  %14974 = vmatprep.mubr.msk.bf16.mxu1 %vm9547_vm0, %v19540_v24  ;;  %v9390_v56 = vadd.f32 %v19605_v33, %v9256_v59  ;;  %v9257_v43 = vmul.f32 %v19597_v48, %v19644_v6 }
 0x6ee   : > { %v8551_v49 = vpop.f32.mrb[228].mxu0  ;;  %v9258_v6 = vmul.f32 %v19597_v48, %v19650_v51 }
 0x6ef   : > { %v9531_v40 = vmax.f32 %v9403_v2, 0.0  ;;  %v9404_v61 = vadd.f32 %v19605_v33, %v9270_v21  ;;  %v15544_v16 = vadd.f32 %v8551_v49, %v20711_v8  ;;  %v8553_v55 = vpop.f32.mrb[229].mxu0  ;;  %v20714_v2 = vld [vmem:[#allocation113_spill] sm:$0xff]  ;;  %v9517_v49 = vmax.f32 %v9389_v0, 0.0  ;;  %v20715_v0 = vld [vmem:[#allocation94_spill] sm:$0xff] }
 0x6f0   : > { %v8554_v17 = vpop.f32.mrb[230].mxu0  ;;  %v9518_v59 = vmax.f32 %v9390_v56, 0.0 }
 0x6f1   : > { %v9693_v62 = vsel %vm9547_vm0, %v9531_v40, -inf  ;;  %v9532_v26 = vmax.f32 %v9404_v61, 0.0  ;;  %v9097_v5 = vadd.f32 %v15544_v16, %v20712_v25  ;;  %v15545_v27 = vadd.f32 %v8554_v17, %v20713_v31  ;;  %v8556_v15 = vpop.f32.mrb[231].mxu0 }
 0x6f2   : > { %v9694_v37 = vmax.f32 %v9692_v7, %v9693_v62  ;;  %v9391_v16 = vadd.f32 %v19605_v33, %v9257_v43  ;;  %v9701_v56 = vsel %vm9547_vm0, %v9518_v59, -inf  ;;  %v9392_v43 = vadd.f32 %v19605_v33, %v9258_v6 }
 0x6f3   : > { %v9696_v29 = vsel %vm9547_vm0, %v9532_v26, -inf  ;;  %v9271_v42 = vmul.f32 %v19597_v48, %v9097_v5  ;;  %v9100_v21 = vadd.f32 %v15545_v27, %v20714_v2  ;;  %v9698_v26 = vsel %vm9547_vm0, %v9517_v49, -inf  ;;  %v20716_v27 = vld [vmem:[#allocation95_spill] sm:$0xff] }
 0x6f4   : > { %v9697_v40 = vmax.f32 %v9695_v12, %v9696_v29  ;;  %14975 = vmatmul.mubr.msk.bf16.gmra.mrb[156].mxu1 %vm9547_vm0, %v19587_v34  ;;  %v9519_v2 = vmax.f32 %v9391_v16, 0.0 }
 0x6f5   : > { %v9405_v61 = vadd.f32 %v19605_v33, %v9271_v42  ;;  %v9272_v1 = vmul.f32 %v19597_v48, %v9100_v21  ;;  %14986 = vmatprep.mubr.bf16.mxu1 %v20686_v19  ;;  %v17024_v42 = vld [vmem:[%s20432_s4 + $0x68] sm:$0xff]  }
 0x6f6   : > { %v8559_v8 = vpop.f32.mrb[232].mxu0 }
 0x6f7   : > { %v9533_v55 = vmax.f32 %v9405_v61, 0.0  ;;  %v9406_v7 = vadd.f32 %v19605_v33, %v9272_v1  ;;  %v15546_v17 = vadd.f32 %v8559_v8, %v20715_v0  ;;  %v8561_v62 = vpop.f32.mrb[233].mxu0  ;;  %v9812_v1 = vsel %vm9547_vm0, %v9694_v37, -inf }
 0x6f8   : > { %v8562_v25 = vpop.f32.mrb[234].mxu0  ;;  %v9815_v37 = vsel %vm9547_vm0, %v9697_v40, -inf }
 0x6f9   : > { %v9699_v5 = vsel %vm9547_vm0, %v9533_v55, -inf  ;;  %v9534_v31 = vmax.f32 %v9406_v7, 0.0  ;;  %v15547_v15 = vadd.f32 %v8562_v25, %v20716_v27  ;;  %v9105_v12 = vadd.f32 %v15546_v17, %v19458_v41  ;;  %v8564_v51 = vpop.f32.mrb[235].mxu0  ;;  %v17025_v17 = vld [vmem:[%s20432_s4 + $0x70] sm:$0xff]   ;;  %v20717_v25 = vld [vmem:[#allocation96_spill] sm:$0xff] }
 0x6fa   : > { %v9700_v29 = vmax.f32 %v9698_v26, %v9699_v5  ;;  %v9259_v41 = vmul.f32 %v19597_v48, %v19660_v60  ;;  %v9260_v60 = vmul.f32 %v19597_v48, %v19667_v63  ;;  %v9704_v27 = vsel %vm9547_vm0, %v9519_v2, -inf  ;;  %v17026_v2 = vld [vmem:[%s20432_s4 + $0x78] sm:$0xff]  }
 0x6fb   : > { %v9702_v21 = vsel %vm9547_vm0, %v9534_v31, -inf  ;;  %v9273_v49 = vmul.f32 %v19597_v48, %v9105_v12  ;;  %v9108_v61 = vadd.f32 %v15547_v15, %v19467_v46  ;;  %v9520_v46 = vmax.f32 %v9392_v43, 0.0 }
 0x6fc   : > { %v9813_v59 = vsel %vm9547_vm0, %v9700_v29, -inf  ;;  %v9703_v6 = vmax.f32 %v9701_v56, %v9702_v21  ;;  %14987 = vmatmul.mubr.bf16.vlgmr.msra.gmra.mrb[128].mxu1 %v20686_v19  ;;  %v9393_v63 = vadd.f32 %v19605_v33, %v9259_v41  ;;  %v9394_v41 = vadd.f32 %v19605_v33, %v9260_v60 }
 0x6fd   : > { %v9814_v8 = vmax.f32 %v9812_v1, %v9813_v59  ;;  %v9407_v55 = vadd.f32 %v19605_v33, %v9273_v49  ;;  %v9274_v16 = vmul.f32 %v19597_v48, %v9108_v61  ;;  %15019 = vmatpush3.bf16.msra.mxu1 %v19674_v9  ;;  %14990 = vmatprep.mubr.bf16.mxu1 %v20686_v19  ;;  %v9707_v29 = vsel %vm9547_vm0, %v9520_v46, -inf  ;;  %v20718_v49 = vld [vmem:[#allocation97_spill] sm:$0xff] }
 0x6fe   : > { %v9816_v7 = vsel %vm9547_vm0, %v9703_v6, -inf  ;;  %v8567_v0 = vpop.f32.mrb[236].mxu0  ;;  %15020 = vmatprep.subr.bf16.mxu1 %v17024_v42  ;;  %v9261_v1 = vmul.f32 %v19597_v48, %v19679_v13  ;;  %v9522_v60 = vmax.f32 %v9394_v41, 0.0 }
 0x6ff   : > { %v9817_v62 = vmax.f32 %v9815_v37, %v9816_v7  ;;  %v9535_v26 = vmax.f32 %v9407_v55, 0.0  ;;  %v9408_v9 = vadd.f32 %v19605_v33, %v9274_v16  ;;  %v15548_v5 = vadd.f32 %v8567_v0, %v20717_v25  ;;  %v8569_v31 = vpop.f32.mrb[237].mxu0  ;;  %v20719_v0 = vld [vmem:[#allocation98_spill] sm:$0xff] }
 0x700   : > { %v8570_v40 = vpop.f32.mrb[238].mxu0  ;;  %v9262_v16 = vmul.f32 %v19597_v48, %v19683_v23  ;;  %v9395_v37 = vadd.f32 %v19605_v33, %v9261_v1 }
 0x701   : > { %v19800_v15 = vpack.c.bf16 %v9817_v62, %v9814_v8  ;;  %v9705_v12 = vsel %vm9547_vm0, %v9535_v26, -inf  ;;  %v9536_v51 = vmax.f32 %v9408_v9, 0.0  ;;  %v9113_v56 = vadd.f32 %v15548_v5, %v19453_v57  ;;  %v8572_v43 = vpop.f32.mrb[239].mxu0  ;;  %15021 = vmatpush3.bf16.msra.mxu1 %v17024_v42  ;;  %v20720_v5 = vld [vmem:[#allocation99_spill] sm:$0xff] }
 0x702   : > { %v9706_v21 = vmax.f32 %v9704_v27, %v9705_v12  ;;  %v15549_v61 = vadd.f32 %v8570_v40, %v20718_v49  ;;  %15022 = vmatprep.subr.bf16.mxu1 %v17025_v17  ;;  %v9521_v8 = vmax.f32 %v9393_v63, 0.0  ;;  %v9396_v40 = vadd.f32 %v19605_v33, %v9262_v16 }
 0x703   : > { %v9708_v59 = vsel %vm9547_vm0, %v9536_v51, -inf  ;;  %v9275_v57 = vmul.f32 %v19597_v48, %v9113_v56  ;;  %v9713_v56 = vsel %vm9547_vm0, %v9522_v60, -inf  ;;  %v9523_v43 = vmax.f32 %v9395_v37, 0.0  ;;  %v20722_v60 = vld [vmem:[#allocation100_spill] sm:$0xff] }
 0x704   : > { %v9709_v42 = vmax.f32 %v9707_v29, %v9708_v59  ;;  %v9116_v6 = vadd.f32 %v15549_v61, %v19462_v20  ;;  %14991 = vmatmul.mubr.bf16.gmra.mrb[132].mxu1 %v20686_v19  ;;  %v19825_v20 = vld [vmem:[%s20432_s4 + $0x80] sm:$0xff]   ;;  %v9710_v23 = vsel %vm9547_vm0, %v9521_v8, -inf  ;;  %v9263_v61 = vmul.f32 %v19597_v48, %v19691_v28  ;;  %v20721_v8 = vld [vmem:[#allocation106_spill] sm:$0xff] }
 0x705   : > { %v9409_v55 = vadd.f32 %v19605_v33, %v9275_v57  ;;  %14994 = vmatprep.mubr.msk.bf16.mxu1 %vm9547_vm0, %v20694_v3  ;;  %15023 = vmatpush3.bf16.msra.mxu1 %v17025_v17  ;;  %v9264_v28 = vmul.f32 %v19597_v48, %v19695_v35 }
 0x706   : > { %v9276_v13 = vmul.f32 %v19597_v48, %v9116_v6  ;;  %v8575_v46 = vpop.f32.mrb[240].mxu0  ;;  %15024 = vmatprep.subr.bf16.mxu1 %v17026_v2 }
 0x707   : > { %v9537_v7 = vmax.f32 %v9409_v55, 0.0  ;;  %v15550_v62 = vadd.f32 %v8575_v46, %v20719_v0  ;;  %v8577_v26 = vpop.f32.mrb[241].mxu0  ;;  %v9716_v0 = vsel %vm9547_vm0, %v9523_v43, -inf }
 0x708   : > { %v9410_v17 = vadd.f32 %v19605_v33, %v9276_v13  ;;  %v8578_v9 = vpop.f32.mrb[242].mxu0 }
 0x709   : > { %v9711_v25 = vsel %vm9547_vm0, %v9537_v7, -inf  ;;  %v15551_v31 = vadd.f32 %v8578_v9, %v20720_v5  ;;  %v9121_v27 = vadd.f32 %v15550_v62, %v19510_v50  ;;  %v8580_v63 = vpop.f32.mrb[243].mxu0  ;;  %15025 = vmatpush3.bf16.msra.mxu1 %v17026_v2  ;;  %v9818_v50 = vsel %vm9547_vm0, %v9706_v21, -inf }
 0x70a   : > { %v9712_v12 = vmax.f32 %v9710_v23, %v9711_v25  ;;  %v9538_v51 = vmax.f32 %v9410_v17, 0.0  ;;  %15058 = vmatprep.subr.bf16.mxu1 %v19825_v20  ;;  %v9821_v21 = vsel %vm9547_vm0, %v9709_v42, -inf  ;;  %v9397_v62 = vadd.f32 %v19605_v33, %v9263_v61  ;;  %v20723_v23 = vld [vmem:[#allocation101_spill] sm:$0xff] }
 0x70b   : > { %v9277_v29 = vmul.f32 %v19597_v48, %v9121_v27  ;;  %v9124_v49 = vadd.f32 %v15551_v31, %v19518_v58  ;;  %v9524_v58 = vmax.f32 %v9396_v40, 0.0  ;;  %v9398_v27 = vadd.f32 %v19605_v33, %v9264_v28 }
 0x70c   : > { %v9819_v2 = vsel %vm9547_vm0, %v9712_v12, -inf  ;;  %v9714_v41 = vsel %vm9547_vm0, %v9538_v51, -inf  ;;  %14995 = vmatmul.mubr.msk.bf16.gmra.mrb[136].mxu1 %vm9547_vm0, %v20697_v52  ;;  %v9265_v12 = vmul.f32 %v19597_v48, %v19703_v11  ;;  %v9266_v11 = vmul.f32 %v19597_v48, %v19706_v53 }
 0x70d   : > { %v9820_v1 = vmax.f32 %v9818_v50, %v9819_v2  ;;  %v9715_v59 = vmax.f32 %v9713_v56, %v9714_v41  ;;  %v9411_v57 = vadd.f32 %v19605_v33, %v9277_v29  ;;  %v9278_v6 = vmul.f32 %v19597_v48, %v9124_v49  ;;  %14998 = vmatprep.mubr.msk.bf16.mxu1 %vm9547_vm0, %v20721_v8 }
 0x70e   : > { %v8583_v55 = vpop.f32.mrb[244].mxu0  ;;  %v9719_v31 = vsel %vm9547_vm0, %v9524_v58, -inf  ;;  %v9526_v50 = vmax.f32 %v9398_v27, 0.0  ;;  %v9399_v41 = vadd.f32 %v19605_v33, %v9265_v12 }
 0x70f   : > { %v9822_v16 = vsel %vm9547_vm0, %v9715_v59, -inf  ;;  %v9539_v13 = vmax.f32 %v9411_v57, 0.0  ;;  %v9412_v46 = vadd.f32 %v19605_v33, %v9278_v6  ;;  %v15552_v37 = vadd.f32 %v8583_v55, %v20722_v60  ;;  %v8585_v7 = vpop.f32.mrb[245].mxu0  ;;  %v20724_v59 = vld [vmem:[#allocation102_spill] sm:$0xff] }
 0x710   : > { %v9823_v26 = vmax.f32 %v9821_v21, %v9822_v16  ;;  %v8586_v17 = vpop.f32.mrb[246].mxu0  ;;  %v20725_v16 = vld [vmem:[#allocation103_spill] sm:$0xff]  ;;  %v9725_v60 = vsel %vm9547_vm0, %v9526_v50, -inf }
 0x711   : > { %v9717_v9 = vsel %vm9547_vm0, %v9539_v13, -inf  ;;  %v9540_v35 = vmax.f32 %v9412_v46, 0.0  ;;  %v9129_v42 = vadd.f32 %v15552_v37, %v19504_v38  ;;  %v15553_v25 = vadd.f32 %v8586_v17, %v20723_v23  ;;  %v8588_v5 = vpop.f32.mrb[247].mxu0 }
 0x712   : > { %v19863_v63 = vpack.c.bf16 %v9823_v26, %v9820_v1  ;;  %v9718_v40 = vmax.f32 %v9716_v0, %v9717_v9  ;;  %v9525_v38 = vmax.f32 %v9397_v62, 0.0  ;;  %v9400_v37 = vadd.f32 %v19605_v33, %v9266_v11 }
 0x713   : > { %v9720_v51 = vsel %vm9547_vm0, %v9540_v35, -inf  ;;  %v9279_v56 = vmul.f32 %v19597_v48, %v9129_v42  ;;  %v9132_v43 = vadd.f32 %v15553_v25, %v19513_v36  ;;  %v9527_v0 = vmax.f32 %v9399_v41, 0.0 }
 0x714   : > { %v9721_v29 = vmax.f32 %v9719_v31, %v9720_v51  ;;  %14999 = vmatmul.mubr.bf16.gmra.mrb[140].mxu1 %v20686_v19  ;;  %v9722_v58 = vsel %vm9547_vm0, %v9525_v38, -inf  ;;  %v9267_v9 = vmul.f32 %v19597_v48, %v19714_v10  ;;  %v9824_v35 = vsel %vm9547_vm0, %v9718_v40, -inf  ;;  %v20726_v31 = vld [vmem:[#allocation111_spill] sm:$0xff] }
 0x715   : > { %v9413_v49 = vadd.f32 %v19605_v33, %v9279_v56  ;;  %v9280_v61 = vmul.f32 %v19597_v48, %v9132_v43  ;;  %15002 = vmatprep.mubr.msk.bf16.mxu1 %vm9547_vm0, %v20701_v22  ;;  %v20727_v43 = vld [vmem:[#allocation104_spill] sm:$0xff]  ;;  %v9268_v11 = vmul.f32 %v19597_v48, %v19718_v47 }
 0x716   : > { %v8591_v2 = vpop.f32.mrb[248].mxu0  ;;  %v9827_v27 = vsel %vm9547_vm0, %v9721_v29, -inf  ;;  %v9401_v50 = vadd.f32 %v19605_v33, %v9267_v9 }
 0x717   : > { %v9541_v1 = vmax.f32 %v9413_v49, 0.0  ;;  %v9414_v36 = vadd.f32 %v19605_v33, %v9280_v61  ;;  %v15554_v57 = vadd.f32 %v8591_v2, %v20724_v59  ;;  %v8593_v6 = vpop.f32.mrb[249].mxu0  ;;  %v9728_v61 = vsel %vm9547_vm0, %v9527_v0, -inf }
 0x718   : > { %v8594_v28 = vpop.f32.mrb[250].mxu0  ;;  %v20728_v6 = vld [vmem:[#allocation105_spill] sm:$0xff]  ;;  %v9402_v47 = vadd.f32 %v19605_v33, %v9268_v11 }
 0x719   : > { %v9723_v21 = vsel %vm9547_vm0, %v9541_v1, -inf  ;;  %v9542_v55 = vmax.f32 %v9414_v36, 0.0  ;;  %v15555_v13 = vadd.f32 %v8594_v28, %v20725_v16  ;;  %v9137_v46 = vadd.f32 %v15554_v57, %v19562_v32  ;;  %v8596_v53 = vpop.f32.mrb[251].mxu0  ;;  %v17045_v11 = vld [vmem:[%s20432_s4 + $0x110] sm:$0xff]  }
 0x71a   : > { %v9724_v7 = vmax.f32 %v9722_v58, %v9723_v21 }
 0x71b   : > { %v9726_v62 = vsel %vm9547_vm0, %v9542_v55, -inf  ;;  %v9281_v26 = vmul.f32 %v19597_v48, %v9137_v46  ;;  %v9140_v17 = vadd.f32 %v15555_v13, %v19571_v30  ;;  %v9528_v30 = vmax.f32 %v9400_v37, 0.0 }
 0x71c   : > { %v9825_v32 = vsel %vm9547_vm0, %v9724_v7, -inf  ;;  %v9727_v42 = vmax.f32 %v9725_v60, %v9726_v62  ;;  %15003 = vmatmul.mubr.msk.bf16.gmra.mrb[144].mxu1 %vm9547_vm0, %v20706_v45  ;;  %v9529_v46 = vmax.f32 %v9401_v50, 0.0  ;;  %v9530_v37 = vmax.f32 %v9402_v47, 0.0  ;;  %v17044_v50 = vld [vmem:[%s20432_s4 + $0x108] sm:$0xff]   ;;  %v20204_v47 = vld [vmem:[%s20434_s6] ss:$0 sm:$0xff] }
 0x71d   : > { %v9826_v23 = vmax.f32 %v9824_v35, %v9825_v32  ;;  %v9415_v25 = vadd.f32 %v19605_v33, %v9281_v26  ;;  %v9282_v5 = vmul.f32 %v19597_v48, %v9140_v17  ;;  %15006 = vmatprep.mubr.msk.bf16.mxu1 %vm9547_vm0, %v20726_v31  ;;  %v9731_v28 = vsel %vm9547_vm0, %v9528_v30, -inf  ;;  %v17028_v30 = vld [vmem:[%s20432_s4 + $0x88] sm:$0xff]  }
 0x71e   : > { %v9828_v10 = vsel %vm9547_vm0, %v9727_v42, -inf  ;;  %v8599_v40 = vpop.f32.mrb[252].mxu0  ;;  %v9734_v0 = vsel %vm9547_vm0, %v9529_v46, -inf  ;;  %v9737_v17 = vsel %vm9547_vm0, %v9530_v37, -inf }
 0x71f   : > { %v9829_v12 = vmax.f32 %v9827_v27, %v9828_v10  ;;  %v9543_v51 = vmax.f32 %v9415_v25, 0.0  ;;  %v9416_v56 = vadd.f32 %v19605_v33, %v9282_v5  ;;  %v15556_v38 = vadd.f32 %v8599_v40, %v20727_v43  ;;  %v8601_v49 = vpop.f32.mrb[253].mxu0  ;;  %v17029_v27 = vld [vmem:[%s20432_s4 + $0x90] sm:$0xff]   ;;  %v17030_v10 = vld [vmem:[%s20432_s4 + $0x98] sm:$0xff]   ;;  %v17032_v40 = vld [vmem:[%s20432_s4 + $0xa8] sm:$0xff]  }
 0x720   : > { %v8602_v2 = vpop.f32.mrb[254].mxu0  ;;  %v17037_v43 = vld [vmem:[%s20432_s4 + $0xd0] sm:$0xff]   ;;  %v17042_v49 = vld [vmem:[%s20432_s4 + $0xf8] sm:$0xff]  }
 0x721   : > { %v19907_v41 = vpack.c.bf16 %v9829_v12, %v9826_v23  ;;  %v9729_v29 = vsel %vm9547_vm0, %v9543_v51, -inf  ;;  %v9544_v1 = vmax.f32 %v9416_v56, 0.0  ;;  %v9145_v36 = vadd.f32 %v15556_v38, %v19557_v44  ;;  %v8604_v59 = vpop.f32.mrb[255].mxu0  ;;  %v17033_v12 = vld [vmem:[%s20432_s4 + $0xb0] sm:$0xff]   ;;  %v17035_v51 = vld [vmem:[%s20432_s4 + $0xc0] sm:$0xff]   ;;  %v17036_v56 = vld [vmem:[%s20432_s4 + $0xc8] sm:$0xff]  }
 0x722   : > { %v9730_v57 = vmax.f32 %v9728_v61, %v9729_v29  ;;  %v15557_v58 = vadd.f32 %v8602_v2, %v20728_v6  ;;  %v17041_v38 = vld [vmem:[%s20432_s4 + $0xf0] sm:$0xff]   ;;  %v17043_v61 = vld [vmem:[%s20432_s4 + $0x100] sm:$0xff]   ;;  %v12054_v29 = vld [vmem:[%s20435_s7 + $0x8] sm:$0xff] }
 0x723   : > { %v9732_v21 = vsel %vm9547_vm0, %v9544_v1, -inf  ;;  %v9283_v55 = vmul.f32 %v19597_v48, %v9145_v36  ;;  %v12053_v2 = vld [vmem:[%s20435_s7] sm:$0xff] }
 0x724   : > { %v9733_v16 = vmax.f32 %v9731_v28, %v9732_v21  ;;  %v9148_v13 = vadd.f32 %v15557_v58, %v19566_v4  ;;  %15007 = vmatmul.mubr.bf16.gmra.mrb[148].mxu1 %v20686_v19  ;;  %v9830_v9 = vsel %vm9547_vm0, %v9730_v57, -inf  ;;  %v15334_v1 = vpack.c.bf16 %v12054_v29, %v12053_v2  ;;  %v20198_v28 = vld [vmem:[%s20433_s5] ss:$0 sm:$0xff] }
 0x725   : > { %v9417_v44 = vadd.f32 %v19605_v33, %v9283_v55  ;;  %15010 = vmatprep.mubr.msk.bf16.mxu1 %vm9547_vm0, %v19540_v24 }
 0x726   : > { %v9284_v53 = vmul.f32 %v19597_v48, %v9148_v13 }
 0x727   : > { %v9545_v60 = vmax.f32 %v9417_v44, 0.0 }
 0x728   : > { %v9418_v7 = vadd.f32 %v19605_v33, %v9284_v53  ;;  %v9833_v33 = vsel %vm9547_vm0, %v9733_v16, -inf }
 0x729   : > { %v9735_v62 = vsel %vm9547_vm0, %v9545_v60, -inf }
 0x72a   : > { %v9736_v26 = vmax.f32 %v9734_v0, %v9735_v62  ;;  %v9546_v4 = vmax.f32 %v9418_v7, 0.0 }
 0x72c   : > { %v9831_v35 = vsel %vm9547_vm0, %v9736_v26, -inf  ;;  %v9738_v32 = vsel %vm9547_vm0, %v9546_v4, -inf  ;;  %15011 = vmatmul.mubr.msk.bf16.gmra.mrb[152].mxu1 %vm9547_vm0, %v19587_v34  ;;  %v14429_v4 = vld [vmem:[%s20435_s7 + $0x50] sm:$0xff] }
 0x72d   : > { %v9832_v48 = vmax.f32 %v9830_v9, %v9831_v35  ;;  %v9739_v42 = vmax.f32 %v9737_v17, %v9738_v32  ;;  %15014 = vmatprep.mubr.msk.bf16.mxu1 %vm9547_vm0, %v19633_v18  ;;  %v14430_v17 = vld [vmem:[%s20435_s7 + $0x58] sm:$0xff] }
 0x72f   : > { %v9834_v23 = vsel %vm9547_vm0, %v9739_v42, -inf }
 0x730   : > { %v9835_v25 = vmax.f32 %v9833_v33, %v9834_v23 }
 0x732   : > { %v19935_v5 = vpack.c.bf16 %v9835_v25, %v9832_v48 }
 0x734   : > { %15015 = vmatmul.mubr.bf16.gmra.mrb[156].mxu1 %v20686_v19 }
 0x735   : > { %15026 = vmatprep.mubr.bf16.mxu1 %v20686_v19 }
 0x73c   : > { %15027 = vmatmul.mubr.msk.bf16.vlgmr.msra.gmra.mrb[128].mxu1 %vm9547_vm0, %v20693_v14 }
 0x73d   : > { %15030 = vmatprep.mubr.msk.bf16.mxu1 %vm9547_vm0, %v20694_v3  ;;  %15059 = vmatpush3.bf16.msra.mxu1 %v19825_v20  ;;  %v17031_v20 = vld [vmem:[%s20432_s4 + $0xa0] sm:$0xff]  }
 0x73e   : > { %15060 = vmatprep.subr.bf16.mxu1 %v17028_v30 }
 0x741   : > { %15061 = vmatpush3.bf16.msra.mxu1 %v17028_v30 }
 0x742   : > { %15062 = vmatprep.subr.bf16.mxu1 %v17029_v27 }
 0x744   : > { %15031 = vmatmul.mubr.msk.bf16.gmra.mrb[132].mxu1 %vm9547_vm0, %v20697_v52 }
 0x745   : > { %15034 = vmatprep.mubr.bf16.mxu1 %v20686_v19  ;;  %15063 = vmatpush3.bf16.msra.mxu1 %v17029_v27  ;;  %v20223_v27 = vpack.c.bf16 %v14430_v17, %v14429_v4 }
 0x746   : > { %15064 = vmatprep.subr.bf16.mxu1 %v17030_v10 }
 0x749   : > { %15065 = vmatpush3.bf16.msra.mxu1 %v17030_v10 }
 0x74a   : > { %15098 = vmatprep.subr.bf16.mxu1 %v17031_v20 }
 0x74c   : > { %15035 = vmatmul.mubr.msk.bf16.gmra.mrb[136].mxu1 %vm9547_vm0, %v20700_v39 }
 0x74d   : > { %15038 = vmatprep.mubr.msk.bf16.mxu1 %vm9547_vm0, %v20701_v22 }
 0x754   : > { %15039 = vmatmul.mubr.msk.bf16.gmra.mrb[140].mxu1 %vm9547_vm0, %v20706_v45 }
 0x755   : > { %15042 = vmatprep.mubr.bf16.mxu1 %v20686_v19 }
 0x75c   : > { %15043 = vmatmul.mubr.msk.bf16.gmra.mrb[144].mxu1 %vm9547_vm0, %v19483_v54 }
 0x75d   : > { %15046 = vmatprep.mubr.msk.bf16.mxu1 %vm9547_vm0, %v19540_v24 }
 0x764   : > { %15047 = vmatmul.mubr.msk.bf16.gmra.mrb[148].mxu1 %vm9547_vm0, %v19587_v34 }
 0x765   : > { %15050 = vmatprep.mubr.bf16.mxu1 %v20686_v19 }
 0x76c   : > { %15051 = vmatmul.mubr.msk.bf16.gmra.mrb[152].mxu1 %vm9547_vm0, %v19800_v15 }
 0x76d   : > { %15054 = vmatprep.mubr.msk.bf16.mxu1 %vm9547_vm0, %v19863_v63 }
 0x774   : > { %15055 = vmatmul.mubr.msk.bf16.gmra.mrb[156].mxu1 %vm9547_vm0, %v19907_v41 }
 0x775   : > { %15066 = vmatprep.mubr.msk.bf16.mxu1 %vm9547_vm0, %v20693_v14  ;;  %v17034_v14 = vld [vmem:[%s20432_s4 + $0xb8] sm:$0xff]  }
 0x77c   : > { %15067 = vmatmul.mubr.msk.bf16.vlgmr.msra.gmra.mrb[128].mxu1 %vm9547_vm0, %v20694_v3 }
 0x77d   : > { %15070 = vmatprep.mubr.msk.bf16.mxu1 %vm9547_vm0, %v20697_v52  ;;  %15099 = vmatpush3.bf16.msra.mxu1 %v17031_v20 }
 0x77e   : > { %15100 = vmatprep.subr.bf16.mxu1 %v17032_v40 }
 0x781   : > { %15101 = vmatpush3.bf16.msra.mxu1 %v17032_v40 }
 0x782   : > { %15102 = vmatprep.subr.bf16.mxu1 %v17033_v12 }
 0x784   : > { %15071 = vmatmul.mubr.msk.bf16.gmra.mrb[132].mxu1 %vm9547_vm0, %v20721_v8 }
 0x785   : > { %15074 = vmatprep.mubr.msk.bf16.mxu1 %vm9547_vm0, %v20700_v39  ;;  %15103 = vmatpush3.bf16.msra.mxu1 %v17033_v12 }
 0x786   : > { %15104 = vmatprep.subr.bf16.mxu1 %v17034_v14 }
 0x789   : > { %15105 = vmatpush3.bf16.msra.mxu1 %v17034_v14 }
 0x78a   : > { %15138 = vmatprep.subr.bf16.mxu1 %v17035_v51 }
 0x78c   : > { %15075 = vmatmul.mubr.msk.bf16.gmra.mrb[136].mxu1 %vm9547_vm0, %v20701_v22 }
 0x78d   : > { %15078 = vmatprep.mubr.msk.bf16.mxu1 %vm9547_vm0, %v20706_v45 }
 0x794   : > { %15079 = vmatmul.mubr.msk.bf16.gmra.mrb[140].mxu1 %vm9547_vm0, %v20726_v31 }
 0x795   : > { %15082 = vmatprep.mubr.msk.bf16.mxu1 %vm9547_vm0, %v19483_v54 }
 0x79c   : > { %15083 = vmatmul.mubr.msk.bf16.gmra.mrb[144].mxu1 %vm9547_vm0, %v19540_v24 }
 0x79d   : > { %15086 = vmatprep.mubr.msk.bf16.mxu1 %vm9547_vm0, %v19587_v34 }
 0x7a4   : > { %15087 = vmatmul.mubr.msk.bf16.gmra.mrb[148].mxu1 %vm9547_vm0, %v19633_v18 }
 0x7a5   : > { %15090 = vmatprep.mubr.msk.bf16.mxu1 %vm9547_vm0, %v19800_v15 }
 0x7ac   : > { %15091 = vmatmul.mubr.msk.bf16.gmra.mrb[152].mxu1 %vm9547_vm0, %v19863_v63 }
 0x7ad   : > { %15094 = vmatprep.mubr.msk.bf16.mxu1 %vm9547_vm0, %v19907_v41 }
 0x7b4   : > { %15095 = vmatmul.mubr.msk.bf16.gmra.mrb[156].mxu1 %vm9547_vm0, %v19935_v5 }
 0x7b5   : > { %15106 = vmatprep.mubr.msk.bf16.mxu1 %vm9547_vm0, %v20694_v3  ;;  %v17038_v3 = vld [vmem:[%s20432_s4 + $0xd8] sm:$0xff]  }
 0x7bc   : > { %15107 = vmatmul.mubr.msk.bf16.vlgmr.msra.gmra.mrb[128].mxu1 %vm9547_vm0, %v20697_v52  ;;  %v17039_v52 = vld [vmem:[%s20432_s4 + $0xe0] sm:$0xff]  }
 0x7bd   : > { %15110 = vmatprep.mubr.msk.bf16.mxu1 %vm9547_vm0, %v20721_v8  ;;  %15139 = vmatpush3.bf16.msra.mxu1 %v17035_v51  ;;  %v17040_v8 = vld [vmem:[%s20432_s4 + $0xe8] sm:$0xff]  }
 0x7be   : > { %15140 = vmatprep.subr.bf16.mxu1 %v17036_v56 }
 0x7c1   : > { %15141 = vmatpush3.bf16.msra.mxu1 %v17036_v56 }
 0x7c2   : > { %15142 = vmatprep.subr.bf16.mxu1 %v17037_v43 }
 0x7c4   : > { %15111 = vmatmul.mubr.bf16.gmra.mrb[132].mxu1 %v20686_v19 }
 0x7c5   : > { %15114 = vmatprep.mubr.msk.bf16.mxu1 %vm9547_vm0, %v20701_v22  ;;  %15143 = vmatpush3.bf16.msra.mxu1 %v17037_v43 }
 0x7c6   : > { %15144 = vmatprep.subr.bf16.mxu1 %v17038_v3 }
 0x7c9   : > { %15145 = vmatpush3.bf16.msra.mxu1 %v17038_v3 }
 0x7ca   : > { %15178 = vmatprep.subr.bf16.mxu1 %v17039_v52 }
 0x7cc   : > { %15115 = vmatmul.mubr.msk.bf16.gmra.mrb[136].mxu1 %vm9547_vm0, %v20706_v45 }
 0x7cd   : > { %15118 = vmatprep.mubr.msk.bf16.mxu1 %vm9547_vm0, %v20726_v31 }
 0x7d4   : > { %15119 = vmatmul.mubr.bf16.gmra.mrb[140].mxu1 %v20686_v19 }
 0x7d5   : > { %15122 = vmatprep.mubr.msk.bf16.mxu1 %vm9547_vm0, %v19540_v24 }
 0x7dc   : > { %15123 = vmatmul.mubr.msk.bf16.gmra.mrb[144].mxu1 %vm9547_vm0, %v19587_v34 }
 0x7dd   : > { %15126 = vmatprep.mubr.msk.bf16.mxu1 %vm9547_vm0, %v19633_v18 }
 0x7e4   : > { %15127 = vmatmul.mubr.bf16.gmra.mrb[148].mxu1 %v20686_v19 }
 0x7e5   : > { %15130 = vmatprep.mubr.msk.bf16.mxu1 %vm9547_vm0, %v19863_v63 }
 0x7ec   : > { %15131 = vmatmul.mubr.msk.bf16.gmra.mrb[152].mxu1 %vm9547_vm0, %v19907_v41 }
 0x7ed   : > { %15134 = vmatprep.mubr.msk.bf16.mxu1 %vm9547_vm0, %v19935_v5 }
 0x7f4   : > { %15135 = vmatmul.mubr.bf16.gmra.mrb[156].mxu1 %v20686_v19 }
 0x7f5   : > { %15146 = vmatprep.mubr.bf16.mxu1 %v20686_v19 }
 0x7fc   : > { %15147 = vmatmul.mubr.msk.bf16.vlgmr.msra.gmra.mrb[128].mxu1 %vm9547_vm0, %v20700_v39 }
 0x7fd   : > { %15150 = vmatprep.mubr.msk.bf16.mxu1 %vm9547_vm0, %v20701_v22  ;;  %15179 = vmatpush3.bf16.msra.mxu1 %v17039_v52 }
 0x7fe   : > { %15180 = vmatprep.subr.bf16.mxu1 %v17040_v8 }
 0x801   : > { %15181 = vmatpush3.bf16.msra.mxu1 %v17040_v8 }
 0x802   : > { %15182 = vmatprep.subr.bf16.mxu1 %v17041_v38 }
 0x804   : > { %15151 = vmatmul.mubr.msk.bf16.gmra.mrb[132].mxu1 %vm9547_vm0, %v20706_v45 }
 0x805   : > { %15154 = vmatprep.mubr.bf16.mxu1 %v20686_v19  ;;  %15183 = vmatpush3.bf16.msra.mxu1 %v17041_v38 }
 0x806   : > { %15184 = vmatprep.subr.bf16.mxu1 %v17042_v49 }
 0x809   : > { %15185 = vmatpush3.bf16.msra.mxu1 %v17042_v49 }
 0x80a   : > { %15218 = vmatprep.subr.bf16.mxu1 %v17043_v61 }
 0x80c   : > { %15155 = vmatmul.mubr.msk.bf16.gmra.mrb[136].mxu1 %vm9547_vm0, %v19483_v54 }
 0x80d   : > { %15158 = vmatprep.mubr.msk.bf16.mxu1 %vm9547_vm0, %v19540_v24 }
 0x814   : > { %15159 = vmatmul.mubr.msk.bf16.gmra.mrb[140].mxu1 %vm9547_vm0, %v19587_v34 }
 0x815   : > { %15162 = vmatprep.mubr.bf16.mxu1 %v20686_v19 }
 0x81c   : > { %15163 = vmatmul.mubr.msk.bf16.gmra.mrb[144].mxu1 %vm9547_vm0, %v19800_v15 }
 0x81d   : > { %15166 = vmatprep.mubr.msk.bf16.mxu1 %vm9547_vm0, %v19863_v63 }
 0x824   : > { %15167 = vmatmul.mubr.msk.bf16.gmra.mrb[148].mxu1 %vm9547_vm0, %v19907_v41 }
 0x825   : > { %15170 = vmatprep.mubr.bf16.mxu1 %v20686_v19 }
 0x82c   : > { %15171 = vmatmul.mubr.bf16.gmra.mrb[152].mxu1 %v20686_v19 }
 0x82d   : > { %15174 = vmatprep.mubr.bf16.mxu1 %v20686_v19 }
 0x834   : > { %15175 = vmatmul.mubr.bf16.gmra.mrb[156].mxu1 %v20686_v19 }
 0x835   : > { %15186 = vmatprep.mubr.msk.bf16.mxu1 %vm9547_vm0, %v20700_v39  ;;  %v17046_v39 = vld [vmem:[%s20432_s4 + $0x118] sm:$0xff]  }
 0x83c   : > { %15187 = vmatmul.mubr.msk.bf16.vlgmr.msra.gmra.mrb[128].mxu1 %vm9547_vm0, %v20701_v22 }
 0x83d   : > { %15190 = vmatprep.mubr.msk.bf16.mxu1 %vm9547_vm0, %v20706_v45  ;;  %15219 = vmatpush3.bf16.msra.mxu1 %v17043_v61 }
 0x83e   : > { %15220 = vmatprep.subr.bf16.mxu1 %v17044_v50 }
 0x841   : > { %15221 = vmatpush3.bf16.msra.mxu1 %v17044_v50 }
 0x842   : > { %15222 = vmatprep.subr.bf16.mxu1 %v17045_v11 }
 0x844   : > { %15191 = vmatmul.mubr.msk.bf16.gmra.mrb[132].mxu1 %vm9547_vm0, %v20726_v31 }
 0x845   : > { %15194 = vmatprep.mubr.msk.bf16.mxu1 %vm9547_vm0, %v19483_v54  ;;  %15223 = vmatpush3.bf16.msra.mxu1 %v17045_v11  ;;  %v12055_v54 = vld [vmem:[%s20435_s7 + $0x10] sm:$0xff] }
 0x846   : > { %15224 = vmatprep.subr.bf16.mxu1 %v17046_v39 }
 0x849   : > { %15225 = vmatpush3.bf16.msra.mxu1 %v17046_v39 }
 0x84a   : > { %15335 = vmatprep.subr.bf16.mxu1 %v15334_v1 }
 0x84c   : > { %15195 = vmatmul.mubr.msk.bf16.gmra.mrb[136].mxu1 %vm9547_vm0, %v19540_v24 }
 0x84d   : > { %15198 = vmatprep.mubr.msk.bf16.mxu1 %vm9547_vm0, %v19587_v34 }
 0x854   : > { %15199 = vmatmul.mubr.msk.bf16.gmra.mrb[140].mxu1 %vm9547_vm0, %v19633_v18 }
 0x855   : > { %15202 = vmatprep.mubr.msk.bf16.mxu1 %vm9547_vm0, %v19800_v15  ;;  %v12056_v15 = vld [vmem:[%s20435_s7 + $0x18] sm:$0xff] }
 0x856   : > { %v15338_v36 = vpack.c.bf16 %v12056_v15, %v12055_v54 }
 0x85c   : > { %15203 = vmatmul.mubr.msk.bf16.gmra.mrb[144].mxu1 %vm9547_vm0, %v19863_v63 }
 0x85d   : > { %15206 = vmatprep.mubr.msk.bf16.mxu1 %vm9547_vm0, %v19907_v41 }
 0x864   : > { %15207 = vmatmul.mubr.msk.bf16.gmra.mrb[148].mxu1 %vm9547_vm0, %v19935_v5 }
 0x865   : > { %15210 = vmatprep.mubr.bf16.mxu1 %v20686_v19 }
 0x86c   : > { %15211 = vmatmul.mubr.bf16.gmra.mrb[152].mxu1 %v20686_v19 }
 0x86d   : > { %15214 = vmatprep.mubr.bf16.mxu1 %v20686_v19 }
 0x874   : > { %15215 = vmatmul.mubr.bf16.gmra.mrb[156].mxu1 %v20686_v19 }
 0x875   : > { %15226 = vmatprep.mubr.msk.bf16.mxu1 %vm9547_vm0, %v20701_v22  ;;  %v12059_v22 = vld [vmem:[%s20435_s7 + $0x30] sm:$0xff] }
 0x87c   : > { %15227 = vmatmul.mubr.msk.bf16.vlgmr.msra.gmra.mrb[128].mxu1 %vm9547_vm0, %v20706_v45  ;;  %v12060_v45 = vld [vmem:[%s20435_s7 + $0x38] sm:$0xff] }
 0x87d   : > { %15230 = vmatprep.mubr.msk.bf16.mxu1 %vm9547_vm0, %v20726_v31  ;;  %15337 = vmatpush3.bf16.msra.mxu1 %v15334_v1  ;;  %v14428_v31 = vld [vmem:[%s20435_s7 + $0x48] sm:$0xff] }
 0x87e   : > { %15339 = vmatprep.subr.bf16.mxu1 %v15338_v36 }
 0x881   : > { %15341 = vmatpush3.bf16.msra.mxu1 %v15338_v36 }
 0x884   : > { %15231 = vmatmul.mubr.bf16.gmra.mrb[132].mxu1 %v20686_v19 }
 0x885   : > { %15234 = vmatprep.mubr.msk.bf16.mxu1 %vm9547_vm0, %v19540_v24  ;;  %v12057_v24 = vld [vmem:[%s20435_s7 + $0x20] sm:$0xff] }
 0x88c   : > { %15235 = vmatmul.mubr.msk.bf16.gmra.mrb[136].mxu1 %vm9547_vm0, %v19587_v34  ;;  %v12058_v34 = vld [vmem:[%s20435_s7 + $0x28] sm:$0xff] }
 0x88d   : > { %15238 = vmatprep.mubr.msk.bf16.mxu1 %vm9547_vm0, %v19633_v18  ;;  %v15342_v18 = vpack.c.bf16 %v12058_v34, %v12057_v24 }
 0x88f   : > { %15343 = vmatprep.subr.bf16.mxu1 %v15342_v18 }
 0x890   : > { %15345 = vmatpush3.bf16.msra.mxu1 %v15342_v18 }
 0x894   : > { %15239 = vmatmul.mubr.bf16.gmra.mrb[140].mxu1 %v20686_v19 }
 0x895   : > { %15242 = vmatprep.mubr.msk.bf16.mxu1 %vm9547_vm0, %v19863_v63  ;;  %v14427_v63 = vld [vmem:[%s20435_s7 + $0x40] sm:$0xff] }
 0x89c   : > { %15243 = vmatmul.mubr.msk.bf16.gmra.mrb[144].mxu1 %vm9547_vm0, %v19907_v41  ;;  %v20192_v41 = vpack.c.bf16 %v14428_v31, %v14427_v63 }
 0x89d   : > { %15246 = vmatprep.mubr.msk.bf16.mxu1 %vm9547_vm0, %v19935_v5 }
 0x8a4   : > { %15247 = vmatmul.mubr.bf16.gmra.mrb[148].mxu1 %v20686_v19 }
 0x8a5   : > { %15250 = vmatprep.mubr.bf16.mxu1 %v20686_v19 }
 0x8ac   : > { %15251 = vmatmul.mubr.bf16.gmra.mrb[152].mxu1 %v20686_v19 }
 0x8ad   : > { %15254 = vmatprep.mubr.bf16.mxu1 %v20686_v19 }
 0x8b4   : > { %15255 = vmatmul.mubr.bf16.gmra.mrb[156].mxu1 %v20686_v19  ;;  %v15346_v19 = vpack.c.bf16 %v12060_v45, %v12059_v22 }
 0x8b6   : > { %15347 = vmatprep.subr.bf16.mxu1 %v15346_v19 }
 0x8b7   : > { %15349 = vmatpush3.bf16.msra.mxu1 %v15346_v19 }
 0x8b8   : > { %15351 = vmatprep.subr.bf16.mxu1 %v20192_v41 }
 0x94f   : > { %v15228_v59 = vpop.f32.mrb[128].mxu1 }
 0x950   : > { %v11713_v57 = vpop.f32.mrb[129].mxu1  ;;  %v11880_v21 = vmul.f32 %v15228_v59, %v20198_v28 }
 0x951   : > { %v15229_v6 = vpop.f32.mrb[130].mxu1  ;;  %v11878_v16 = vmul.f32 %v20198_v28, %v11713_v57 }
 0x952   : > { %v11716_v58 = vpop.f32.mrb[131].mxu1  ;;  %v11881_v46 = vmul.f32 %v15229_v6, %v20198_v28  ;;  %v11918_v37 = vadd.f32 %v20204_v47, %v11880_v21 }
 0x953   : > { %v11879_v44 = vmul.f32 %v20198_v28, %v11716_v58  ;;  %v11916_v7 = vadd.f32 %v20204_v47, %v11878_v16 }
 0x954   : > { %v11919_v0 = vadd.f32 %v20204_v47, %v11881_v46  ;;  %v11950_v9 = vmax.f32 %v11918_v37, 0.0 }
 0x955   : > { %v11917_v62 = vadd.f32 %v20204_v47, %v11879_v44  ;;  %v11948_v48 = vmax.f32 %v11916_v7, 0.0 }
 0x956   : > { %v11951_v23 = vmax.f32 %v11919_v0, 0.0  ;;  %v11986_v51 = vsel %vm9547_vm0, %v11950_v9, -inf }
 0x957   : > { %v15232_v55 = vpop.f32.mrb[132].mxu1  ;;  %v11949_v25 = vmax.f32 %v11917_v62, 0.0  ;;  %v11980_v52 = vsel %vm9547_vm0, %v11948_v48, -inf  ;;  %v14431_v48 = vld [vmem:[%s20435_s7 + $0x60] sm:$0xff] }
 0x958   : > { %v11729_v13 = vpop.f32.mrb[133].mxu1  ;;  %v11884_v26 = vmul.f32 %v15232_v55, %v20198_v28  ;;  %v11989_v61 = vsel %vm9547_vm0, %v11951_v23, -inf }
 0x959   : > { %v15233_v53 = vpop.f32.mrb[134].mxu1  ;;  %v11882_v35 = vmul.f32 %v20198_v28, %v11729_v13  ;;  %v11983_v50 = vsel %vm9547_vm0, %v11949_v25, -inf }
 0x95a   : > { %v11732_v60 = vpop.f32.mrb[135].mxu1  ;;  %v11922_v10 = vadd.f32 %v20204_v47, %v11884_v26  ;;  %v11885_v20 = vmul.f32 %v15233_v53, %v20198_v28 }
 0x95b   : > { %v11920_v56 = vadd.f32 %v20204_v47, %v11882_v35  ;;  %v11883_v8 = vmul.f32 %v20198_v28, %v11732_v60 }
 0x95c   : > { %v11954_v2 = vmax.f32 %v11922_v10, 0.0  ;;  %v11923_v29 = vadd.f32 %v20204_v47, %v11885_v20 }
 0x95d   : > { %v11952_v15 = vmax.f32 %v11920_v56, 0.0  ;;  %v11921_v22 = vadd.f32 %v20204_v47, %v11883_v8 }
 0x95e   : > { %v11955_v0 = vmax.f32 %v11923_v29, 0.0 }
 0x95f   : > { %v15236_v32 = vpop.f32.mrb[136].mxu1  ;;  %v11953_v17 = vmax.f32 %v11921_v22, 0.0 }
 0x960   : > { %v11888_v42 = vmul.f32 %v15236_v32, %v20198_v28  ;;  %v11745_v33 = vpop.f32.mrb[137].mxu1 }
 0x961   : > { %v11886_v5 = vmul.f32 %v20198_v28, %v11745_v33  ;;  %v15237_v30 = vpop.f32.mrb[138].mxu1  ;;  %v11998_v33 = vsel %vm9547_vm0, %v11954_v2, -inf }
 0x962   : > { %v11926_v40 = vadd.f32 %v20204_v47, %v11888_v42  ;;  %v11889_v12 = vmul.f32 %v15237_v30, %v20198_v28  ;;  %v11748_v14 = vpop.f32.mrb[139].mxu1  ;;  %v14432_v42 = vld [vmem:[%s20435_s7 + $0x68] sm:$0xff] }
 0x963   : > { %v11924_v43 = vadd.f32 %v20204_v47, %v11886_v5  ;;  %v11887_v3 = vmul.f32 %v20198_v28, %v11748_v14  ;;  %v11992_v5 = vsel %vm9547_vm0, %v11952_v15, -inf }
 0x964   : > { %v11958_v38 = vmax.f32 %v11926_v40, 0.0  ;;  %v11927_v49 = vadd.f32 %v20204_v47, %v11889_v12  ;;  %v12001_v12 = vsel %vm9547_vm0, %v11955_v0, -inf }
 0x965   : > { %v11956_v11 = vmax.f32 %v11924_v43, 0.0  ;;  %v11925_v39 = vadd.f32 %v20204_v47, %v11887_v3  ;;  %v15358_v43 = vpack.c.bf16 %v14432_v42, %v14431_v48  ;;  %v11995_v3 = vsel %vm9547_vm0, %v11953_v17, -inf }
 0x966   : > { %v11987_v1 = vsel %vm9547_vm0, %v11958_v38, -inf  ;;  %v11959_v54 = vmax.f32 %v11927_v49, 0.0 }
 0x967   : > { %v11988_v36 = vmax.f32 %v11986_v51, %v11987_v1  ;;  %v11981_v24 = vsel %vm9547_vm0, %v11956_v11, -inf  ;;  %v11957_v34 = vmax.f32 %v11925_v39, 0.0  ;;  %v15240_v18 = vpop.f32.mrb[140].mxu1  ;;  %v14434_v39 = vld [vmem:[%s20435_s7 + $0x78] sm:$0xff] }
 0x968   : > { %v11982_v45 = vmax.f32 %v11980_v52, %v11981_v24  ;;  %v11990_v19 = vsel %vm9547_vm0, %v11959_v54, -inf  ;;  %v11892_v63 = vmul.f32 %v15240_v18, %v20198_v28  ;;  %v11761_v31 = vpop.f32.mrb[141].mxu1  ;;  %v14438_v24 = vld [vmem:[%s20435_s7 + $0x88] sm:$0xff] }
 0x969   : > { %v12029_v59 = vsel %vm9547_vm0, %v11988_v36, -inf  ;;  %v11991_v57 = vmax.f32 %v11989_v61, %v11990_v19  ;;  %v11984_v6 = vsel %vm9547_vm0, %v11957_v34, -inf  ;;  %v11890_v58 = vmul.f32 %v20198_v28, %v11761_v31  ;;  %v15241_v21 = vpop.f32.mrb[142].mxu1  ;;  %v14437_v36 = vld [vmem:[%s20435_s7 + $0x80] sm:$0xff] }
 0x96a   : > { %v12028_v55 = vsel %vm9547_vm0, %v11982_v45, -inf  ;;  %v11985_v16 = vmax.f32 %v11983_v50, %v11984_v6  ;;  %v11930_v13 = vadd.f32 %v20204_v47, %v11892_v63  ;;  %v11893_v46 = vmul.f32 %v15241_v21, %v20198_v28  ;;  %v11764_v44 = vpop.f32.mrb[143].mxu1  ;;  %v14440_v6 = vld [vmem:[%s20435_s7 + $0x98] sm:$0xff] }
 0x96b   : > { %v12032_v53 = vsel %vm9547_vm0, %v11991_v57, -inf  ;;  %v11928_v60 = vadd.f32 %v20204_v47, %v11890_v58  ;;  %v11891_v37 = vmul.f32 %v20198_v28, %v11764_v44  ;;  %v12030_v7 = vmax.f32 %v12028_v55, %v12029_v59  ;;  %v14439_v57 = vld [vmem:[%s20435_s7 + $0x90] sm:$0xff]  ;;  %v14441_v55 = vld [vmem:[%s20435_s7 + $0xa0] sm:$0xff] }
 0x96c   : > { %v12031_v62 = vsel %vm9547_vm0, %v11985_v16, -inf  ;;  %v11962_v26 = vmax.f32 %v11930_v13, 0.0  ;;  %v11931_v4 = vadd.f32 %v20204_v47, %v11893_v46  ;;  %v15366_v31 = vpack.c.bf16 %v14438_v24, %v14437_v36  ;;  %v14442_v16 = vld [vmem:[%s20435_s7 + $0xa8] sm:$0xff]  ;;  %v14443_v13 = vld [vmem:[%s20435_s7 + $0xb0] sm:$0xff] }
 0x96d   : > { %v12033_v9 = vmax.f32 %v12031_v62, %v12032_v53  ;;  %v11960_v35 = vmax.f32 %v11928_v60, 0.0  ;;  %v11929_v32 = vadd.f32 %v20204_v47, %v11891_v37  ;;  %15274 = vmatprep.mubr.msk.f32.mxu1 %vm9547_vm0, %v12030_v7  ;;  %v15370_v53 = vpack.c.bf16 %v14440_v6, %v14439_v57  ;;  %v14444_v60 = vld [vmem:[%s20435_s7 + $0xb8] sm:$0xff]  ;;  %v14447_v37 = vld [vmem:[%s20435_s7 + $0xc0] sm:$0xff]  ;;  %v14448_v7 = vld [vmem:[%s20435_s7 + $0xc8] sm:$0xff] }
 0x96e   : > { %v11999_v23 = vsel %vm9547_vm0, %v11962_v26, -inf  ;;  %v11963_v25 = vmax.f32 %v11931_v4, 0.0  ;;  %v14449_v62 = vld [vmem:[%s20435_s7 + $0xd0] sm:$0xff]  ;;  %v14450_v26 = vld [vmem:[%s20435_s7 + $0xd8] sm:$0xff] }
 0x96f   : > { %v12000_v30 = vmax.f32 %v11998_v33, %v11999_v23  ;;  %v11993_v10 = vsel %vm9547_vm0, %v11960_v35, -inf  ;;  %v11961_v20 = vmax.f32 %v11929_v32, 0.0  ;;  %v15244_v40 = vpop.f32.mrb[144].mxu1  ;;  %15275 = vmatmul.mubr.msk.f32.vlgmr.msra.gmra.mrb[160].mxu1 %vm9547_vm0, %v12033_v9  ;;  %v15374_v35 = vpack.c.bf16 %v14442_v16, %v14441_v55 }
 0x970   : > { %v11994_v14 = vmax.f32 %v11992_v5, %v11993_v10  ;;  %v12002_v51 = vsel %vm9547_vm0, %v11963_v25, -inf  ;;  %15353 = vmatpush3.bf16.msra.mxu1 %v20192_v41  ;;  %v11777_v56 = vpop.f32.mrb[145].mxu1  ;;  %v14433_v41 = vld [vmem:[%s20435_s7 + $0x70] sm:$0xff]  ;;  %v11896_v34 = vmul.f32 %v15244_v40, %v20198_v28  ;;  %v15378_v33 = vpack.c.bf16 %v14444_v60, %v14443_v13 }
 0x971   : > { %v12035_v52 = vsel %vm9547_vm0, %v12000_v30, -inf  ;;  %v12003_v8 = vmax.f32 %v12001_v12, %v12002_v51  ;;  %v11996_v38 = vsel %vm9547_vm0, %v11961_v20, -inf  ;;  %v15245_v49 = vpop.f32.mrb[146].mxu1  ;;  %15355 = vmatprep.subr.bf16.mxu1 %v20223_v27  ;;  %v15362_v15 = vpack.c.bf16 %v14434_v39, %v14433_v41 }
 0x972   : > { %v12034_v61 = vsel %vm9547_vm0, %v11994_v14, -inf  ;;  %v11997_v50 = vmax.f32 %v11995_v3, %v11996_v38  ;;  %v11780_v11 = vpop.f32.mrb[147].mxu1  ;;  %v11894_v22 = vmul.f32 %v20198_v28, %v11777_v56  ;;  %v11897_v45 = vmul.f32 %v15245_v49, %v20198_v28 }
 0x973   : > { %v12038_v2 = vsel %vm9547_vm0, %v12003_v8, -inf  ;;  %v12036_v29 = vmax.f32 %v12034_v61, %v12035_v52  ;;  %v11895_v19 = vmul.f32 %v20198_v28, %v11780_v11  ;;  %v11934_v58 = vadd.f32 %v20204_v47, %v11896_v34 }
 0x974   : > { %v12037_v1 = vsel %vm9547_vm0, %v11997_v50, -inf  ;;  %15357 = vmatpush3.bf16.msra.mxu1 %v20223_v27  ;;  %v11932_v21 = vadd.f32 %v20204_v47, %v11894_v22  ;;  %v11935_v46 = vadd.f32 %v20204_v47, %v11897_v45  ;;  %v20335_v23 = vpack.c.bf16 %v14448_v7, %v14447_v37 }
 0x975   : > { %v12039_v54 = vmax.f32 %v12037_v1, %v12038_v2  ;;  %15293 = vmatprep.mubr.msk.f32.mxu1 %vm9547_vm0, %v12036_v29  ;;  %15359 = vmatprep.subr.bf16.mxu1 %v15358_v43  ;;  %v11933_v44 = vadd.f32 %v20204_v47, %v11895_v19  ;;  %v11966_v4 = vmax.f32 %v11934_v58, 0.0  ;;  %v20338_v20 = vpack.c.bf16 %v14450_v26, %v14449_v62 }
 0x976   : > { %v11964_v32 = vmax.f32 %v11932_v21, 0.0  ;;  %v11967_v25 = vmax.f32 %v11935_v46, 0.0 }
 0x977   : > { %v15248_v18 = vpop.f32.mrb[148].mxu1  ;;  %v11965_v5 = vmax.f32 %v11933_v44, 0.0 }
 0x978   : > { %15361 = vmatpush3.bf16.msra.mxu1 %v15358_v43  ;;  %v11793_v27 = vpop.f32.mrb[149].mxu1  ;;  %v11900_v0 = vmul.f32 %v15248_v18, %v20198_v28  ;;  %v12010_v43 = vsel %vm9547_vm0, %v11966_v4, -inf  ;;  %v12004_v38 = vsel %vm9547_vm0, %v11964_v32, -inf  ;;  %v12013_v11 = vsel %vm9547_vm0, %v11967_v25, -inf }
 0x979   : > { %v15249_v63 = vpop.f32.mrb[150].mxu1  ;;  %15363 = vmatprep.subr.bf16.mxu1 %v15362_v15  ;;  %v11898_v17 = vmul.f32 %v20198_v28, %v11793_v27  ;;  %v12007_v41 = vsel %vm9547_vm0, %v11965_v5, -inf }
 0x97a   : > { %v11796_v59 = vpop.f32.mrb[151].mxu1  ;;  %v20341_v40 = vadd.f32 %v20204_v47, %v11900_v0  ;;  %v11901_v12 = vmul.f32 %v15249_v63, %v20198_v28 }
 0x97b   : > { %v11936_v3 = vadd.f32 %v20204_v47, %v11898_v17  ;;  %v11899_v49 = vmul.f32 %v20198_v28, %v11796_v59 }
 0x97c   : > { %15365 = vmatpush3.bf16.msra.mxu1 %v15362_v15  ;;  %v11970_v29 = vmax.f32 %v20341_v40, 0.0  ;;  %v11939_v1 = vadd.f32 %v20204_v47, %v11901_v12 }
 0x97d   : > { %15367 = vmatprep.subr.bf16.mxu1 %v15366_v31  ;;  %v11968_v36 = vmax.f32 %v11936_v3, 0.0  ;;  %v11937_v27 = vadd.f32 %v20204_v47, %v11899_v49  ;;  %v14453_v49 = vld [vmem:[%s20435_s7 + $0xf0] sm:$0xff] }
 0x97e   : > { %v11971_v0 = vmax.f32 %v11939_v1, 0.0 }
 0x97f   : > { %15294 = vmatmul.mubr.msk.f32.vlgmr.msra.gmra.mrb[160].mxu1 %vm9547_vm0, %v12039_v54  ;;  %v15252_v9 = vpop.f32.mrb[152].mxu1  ;;  %v11969_v17 = vmax.f32 %v11937_v27, 0.0  ;;  %v12016_v5 = vsel %vm9547_vm0, %v11968_v36, -inf }
 0x980   : > { %v11904_v48 = vmul.f32 %v15252_v9, %v20198_v28  ;;  %15369 = vmatpush3.bf16.msra.mxu1 %v15366_v31  ;;  %v11809_v42 = vpop.f32.mrb[153].mxu1  ;;  %v12025_v40 = vsel %vm9547_vm0, %v11971_v0, -inf }
 0x981   : > { %v11902_v30 = vmul.f32 %v20198_v28, %v11809_v42  ;;  %v15253_v10 = vpop.f32.mrb[154].mxu1  ;;  %15371 = vmatprep.subr.bf16.mxu1 %v15370_v53  ;;  %v12022_v42 = vsel %vm9547_vm0, %v11970_v29, -inf }
 0x982   : > { %v11942_v14 = vadd.f32 %v20204_v47, %v11904_v48  ;;  %v11905_v51 = vmul.f32 %v15253_v10, %v20198_v28  ;;  %v11812_v56 = vpop.f32.mrb[155].mxu1  ;;  %v14452_v48 = vld [vmem:[%s20435_s7 + $0xe8] sm:$0xff] }
 0x983   : > { %v11940_v52 = vadd.f32 %v20204_v47, %v11902_v30  ;;  %v11903_v8 = vmul.f32 %v20198_v28, %v11812_v56  ;;  %v12019_v56 = vsel %vm9547_vm0, %v11969_v17, -inf }
 0x984   : > { %v11974_v61 = vmax.f32 %v11942_v14, 0.0  ;;  %v11943_v50 = vadd.f32 %v20204_v47, %v11905_v51  ;;  %15373 = vmatpush3.bf16.msra.mxu1 %v15370_v53 }
 0x985   : > { %v11972_v39 = vmax.f32 %v11940_v52, 0.0  ;;  %v11941_v2 = vadd.f32 %v20204_v47, %v11903_v8  ;;  %15375 = vmatprep.subr.bf16.mxu1 %v15374_v35 }
 0x986   : > { %v12011_v54 = vsel %vm9547_vm0, %v11974_v61, -inf  ;;  %v11975_v15 = vmax.f32 %v11943_v50, 0.0 }
 0x987   : > { %v12012_v24 = vmax.f32 %v12010_v43, %v12011_v54  ;;  %v12005_v34 = vsel %vm9547_vm0, %v11972_v39, -inf  ;;  %v11973_v18 = vmax.f32 %v11941_v2, 0.0  ;;  %v15256_v22 = vpop.f32.mrb[156].mxu1  ;;  %v14426_v2 = vld [vmem:[%s20436_s8] ss:$0 sm:$0xff] }
 0x988   : > { %v12006_v45 = vmax.f32 %v12004_v38, %v12005_v34  ;;  %v12014_v19 = vsel %vm9547_vm0, %v11975_v15, -inf  ;;  %v11908_v63 = vmul.f32 %v15256_v22, %v20198_v28  ;;  %15377 = vmatpush3.bf16.msra.mxu1 %v15374_v35  ;;  %v11825_v31 = vpop.f32.mrb[157].mxu1 }
 0x989   : > { %v12041_v59 = vsel %vm9547_vm0, %v12012_v24, -inf  ;;  %v12015_v57 = vmax.f32 %v12013_v11, %v12014_v19  ;;  %v12008_v6 = vsel %vm9547_vm0, %v11973_v18, -inf  ;;  %v11906_v58 = vmul.f32 %v20198_v28, %v11825_v31  ;;  %v15257_v21 = vpop.f32.mrb[158].mxu1  ;;  %15379 = vmatprep.subr.bf16.mxu1 %v15378_v33 }
 0x98a   : > { %v12040_v55 = vsel %vm9547_vm0, %v12006_v45, -inf  ;;  %v12009_v16 = vmax.f32 %v12007_v41, %v12008_v6  ;;  %v11946_v13 = vadd.f32 %v20204_v47, %v11908_v63  ;;  %v11909_v46 = vmul.f32 %v15257_v21, %v20198_v28  ;;  %v11828_v44 = vpop.f32.mrb[159].mxu1  ;;  %v14458_v45 = vld [vmem:[#allocation2] ss:$0 sm:$0xff] }
 0x98b   : > { %v12044_v53 = vsel %vm9547_vm0, %v12015_v57, -inf  ;;  %v11944_v60 = vadd.f32 %v20204_v47, %v11906_v58  ;;  %v11907_v37 = vmul.f32 %v20198_v28, %v11828_v44  ;;  %v12042_v7 = vmax.f32 %v12040_v55, %v12041_v59  ;;  %v14451_v28 = vld [vmem:[%s20435_s7 + $0xe0] sm:$0xff] }
 0x98c   : > { %v12043_v62 = vsel %vm9547_vm0, %v12009_v16, -inf  ;;  %v11978_v26 = vmax.f32 %v11946_v13, 0.0  ;;  %v11947_v4 = vadd.f32 %v20204_v47, %v11909_v46  ;;  %15381 = vmatpush3.bf16.msra.mxu1 %v15378_v33  ;;  %v15390_v51 = vpack.c.bf16 %v14452_v48, %v14451_v28 }
 0x98d   : > { %v12045_v9 = vmax.f32 %v12043_v62, %v12044_v53  ;;  %v11976_v35 = vmax.f32 %v11944_v60, 0.0  ;;  %v11945_v32 = vadd.f32 %v20204_v47, %v11907_v37  ;;  %15312 = vmatprep.mubr.msk.f32.mxu1 %vm9547_vm0, %v12042_v7  ;;  %15383 = vmatprep.subr.bf16.mxu1 %v20335_v23 }
 0x98e   : > { %v12023_v33 = vsel %vm9547_vm0, %v11978_v26, -inf  ;;  %v11979_v25 = vmax.f32 %v11947_v4, 0.0 }
 0x98f   : > { %v12024_v47 = vmax.f32 %v12022_v42, %v12023_v33  ;;  %v12017_v30 = vsel %vm9547_vm0, %v11976_v35, -inf  ;;  %v11977_v10 = vmax.f32 %v11945_v32, 0.0  ;;  %15313 = vmatmul.mubr.msk.f32.vlgmr.msra.gmra.mrb[160].mxu1 %vm9547_vm0, %v12045_v9 }
 0x990   : > { %v12018_v12 = vmax.f32 %v12016_v5, %v12017_v30  ;;  %v12026_v14 = vsel %vm9547_vm0, %v11979_v25, -inf  ;;  %15385 = vmatpush3.bf16.msra.mxu1 %v20335_v23  ;;  %v14454_v23 = vld [vmem:[%s20435_s7 + $0xf8] sm:$0xff] }
 0x991   : > { %v12047_v43 = vsel %vm9547_vm0, %v12024_v47, -inf  ;;  %v12027_v3 = vmax.f32 %v12025_v40, %v12026_v14  ;;  %v12020_v52 = vsel %vm9547_vm0, %v11977_v10, -inf  ;;  %15387 = vmatprep.subr.bf16.mxu1 %v20338_v20  ;;  %v15394_v39 = vpack.c.bf16 %v14454_v23, %v14453_v49 }
 0x992   : > { %v12046_v8 = vsel %vm9547_vm0, %v12018_v12, -inf  ;;  %v12021_v38 = vmax.f32 %v12019_v56, %v12020_v52 }
 0x993   : > { %v12050_v61 = vsel %vm9547_vm0, %v12027_v3, -inf  ;;  %v12048_v50 = vmax.f32 %v12046_v8, %v12047_v43 }
 0x994   : > { %v12049_v11 = vsel %vm9547_vm0, %v12021_v38, -inf  ;;  %15389 = vmatpush3.bf16.msra.mxu1 %v20338_v20  ;;  %v14457_v20 = vld [vmem:[%s20437_s9] ss:$0 sm:$0xff] }
 0x995   : > { %v12051_v41 = vmax.f32 %v12049_v11, %v12050_v61  ;;  %15331 = vmatprep.mubr.msk.f32.mxu1 %vm9547_vm0, %v12048_v50  ;;  %15391 = vmatprep.subr.bf16.mxu1 %v15390_v51 }
 0x998   : > { %15393 = vmatpush3.bf16.msra.mxu1 %v15390_v51 }
 0x999   : > { %15395 = vmatprep.subr.bf16.mxu1 %v15394_v39 }
 0x99c   : > { %15397 = vmatpush3.bf16.msra.mxu1 %v15394_v39 }
 0x99f   : > { %15332 = vmatmul.mubr.msk.f32.vlgmr.msra.gmra.mrb[160].mxu1 %vm9547_vm0, %v12051_v41 }
 0xa72   : > { %v15333_v29 = vpop.f32.mrb[160].mxu1 }
 0xa73   : > { %v15558_v1 = vadd.f32 %v15333_v29, %v14426_v2  ;;  %v12415_v54 = vpop.f32.mrb[161].mxu1 }
 0xa74   : > { %v15559_v15 = vadd.f32 %v14426_v2, %v12415_v54 }
 0xa75   : > { %v12427_v36 = vmax.f32 %v15558_v1, 0.0 }
 0xa76   : > { %v12426_v24 = vmax.f32 %v15559_v15, 0.0 }
 0xa77   : > { %v12436_v22 = vmul.f32 %v14457_v20, %v12427_v36 }
 0xa78   : > { %v12435_v34 = vmul.f32 %v14457_v20, %v12426_v24 }
 0xa79   : > { %v12441_v27 = vsel %vm12437_vm1, %v12436_v22, 0.0 }
 0xa7a   : > { %v12438_v18 = vsel %vm12437_vm1, %v12435_v34, 0.0 }
 0xa7b   : > { %12439 = vadd.xlane.f32.xlu0 %v12438_v18 }
 0xa7f   : > { %12442 = vadd.xlane.f32.xlu0 %v12441_v27 }
 0xb08   : > { %v12440_v19 = vpop.xlane.xlu0 %12439 }
 0xb09   : > { %v12451_v63 = vadd.f32 %v14458_v45, %v12440_v19 }
 0xb0b   : > { %v12453_v31 = vsub.f32 0.0, %v12451_v63 }
 0xb0c   : > { %v12443_v59 = vpop.xlane.xlu0 %12442 }
 0xb0d   : > { %v12455_v57 = vmul.f32 1.442695, %v12453_v31  ;;  %v12452_v6 = vadd.f32 %v14458_v45, %v12443_v59 }
 0xb0f   : > { %17047 = vpow2.f32 %v12455_v57  ;;  %v12454_v58 = vsub.f32 0.0, %v12452_v6 }
 0xb11   : > { %v12457_v21 = vmul.f32 1.442695, %v12454_v58 }
 0xb13   : > { %17049 = vpow2.f32 %v12457_v21 }
 0xb19   : > { %v17048_v55 = vpop.eup %17047 }
 0xb1a   : > { %v12459_v16 = vadd.f32 1.0, %v17048_v55 }
 0xb1c   : > { %17051 = vrcp.f32 %v12459_v16 }
 0xb1d   : > { %v17050_v13 = vpop.eup %17049 }
 0xb1e   : > { %v12460_v46 = vadd.f32 1.0, %v17050_v13 }
 0xb20   : > { %17053 = vrcp.f32 %v12460_v46 }
 0xb26   : > { %v17052_v44 = vpop.eup %17051 }
 0xb27   : > { %12467 = vperm.xlu1 %16361, %v17052_v44  }
 0xb2a   : > { %v17054_v53 = vpop.eup %17053 }
 0xb2b   : > { %12472 = vperm.xlu1 %16361, %v17054_v53  }
 0xba6   : > { %v12468_v60 = vpop.permute.xlu1 %12467 }
 0xba7   : > { %12475 = vst [vmem:[%s1227_s26] sm:$0xff] %v12468_v60 }
 0xbaa   : > { %v12473_v37 = vpop.permute.xlu1 %12472 }
 0xbab   : > { %12476 = vst [vmem:[%s1227_s26 + $0x8] sm:$0xff] %v12473_v37 }
 0xbac PF: > { %p20_p9 = scmp.ge.s32.totalorder %s17180_s22, 4   ;;  %s20729_s19 = smov %s17093_s20 }
 0xbad   : > { %s20730_s20 = smov %s17189_s25  ;;  %s20731_s21 = smov %s17180_s22 }
 0xbae   :  { %22 = sbr.rel (!%p20_p9) target bundleno = 5 (0x5), region = 159 }

</bundles_post_ra>
